<compile_context>
chip_gen: v5e
topology: v5e:2x2
jax: 0.10.0
libtpu: 0.0.40
codegen_flags: <defaults>
</compile_context>

<pallas_src>
import jax
import jax.numpy as jnp
import numpy as np
from jax import lax
from jax.experimental import pallas as pl
from jax.experimental.pallas import tpu as pltpu

_VMEM_BLOCK_BUDGET = 24 << 20  # double-buffered gx+out blocks kept under this


def _round_up(x, m):
    return (x + m - 1) // m * m


def _bilstm_kernel(gx_f_ref, gx_b_ref, whh_ref, out_f_ref, out_b_ref,
                   h_scr, cf_scr, cb_scr):
    # gx_f_ref : (Tc, Bp, 4Hp)  fwd  x-projection (+bias), gate order [i,f,o,g]
    # gx_b_ref : (Tc, Bp, 4Hp)  bwd  x-projection (chunk order pre-reversed)
    # whh_ref  : (2Hp, 8Hp)     block-diag recurrent weights [fwd | bwd]
    # out_*    : (Tc, Bp, Hp)   hidden states, in original time order
    # h_scr    : (Bp, 2Hp)      [h_fwd | h_bwd] carried across time chunks
    # cf/cb_scr: (Bp, Hp)       cell states carried across time chunks
    t = pl.program_id(0)
    Tc = gx_f_ref.shape[0]
    Hp = out_f_ref.shape[2]

    @pl.when(t == 0)
    def _():
        h_scr[...] = jnp.zeros_like(h_scr)
        cf_scr[...] = jnp.zeros_like(cf_scr)
        cb_scr[...] = jnp.zeros_like(cb_scr)

    w = whh_ref[...]  # load once per chunk, resident across the recurrence

    def step(p, carry):
        h, c_f, c_b = carry
        pf = p              # forward walks its chunk front -> back
        pb = Tc - 1 - p     # backward walks its chunk back -> front

        # One fused block-diagonal matmul covers both directions (K = 2Hp).
        mm = jnp.dot(h.astype(w.dtype), w, preferred_element_type=jnp.float32)
        g_f = gx_f_ref[pf].astype(jnp.float32) + mm[:, :4 * Hp]
        g_b = gx_b_ref[pb].astype(jnp.float32) + mm[:, 4 * Hp:]

        # Forward cell: one wide sigmoid pass over [i|f|o], one tanh over g.
        sgf = jax.nn.sigmoid(g_f[:, :3 * Hp])
        ggf = jnp.tanh(g_f[:, 3 * Hp:])
        c_f = sgf[:, Hp:2 * Hp] * c_f + sgf[:, :Hp] * ggf
        h_f = sgf[:, 2 * Hp:3 * Hp] * jnp.tanh(c_f)

        # Backward cell.
        sgb = jax.nn.sigmoid(g_b[:, :3 * Hp])
        ggb = jnp.tanh(g_b[:, 3 * Hp:])
        c_b = sgb[:, Hp:2 * Hp] * c_b + sgb[:, :Hp] * ggb
        h_b = sgb[:, 2 * Hp:3 * Hp] * jnp.tanh(c_b)

        out_f_ref[pf] = h_f
        out_b_ref[pb] = h_b
        return jnp.concatenate([h_f, h_b], axis=-1), c_f, c_b

    unroll = Tc if Tc <= 16 else 4
    h, c_f, c_b = lax.fori_loop(0, Tc, step,
                                (h_scr[...], cf_scr[...], cb_scr[...]),
                                unroll=unroll)
    h_scr[...] = h
    cf_scr[...] = c_f
    cb_scr[...] = c_b


def prepare_weights(params, *, mm_dtype=jnp.bfloat16):
    """One-time weight prep: gate reorder (i,f,g,o)->(i,f,o,g), fuse both
    directions' input projections, build padded block-diagonal W_hh."""
    H = params["w_hh_f"].shape[1]
    Hp = _round_up(max(H, 1), 128)
    order = (0, 1, 3, 2)  # PyTorch [i, f, g, o] -> [i, f, o, g]

    def reorder(w):
        return jnp.concatenate([w[k * H:(k + 1) * H] for k in order], axis=0)

    # Fused input projection for both directions: (8H, D) and (8H,) bias.
    w_ih = jnp.concatenate([reorder(params["w_ih_f"]),
                            reorder(params["w_ih_b"])], axis=0)
    b = jnp.concatenate([reorder(params["b_ih_f"] + params["b_hh_f"]),
                         reorder(params["b_ih_b"] + params["b_hh_b"])], axis=0)

    def pad_whh(w_hh):                      # (4H, H) -> (Hp, 4Hp), zero padding
        w = reorder(w_hh).T.reshape(H, 4, H)
        w = jnp.pad(w, ((0, Hp - H), (0, 0), (0, Hp - H)))
        return w.reshape(Hp, 4 * Hp)

    whh_f = pad_whh(params["w_hh_f"])
    whh_b = pad_whh(params["w_hh_b"])
    zeros = jnp.zeros_like(whh_f)
    whh = jnp.concatenate(
        [jnp.concatenate([whh_f, zeros], axis=1),
         jnp.concatenate([zeros, whh_b], axis=1)], axis=0)   # (2Hp, 8Hp)

    return {"H": H, "Hp": Hp, "dtype": jnp.dtype(mm_dtype),
            "w_ih": w_ih.astype(jnp.float32), "b": b.astype(jnp.float32),
            "whh": whh.astype(mm_dtype)}


def semantic_word_forward(texts, params=None, *, prepared=None,
                          time_chunk=128, mm_dtype=jnp.bfloat16):
    """texts: (B, T, D) float32 (batch_first). Returns (B, T, 2H) = [fwd | bwd]."""
    if prepared is None:
        prepared = prepare_weights(params, mm_dtype=mm_dtype)
    dtype = prepared["dtype"]
    H, Hp = prepared["H"], prepared["Hp"]

    B, T, D = texts.shape
    x = texts.astype(jnp.float32)
    itemsz = dtype.itemsize
    sub = 16 if itemsz == 2 else 8           # sublane tile for gx dtype
    Bp = _round_up(max(B, 1), sub)

    # VMEM-aware time-chunk size (both dirs, double-buffered gx + out blocks).
    per_t = 4 * (Bp * 4 * Hp * itemsz + Bp * Hp * 4)
    tc_cap = max(1, _VMEM_BLOCK_BUDGET // per_t)
    Tc = int(max(1, min(time_chunk, T, tc_cap)))
    Tp = _round_up(T, Tc)
    nT = Tp // Tc

    # Hoisted input projection: ONE (B*T, D) x (D, 8H) GEMM, bias folded in.
    gx = x.reshape(B * T, D) @ prepared["w_ih"].T + prepared["b"]   # (B*T, 8H)
    gx = gx.reshape(B, T, 8, H)
    gx = jnp.pad(gx, ((0, Bp - B), (0, Tp - T), (0, 0), (0, Hp - H)))
    if Tp > T:
        # Padded timesteps: gate pre-activations -> -1e9 so the cell is a no-op
        # on a zero state (backward direction consumes padded steps first).
        tmask = (jnp.arange(Tp) >= T)[None, :, None, None]
        gx = jnp.where(tmask, -1e9, gx)
    gx = gx.astype(dtype).transpose(1, 0, 2, 3)                     # (Tp, Bp, 8, Hp)
    gx_f = gx[:, :, :4, :].reshape(Tp, Bp, 4 * Hp)
    gx_b = gx[:, :, 4:, :].reshape(Tp, Bp, 4 * Hp)

    # Explicit VMEM limit (fits v7x 64 MiB, v5e/v6e 128 MiB).
    whh_bytes = 2 * Hp * 8 * Hp * itemsz
    vmem_limit = int(per_t * Tc + 2 * whh_bytes + Bp * 4 * Hp * 4 + (4 << 20))
    vmem_limit = max(32 << 20, min(vmem_limit, 64 << 20))

    out_f, out_b = pl.pallas_call(
        _bilstm_kernel,
        out_shape=(jax.ShapeDtypeStruct((Tp, Bp, Hp), jnp.float32),
                   jax.ShapeDtypeStruct((Tp, Bp, Hp), jnp.float32)),
        grid_spec=pltpu.PrefetchScalarGridSpec(
            num_scalar_prefetch=0,
            grid=(nT,),
            in_specs=[
                pl.BlockSpec((Tc, Bp, 4 * Hp), lambda t: (t, 0, 0)),
                pl.BlockSpec((Tc, Bp, 4 * Hp), lambda t: (nT - 1 - t, 0, 0)),
                pl.BlockSpec((2 * Hp, 8 * Hp), lambda t: (0, 0)),
            ],
            out_specs=[
                pl.BlockSpec((Tc, Bp, Hp), lambda t: (t, 0, 0)),
                pl.BlockSpec((Tc, Bp, Hp), lambda t: (nT - 1 - t, 0, 0)),
            ],
            scratch_shapes=[pltpu.VMEM((Bp, 2 * Hp), jnp.float32),
                            pltpu.VMEM((Bp, Hp), jnp.float32),
                            pltpu.VMEM((Bp, Hp), jnp.float32)],
        ),
        compiler_params=pltpu.CompilerParams(
            dimension_semantics=("arbitrary",),
            vmem_limit_bytes=vmem_limit),
    )(gx_f, gx_b, prepared["whh"])

    h_f = out_f[:T, :B, :H]
    h_b = out_b[:T, :B, :H]
    # TODO(synk): consumers that can accept time-major (T, B, 2H) should skip
    # this concat+transpose (two extra full-output HBM passes).
    res = jnp.concatenate([h_f, h_b], axis=-1)          # (T, B, 2H)
    return jnp.transpose(res, (1, 0, 2))                # (B, T, 2H)


def init_params(key, in_dim, hidden_dim):
    """Deterministic init matching nn.LSTM parameter shapes (gate order i,f,g,o)."""
    H = hidden_dim // 2
    k = 1.0 / np.sqrt(H)
    keys = jax.random.split(key, 8)
    u = lambda kk, shape: jax.random.uniform(kk, shape, jnp.float32, -k, k)
    return {
        "w_ih_f": u(keys[0], (4 * H, in_dim)),
        "w_hh_f": u(keys[1], (4 * H, H)),
        "b_ih_f": u(keys[2], (4 * H,)),
        "b_hh_f": u(keys[3], (4 * H,)),
        "w_ih_b": u(keys[4], (4 * H, in_dim)),
        "w_hh_b": u(keys[5], (4 * H, H)),
        "b_ih_b": u(keys[6], (4 * H,)),
        "b_hh_b": u(keys[7], (4 * H,)),
    }


def semantic_word_reference(texts, params):
    """Pure-JAX reference of the same bidirectional LSTM (for validation)."""
    B, T, _ = texts.shape
    H = params["w_hh_f"].shape[1]

    def run(w_ih, w_hh, b, xs):
        def step(carry, x_t):
            h, c = carry
            gates = x_t @ w_ih.T + h @ w_hh.T + b
            i = jax.nn.sigmoid(gates[:, 0 * H:1 * H])
            f = jax.nn.sigmoid(gates[:, 1 * H:2 * H])
            g = jnp.tanh(gates[:, 2 * H:3 * H])
            o = jax.nn.sigmoid(gates[:, 3 * H:4 * H])
            c = f * c + i * g
            h = o * jnp.tanh(c)
            return (h, c), h
        init = (jnp.zeros((B, H), jnp.float32), jnp.zeros((B, H), jnp.float32))
        _, hs = lax.scan(step, init, xs)
        return hs  # (T, B, H)

    xs = jnp.transpose(texts, (1, 0, 2)).astype(jnp.float32)
    h_f = run(params["w_ih_f"], params["w_hh_f"],
              params["b_ih_f"] + params["b_hh_f"], xs)
    h_b = run(params["w_ih_b"], params["w_hh_b"],
              params["b_ih_b"] + params["b_hh_b"], xs[::-1])[::-1]
    return jnp.transpose(jnp.concatenate([h_f, h_b], axis=-1), (1, 0, 2))


if __name__ == "__main__":
    B, T, in_dim, hidden_dim = 2, 8, 8, 32   # per-direction H = 16 -> output (2, 8, 32)

    key = jax.random.PRNGKey(0)
    k_x, k_p, k_x2, k_x3 = jax.random.split(key, 4)
    params = init_params(k_p, in_dim, hidden_dim)

    # Case 1: exact-precision path (f32 recurrence), single chunk, full unroll.
    texts = jax.random.normal(k_x, (B, T, in_dim), jnp.float32)
    out = jax.block_until_ready(
        semantic_word_forward(texts, params, mm_dtype=jnp.float32))
    ref = jax.block_until_ready(semantic_word_reference(texts, params))
    assert out.shape == (B, T, hidden_dim)
    np.testing.assert_allclose(np.asarray(out), np.asarray(ref), rtol=1e-4, atol=1e-4)

    # Case 2: multi-chunk grid + sequence-length padding, still exact precision.
    B2, T2 = 3, 11
    texts2 = jax.random.normal(k_x2, (B2, T2, in_dim), jnp.float32)
    out2 = jax.block_until_ready(
        semantic_word_forward(texts2, params, time_chunk=4, mm_dtype=jnp.float32))
    ref2 = jax.block_until_ready(semantic_word_reference(texts2, params))
    np.testing.assert_allclose(np.asarray(out2), np.asarray(ref2), rtol=1e-4, atol=1e-4)

    # Case 3: default bf16 fast path (halved gx/whh traffic), hoisted weight
    # prep, multi-chunk with padding, unroll=4 path (Tc > 16).
    B3, T3 = 3, 40
    texts3 = jax.random.normal(k_x3, (B3, T3, in_dim), jnp.float32)
    prepared = prepare_weights(params)                      # bf16 by default
    out3 = jax.block_until_ready(
        semantic_word_forward(texts3, params, time_chunk=32, prepared=prepared))
    ref3 = jax.block_until_ready(semantic_word_reference(texts3, params))
    np.testing.assert_allclose(np.asarray(out3), np.asarray(ref3), rtol=5e-2, atol=5e-2)

    print("KERNEL_OK")
</pallas_src>

<mosaic_0001>
module attributes {stable_mosaic.version = 11 : i64} {
  func.func @_bilstm_kernel(%arg0: i32, %arg1: memref<8x8x512xf32, #tpu.memory_space<vmem>>, %arg2: memref<8x8x512xf32, #tpu.memory_space<vmem>>, %arg3: memref<256x1024xf32, #tpu.memory_space<vmem>>, %arg4: memref<8x8x128xf32, #tpu.memory_space<vmem>>, %arg5: memref<8x8x128xf32, #tpu.memory_space<vmem>>, %arg6: memref<8x256xf32, #tpu.memory_space<vmem>>, %arg7: memref<8x128xf32, #tpu.memory_space<vmem>>, %arg8: memref<8x128xf32, #tpu.memory_space<vmem>>) attributes {dimension_semantics = [#tpu.dimension_semantics<arbitrary>], iteration_bounds = array<i64: 1>, scalar_prefetch = 0 : i64, scratch_operands = 3 : i64, tpu.core_type = #tpu.core_type<tc>, window_params = [{transform_indices = @transform_0, window_bounds = array<i64: 8, 8, 512>}, {transform_indices = @transform_1, window_bounds = array<i64: 8, 8, 512>}, {pipeline_mode = #tpu.pipeline_mode<synchronous>, transform_indices = @transform_2, window_bounds = array<i64: 256, 1024>}, {transform_indices = @transform_3, window_bounds = array<i64: 8, 8, 128>}, {transform_indices = @transform_4, window_bounds = array<i64: 8, 8, 128>}]} {
    %c0_i32 = arith.constant 0 : i32
    %0 = arith.cmpi eq, %arg0, %c0_i32 : i32
    %1 = arith.extui %0 : i1 to i32
    %c0_i32_0 = arith.constant 0 : i32
    %2 = arith.cmpi ne, %1, %c0_i32_0 : i32
    scf.if %2 {
      %cst_110 = arith.constant 0.000000e+00 : f32
      %434 = vector.broadcast %cst_110 : f32 to vector<8x256xf32>
      %c0_111 = arith.constant 0 : index
      %c0_112 = arith.constant 0 : index
      %435 = vector.load %arg6[%c0_111, %c0_112] : memref<8x256xf32, #tpu.memory_space<vmem>>, vector<8x256xf32>
      tpu.vector_store %arg6[%c0_111, %c0_112], %434 {strides = array<i32>} : memref<8x256xf32, #tpu.memory_space<vmem>>, vector<8x256xf32>,
      %cst_113 = arith.constant 0.000000e+00 : f32
      %436 = vector.broadcast %cst_113 : f32 to vector<8x128xf32>
      %c0_114 = arith.constant 0 : index
      %c0_115 = arith.constant 0 : index
      %437 = vector.load %arg7[%c0_114, %c0_115] : memref<8x128xf32, #tpu.memory_space<vmem>>, vector<8x128xf32>
      tpu.vector_store %arg7[%c0_114, %c0_115], %436 {strides = array<i32>} : memref<8x128xf32, #tpu.memory_space<vmem>>, vector<8x128xf32>,
      %cst_116 = arith.constant 0.000000e+00 : f32
      %438 = vector.broadcast %cst_116 : f32 to vector<8x128xf32>
      %c0_117 = arith.constant 0 : index
      %c0_118 = arith.constant 0 : index
      %439 = vector.load %arg8[%c0_117, %c0_118] : memref<8x128xf32, #tpu.memory_space<vmem>>, vector<8x128xf32>
      tpu.vector_store %arg8[%c0_117, %c0_118], %438 {strides = array<i32>} : memref<8x128xf32, #tpu.memory_space<vmem>>, vector<8x128xf32>,
    } else {
    }
    %c0 = arith.constant 0 : index
    %c0_1 = arith.constant 0 : index
    %3 = vector.load %arg3[%c0, %c0_1] : memref<256x1024xf32, #tpu.memory_space<vmem>>, vector<256x1024xf32>
    %c0_2 = arith.constant 0 : index
    %c0_3 = arith.constant 0 : index
    %4 = vector.load %arg6[%c0_2, %c0_3] : memref<8x256xf32, #tpu.memory_space<vmem>>, vector<8x256xf32>
    %c0_4 = arith.constant 0 : index
    %c0_5 = arith.constant 0 : index
    %5 = vector.load %arg7[%c0_4, %c0_5] : memref<8x128xf32, #tpu.memory_space<vmem>>, vector<8x128xf32>
    %c0_6 = arith.constant 0 : index
    %c0_7 = arith.constant 0 : index
    %6 = vector.load %arg8[%c0_6, %c0_7] : memref<8x128xf32, #tpu.memory_space<vmem>>, vector<8x128xf32>
    %c0_i32_8 = arith.constant 0 : i32
    %c7_i32 = arith.constant 7 : i32
    %7 = arith.subi %c7_i32, %c0_i32_8 : i32
    %cst = arith.constant dense<0.000000e+00> : vector<8x1024xf32>
    %8 = tpu.matmul %4, %3, %cst {dimension_numbers = #tpu.dot_dimension_numbers<[1], [0], [0], [1], [0, 0, 1, 1], [], []>} : vector<8x256xf32>, vector<256x1024xf32>, vector<8x1024xf32> -> vector<8x1024xf32>
    %9 = arith.index_cast %c0_i32_8 : i32 to index
    %c0_9 = arith.constant 0 : index
    %c0_10 = arith.constant 0 : index
    %10 = vector.load %arg1[%9, %c0_9, %c0_10] : memref<8x8x512xf32, #tpu.memory_space<vmem>>, vector<1x8x512xf32>
    %11 = vector.shape_cast %10 : vector<1x8x512xf32> to vector<8x512xf32>
    %12 = vector.extract_strided_slice %8 {offsets = [0, 0], sizes = [8, 512], strides = [1, 1]} : vector<8x1024xf32> to vector<8x512xf32>
    %13 = arith.addf %11, %12 : vector<8x512xf32>
    %14 = arith.index_cast %7 : i32 to index
    %c0_11 = arith.constant 0 : index
    %c0_12 = arith.constant 0 : index
    %15 = vector.load %arg2[%14, %c0_11, %c0_12] : memref<8x8x512xf32, #tpu.memory_space<vmem>>, vector<1x8x512xf32>
    %16 = vector.shape_cast %15 : vector<1x8x512xf32> to vector<8x512xf32>
    %17 = vector.extract_strided_slice %8 {offsets = [0, 512], sizes = [8, 512], strides = [1, 1]} : vector<8x1024xf32> to vector<8x512xf32>
    %18 = arith.addf %16, %17 : vector<8x512xf32>
    %19 = vector.extract_strided_slice %13 {offsets = [0, 0], sizes = [8, 384], strides = [1, 1]} : vector<8x512xf32> to vector<8x384xf32>
    %20 = arith.negf %19 : vector<8x384xf32>
    %21 = math.exp %20 : vector<8x384xf32>
    %cst_13 = arith.constant 1.000000e+00 : f32
    %22 = vector.broadcast %cst_13 : f32 to vector<8x384xf32>
    %23 = arith.addf %22, %21 : vector<8x384xf32>
    %24 = arith.divf %22, %23 : vector<8x384xf32>
    %25 = vector.extract_strided_slice %13 {offsets = [0, 384], sizes = [8, 128], strides = [1, 1]} : vector<8x512xf32> to vector<8x128xf32>
    %26 = math.tanh %25 : vector<8x128xf32>
    %27 = vector.extract_strided_slice %24 {offsets = [0, 128], sizes = [8, 128], strides = [1, 1]} : vector<8x384xf32> to vector<8x128xf32>
    %28 = arith.mulf %27, %5 : vector<8x128xf32>
    %29 = vector.extract_strided_slice %24 {offsets = [0, 0], sizes = [8, 128], strides = [1, 1]} : vector<8x384xf32> to vector<8x128xf32>
    %30 = arith.mulf %29, %26 : vector<8x128xf32>
    %31 = arith.addf %28, %30 : vector<8x128xf32>
    %32 = vector.extract_strided_slice %24 {offsets = [0, 256], sizes = [8, 128], strides = [1, 1]} : vector<8x384xf32> to vector<8x128xf32>
    %33 = math.tanh %31 : vector<8x128xf32>
    %34 = arith.mulf %32, %33 : vector<8x128xf32>
    %35 = vector.extract_strided_slice %18 {offsets = [0, 0], sizes = [8, 384], strides = [1, 1]} : vector<8x512xf32> to vector<8x384xf32>
    %36 = arith.negf %35 : vector<8x384xf32>
    %37 = math.exp %36 : vector<8x384xf32>
    %cst_14 = arith.constant 1.000000e+00 : f32
    %38 = vector.broadcast %cst_14 : f32 to vector<8x384xf32>
    %39 = arith.addf %38, %37 : vector<8x384xf32>
    %40 = arith.divf %38, %39 : vector<8x384xf32>
    %41 = vector.extract_strided_slice %18 {offsets = [0, 384], sizes = [8, 128], strides = [1, 1]} : vector<8x512xf32> to vector<8x128xf32>
    %42 = math.tanh %41 : vector<8x128xf32>
    %43 = vector.extract_strided_slice %40 {offsets = [0, 128], sizes = [8, 128], strides = [1, 1]} : vector<8x384xf32> to vector<8x128xf32>
    %44 = arith.mulf %43, %6 : vector<8x128xf32>
    %45 = vector.extract_strided_slice %40 {offsets = [0, 0], sizes = [8, 128], strides = [1, 1]} : vector<8x384xf32> to vector<8x128xf32>
    %46 = arith.mulf %45, %42 : vector<8x128xf32>
    %47 = arith.addf %44, %46 : vector<8x128xf32>
    %48 = vector.extract_strided_slice %40 {offsets = [0, 256], sizes = [8, 128], strides = [1, 1]} : vector<8x384xf32> to vector<8x128xf32>
    %49 = math.tanh %47 : vector<8x128xf32>
    %50 = arith.mulf %48, %49 : vector<8x128xf32>
    %51 = arith.index_cast %c0_i32_8 : i32 to index
    %c0_15 = arith.constant 0 : index
    %c0_16 = arith.constant 0 : index
    %52 = vector.load %arg4[%51, %c0_15, %c0_16] : memref<8x8x128xf32, #tpu.memory_space<vmem>>, vector<1x8x128xf32>
    %53 = vector.shape_cast %52 : vector<1x8x128xf32> to vector<8x128xf32>
    %54 = vector.shape_cast %34 : vector<8x128xf32> to vector<1x8x128xf32>
    tpu.vector_store %arg4[%51, %c0_15, %c0_16], %54 {strides = array<i32>} : memref<8x8x128xf32, #tpu.memory_space<vmem>>, vector<1x8x128xf32>,
    %55 = arith.index_cast %7 : i32 to index
    %c0_17 = arith.constant 0 : index
    %c0_18 = arith.constant 0 : index
    %56 = vector.load %arg5[%55, %c0_17, %c0_18] : memref<8x8x128xf32, #tpu.memory_space<vmem>>, vector<1x8x128xf32>
    %57 = vector.shape_cast %56 : vector<1x8x128xf32> to vector<8x128xf32>
    %58 = vector.shape_cast %50 : vector<8x128xf32> to vector<1x8x128xf32>
    tpu.vector_store %arg5[%55, %c0_17, %c0_18], %58 {strides = array<i32>} : memref<8x8x128xf32, #tpu.memory_space<vmem>>, vector<1x8x128xf32>,
    %59 = tpu.concatenate %34, %50 in 1 : vector<8x128xf32>, vector<8x128xf32> -> vector<8x256xf32>
    %c1_i32 = arith.constant 1 : i32
    %c7_i32_19 = arith.constant 7 : i32
    %60 = arith.subi %c7_i32_19, %c1_i32 : i32
    %cst_20 = arith.constant dense<0.000000e+00> : vector<8x1024xf32>
    %61 = tpu.matmul %59, %3, %cst_20 {dimension_numbers = #tpu.dot_dimension_numbers<[1], [0], [0], [1], [0, 0, 1, 1], [], []>} : vector<8x256xf32>, vector<256x1024xf32>, vector<8x1024xf32> -> vector<8x1024xf32>
    %62 = arith.index_cast %c1_i32 : i32 to index
    %c0_21 = arith.constant 0 : index
    %c0_22 = arith.constant 0 : index
    %63 = vector.load %arg1[%62, %c0_21, %c0_22] : memref<8x8x512xf32, #tpu.memory_space<vmem>>, vector<1x8x512xf32>
    %64 = vector.shape_cast %63 : vector<1x8x512xf32> to vector<8x512xf32>
    %65 = vector.extract_strided_slice %61 {offsets = [0, 0], sizes = [8, 512], strides = [1, 1]} : vector<8x1024xf32> to vector<8x512xf32>
    %66 = arith.addf %64, %65 : vector<8x512xf32>
    %67 = arith.index_cast %60 : i32 to index
    %c0_23 = arith.constant 0 : index
    %c0_24 = arith.constant 0 : index
    %68 = vector.load %arg2[%67, %c0_23, %c0_24] : memref<8x8x512xf32, #tpu.memory_space<vmem>>, vector<1x8x512xf32>
    %69 = vector.shape_cast %68 : vector<1x8x512xf32> to vector<8x512xf32>
    %70 = vector.extract_strided_slice %61 {offsets = [0, 512], sizes = [8, 512], strides = [1, 1]} : vector<8x1024xf32> to vector<8x512xf32>
    %71 = arith.addf %69, %70 : vector<8x512xf32>
    %72 = vector.extract_strided_slice %66 {offsets = [0, 0], sizes = [8, 384], strides = [1, 1]} : vector<8x512xf32> to vector<8x384xf32>
    %73 = arith.negf %72 : vector<8x384xf32>
    %74 = math.exp %73 : vector<8x384xf32>
    %cst_25 = arith.constant 1.000000e+00 : f32
    %75 = vector.broadcast %cst_25 : f32 to vector<8x384xf32>
    %76 = arith.addf %75, %74 : vector<8x384xf32>
    %77 = arith.divf %75, %76 : vector<8x384xf32>
    %78 = vector.extract_strided_slice %66 {offsets = [0, 384], sizes = [8, 128], strides = [1, 1]} : vector<8x512xf32> to vector<8x128xf32>
    %79 = math.tanh %78 : vector<8x128xf32>
    %80 = vector.extract_strided_slice %77 {offsets = [0, 128], sizes = [8, 128], strides = [1, 1]} : vector<8x384xf32> to vector<8x128xf32>
    %81 = arith.mulf %80, %31 : vector<8x128xf32>
    %82 = vector.extract_strided_slice %77 {offsets = [0, 0], sizes = [8, 128], strides = [1, 1]} : vector<8x384xf32> to vector<8x128xf32>
    %83 = arith.mulf %82, %79 : vector<8x128xf32>
    %84 = arith.addf %81, %83 : vector<8x128xf32>
    %85 = vector.extract_strided_slice %77 {offsets = [0, 256], sizes = [8, 128], strides = [1, 1]} : vector<8x384xf32> to vector<8x128xf32>
    %86 = math.tanh %84 : vector<8x128xf32>
    %87 = arith.mulf %85, %86 : vector<8x128xf32>
    %88 = vector.extract_strided_slice %71 {offsets = [0, 0], sizes = [8, 384], strides = [1, 1]} : vector<8x512xf32> to vector<8x384xf32>
    %89 = arith.negf %88 : vector<8x384xf32>
    %90 = math.exp %89 : vector<8x384xf32>
    %cst_26 = arith.constant 1.000000e+00 : f32
    %91 = vector.broadcast %cst_26 : f32 to vector<8x384xf32>
    %92 = arith.addf %91, %90 : vector<8x384xf32>
    %93 = arith.divf %91, %92 : vector<8x384xf32>
    %94 = vector.extract_strided_slice %71 {offsets = [0, 384], sizes = [8, 128], strides = [1, 1]} : vector<8x512xf32> to vector<8x128xf32>
    %95 = math.tanh %94 : vector<8x128xf32>
    %96 = vector.extract_strided_slice %93 {offsets = [0, 128], sizes = [8, 128], strides = [1, 1]} : vector<8x384xf32> to vector<8x128xf32>
    %97 = arith.mulf %96, %47 : vector<8x128xf32>
    %98 = vector.extract_strided_slice %93 {offsets = [0, 0], sizes = [8, 128], strides = [1, 1]} : vector<8x384xf32> to vector<8x128xf32>
    %99 = arith.mulf %98, %95 : vector<8x128xf32>
    %100 = arith.addf %97, %99 : vector<8x128xf32>
    %101 = vector.extract_strided_slice %93 {offsets = [0, 256], sizes = [8, 128], strides = [1, 1]} : vector<8x384xf32> to vector<8x128xf32>
    %102 = math.tanh %100 : vector<8x128xf32>
    %103 = arith.mulf %101, %102 : vector<8x128xf32>
    %104 = arith.index_cast %c1_i32 : i32 to index
    %c0_27 = arith.constant 0 : index
    %c0_28 = arith.constant 0 : index
    %105 = vector.load %arg4[%104, %c0_27, %c0_28] : memref<8x8x128xf32, #tpu.memory_space<vmem>>, vector<1x8x128xf32>
    %106 = vector.shape_cast %105 : vector<1x8x128xf32> to vector<8x128xf32>
    %107 = vector.shape_cast %87 : vector<8x128xf32> to vector<1x8x128xf32>
    tpu.vector_store %arg4[%104, %c0_27, %c0_28], %107 {strides = array<i32>} : memref<8x8x128xf32, #tpu.memory_space<vmem>>, vector<1x8x128xf32>,
    %108 = arith.index_cast %60 : i32 to index
    %c0_29 = arith.constant 0 : index
    %c0_30 = arith.constant 0 : index
    %109 = vector.load %arg5[%108, %c0_29, %c0_30] : memref<8x8x128xf32, #tpu.memory_space<vmem>>, vector<1x8x128xf32>
    %110 = vector.shape_cast %109 : vector<1x8x128xf32> to vector<8x128xf32>
    %111 = vector.shape_cast %103 : vector<8x128xf32> to vector<1x8x128xf32>
    tpu.vector_store %arg5[%108, %c0_29, %c0_30], %111 {strides = array<i32>} : memref<8x8x128xf32, #tpu.memory_space<vmem>>, vector<1x8x128xf32>,
    %112 = tpu.concatenate %87, %103 in 1 : vector<8x128xf32>, vector<8x128xf32> -> vector<8x256xf32>
    %c2_i32 = arith.constant 2 : i32
    %c7_i32_31 = arith.constant 7 : i32
    %113 = arith.subi %c7_i32_31, %c2_i32 : i32
    %cst_32 = arith.constant dense<0.000000e+00> : vector<8x1024xf32>
    %114 = tpu.matmul %112, %3, %cst_32 {dimension_numbers = #tpu.dot_dimension_numbers<[1], [0], [0], [1], [0, 0, 1, 1], [], []>} : vector<8x256xf32>, vector<256x1024xf32>, vector<8x1024xf32> -> vector<8x1024xf32>
    %115 = arith.index_cast %c2_i32 : i32 to index
    %c0_33 = arith.constant 0 : index
    %c0_34 = arith.constant 0 : index
    %116 = vector.load %arg1[%115, %c0_33, %c0_34] : memref<8x8x512xf32, #tpu.memory_space<vmem>>, vector<1x8x512xf32>
    %117 = vector.shape_cast %116 : vector<1x8x512xf32> to vector<8x512xf32>
    %118 = vector.extract_strided_slice %114 {offsets = [0, 0], sizes = [8, 512], strides = [1, 1]} : vector<8x1024xf32> to vector<8x512xf32>
    %119 = arith.addf %117, %118 : vector<8x512xf32>
    %120 = arith.index_cast %113 : i32 to index
    %c0_35 = arith.constant 0 : index
    %c0_36 = arith.constant 0 : index
    %121 = vector.load %arg2[%120, %c0_35, %c0_36] : memref<8x8x512xf32, #tpu.memory_space<vmem>>, vector<1x8x512xf32>
    %122 = vector.shape_cast %121 : vector<1x8x512xf32> to vector<8x512xf32>
    %123 = vector.extract_strided_slice %114 {offsets = [0, 512], sizes = [8, 512], strides = [1, 1]} : vector<8x1024xf32> to vector<8x512xf32>
    %124 = arith.addf %122, %123 : vector<8x512xf32>
    %125 = vector.extract_strided_slice %119 {offsets = [0, 0], sizes = [8, 384], strides = [1, 1]} : vector<8x512xf32> to vector<8x384xf32>
    %126 = arith.negf %125 : vector<8x384xf32>
    %127 = math.exp %126 : vector<8x384xf32>
    %cst_37 = arith.constant 1.000000e+00 : f32
    %128 = vector.broadcast %cst_37 : f32 to vector<8x384xf32>
    %129 = arith.addf %128, %127 : vector<8x384xf32>
    %130 = arith.divf %128, %129 : vector<8x384xf32>
    %131 = vector.extract_strided_slice %119 {offsets = [0, 384], sizes = [8, 128], strides = [1, 1]} : vector<8x512xf32> to vector<8x128xf32>
    %132 = math.tanh %131 : vector<8x128xf32>
    %133 = vector.extract_strided_slice %130 {offsets = [0, 128], sizes = [8, 128], strides = [1, 1]} : vector<8x384xf32> to vector<8x128xf32>
    %134 = arith.mulf %133, %84 : vector<8x128xf32>
    %135 = vector.extract_strided_slice %130 {offsets = [0, 0], sizes = [8, 128], strides = [1, 1]} : vector<8x384xf32> to vector<8x128xf32>
    %136 = arith.mulf %135, %132 : vector<8x128xf32>
    %137 = arith.addf %134, %136 : vector<8x128xf32>
    %138 = vector.extract_strided_slice %130 {offsets = [0, 256], sizes = [8, 128], strides = [1, 1]} : vector<8x384xf32> to vector<8x128xf32>
    %139 = math.tanh %137 : vector<8x128xf32>
    %140 = arith.mulf %138, %139 : vector<8x128xf32>
    %141 = vector.extract_strided_slice %124 {offsets = [0, 0], sizes = [8, 384], strides = [1, 1]} : vector<8x512xf32> to vector<8x384xf32>
    %142 = arith.negf %141 : vector<8x384xf32>
    %143 = math.exp %142 : vector<8x384xf32>
    %cst_38 = arith.constant 1.000000e+00 : f32
    %144 = vector.broadcast %cst_38 : f32 to vector<8x384xf32>
    %145 = arith.addf %144, %143 : vector<8x384xf32>
    %146 = arith.divf %144, %145 : vector<8x384xf32>
    %147 = vector.extract_strided_slice %124 {offsets = [0, 384], sizes = [8, 128], strides = [1, 1]} : vector<8x512xf32> to vector<8x128xf32>
    %148 = math.tanh %147 : vector<8x128xf32>
    %149 = vector.extract_strided_slice %146 {offsets = [0, 128], sizes = [8, 128], strides = [1, 1]} : vector<8x384xf32> to vector<8x128xf32>
    %150 = arith.mulf %149, %100 : vector<8x128xf32>
    %151 = vector.extract_strided_slice %146 {offsets = [0, 0], sizes = [8, 128], strides = [1, 1]} : vector<8x384xf32> to vector<8x128xf32>
    %152 = arith.mulf %151, %148 : vector<8x128xf32>
    %153 = arith.addf %150, %152 : vector<8x128xf32>
    %154 = vector.extract_strided_slice %146 {offsets = [0, 256], sizes = [8, 128], strides = [1, 1]} : vector<8x384xf32> to vector<8x128xf32>
    %155 = math.tanh %153 : vector<8x128xf32>
    %156 = arith.mulf %154, %155 : vector<8x128xf32>
    %157 = arith.index_cast %c2_i32 : i32 to index
    %c0_39 = arith.constant 0 : index
    %c0_40 = arith.constant 0 : index
    %158 = vector.load %arg4[%157, %c0_39, %c0_40] : memref<8x8x128xf32, #tpu.memory_space<vmem>>, vector<1x8x128xf32>
    %159 = vector.shape_cast %158 : vector<1x8x128xf32> to vector<8x128xf32>
    %160 = vector.shape_cast %140 : vector<8x128xf32> to vector<1x8x128xf32>
    tpu.vector_store %arg4[%157, %c0_39, %c0_40], %160 {strides = array<i32>} : memref<8x8x128xf32, #tpu.memory_space<vmem>>, vector<1x8x128xf32>,
    %161 = arith.index_cast %113 : i32 to index
    %c0_41 = arith.constant 0 : index
    %c0_42 = arith.constant 0 : index
    %162 = vector.load %arg5[%161, %c0_41, %c0_42] : memref<8x8x128xf32, #tpu.memory_space<vmem>>, vector<1x8x128xf32>
    %163 = vector.shape_cast %162 : vector<1x8x128xf32> to vector<8x128xf32>
    %164 = vector.shape_cast %156 : vector<8x128xf32> to vector<1x8x128xf32>
    tpu.vector_store %arg5[%161, %c0_41, %c0_42], %164 {strides = array<i32>} : memref<8x8x128xf32, #tpu.memory_space<vmem>>, vector<1x8x128xf32>,
    %165 = tpu.concatenate %140, %156 in 1 : vector<8x128xf32>, vector<8x128xf32> -> vector<8x256xf32>
    %c3_i32 = arith.constant 3 : i32
    %c7_i32_43 = arith.constant 7 : i32
    %166 = arith.subi %c7_i32_43, %c3_i32 : i32
    %cst_44 = arith.constant dense<0.000000e+00> : vector<8x1024xf32>
    %167 = tpu.matmul %165, %3, %cst_44 {dimension_numbers = #tpu.dot_dimension_numbers<[1], [0], [0], [1], [0, 0, 1, 1], [], []>} : vector<8x256xf32>, vector<256x1024xf32>, vector<8x1024xf32> -> vector<8x1024xf32>
    %168 = arith.index_cast %c3_i32 : i32 to index
    %c0_45 = arith.constant 0 : index
    %c0_46 = arith.constant 0 : index
    %169 = vector.load %arg1[%168, %c0_45, %c0_46] : memref<8x8x512xf32, #tpu.memory_space<vmem>>, vector<1x8x512xf32>
    %170 = vector.shape_cast %169 : vector<1x8x512xf32> to vector<8x512xf32>
    %171 = vector.extract_strided_slice %167 {offsets = [0, 0], sizes = [8, 512], strides = [1, 1]} : vector<8x1024xf32> to vector<8x512xf32>
    %172 = arith.addf %170, %171 : vector<8x512xf32>
    %173 = arith.index_cast %166 : i32 to index
    %c0_47 = arith.constant 0 : index
    %c0_48 = arith.constant 0 : index
    %174 = vector.load %arg2[%173, %c0_47, %c0_48] : memref<8x8x512xf32, #tpu.memory_space<vmem>>, vector<1x8x512xf32>
    %175 = vector.shape_cast %174 : vector<1x8x512xf32> to vector<8x512xf32>
    %176 = vector.extract_strided_slice %167 {offsets = [0, 512], sizes = [8, 512], strides = [1, 1]} : vector<8x1024xf32> to vector<8x512xf32>
    %177 = arith.addf %175, %176 : vector<8x512xf32>
    %178 = vector.extract_strided_slice %172 {offsets = [0, 0], sizes = [8, 384], strides = [1, 1]} : vector<8x512xf32> to vector<8x384xf32>
    %179 = arith.negf %178 : vector<8x384xf32>
    %180 = math.exp %179 : vector<8x384xf32>
    %cst_49 = arith.constant 1.000000e+00 : f32
    %181 = vector.broadcast %cst_49 : f32 to vector<8x384xf32>
    %182 = arith.addf %181, %180 : vector<8x384xf32>
    %183 = arith.divf %181, %182 : vector<8x384xf32>
    %184 = vector.extract_strided_slice %172 {offsets = [0, 384], sizes = [8, 128], strides = [1, 1]} : vector<8x512xf32> to vector<8x128xf32>
    %185 = math.tanh %184 : vector<8x128xf32>
    %186 = vector.extract_strided_slice %183 {offsets = [0, 128], sizes = [8, 128], strides = [1, 1]} : vector<8x384xf32> to vector<8x128xf32>
    %187 = arith.mulf %186, %137 : vector<8x128xf32>
    %188 = vector.extract_strided_slice %183 {offsets = [0, 0], sizes = [8, 128], strides = [1, 1]} : vector<8x384xf32> to vector<8x128xf32>
    %189 = arith.mulf %188, %185 : vector<8x128xf32>
    %190 = arith.addf %187, %189 : vector<8x128xf32>
    %191 = vector.extract_strided_slice %183 {offsets = [0, 256], sizes = [8, 128], strides = [1, 1]} : vector<8x384xf32> to vector<8x128xf32>
    %192 = math.tanh %190 : vector<8x128xf32>
    %193 = arith.mulf %191, %192 : vector<8x128xf32>
    %194 = vector.extract_strided_slice %177 {offsets = [0, 0], sizes = [8, 384], strides = [1, 1]} : vector<8x512xf32> to vector<8x384xf32>
    %195 = arith.negf %194 : vector<8x384xf32>
    %196 = math.exp %195 : vector<8x384xf32>
    %cst_50 = arith.constant 1.000000e+00 : f32
    %197 = vector.broadcast %cst_50 : f32 to vector<8x384xf32>
    %198 = arith.addf %197, %196 : vector<8x384xf32>
    %199 = arith.divf %197, %198 : vector<8x384xf32>
    %200 = vector.extract_strided_slice %177 {offsets = [0, 384], sizes = [8, 128], strides = [1, 1]} : vector<8x512xf32> to vector<8x128xf32>
    %201 = math.tanh %200 : vector<8x128xf32>
    %202 = vector.extract_strided_slice %199 {offsets = [0, 128], sizes = [8, 128], strides = [1, 1]} : vector<8x384xf32> to vector<8x128xf32>
    %203 = arith.mulf %202, %153 : vector<8x128xf32>
    %204 = vector.extract_strided_slice %199 {offsets = [0, 0], sizes = [8, 128], strides = [1, 1]} : vector<8x384xf32> to vector<8x128xf32>
    %205 = arith.mulf %204, %201 : vector<8x128xf32>
    %206 = arith.addf %203, %205 : vector<8x128xf32>
    %207 = vector.extract_strided_slice %199 {offsets = [0, 256], sizes = [8, 128], strides = [1, 1]} : vector<8x384xf32> to vector<8x128xf32>
    %208 = math.tanh %206 : vector<8x128xf32>
    %209 = arith.mulf %207, %208 : vector<8x128xf32>
    %210 = arith.index_cast %c3_i32 : i32 to index
    %c0_51 = arith.constant 0 : index
    %c0_52 = arith.constant 0 : index
    %211 = vector.load %arg4[%210, %c0_51, %c0_52] : memref<8x8x128xf32, #tpu.memory_space<vmem>>, vector<1x8x128xf32>
    %212 = vector.shape_cast %211 : vector<1x8x128xf32> to vector<8x128xf32>
    %213 = vector.shape_cast %193 : vector<8x128xf32> to vector<1x8x128xf32>
    tpu.vector_store %arg4[%210, %c0_51, %c0_52], %213 {strides = array<i32>} : memref<8x8x128xf32, #tpu.memory_space<vmem>>, vector<1x8x128xf32>,
    %214 = arith.index_cast %166 : i32 to index
    %c0_53 = arith.constant 0 : index
    %c0_54 = arith.constant 0 : index
    %215 = vector.load %arg5[%214, %c0_53, %c0_54] : memref<8x8x128xf32, #tpu.memory_space<vmem>>, vector<1x8x128xf32>
    %216 = vector.shape_cast %215 : vector<1x8x128xf32> to vector<8x128xf32>
    %217 = vector.shape_cast %209 : vector<8x128xf32> to vector<1x8x128xf32>
    tpu.vector_store %arg5[%214, %c0_53, %c0_54], %217 {strides = array<i32>} : memref<8x8x128xf32, #tpu.memory_space<vmem>>, vector<1x8x128xf32>,
    %218 = tpu.concatenate %193, %209 in 1 : vector<8x128xf32>, vector<8x128xf32> -> vector<8x256xf32>
    %c4_i32 = arith.constant 4 : i32
    %c7_i32_55 = arith.constant 7 : i32
    %219 = arith.subi %c7_i32_55, %c4_i32 : i32
    %cst_56 = arith.constant dense<0.000000e+00> : vector<8x1024xf32>
    %220 = tpu.matmul %218, %3, %cst_56 {dimension_numbers = #tpu.dot_dimension_numbers<[1], [0], [0], [1], [0, 0, 1, 1], [], []>} : vector<8x256xf32>, vector<256x1024xf32>, vector<8x1024xf32> -> vector<8x1024xf32>
    %221 = arith.index_cast %c4_i32 : i32 to index
    %c0_57 = arith.constant 0 : index
    %c0_58 = arith.constant 0 : index
    %222 = vector.load %arg1[%221, %c0_57, %c0_58] : memref<8x8x512xf32, #tpu.memory_space<vmem>>, vector<1x8x512xf32>
    %223 = vector.shape_cast %222 : vector<1x8x512xf32> to vector<8x512xf32>
    %224 = vector.extract_strided_slice %220 {offsets = [0, 0], sizes = [8, 512], strides = [1, 1]} : vector<8x1024xf32> to vector<8x512xf32>
    %225 = arith.addf %223, %224 : vector<8x512xf32>
    %226 = arith.index_cast %219 : i32 to index
    %c0_59 = arith.constant 0 : index
    %c0_60 = arith.constant 0 : index
    %227 = vector.load %arg2[%226, %c0_59, %c0_60] : memref<8x8x512xf32, #tpu.memory_space<vmem>>, vector<1x8x512xf32>
    %228 = vector.shape_cast %227 : vector<1x8x512xf32> to vector<8x512xf32>
    %229 = vector.extract_strided_slice %220 {offsets = [0, 512], sizes = [8, 512], strides = [1, 1]} : vector<8x1024xf32> to vector<8x512xf32>
    %230 = arith.addf %228, %229 : vector<8x512xf32>
    %231 = vector.extract_strided_slice %225 {offsets = [0, 0], sizes = [8, 384], strides = [1, 1]} : vector<8x512xf32> to vector<8x384xf32>
    %232 = arith.negf %231 : vector<8x384xf32>
    %233 = math.exp %232 : vector<8x384xf32>
    %cst_61 = arith.constant 1.000000e+00 : f32
    %234 = vector.broadcast %cst_61 : f32 to vector<8x384xf32>
    %235 = arith.addf %234, %233 : vector<8x384xf32>
    %236 = arith.divf %234, %235 : vector<8x384xf32>
    %237 = vector.extract_strided_slice %225 {offsets = [0, 384], sizes = [8, 128], strides = [1, 1]} : vector<8x512xf32> to vector<8x128xf32>
    %238 = math.tanh %237 : vector<8x128xf32>
    %239 = vector.extract_strided_slice %236 {offsets = [0, 128], sizes = [8, 128], strides = [1, 1]} : vector<8x384xf32> to vector<8x128xf32>
    %240 = arith.mulf %239, %190 : vector<8x128xf32>
    %241 = vector.extract_strided_slice %236 {offsets = [0, 0], sizes = [8, 128], strides = [1, 1]} : vector<8x384xf32> to vector<8x128xf32>
    %242 = arith.mulf %241, %238 : vector<8x128xf32>
    %243 = arith.addf %240, %242 : vector<8x128xf32>
    %244 = vector.extract_strided_slice %236 {offsets = [0, 256], sizes = [8, 128], strides = [1, 1]} : vector<8x384xf32> to vector<8x128xf32>
    %245 = math.tanh %243 : vector<8x128xf32>
    %246 = arith.mulf %244, %245 : vector<8x128xf32>
    %247 = vector.extract_strided_slice %230 {offsets = [0, 0], sizes = [8, 384], strides = [1, 1]} : vector<8x512xf32> to vector<8x384xf32>
    %248 = arith.negf %247 : vector<8x384xf32>
    %249 = math.exp %248 : vector<8x384xf32>
    %cst_62 = arith.constant 1.000000e+00 : f32
    %250 = vector.broadcast %cst_62 : f32 to vector<8x384xf32>
    %251 = arith.addf %250, %249 : vector<8x384xf32>
    %252 = arith.divf %250, %251 : vector<8x384xf32>
    %253 = vector.extract_strided_slice %230 {offsets = [0, 384], sizes = [8, 128], strides = [1, 1]} : vector<8x512xf32> to vector<8x128xf32>
    %254 = math.tanh %253 : vector<8x128xf32>
    %255 = vector.extract_strided_slice %252 {offsets = [0, 128], sizes = [8, 128], strides = [1, 1]} : vector<8x384xf32> to vector<8x128xf32>
    %256 = arith.mulf %255, %206 : vector<8x128xf32>
    %257 = vector.extract_strided_slice %252 {offsets = [0, 0], sizes = [8, 128], strides = [1, 1]} : vector<8x384xf32> to vector<8x128xf32>
    %258 = arith.mulf %257, %254 : vector<8x128xf32>
    %259 = arith.addf %256, %258 : vector<8x128xf32>
    %260 = vector.extract_strided_slice %252 {offsets = [0, 256], sizes = [8, 128], strides = [1, 1]} : vector<8x384xf32> to vector<8x128xf32>
    %261 = math.tanh %259 : vector<8x128xf32>
    %262 = arith.mulf %260, %261 : vector<8x128xf32>
    %263 = arith.index_cast %c4_i32 : i32 to index
    %c0_63 = arith.constant 0 : index
    %c0_64 = arith.constant 0 : index
    %264 = vector.load %arg4[%263, %c0_63, %c0_64] : memref<8x8x128xf32, #tpu.memory_space<vmem>>, vector<1x8x128xf32>
    %265 = vector.shape_cast %264 : vector<1x8x128xf32> to vector<8x128xf32>
    %266 = vector.shape_cast %246 : vector<8x128xf32> to vector<1x8x128xf32>
    tpu.vector_store %arg4[%263, %c0_63, %c0_64], %266 {strides = array<i32>} : memref<8x8x128xf32, #tpu.memory_space<vmem>>, vector<1x8x128xf32>,
    %267 = arith.index_cast %219 : i32 to index
    %c0_65 = arith.constant 0 : index
    %c0_66 = arith.constant 0 : index
    %268 = vector.load %arg5[%267, %c0_65, %c0_66] : memref<8x8x128xf32, #tpu.memory_space<vmem>>, vector<1x8x128xf32>
    %269 = vector.shape_cast %268 : vector<1x8x128xf32> to vector<8x128xf32>
    %270 = vector.shape_cast %262 : vector<8x128xf32> to vector<1x8x128xf32>
    tpu.vector_store %arg5[%267, %c0_65, %c0_66], %270 {strides = array<i32>} : memref<8x8x128xf32, #tpu.memory_space<vmem>>, vector<1x8x128xf32>,
    %271 = tpu.concatenate %246, %262 in 1 : vector<8x128xf32>, vector<8x128xf32> -> vector<8x256xf32>
    %c5_i32 = arith.constant 5 : i32
    %c7_i32_67 = arith.constant 7 : i32
    %272 = arith.subi %c7_i32_67, %c5_i32 : i32
    %cst_68 = arith.constant dense<0.000000e+00> : vector<8x1024xf32>
    %273 = tpu.matmul %271, %3, %cst_68 {dimension_numbers = #tpu.dot_dimension_numbers<[1], [0], [0], [1], [0, 0, 1, 1], [], []>} : vector<8x256xf32>, vector<256x1024xf32>, vector<8x1024xf32> -> vector<8x1024xf32>
    %274 = arith.index_cast %c5_i32 : i32 to index
    %c0_69 = arith.constant 0 : index
    %c0_70 = arith.constant 0 : index
    %275 = vector.load %arg1[%274, %c0_69, %c0_70] : memref<8x8x512xf32, #tpu.memory_space<vmem>>, vector<1x8x512xf32>
    %276 = vector.shape_cast %275 : vector<1x8x512xf32> to vector<8x512xf32>
    %277 = vector.extract_strided_slice %273 {offsets = [0, 0], sizes = [8, 512], strides = [1, 1]} : vector<8x1024xf32> to vector<8x512xf32>
    %278 = arith.addf %276, %277 : vector<8x512xf32>
    %279 = arith.index_cast %272 : i32 to index
    %c0_71 = arith.constant 0 : index
    %c0_72 = arith.constant 0 : index
    %280 = vector.load %arg2[%279, %c0_71, %c0_72] : memref<8x8x512xf32, #tpu.memory_space<vmem>>, vector<1x8x512xf32>
    %281 = vector.shape_cast %280 : vector<1x8x512xf32> to vector<8x512xf32>
    %282 = vector.extract_strided_slice %273 {offsets = [0, 512], sizes = [8, 512], strides = [1, 1]} : vector<8x1024xf32> to vector<8x512xf32>
    %283 = arith.addf %281, %282 : vector<8x512xf32>
    %284 = vector.extract_strided_slice %278 {offsets = [0, 0], sizes = [8, 384], strides = [1, 1]} : vector<8x512xf32> to vector<8x384xf32>
    %285 = arith.negf %284 : vector<8x384xf32>
    %286 = math.exp %285 : vector<8x384xf32>
    %cst_73 = arith.constant 1.000000e+00 : f32
    %287 = vector.broadcast %cst_73 : f32 to vector<8x384xf32>
    %288 = arith.addf %287, %286 : vector<8x384xf32>
    %289 = arith.divf %287, %288 : vector<8x384xf32>
    %290 = vector.extract_strided_slice %278 {offsets = [0, 384], sizes = [8, 128], strides = [1, 1]} : vector<8x512xf32> to vector<8x128xf32>
    %291 = math.tanh %290 : vector<8x128xf32>
    %292 = vector.extract_strided_slice %289 {offsets = [0, 128], sizes = [8, 128], strides = [1, 1]} : vector<8x384xf32> to vector<8x128xf32>
    %293 = arith.mulf %292, %243 : vector<8x128xf32>
    %294 = vector.extract_strided_slice %289 {offsets = [0, 0], sizes = [8, 128], strides = [1, 1]} : vector<8x384xf32> to vector<8x128xf32>
    %295 = arith.mulf %294, %291 : vector<8x128xf32>
    %296 = arith.addf %293, %295 : vector<8x128xf32>
    %297 = vector.extract_strided_slice %289 {offsets = [0, 256], sizes = [8, 128], strides = [1, 1]} : vector<8x384xf32> to vector<8x128xf32>
    %298 = math.tanh %296 : vector<8x128xf32>
    %299 = arith.mulf %297, %298 : vector<8x128xf32>
    %300 = vector.extract_strided_slice %283 {offsets = [0, 0], sizes = [8, 384], strides = [1, 1]} : vector<8x512xf32> to vector<8x384xf32>
    %301 = arith.negf %300 : vector<8x384xf32>
    %302 = math.exp %301 : vector<8x384xf32>
    %cst_74 = arith.constant 1.000000e+00 : f32
    %303 = vector.broadcast %cst_74 : f32 to vector<8x384xf32>
    %304 = arith.addf %303, %302 : vector<8x384xf32>
    %305 = arith.divf %303, %304 : vector<8x384xf32>
    %306 = vector.extract_strided_slice %283 {offsets = [0, 384], sizes = [8, 128], strides = [1, 1]} : vector<8x512xf32> to vector<8x128xf32>
    %307 = math.tanh %306 : vector<8x128xf32>
    %308 = vector.extract_strided_slice %305 {offsets = [0, 128], sizes = [8, 128], strides = [1, 1]} : vector<8x384xf32> to vector<8x128xf32>
    %309 = arith.mulf %308, %259 : vector<8x128xf32>
    %310 = vector.extract_strided_slice %305 {offsets = [0, 0], sizes = [8, 128], strides = [1, 1]} : vector<8x384xf32> to vector<8x128xf32>
    %311 = arith.mulf %310, %307 : vector<8x128xf32>
    %312 = arith.addf %309, %311 : vector<8x128xf32>
    %313 = vector.extract_strided_slice %305 {offsets = [0, 256], sizes = [8, 128], strides = [1, 1]} : vector<8x384xf32> to vector<8x128xf32>
    %314 = math.tanh %312 : vector<8x128xf32>
    %315 = arith.mulf %313, %314 : vector<8x128xf32>
    %316 = arith.index_cast %c5_i32 : i32 to index
    %c0_75 = arith.constant 0 : index
    %c0_76 = arith.constant 0 : index
    %317 = vector.load %arg4[%316, %c0_75, %c0_76] : memref<8x8x128xf32, #tpu.memory_space<vmem>>, vector<1x8x128xf32>
    %318 = vector.shape_cast %317 : vector<1x8x128xf32> to vector<8x128xf32>
    %319 = vector.shape_cast %299 : vector<8x128xf32> to vector<1x8x128xf32>
    tpu.vector_store %arg4[%316, %c0_75, %c0_76], %319 {strides = array<i32>} : memref<8x8x128xf32, #tpu.memory_space<vmem>>, vector<1x8x128xf32>,
    %320 = arith.index_cast %272 : i32 to index
    %c0_77 = arith.constant 0 : index
    %c0_78 = arith.constant 0 : index
    %321 = vector.load %arg5[%320, %c0_77, %c0_78] : memref<8x8x128xf32, #tpu.memory_space<vmem>>, vector<1x8x128xf32>
    %322 = vector.shape_cast %321 : vector<1x8x128xf32> to vector<8x128xf32>
    %323 = vector.shape_cast %315 : vector<8x128xf32> to vector<1x8x128xf32>
    tpu.vector_store %arg5[%320, %c0_77, %c0_78], %323 {strides = array<i32>} : memref<8x8x128xf32, #tpu.memory_space<vmem>>, vector<1x8x128xf32>,
    %324 = tpu.concatenate %299, %315 in 1 : vector<8x128xf32>, vector<8x128xf32> -> vector<8x256xf32>
    %c6_i32 = arith.constant 6 : i32
    %c7_i32_79 = arith.constant 7 : i32
    %325 = arith.subi %c7_i32_79, %c6_i32 : i32
    %cst_80 = arith.constant dense<0.000000e+00> : vector<8x1024xf32>
    %326 = tpu.matmul %324, %3, %cst_80 {dimension_numbers = #tpu.dot_dimension_numbers<[1], [0], [0], [1], [0, 0, 1, 1], [], []>} : vector<8x256xf32>, vector<256x1024xf32>, vector<8x1024xf32> -> vector<8x1024xf32>
    %327 = arith.index_cast %c6_i32 : i32 to index
    %c0_81 = arith.constant 0 : index
    %c0_82 = arith.constant 0 : index
    %328 = vector.load %arg1[%327, %c0_81, %c0_82] : memref<8x8x512xf32, #tpu.memory_space<vmem>>, vector<1x8x512xf32>
    %329 = vector.shape_cast %328 : vector<1x8x512xf32> to vector<8x512xf32>
    %330 = vector.extract_strided_slice %326 {offsets = [0, 0], sizes = [8, 512], strides = [1, 1]} : vector<8x1024xf32> to vector<8x512xf32>
    %331 = arith.addf %329, %330 : vector<8x512xf32>
    %332 = arith.index_cast %325 : i32 to index
    %c0_83 = arith.constant 0 : index
    %c0_84 = arith.constant 0 : index
    %333 = vector.load %arg2[%332, %c0_83, %c0_84] : memref<8x8x512xf32, #tpu.memory_space<vmem>>, vector<1x8x512xf32>
    %334 = vector.shape_cast %333 : vector<1x8x512xf32> to vector<8x512xf32>
    %335 = vector.extract_strided_slice %326 {offsets = [0, 512], sizes = [8, 512], strides = [1, 1]} : vector<8x1024xf32> to vector<8x512xf32>
    %336 = arith.addf %334, %335 : vector<8x512xf32>
    %337 = vector.extract_strided_slice %331 {offsets = [0, 0], sizes = [8, 384], strides = [1, 1]} : vector<8x512xf32> to vector<8x384xf32>
    %338 = arith.negf %337 : vector<8x384xf32>
    %339 = math.exp %338 : vector<8x384xf32>
    %cst_85 = arith.constant 1.000000e+00 : f32
    %340 = vector.broadcast %cst_85 : f32 to vector<8x384xf32>
    %341 = arith.addf %340, %339 : vector<8x384xf32>
    %342 = arith.divf %340, %341 : vector<8x384xf32>
    %343 = vector.extract_strided_slice %331 {offsets = [0, 384], sizes = [8, 128], strides = [1, 1]} : vector<8x512xf32> to vector<8x128xf32>
    %344 = math.tanh %343 : vector<8x128xf32>
    %345 = vector.extract_strided_slice %342 {offsets = [0, 128], sizes = [8, 128], strides = [1, 1]} : vector<8x384xf32> to vector<8x128xf32>
    %346 = arith.mulf %345, %296 : vector<8x128xf32>
    %347 = vector.extract_strided_slice %342 {offsets = [0, 0], sizes = [8, 128], strides = [1, 1]} : vector<8x384xf32> to vector<8x128xf32>
    %348 = arith.mulf %347, %344 : vector<8x128xf32>
    %349 = arith.addf %346, %348 : vector<8x128xf32>
    %350 = vector.extract_strided_slice %342 {offsets = [0, 256], sizes = [8, 128], strides = [1, 1]} : vector<8x384xf32> to vector<8x128xf32>
    %351 = math.tanh %349 : vector<8x128xf32>
    %352 = arith.mulf %350, %351 : vector<8x128xf32>
    %353 = vector.extract_strided_slice %336 {offsets = [0, 0], sizes = [8, 384], strides = [1, 1]} : vector<8x512xf32> to vector<8x384xf32>
    %354 = arith.negf %353 : vector<8x384xf32>
    %355 = math.exp %354 : vector<8x384xf32>
    %cst_86 = arith.constant 1.000000e+00 : f32
    %356 = vector.broadcast %cst_86 : f32 to vector<8x384xf32>
    %357 = arith.addf %356, %355 : vector<8x384xf32>
    %358 = arith.divf %356, %357 : vector<8x384xf32>
    %359 = vector.extract_strided_slice %336 {offsets = [0, 384], sizes = [8, 128], strides = [1, 1]} : vector<8x512xf32> to vector<8x128xf32>
    %360 = math.tanh %359 : vector<8x128xf32>
    %361 = vector.extract_strided_slice %358 {offsets = [0, 128], sizes = [8, 128], strides = [1, 1]} : vector<8x384xf32> to vector<8x128xf32>
    %362 = arith.mulf %361, %312 : vector<8x128xf32>
    %363 = vector.extract_strided_slice %358 {offsets = [0, 0], sizes = [8, 128], strides = [1, 1]} : vector<8x384xf32> to vector<8x128xf32>
    %364 = arith.mulf %363, %360 : vector<8x128xf32>
    %365 = arith.addf %362, %364 : vector<8x128xf32>
    %366 = vector.extract_strided_slice %358 {offsets = [0, 256], sizes = [8, 128], strides = [1, 1]} : vector<8x384xf32> to vector<8x128xf32>
    %367 = math.tanh %365 : vector<8x128xf32>
    %368 = arith.mulf %366, %367 : vector<8x128xf32>
    %369 = arith.index_cast %c6_i32 : i32 to index
    %c0_87 = arith.constant 0 : index
    %c0_88 = arith.constant 0 : index
    %370 = vector.load %arg4[%369, %c0_87, %c0_88] : memref<8x8x128xf32, #tpu.memory_space<vmem>>, vector<1x8x128xf32>
    %371 = vector.shape_cast %370 : vector<1x8x128xf32> to vector<8x128xf32>
    %372 = vector.shape_cast %352 : vector<8x128xf32> to vector<1x8x128xf32>
    tpu.vector_store %arg4[%369, %c0_87, %c0_88], %372 {strides = array<i32>} : memref<8x8x128xf32, #tpu.memory_space<vmem>>, vector<1x8x128xf32>,
    %373 = arith.index_cast %325 : i32 to index
    %c0_89 = arith.constant 0 : index
    %c0_90 = arith.constant 0 : index
    %374 = vector.load %arg5[%373, %c0_89, %c0_90] : memref<8x8x128xf32, #tpu.memory_space<vmem>>, vector<1x8x128xf32>
    %375 = vector.shape_cast %374 : vector<1x8x128xf32> to vector<8x128xf32>
    %376 = vector.shape_cast %368 : vector<8x128xf32> to vector<1x8x128xf32>
    tpu.vector_store %arg5[%373, %c0_89, %c0_90], %376 {strides = array<i32>} : memref<8x8x128xf32, #tpu.memory_space<vmem>>, vector<1x8x128xf32>,
    %377 = tpu.concatenate %352, %368 in 1 : vector<8x128xf32>, vector<8x128xf32> -> vector<8x256xf32>
    %c7_i32_91 = arith.constant 7 : i32
    %c7_i32_92 = arith.constant 7 : i32
    %378 = arith.subi %c7_i32_92, %c7_i32_91 : i32
    %cst_93 = arith.constant dense<0.000000e+00> : vector<8x1024xf32>
    %379 = tpu.matmul %377, %3, %cst_93 {dimension_numbers = #tpu.dot_dimension_numbers<[1], [0], [0], [1], [0, 0, 1, 1], [], []>} : vector<8x256xf32>, vector<256x1024xf32>, vector<8x1024xf32> -> vector<8x1024xf32>
    %380 = arith.index_cast %c7_i32_91 : i32 to index
    %c0_94 = arith.constant 0 : index
    %c0_95 = arith.constant 0 : index
    %381 = vector.load %arg1[%380, %c0_94, %c0_95] : memref<8x8x512xf32, #tpu.memory_space<vmem>>, vector<1x8x512xf32>
    %382 = vector.shape_cast %381 : vector<1x8x512xf32> to vector<8x512xf32>
    %383 = vector.extract_strided_slice %379 {offsets = [0, 0], sizes = [8, 512], strides = [1, 1]} : vector<8x1024xf32> to vector<8x512xf32>
    %384 = arith.addf %382, %383 : vector<8x512xf32>
    %385 = arith.index_cast %378 : i32 to index
    %c0_96 = arith.constant 0 : index
    %c0_97 = arith.constant 0 : index
    %386 = vector.load %arg2[%385, %c0_96, %c0_97] : memref<8x8x512xf32, #tpu.memory_space<vmem>>, vector<1x8x512xf32>
    %387 = vector.shape_cast %386 : vector<1x8x512xf32> to vector<8x512xf32>
    %388 = vector.extract_strided_slice %379 {offsets = [0, 512], sizes = [8, 512], strides = [1, 1]} : vector<8x1024xf32> to vector<8x512xf32>
    %389 = arith.addf %387, %388 : vector<8x512xf32>
    %390 = vector.extract_strided_slice %384 {offsets = [0, 0], sizes = [8, 384], strides = [1, 1]} : vector<8x512xf32> to vector<8x384xf32>
    %391 = arith.negf %390 : vector<8x384xf32>
    %392 = math.exp %391 : vector<8x384xf32>
    %cst_98 = arith.constant 1.000000e+00 : f32
    %393 = vector.broadcast %cst_98 : f32 to vector<8x384xf32>
    %394 = arith.addf %393, %392 : vector<8x384xf32>
    %395 = arith.divf %393, %394 : vector<8x384xf32>
    %396 = vector.extract_strided_slice %384 {offsets = [0, 384], sizes = [8, 128], strides = [1, 1]} : vector<8x512xf32> to vector<8x128xf32>
    %397 = math.tanh %396 : vector<8x128xf32>
    %398 = vector.extract_strided_slice %395 {offsets = [0, 128], sizes = [8, 128], strides = [1, 1]} : vector<8x384xf32> to vector<8x128xf32>
    %399 = arith.mulf %398, %349 : vector<8x128xf32>
    %400 = vector.extract_strided_slice %395 {offsets = [0, 0], sizes = [8, 128], strides = [1, 1]} : vector<8x384xf32> to vector<8x128xf32>
    %401 = arith.mulf %400, %397 : vector<8x128xf32>
    %402 = arith.addf %399, %401 : vector<8x128xf32>
    %403 = vector.extract_strided_slice %395 {offsets = [0, 256], sizes = [8, 128], strides = [1, 1]} : vector<8x384xf32> to vector<8x128xf32>
    %404 = math.tanh %402 : vector<8x128xf32>
    %405 = arith.mulf %403, %404 : vector<8x128xf32>
    %406 = vector.extract_strided_slice %389 {offsets = [0, 0], sizes = [8, 384], strides = [1, 1]} : vector<8x512xf32> to vector<8x384xf32>
    %407 = arith.negf %406 : vector<8x384xf32>
    %408 = math.exp %407 : vector<8x384xf32>
    %cst_99 = arith.constant 1.000000e+00 : f32
    %409 = vector.broadcast %cst_99 : f32 to vector<8x384xf32>
    %410 = arith.addf %409, %408 : vector<8x384xf32>
    %411 = arith.divf %409, %410 : vector<8x384xf32>
    %412 = vector.extract_strided_slice %389 {offsets = [0, 384], sizes = [8, 128], strides = [1, 1]} : vector<8x512xf32> to vector<8x128xf32>
    %413 = math.tanh %412 : vector<8x128xf32>
    %414 = vector.extract_strided_slice %411 {offsets = [0, 128], sizes = [8, 128], strides = [1, 1]} : vector<8x384xf32> to vector<8x128xf32>
    %415 = arith.mulf %414, %365 : vector<8x128xf32>
    %416 = vector.extract_strided_slice %411 {offsets = [0, 0], sizes = [8, 128], strides = [1, 1]} : vector<8x384xf32> to vector<8x128xf32>
    %417 = arith.mulf %416, %413 : vector<8x128xf32>
    %418 = arith.addf %415, %417 : vector<8x128xf32>
    %419 = vector.extract_strided_slice %411 {offsets = [0, 256], sizes = [8, 128], strides = [1, 1]} : vector<8x384xf32> to vector<8x128xf32>
    %420 = math.tanh %418 : vector<8x128xf32>
    %421 = arith.mulf %419, %420 : vector<8x128xf32>
    %422 = arith.index_cast %c7_i32_91 : i32 to index
    %c0_100 = arith.constant 0 : index
    %c0_101 = arith.constant 0 : index
    %423 = vector.load %arg4[%422, %c0_100, %c0_101] : memref<8x8x128xf32, #tpu.memory_space<vmem>>, vector<1x8x128xf32>
    %424 = vector.shape_cast %423 : vector<1x8x128xf32> to vector<8x128xf32>
    %425 = vector.shape_cast %405 : vector<8x128xf32> to vector<1x8x128xf32>
    tpu.vector_store %arg4[%422, %c0_100, %c0_101], %425 {strides = array<i32>} : memref<8x8x128xf32, #tpu.memory_space<vmem>>, vector<1x8x128xf32>,
    %426 = arith.index_cast %378 : i32 to index
    %c0_102 = arith.constant 0 : index
    %c0_103 = arith.constant 0 : index
    %427 = vector.load %arg5[%426, %c0_102, %c0_103] : memref<8x8x128xf32, #tpu.memory_space<vmem>>, vector<1x8x128xf32>
    %428 = vector.shape_cast %427 : vector<1x8x128xf32> to vector<8x128xf32>
    %429 = vector.shape_cast %421 : vector<8x128xf32> to vector<1x8x128xf32>
    tpu.vector_store %arg5[%426, %c0_102, %c0_103], %429 {strides = array<i32>} : memref<8x8x128xf32, #tpu.memory_space<vmem>>, vector<1x8x128xf32>,
    %430 = tpu.concatenate %405, %421 in 1 : vector<8x128xf32>, vector<8x128xf32> -> vector<8x256xf32>
    %c8_i32 = arith.constant 8 : i32
    %c0_104 = arith.constant 0 : index
    %c0_105 = arith.constant 0 : index
    %431 = vector.load %arg6[%c0_104, %c0_105] : memref<8x256xf32, #tpu.memory_space<vmem>>, vector<8x256xf32>
    tpu.vector_store %arg6[%c0_104, %c0_105], %430 {strides = array<i32>} : memref<8x256xf32, #tpu.memory_space<vmem>>, vector<8x256xf32>,
    %c0_106 = arith.constant 0 : index
    %c0_107 = arith.constant 0 : index
    %432 = vector.load %arg7[%c0_106, %c0_107] : memref<8x128xf32, #tpu.memory_space<vmem>>, vector<8x128xf32>
    tpu.vector_store %arg7[%c0_106, %c0_107], %402 {strides = array<i32>} : memref<8x128xf32, #tpu.memory_space<vmem>>, vector<8x128xf32>,
    %c0_108 = arith.constant 0 : index
    %c0_109 = arith.constant 0 : index
    %433 = vector.load %arg8[%c0_108, %c0_109] : memref<8x128xf32, #tpu.memory_space<vmem>>, vector<8x128xf32>
    tpu.vector_store %arg8[%c0_108, %c0_109], %418 {strides = array<i32>} : memref<8x128xf32, #tpu.memory_space<vmem>>, vector<8x128xf32>,
    return
  }
  func.func @transform_0(%arg0: i32) -> (i32, i32, i32) {
    %c0_i32 = arith.constant 0 : i32
    %c0_i32_0 = arith.constant 0 : i32
    %c0_i32_1 = arith.constant 0 : i32
    return %arg0, %c0_i32, %c0_i32_0 : i32, i32, i32
  }
  func.func @transform_1(%arg0: i32) -> (i32, i32, i32) {
    %c0_i32 = arith.constant 0 : i32
    %0 = arith.subi %c0_i32, %arg0 : i32
    %c0_i32_0 = arith.constant 0 : i32
    %c0_i32_1 = arith.constant 0 : i32
    %c0_i32_2 = arith.constant 0 : i32
    return %0, %c0_i32_0, %c0_i32_1 : i32, i32, i32
  }
  func.func @transform_2(%arg0: i32) -> (i32, i32) {
    %c0_i32 = arith.constant 0 : i32
    %c0_i32_0 = arith.constant 0 : i32
    %c0_i32_1 = arith.constant 0 : i32
    return %c0_i32, %c0_i32_0 : i32, i32
  }
  func.func @transform_3(%arg0: i32) -> (i32, i32, i32) {
    %c0_i32 = arith.constant 0 : i32
    %c0_i32_0 = arith.constant 0 : i32
    %c0_i32_1 = arith.constant 0 : i32
    return %arg0, %c0_i32, %c0_i32_0 : i32, i32, i32
  }
  func.func @transform_4(%arg0: i32) -> (i32, i32, i32) {
    %c0_i32 = arith.constant 0 : i32
    %0 = arith.subi %c0_i32, %arg0 : i32
    %c0_i32_0 = arith.constant 0 : i32
    %c0_i32_1 = arith.constant 0 : i32
    %c0_i32_2 = arith.constant 0 : i32
    return %0, %c0_i32_0, %c0_i32_1 : i32, i32, i32
  }
}

</mosaic_0001>

<bundles_post_ra>
// kernel: tpu_custom_call.1
= control target key start
LH: loop header
LB: loop body
LE: loop exit
PB: predicated region body
PF: predicated region fallthrough
CT: control target
= control target key end

     0   :  { %10 = vsyncpa [#allocation6], 0  ;;  %s9866_s0 = inlined_call_operand.hbm [shape: f32[8,8,512], index: 0, kind: input, shape index: {}]   ;;  %s9867_s1 = inlined_call_operand.hbm [shape: f32[8,8,512], index: 1, kind: input, shape index: {}]   ;;  %s9868_s2 = inlined_call_operand.hbm [shape: f32[256,1024], index: 2, kind: input, shape index: {}]   ;;  %s9869_s3 = inlined_call_operand.hbm [shape: f32[8,8,128], index: 3, kind: output, shape index: {0}]   ;;  %s9870_s4 = inlined_call_operand.hbm [shape: f32[8,8,128], index: 4, kind: output, shape index: {1}]  }
   0x1   :  { %11 = vsyncpa [#allocation9], 0 }
   0x2   :  { %12 = vsyncpa [#allocation7], 0 }
   0x3   :  { %13 = vsyncpa [#allocation13], 0  ;;  %s36_s17 = sshll.u32 %s9867_s1, 4  ;;  %s5430_s18 = smov [#allocation8]   ;;  %s37_s17 = int_to_ptr.hbm [resolvable:$true] %s36_s17 }
   0x4   :  { %s38_s19 = sshll.u32 %s5430_s18, 4  ;;  %s18_s22 = sshll.u32 %s9866_s0, 4  ;;  %s39_s19 = int_to_ptr.vmem [resolvable:$true] %s38_s19  ;;  %s19_s22 = int_to_ptr.hbm [resolvable:$true] %s18_s22 }
   0x5   :  { %s5431_s23 = smov 512   ;;  %s5432_s24 = smov 32  }
   0x6   :  { %44 = dma.hbm_to_vmem [thread:$0]  %s37_s17, 4096, %s39_s19, [#allocation9], %s5431_s23, %s5431_s23, %s5432_s24  }
   0x7   :  { %s5433_s25 = smov [#allocation5]   ;;  %s49_s29 = sshll.u32 %s9868_s2, 4  ;;  %s50_s29 = int_to_ptr.hbm [resolvable:$true] %s49_s29 }
   0x8   :  { %s20_s26 = sshll.u32 %s5433_s25, 4  ;;  %s5434_s1 = smov [#allocation10]   ;;  %s21_s26 = int_to_ptr.vmem [resolvable:$true] %s20_s26 }
   0x9   :  { %26 = dma.hbm_to_vmem [thread:$0]  %s19_s22, 4096, %s21_s26, [#allocation6], %s5431_s23, %s5431_s23, %s5432_s24  }
   0xa   :  { %s51_s30 = sshll.u32 %s5434_s1, 4  ;;  %s5435_s5 = smov 1024   ;;  %s52_s30 = int_to_ptr.vmem [resolvable:$true] %s51_s30 }
   0xb   :  { %s5436_s6 = smov 64  }
   0xc   :  { %57 = dma.hbm_to_vmem [thread:$0]  %s50_s29, 32768, %s52_s30, [#allocation9], %s5435_s5, %s5435_s5, %s5436_s6  }
   0xd   :  { %5422 = dma.done.wait [#allocation6], 4096  }
   0xe   :  { %5423 = vsyncadd [#allocation6], 4294963200 }
   0xf   :  { %5424 = dma.done.wait [#allocation9], 36864  }
  0x10   :  { %5425 = vsyncadd [#allocation9], 4294930432  ;;  %v202_v0 = vld [vmem:[#allocation10 + $0x3c0] sm:$0xff]  ;;  %v203_v2 = vld [vmem:[#allocation10 + $0x3c8] sm:$0xff]  ;;  %s5438_s0 = smov [#allocation11]   ;;  %s4092_s9 = sshll.u32 %s9869_s3, 4  ;;  %s4093_s9 = int_to_ptr.hbm [resolvable:$true] %s4092_s9 }
  0x11   :  { %v330_v1 = vld [vmem:[#allocation10 + $0x7c0] sm:$0xff]  ;;  %342 = vmatpush.msra.mxu0 %v202_v0  ;;  %v331_v3 = vld [vmem:[#allocation10 + $0x7c8] sm:$0xff]  ;;  %382 = vmatpush.msra.mxu2 %v203_v2  ;;  %v5598_v0 = vld [vmem:[#allocation10 + $0x3d0] sm:$0xff]  ;;  %s4090_s2 = sshll.u32 %s5438_s0, 4  ;;  %s5439_s10 = smov 128   ;;  %s4091_s2 = int_to_ptr.vmem [resolvable:$true] %s4090_s2 }
  0x12   :  { %362 = vmatpush.msra.mxu1 %v330_v1  ;;  %v194_v4 = vld [vmem:[#allocation10 + $0x380] sm:$0xff]  ;;  %402 = vmatpush.msra.mxu3 %v331_v3  ;;  %v195_v6 = vld [vmem:[#allocation10 + $0x388] sm:$0xff]  ;;  %v5600_v1 = vld [vmem:[#allocation10 + $0x7d0] sm:$0xff]  ;;  %s5440_s11 = smov 8   ;;  %s5441_s3 = smov [#allocation12]  }
  0x13   :  { %v322_v5 = vld [vmem:[#allocation10 + $0x780] sm:$0xff]  ;;  %v323_v7 = vld [vmem:[#allocation10 + $0x788] sm:$0xff]  ;;  %343 = vmatpush.msra.mxu0 %v194_v4  ;;  %383 = vmatpush.msra.mxu2 %v195_v6  ;;  %v5604_v2 = vld [vmem:[#allocation10 + $0x3d8] sm:$0xff]  ;;  %s4107_s12 = sshll.u32 %s5441_s3, 4  ;;  %s4109_s15 = sshll.u32 %s9870_s4, 4  ;;  %s4108_s12 = int_to_ptr.vmem [resolvable:$true] %s4107_s12  ;;  %s4110_s15 = int_to_ptr.hbm [resolvable:$true] %s4109_s15 }
  0x14   :  { %v186_v8 = vld [vmem:[#allocation10 + $0x340] sm:$0xff]  ;;  %363 = vmatpush.msra.mxu1 %v322_v5  ;;  %v187_v10 = vld [vmem:[#allocation10 + $0x348] sm:$0xff]  ;;  %403 = vmatpush.msra.mxu3 %v323_v7  ;;  %v5606_v3 = vld [vmem:[#allocation10 + $0x7d8] sm:$0xff] }
  0x15   :  { %v314_v9 = vld [vmem:[#allocation10 + $0x740] sm:$0xff]  ;;  %v315_v11 = vld [vmem:[#allocation10 + $0x748] sm:$0xff]  ;;  %344 = vmatpush.msra.mxu0 %v186_v8  ;;  %384 = vmatpush.msra.mxu2 %v187_v10  ;;  %v5610_v4 = vld [vmem:[#allocation10 + $0x390] sm:$0xff] }
  0x16   :  { %v178_v12 = vld [vmem:[#allocation10 + $0x300] sm:$0xff]  ;;  %364 = vmatpush.msra.mxu1 %v314_v9  ;;  %v179_v14 = vld [vmem:[#allocation10 + $0x308] sm:$0xff]  ;;  %404 = vmatpush.msra.mxu3 %v315_v11  ;;  %v5612_v5 = vld [vmem:[#allocation10 + $0x790] sm:$0xff] }
  0x17   :  { %v306_v13 = vld [vmem:[#allocation10 + $0x700] sm:$0xff]  ;;  %v307_v15 = vld [vmem:[#allocation10 + $0x708] sm:$0xff]  ;;  %345 = vmatpush.msra.mxu0 %v178_v12  ;;  %385 = vmatpush.msra.mxu2 %v179_v14  ;;  %v5616_v6 = vld [vmem:[#allocation10 + $0x398] sm:$0xff] }
  0x18   :  { %v170_v16 = vld [vmem:[#allocation10 + $0x2c0] sm:$0xff]  ;;  %365 = vmatpush.msra.mxu1 %v306_v13  ;;  %v171_v18 = vld [vmem:[#allocation10 + $0x2c8] sm:$0xff]  ;;  %405 = vmatpush.msra.mxu3 %v307_v15  ;;  %v5618_v7 = vld [vmem:[#allocation10 + $0x798] sm:$0xff] }
  0x19   :  { %v298_v17 = vld [vmem:[#allocation10 + $0x6c0] sm:$0xff]  ;;  %v299_v19 = vld [vmem:[#allocation10 + $0x6c8] sm:$0xff]  ;;  %346 = vmatpush.msra.mxu0 %v170_v16  ;;  %386 = vmatpush.msra.mxu2 %v171_v18  ;;  %10551 = vst [vmem:[#allocation18_spill] sm:$0xff] %v5618_v7  ;;  %v5622_v8 = vld [vmem:[#allocation10 + $0x350] sm:$0xff] }
  0x1a   :  { %v162_v20 = vld [vmem:[#allocation10 + $0x280] sm:$0xff]  ;;  %366 = vmatpush.msra.mxu1 %v298_v17  ;;  %v5476_v22 = vld [vmem:[#allocation10 + $0x288] sm:$0xff]  ;;  %406 = vmatpush.msra.mxu3 %v299_v19  ;;  %v5624_v9 = vld [vmem:[#allocation10 + $0x750] sm:$0xff] }
  0x1b   :  { %v290_v21 = vld [vmem:[#allocation10 + $0x680] sm:$0xff]  ;;  %v5478_v23 = vld [vmem:[#allocation10 + $0x688] sm:$0xff]  ;;  %347 = vmatpush.msra.mxu0 %v162_v20  ;;  %387 = vmatpush.msra.mxu2 %v5476_v22  ;;  %10552 = vst [vmem:[#allocation19_spill] sm:$0xff] %v5624_v9  ;;  %v5628_v10 = vld [vmem:[#allocation10 + $0x358] sm:$0xff] }
  0x1c   :  { %v5480_v24 = vld [vmem:[#allocation10 + $0x240] sm:$0xff]  ;;  %367 = vmatpush.msra.mxu1 %v290_v21  ;;  %v5484_v26 = vld [vmem:[#allocation10 + $0x248] sm:$0xff]  ;;  %407 = vmatpush.msra.mxu3 %v5478_v23  ;;  %v5630_v11 = vld [vmem:[#allocation10 + $0x758] sm:$0xff] }
  0x1d   :  { %v5482_v25 = vld [vmem:[#allocation10 + $0x640] sm:$0xff]  ;;  %v5486_v27 = vld [vmem:[#allocation10 + $0x648] sm:$0xff]  ;;  %348 = vmatpush.msra.mxu0 %v5480_v24  ;;  %388 = vmatpush.msra.mxu2 %v5484_v26  ;;  %10553 = vst [vmem:[#allocation20_spill] sm:$0xff] %v5630_v11  ;;  %v5634_v12 = vld [vmem:[#allocation10 + $0x310] sm:$0xff] }
  0x1e   :  { %v5490_v28 = vld [vmem:[#allocation10 + $0x200] sm:$0xff]  ;;  %368 = vmatpush.msra.mxu1 %v5482_v25  ;;  %v5496_v30 = vld [vmem:[#allocation10 + $0x208] sm:$0xff]  ;;  %408 = vmatpush.msra.mxu3 %v5486_v27  ;;  %10554 = vst [vmem:[#allocation21_spill] sm:$0xff] %v5634_v12  ;;  %v5636_v13 = vld [vmem:[#allocation10 + $0x710] sm:$0xff] }
  0x1f   :  { %v5492_v29 = vld [vmem:[#allocation10 + $0x600] sm:$0xff]  ;;  %v5498_v31 = vld [vmem:[#allocation10 + $0x608] sm:$0xff]  ;;  %349 = vmatpush.msra.mxu0 %v5490_v28  ;;  %389 = vmatpush.msra.mxu2 %v5496_v30  ;;  %10555 = vst [vmem:[#allocation22_spill] sm:$0xff] %v5636_v13  ;;  %v5640_v14 = vld [vmem:[#allocation10 + $0x318] sm:$0xff] }
  0x20   :  { %v5502_v32 = vld [vmem:[#allocation10 + $0x1c0] sm:$0xff]  ;;  %369 = vmatpush.msra.mxu1 %v5492_v29  ;;  %v5508_v34 = vld [vmem:[#allocation10 + $0x1c8] sm:$0xff]  ;;  %409 = vmatpush.msra.mxu3 %v5498_v31  ;;  %10556 = vst [vmem:[#allocation23_spill] sm:$0xff] %v5640_v14  ;;  %v5642_v15 = vld [vmem:[#allocation10 + $0x718] sm:$0xff] }
  0x21   :  { %v5504_v33 = vld [vmem:[#allocation10 + $0x5c0] sm:$0xff]  ;;  %v5510_v35 = vld [vmem:[#allocation10 + $0x5c8] sm:$0xff]  ;;  %350 = vmatpush.msra.mxu0 %v5502_v32  ;;  %390 = vmatpush.msra.mxu2 %v5508_v34  ;;  %10557 = vst [vmem:[#allocation24_spill] sm:$0xff] %v5642_v15  ;;  %v5646_v16 = vld [vmem:[#allocation10 + $0x2d0] sm:$0xff] }
  0x22   :  { %v5514_v36 = vld [vmem:[#allocation10 + $0x180] sm:$0xff]  ;;  %370 = vmatpush.msra.mxu1 %v5504_v33  ;;  %v5520_v38 = vld [vmem:[#allocation10 + $0x188] sm:$0xff]  ;;  %410 = vmatpush.msra.mxu3 %v5510_v35  ;;  %10558 = vst [vmem:[#allocation25_spill] sm:$0xff] %v5646_v16  ;;  %v5648_v17 = vld [vmem:[#allocation10 + $0x6d0] sm:$0xff] }
  0x23   :  { %v5516_v37 = vld [vmem:[#allocation10 + $0x580] sm:$0xff]  ;;  %v5522_v39 = vld [vmem:[#allocation10 + $0x588] sm:$0xff]  ;;  %351 = vmatpush.msra.mxu0 %v5514_v36  ;;  %391 = vmatpush.msra.mxu2 %v5520_v38  ;;  %10559 = vst [vmem:[#allocation26_spill] sm:$0xff] %v5648_v17  ;;  %v5652_v18 = vld [vmem:[#allocation10 + $0x2d8] sm:$0xff] }
  0x24   :  { %v5526_v40 = vld [vmem:[#allocation10 + $0x140] sm:$0xff]  ;;  %371 = vmatpush.msra.mxu1 %v5516_v37  ;;  %v5532_v42 = vld [vmem:[#allocation10 + $0x148] sm:$0xff]  ;;  %411 = vmatpush.msra.mxu3 %v5522_v39  ;;  %10560 = vst [vmem:[#allocation27_spill] sm:$0xff] %v5652_v18  ;;  %v5654_v19 = vld [vmem:[#allocation10 + $0x6d8] sm:$0xff] }
  0x25   :  { %v5528_v41 = vld [vmem:[#allocation10 + $0x540] sm:$0xff]  ;;  %v5534_v43 = vld [vmem:[#allocation10 + $0x548] sm:$0xff]  ;;  %352 = vmatpush.msra.mxu0 %v5526_v40  ;;  %392 = vmatpush.msra.mxu2 %v5532_v42  ;;  %10561 = vst [vmem:[#allocation28_spill] sm:$0xff] %v5654_v19  ;;  %v5658_v20 = vld [vmem:[#allocation10 + $0x290] sm:$0xff] }
  0x26   :  { %v5538_v44 = vld [vmem:[#allocation10 + $0x100] sm:$0xff]  ;;  %372 = vmatpush.msra.mxu1 %v5528_v41  ;;  %v5544_v46 = vld [vmem:[#allocation10 + $0x108] sm:$0xff]  ;;  %412 = vmatpush.msra.mxu3 %v5534_v43  ;;  %10562 = vst [vmem:[#allocation29_spill] sm:$0xff] %v5658_v20  ;;  %v5660_v21 = vld [vmem:[#allocation10 + $0x690] sm:$0xff] }
  0x27   :  { %v5540_v45 = vld [vmem:[#allocation10 + $0x500] sm:$0xff]  ;;  %v5546_v47 = vld [vmem:[#allocation10 + $0x508] sm:$0xff]  ;;  %353 = vmatpush.msra.mxu0 %v5538_v44  ;;  %393 = vmatpush.msra.mxu2 %v5544_v46  ;;  %10563 = vst [vmem:[#allocation30_spill] sm:$0xff] %v5660_v21 }
  0x28   :  { %v5550_v48 = vld [vmem:[#allocation10 + $0xc0] sm:$0xff]  ;;  %373 = vmatpush.msra.mxu1 %v5540_v45  ;;  %v5556_v50 = vld [vmem:[#allocation10 + $0xc8] sm:$0xff]  ;;  %413 = vmatpush.msra.mxu3 %v5546_v47 }
  0x29   :  { %v5552_v49 = vld [vmem:[#allocation10 + $0x4c0] sm:$0xff]  ;;  %v5558_v51 = vld [vmem:[#allocation10 + $0x4c8] sm:$0xff]  ;;  %354 = vmatpush.msra.mxu0 %v5550_v48  ;;  %394 = vmatpush.msra.mxu2 %v5556_v50 }
  0x2a   :  { %v5562_v52 = vld [vmem:[#allocation10 + $0x80] sm:$0xff]  ;;  %374 = vmatpush.msra.mxu1 %v5552_v49  ;;  %v5568_v54 = vld [vmem:[#allocation10 + $0x88] sm:$0xff]  ;;  %414 = vmatpush.msra.mxu3 %v5558_v51 }
  0x2b   :  { %v5564_v53 = vld [vmem:[#allocation10 + $0x480] sm:$0xff]  ;;  %v5570_v55 = vld [vmem:[#allocation10 + $0x488] sm:$0xff]  ;;  %355 = vmatpush.msra.mxu0 %v5562_v52  ;;  %395 = vmatpush.msra.mxu2 %v5568_v54 }
  0x2c   :  { %v5574_v56 = vld [vmem:[#allocation10 + $0x40] sm:$0xff]  ;;  %375 = vmatpush.msra.mxu1 %v5564_v53  ;;  %v5580_v58 = vld [vmem:[#allocation10 + $0x48] sm:$0xff]  ;;  %415 = vmatpush.msra.mxu3 %v5570_v55 }
  0x2d   :  { %v5576_v57 = vld [vmem:[#allocation10 + $0x440] sm:$0xff]  ;;  %v5582_v59 = vld [vmem:[#allocation10 + $0x448] sm:$0xff]  ;;  %356 = vmatpush.msra.mxu0 %v5574_v56  ;;  %396 = vmatpush.msra.mxu2 %v5580_v58 }
  0x2e   :  { %v5586_v60 = vld [vmem:[#allocation10] sm:$0xff]  ;;  %376 = vmatpush.msra.mxu1 %v5576_v57  ;;  %v5592_v62 = vld [vmem:[#allocation10 + $0x8] sm:$0xff]  ;;  %416 = vmatpush.msra.mxu3 %v5582_v59 }
  0x2f   :  { %v5588_v61 = vld [vmem:[#allocation10 + $0x400] sm:$0xff]  ;;  %v5594_v63 = vld [vmem:[#allocation10 + $0x408] sm:$0xff]  ;;  %357 = vmatpush.msra.mxu0 %v5586_v60  ;;  %397 = vmatpush.msra.mxu2 %v5592_v62 }
  0x30   :  { %377 = vmatpush.msra.mxu1 %v5588_v61  ;;  %417 = vmatpush.msra.mxu3 %v5594_v63 }
  0x31   :  { %422 = vmatpush.msrb.mxu0 %v5598_v0  ;;  %462 = vmatpush.msrb.mxu2 %v5604_v2 }
  0x32   :  { %442 = vmatpush.msrb.mxu1 %v5600_v1  ;;  %482 = vmatpush.msrb.mxu3 %v5606_v3 }
  0x33   :  { %423 = vmatpush.msrb.mxu0 %v5610_v4  ;;  %463 = vmatpush.msrb.mxu2 %v5616_v6 }
  0x34   :  { %443 = vmatpush.msrb.mxu1 %v5612_v5  ;;  %483 = vmatpush.msrb.mxu3 %v5618_v7  ;;  %v311_v7 = vld [vmem:[#allocation10 + $0x728] sm:$0xff] }
  0x35   :  { %424 = vmatpush.msrb.mxu0 %v5622_v8  ;;  %464 = vmatpush.msrb.mxu2 %v5628_v10 }
  0x36   :  { %444 = vmatpush.msrb.mxu1 %v5624_v9  ;;  %484 = vmatpush.msrb.mxu3 %v5630_v11  ;;  %v5664_v11 = vld [vmem:[#allocation10 + $0x298] sm:$0xff] }
  0x37   :  { %425 = vmatpush.msrb.mxu0 %v5634_v12  ;;  %465 = vmatpush.msrb.mxu2 %v5640_v14  ;;  %10564 = vst [vmem:[#allocation31_spill] sm:$0xff] %v5664_v11  ;;  %v5666_v9 = vld [vmem:[#allocation10 + $0x698] sm:$0xff]  ;;  %v9884_v14 = vmov 0.0  }
  0x38   :  { %445 = vmatpush.msrb.mxu1 %v5636_v13  ;;  %485 = vmatpush.msrb.mxu3 %v5642_v15  ;;  %10565 = vst [vmem:[#allocation32_spill] sm:$0xff] %v5666_v9  ;;  %v5672_v15 = vld [vmem:[#allocation10 + $0x250] sm:$0xff]  ;;  %v5740_v12 = vld [vmem:[#allocation10 + $0x118] sm:$0xff] }
  0x39   :  { %426 = vmatpush.msrb.mxu0 %v5646_v16  ;;  %466 = vmatpush.msrb.mxu2 %v5652_v18  ;;  %10566 = vst [vmem:[#allocation33_spill] sm:$0xff] %v5672_v15  ;;  %v5674_v13 = vld [vmem:[#allocation10 + $0x650] sm:$0xff]  ;;  %v5680_v16 = vld [vmem:[#allocation10 + $0x658] sm:$0xff] }
  0x3a   :  { %446 = vmatpush.msrb.mxu1 %v5648_v17  ;;  %486 = vmatpush.msrb.mxu3 %v5654_v19  ;;  %10567 = vst [vmem:[#allocation34_spill] sm:$0xff] %v5674_v13  ;;  %v5678_v17 = vld [vmem:[#allocation10 + $0x258] sm:$0xff]  ;;  %v5684_v19 = vld [vmem:[#allocation10 + $0x210] sm:$0xff] }
  0x3b   :  { %427 = vmatpush.msrb.mxu0 %v5658_v20  ;;  %467 = vmatpush.msrb.mxu2 %v5664_v11  ;;  %10568 = vst [vmem:[#allocation35_spill] sm:$0xff] %v5678_v17  ;;  %v5690_v11 = vld [vmem:[#allocation10 + $0x218] sm:$0xff]  ;;  %v5696_v20 = vld [vmem:[#allocation10 + $0x1d0] sm:$0xff] }
  0x3c   :  { %447 = vmatpush.msrb.mxu1 %v5660_v21  ;;  %487 = vmatpush.msrb.mxu3 %v5666_v9  ;;  %10569 = vst [vmem:[#allocation36_spill] sm:$0xff] %v5680_v16  ;;  %v5686_v21 = vld [vmem:[#allocation10 + $0x610] sm:$0xff]  ;;  %v5692_v9 = vld [vmem:[#allocation10 + $0x618] sm:$0xff] }
  0x3d   :  { %398 = vmatmul.f32.vlgmr.msra.gmra.mxu2 %v9884_v14  ;;  %418 = vmatmul.f32.vlgmr.msra.gmra.mxu3 %v9884_v14  ;;  %10570 = vst [vmem:[#allocation37_spill] sm:$0xff] %v5684_v19  ;;  %v5698_v18 = vld [vmem:[#allocation10 + $0x5d0] sm:$0xff]  ;;  %v5702_v14 = vld [vmem:[#allocation10 + $0x1d8] sm:$0xff] }
  0x3e   :  { %10571 = vst [vmem:[#allocation38_spill] sm:$0xff] %v5686_v21  ;;  %428 = vmatpush.msrb.mxu0 %v5672_v15  ;;  %448 = vmatpush.msrb.mxu1 %v5674_v13  ;;  %v5704_v15 = vld [vmem:[#allocation10 + $0x5d8] sm:$0xff]  ;;  %v5712_v13 = vld [vmem:[#allocation10 + $0x590] sm:$0xff] }
  0x3f   :  { %10572 = vst [vmem:[#allocation39_spill] sm:$0xff] %v5690_v11  ;;  %468 = vmatpush.msrb.mxu2 %v5678_v17  ;;  %488 = vmatpush.msrb.mxu3 %v5680_v16  ;;  %v5710_v16 = vld [vmem:[#allocation10 + $0x190] sm:$0xff]  ;;  %v10582_v17 = vmov 0.0  }
  0x40   :  { %10573 = vst [vmem:[#allocation40_spill] sm:$0xff] %v5692_v9  ;;  %429 = vmatpush.msrb.mxu0 %v5684_v19  ;;  %449 = vmatpush.msrb.mxu1 %v5686_v21  ;;  %v5716_v21 = vld [vmem:[#allocation10 + $0x198] sm:$0xff] }
  0x41   :  { %10574 = vst [vmem:[#allocation41_spill] sm:$0xff] %v5696_v20  ;;  %469 = vmatpush.msrb.mxu2 %v5690_v11  ;;  %489 = vmatpush.msrb.mxu3 %v5692_v9  ;;  %v5718_v19 = vld [vmem:[#allocation10 + $0x598] sm:$0xff]  ;;  %v5722_v9 = vld [vmem:[#allocation10 + $0x150] sm:$0xff] }
  0x42   :  { %10575 = vst [vmem:[#allocation42_spill] sm:$0xff] %v5698_v18  ;;  %430 = vmatpush.msrb.mxu0 %v5696_v20  ;;  %450 = vmatpush.msrb.mxu1 %v5698_v18  ;;  %v5724_v20 = vld [vmem:[#allocation10 + $0x550] sm:$0xff]  ;;  %v5728_v18 = vld [vmem:[#allocation10 + $0x158] sm:$0xff] }
  0x43   :  { %10576 = vst [vmem:[#allocation43_spill] sm:$0xff] %v5702_v14  ;;  %470 = vmatpush.msrb.mxu2 %v5702_v14  ;;  %490 = vmatpush.msrb.mxu3 %v5704_v15  ;;  %v5730_v14 = vld [vmem:[#allocation10 + $0x558] sm:$0xff]  ;;  %v5736_v11 = vld [vmem:[#allocation10 + $0x510] sm:$0xff] }
  0x44   :  { %10577 = vst [vmem:[#allocation44_spill] sm:$0xff] %v5704_v15  ;;  %358 = vmatmul.f32.vlgmr.msra.gmra.mxu0 %v10582_v17  ;;  %378 = vmatmul.f32.vlgmr.msra.gmra.mxu1 %v10582_v17  ;;  %v5734_v15 = vld [vmem:[#allocation10 + $0x110] sm:$0xff] }
  0x45   :  { %10578 = vst [vmem:[#allocation45_spill] sm:$0xff] %v5710_v16  ;;  %431 = vmatpush.msrb.mxu0 %v5710_v16  ;;  %451 = vmatpush.msrb.mxu1 %v5712_v13  ;;  %v5742_v16 = vld [vmem:[#allocation10 + $0x518] sm:$0xff] }
  0x46   :  { %10579 = vst [vmem:[#allocation46_spill] sm:$0xff] %v5712_v13  ;;  %471 = vmatpush.msrb.mxu2 %v5716_v21  ;;  %491 = vmatpush.msrb.mxu3 %v5718_v19  ;;  %v5746_v13 = vld [vmem:[#allocation10 + $0xd0] sm:$0xff] }
  0x47   :  { %10580 = vst [vmem:[#allocation47_spill] sm:$0xff] %v5716_v21  ;;  %432 = vmatpush.msrb.mxu0 %v5722_v9  ;;  %452 = vmatpush.msrb.mxu1 %v5724_v20  ;;  %v5748_v21 = vld [vmem:[#allocation10 + $0x4d0] sm:$0xff] }
  0x48   :  { %10581 = vst [vmem:[#allocation48_spill] sm:$0xff] %v5718_v19  ;;  %472 = vmatpush.msrb.mxu2 %v5728_v18  ;;  %492 = vmatpush.msrb.mxu3 %v5730_v14  ;;  %v5752_v19 = vld [vmem:[#allocation10 + $0xd8] sm:$0xff] }
  0x49   :  { %10583 = vst [vmem:[#allocation49_spill] sm:$0xff] %v5722_v9  ;;  %433 = vmatpush.msrb.mxu0 %v5734_v15  ;;  %453 = vmatpush.msrb.mxu1 %v5736_v11  ;;  %v5754_v9 = vld [vmem:[#allocation10 + $0x4d8] sm:$0xff] }
  0x4a   :  { %10584 = vst [vmem:[#allocation50_spill] sm:$0xff] %v5724_v20  ;;  %473 = vmatpush.msrb.mxu2 %v5740_v12  ;;  %493 = vmatpush.msrb.mxu3 %v5742_v16  ;;  %v5758_v20 = vld [vmem:[#allocation10 + $0x90] sm:$0xff] }
  0x4b   :  { %10585 = vst [vmem:[#allocation51_spill] sm:$0xff] %v5728_v18  ;;  %v5760_v18 = vld [vmem:[#allocation10 + $0x490] sm:$0xff]  ;;  %434 = vmatpush.msrb.mxu0 %v5746_v13  ;;  %454 = vmatpush.msrb.mxu1 %v5748_v21 }
  0x4c   :  { %10586 = vst [vmem:[#allocation52_spill] sm:$0xff] %v5730_v14  ;;  %v5764_v14 = vld [vmem:[#allocation10 + $0x98] sm:$0xff]  ;;  %474 = vmatpush.msrb.mxu2 %v5752_v19  ;;  %494 = vmatpush.msrb.mxu3 %v5754_v9 }
  0x4d   :  { %10587 = vst [vmem:[#allocation53_spill] sm:$0xff] %v5734_v15  ;;  %v5766_v15 = vld [vmem:[#allocation10 + $0x498] sm:$0xff]  ;;  %435 = vmatpush.msrb.mxu0 %v5758_v20  ;;  %455 = vmatpush.msrb.mxu1 %v5760_v18 }
  0x4e   :  { %10588 = vst [vmem:[#allocation54_spill] sm:$0xff] %v5736_v11  ;;  %v5770_v11 = vld [vmem:[#allocation10 + $0x50] sm:$0xff]  ;;  %475 = vmatpush.msrb.mxu2 %v5764_v14  ;;  %495 = vmatpush.msrb.mxu3 %v5766_v15 }
  0x4f   :  { %10589 = vst [vmem:[#allocation55_spill] sm:$0xff] %v5740_v12  ;;  %v5772_v12 = vld [vmem:[#allocation10 + $0x450] sm:$0xff]  ;;  %436 = vmatpush.msrb.mxu0 %v5770_v11 }
  0x50   :  { %10590 = vst [vmem:[#allocation56_spill] sm:$0xff] %v5742_v16  ;;  %v5776_v16 = vld [vmem:[#allocation10 + $0x58] sm:$0xff]  ;;  %456 = vmatpush.msrb.mxu1 %v5772_v12 }
  0x51   :  { %10591 = vst [vmem:[#allocation57_spill] sm:$0xff] %v5746_v13  ;;  %v5778_v13 = vld [vmem:[#allocation10 + $0x458] sm:$0xff]  ;;  %476 = vmatpush.msrb.mxu2 %v5776_v16 }
  0x52   :  { %10592 = vst [vmem:[#allocation58_spill] sm:$0xff] %v5748_v21  ;;  %v5782_v21 = vld [vmem:[#allocation10 + $0x10] sm:$0xff]  ;;  %496 = vmatpush.msrb.mxu3 %v5778_v13 }
  0x53   :  { %10593 = vst [vmem:[#allocation59_spill] sm:$0xff] %v5752_v19  ;;  %v5784_v19 = vld [vmem:[#allocation10 + $0x410] sm:$0xff]  ;;  %437 = vmatpush.msrb.mxu0 %v5782_v21 }
  0x54   :  { %10594 = vst [vmem:[#allocation60_spill] sm:$0xff] %v5754_v9  ;;  %v5788_v9 = vld [vmem:[#allocation10 + $0x18] sm:$0xff]  ;;  %457 = vmatpush.msrb.mxu1 %v5784_v19  ;;  %438 = vmatmul.f32.vlgmr.msrb.gmra.mxu0 %v10582_v17 }
  0x55   :  { %10595 = vst [vmem:[#allocation61_spill] sm:$0xff] %v5758_v20  ;;  %v5790_v20 = vld [vmem:[#allocation10 + $0x418] sm:$0xff]  ;;  %477 = vmatpush.msrb.mxu2 %v5788_v9  ;;  %458 = vmatmul.f32.vlgmr.msrb.gmra.mxu1 %v10582_v17 }
  0x56   :  { %10596 = vst [vmem:[#allocation62_spill] sm:$0xff] %v5760_v18  ;;  %v334_v18 = vld [vmem:[#allocation10 + $0x7e0] sm:$0xff]  ;;  %497 = vmatpush.msrb.mxu3 %v5790_v20  ;;  %478 = vmatmul.f32.vlgmr.msrb.gmra.mxu2 %v10582_v17 }
  0x57   :  { %10597 = vst [vmem:[#allocation63_spill] sm:$0xff] %v5764_v14  ;;  %522 = vmatpush.msra.mxu1 %v334_v18  ;;  %498 = vmatmul.f32.vlgmr.msrb.gmra.mxu3 %v10582_v17  ;;  %v5815_v18 = vld [vmem:[#allocation10 + $0x368] sm:$0xff] }
  0x58   :  { %10598 = vst [vmem:[#allocation64_spill] sm:$0xff] %v5766_v15  ;;  %v5796_v15 = vld [vmem:[#allocation10 + $0x3e0] sm:$0xff]  ;;  %v5821_v14 = vld [vmem:[#allocation10 + $0x328] sm:$0xff] }
  0x59   :  { %10599 = vst [vmem:[#allocation65_spill] sm:$0xff] %v5770_v11  ;;  %v335_v11 = vld [vmem:[#allocation10 + $0x7e8] sm:$0xff]  ;;  %502 = vmatpush.msra.mxu0 %v5796_v15 }
  0x5a   :  { %10600 = vst [vmem:[#allocation66_spill] sm:$0xff] %v5772_v12  ;;  %v5800_v12 = vld [vmem:[#allocation10 + $0x3e8] sm:$0xff]  ;;  %562 = vmatpush.msra.mxu3 %v335_v11  ;;  %v5818_v11 = vld [vmem:[#allocation10 + $0x320] sm:$0xff] }
  0x5b   :  { %10601 = vst [vmem:[#allocation67_spill] sm:$0xff] %v5776_v16  ;;  %542 = vmatpush.msra.mxu2 %v5800_v12  ;;  %v318_v16 = vld [vmem:[#allocation10 + $0x760] sm:$0xff] }
  0x5c   :  { %10602 = vst [vmem:[#allocation68_spill] sm:$0xff] %v5778_v13  ;;  %v5805_v13 = vld [vmem:[#allocation10 + $0x3a0] sm:$0xff] }
  0x5d   :  { %10603 = vst [vmem:[#allocation69_spill] sm:$0xff] %v5782_v21  ;;  %v5808_v21 = vld [vmem:[#allocation10 + $0x3a8] sm:$0xff]  ;;  %503 = vmatpush.msra.mxu0 %v5805_v13 }
  0x5e   :  { %10604 = vst [vmem:[#allocation70_spill] sm:$0xff] %v5784_v19  ;;  %v326_v19 = vld [vmem:[#allocation10 + $0x7a0] sm:$0xff]  ;;  %543 = vmatpush.msra.mxu2 %v5808_v21 }
  0x5f   :  { %10605 = vst [vmem:[#allocation71_spill] sm:$0xff] %v5788_v9  ;;  %v327_v9 = vld [vmem:[#allocation10 + $0x7a8] sm:$0xff]  ;;  %523 = vmatpush.msra.mxu1 %v326_v19  ;;  %v302_v19 = vld [vmem:[#allocation10 + $0x6e0] sm:$0xff] }
  0x60   :  { %10606 = vst [vmem:[#allocation72_spill] sm:$0xff] %v5790_v20  ;;  %v5812_v20 = vld [vmem:[#allocation10 + $0x360] sm:$0xff]  ;;  %563 = vmatpush.msra.mxu3 %v327_v9  ;;  %544 = vmatpush.msra.mxu2 %v5815_v18  ;;  %v303_v9 = vld [vmem:[#allocation10 + $0x6e8] sm:$0xff] }
  0x61   :  { %10607 = vst [vmem:[#allocation73_spill] sm:$0xff] %v5796_v15  ;;  %v319_v15 = vld [vmem:[#allocation10 + $0x768] sm:$0xff]  ;;  %504 = vmatpush.msra.mxu0 %v5812_v20  ;;  %524 = vmatpush.msra.mxu1 %v318_v16  ;;  %v294_v16 = vld [vmem:[#allocation10 + $0x6a0] sm:$0xff] }
  0x62   :  { %10608 = vst [vmem:[#allocation74_spill] sm:$0xff] %v5800_v12  ;;  %v310_v12 = vld [vmem:[#allocation10 + $0x720] sm:$0xff]  ;;  %564 = vmatpush.msra.mxu3 %v319_v15  ;;  %545 = vmatpush.msra.mxu2 %v5821_v14  ;;  %v295_v15 = vld [vmem:[#allocation10 + $0x6a8] sm:$0xff] }
  0x63   :  { %10609 = vst [vmem:[#allocation75_spill] sm:$0xff] %v5805_v13  ;;  %v5824_v13 = vld [vmem:[#allocation10 + $0x2e0] sm:$0xff]  ;;  %505 = vmatpush.msra.mxu0 %v5818_v11  ;;  %525 = vmatpush.msra.mxu1 %v310_v12 }
  0x64   :  { %10610 = vst [vmem:[#allocation76_spill] sm:$0xff] %v5808_v21  ;;  %v5827_v21 = vld [vmem:[#allocation10 + $0x2e8] sm:$0xff]  ;;  %565 = vmatpush.msra.mxu3 %v311_v7  ;;  %v286_v12 = vld [vmem:[#allocation10 + $0x660] sm:$0xff] }
  0x65   :  { %10611 = vst [vmem:[#allocation77_spill] sm:$0xff] %v5812_v20  ;;  %v5830_v20 = vld [vmem:[#allocation10 + $0x2a0] sm:$0xff]  ;;  %506 = vmatpush.msra.mxu0 %v5824_v13  ;;  %526 = vmatpush.msra.mxu1 %v302_v19  ;;  %v287_v7 = vld [vmem:[#allocation10 + $0x668] sm:$0xff] }
  0x66   :  { %10612 = vst [vmem:[#allocation78_spill] sm:$0xff] %v5815_v18  ;;  %v5833_v18 = vld [vmem:[#allocation10 + $0x2a8] sm:$0xff]  ;;  %546 = vmatpush.msra.mxu2 %v5827_v21  ;;  %566 = vmatpush.msra.mxu3 %v303_v9  ;;  %v278_v19 = vld [vmem:[#allocation10 + $0x620] sm:$0xff] }
  0x67   :  { %10613 = vst [vmem:[#allocation79_spill] sm:$0xff] %v5818_v11  ;;  %v5836_v11 = vld [vmem:[#allocation10 + $0x260] sm:$0xff]  ;;  %507 = vmatpush.msra.mxu0 %v5830_v20  ;;  %527 = vmatpush.msra.mxu1 %v294_v16  ;;  %v279_v9 = vld [vmem:[#allocation10 + $0x628] sm:$0xff] }
  0x68   :  { %10614 = vst [vmem:[#allocation80_spill] sm:$0xff] %v5821_v14  ;;  %v5839_v14 = vld [vmem:[#allocation10 + $0x268] sm:$0xff]  ;;  %547 = vmatpush.msra.mxu2 %v5833_v18  ;;  %567 = vmatpush.msra.mxu3 %v295_v15  ;;  %v270_v16 = vld [vmem:[#allocation10 + $0x5e0] sm:$0xff] }
  0x69   :  { %10615 = vst [vmem:[#allocation81_spill] sm:$0xff] %v5824_v13  ;;  %v5842_v13 = vld [vmem:[#allocation10 + $0x220] sm:$0xff]  ;;  %508 = vmatpush.msra.mxu0 %v5836_v11  ;;  %528 = vmatpush.msra.mxu1 %v286_v12  ;;  %v271_v15 = vld [vmem:[#allocation10 + $0x5e8] sm:$0xff] }
  0x6a   :  { %10616 = vst [vmem:[#allocation82_spill] sm:$0xff] %v5827_v21  ;;  %v5845_v21 = vld [vmem:[#allocation10 + $0x228] sm:$0xff]  ;;  %548 = vmatpush.msra.mxu2 %v5839_v14  ;;  %568 = vmatpush.msra.mxu3 %v287_v7  ;;  %v262_v12 = vld [vmem:[#allocation10 + $0x5a0] sm:$0xff] }
  0x6b   :  { %10617 = vst [vmem:[#allocation83_spill] sm:$0xff] %v5830_v20  ;;  %v5848_v20 = vld [vmem:[#allocation10 + $0x1e0] sm:$0xff]  ;;  %509 = vmatpush.msra.mxu0 %v5842_v13  ;;  %529 = vmatpush.msra.mxu1 %v278_v19  ;;  %v263_v7 = vld [vmem:[#allocation10 + $0x5a8] sm:$0xff] }
  0x6c   :  { %10618 = vst [vmem:[#allocation84_spill] sm:$0xff] %v5833_v18  ;;  %v5851_v18 = vld [vmem:[#allocation10 + $0x1e8] sm:$0xff]  ;;  %549 = vmatpush.msra.mxu2 %v5845_v21  ;;  %569 = vmatpush.msra.mxu3 %v279_v9  ;;  %v254_v19 = vld [vmem:[#allocation10 + $0x560] sm:$0xff] }
  0x6d   :  { %10619 = vst [vmem:[#allocation85_spill] sm:$0xff] %v5836_v11  ;;  %v5854_v11 = vld [vmem:[#allocation10 + $0x1a0] sm:$0xff]  ;;  %510 = vmatpush.msra.mxu0 %v5848_v20  ;;  %530 = vmatpush.msra.mxu1 %v270_v16  ;;  %v255_v9 = vld [vmem:[#allocation10 + $0x568] sm:$0xff] }
  0x6e   :  { %10620 = vst [vmem:[#allocation86_spill] sm:$0xff] %v5839_v14  ;;  %v5857_v14 = vld [vmem:[#allocation10 + $0x1a8] sm:$0xff]  ;;  %550 = vmatpush.msra.mxu2 %v5851_v18  ;;  %570 = vmatpush.msra.mxu3 %v271_v15  ;;  %v246_v16 = vld [vmem:[#allocation10 + $0x520] sm:$0xff] }
  0x6f   :  { %10621 = vst [vmem:[#allocation87_spill] sm:$0xff] %v5842_v13  ;;  %v5860_v13 = vld [vmem:[#allocation10 + $0x160] sm:$0xff]  ;;  %511 = vmatpush.msra.mxu0 %v5854_v11  ;;  %531 = vmatpush.msra.mxu1 %v262_v12  ;;  %v247_v15 = vld [vmem:[#allocation10 + $0x528] sm:$0xff] }
  0x70   :  { %10622 = vst [vmem:[#allocation88_spill] sm:$0xff] %v5845_v21  ;;  %v5863_v21 = vld [vmem:[#allocation10 + $0x168] sm:$0xff]  ;;  %551 = vmatpush.msra.mxu2 %v5857_v14  ;;  %571 = vmatpush.msra.mxu3 %v263_v7  ;;  %v238_v12 = vld [vmem:[#allocation10 + $0x4e0] sm:$0xff] }
  0x71   :  { %10623 = vst [vmem:[#allocation89_spill] sm:$0xff] %v5848_v20  ;;  %v5866_v20 = vld [vmem:[#allocation10 + $0x120] sm:$0xff]  ;;  %512 = vmatpush.msra.mxu0 %v5860_v13  ;;  %532 = vmatpush.msra.mxu1 %v254_v19  ;;  %v239_v7 = vld [vmem:[#allocation10 + $0x4e8] sm:$0xff] }
  0x72   :  { %10624 = vst [vmem:[#allocation90_spill] sm:$0xff] %v5851_v18  ;;  %v5869_v18 = vld [vmem:[#allocation10 + $0x128] sm:$0xff]  ;;  %552 = vmatpush.msra.mxu2 %v5863_v21  ;;  %572 = vmatpush.msra.mxu3 %v255_v9  ;;  %v230_v19 = vld [vmem:[#allocation10 + $0x4a0] sm:$0xff] }
  0x73   :  { %10625 = vst [vmem:[#allocation91_spill] sm:$0xff] %v5854_v11  ;;  %v5872_v11 = vld [vmem:[#allocation10 + $0xe0] sm:$0xff]  ;;  %513 = vmatpush.msra.mxu0 %v5866_v20  ;;  %533 = vmatpush.msra.mxu1 %v246_v16  ;;  %v231_v9 = vld [vmem:[#allocation10 + $0x4a8] sm:$0xff] }
  0x74   :  { %10626 = vst [vmem:[#allocation92_spill] sm:$0xff] %v5857_v14  ;;  %v5875_v14 = vld [vmem:[#allocation10 + $0xe8] sm:$0xff]  ;;  %553 = vmatpush.msra.mxu2 %v5869_v18  ;;  %573 = vmatpush.msra.mxu3 %v247_v15  ;;  %v222_v16 = vld [vmem:[#allocation10 + $0x460] sm:$0xff] }
  0x75   :  { %10627 = vst [vmem:[#allocation93_spill] sm:$0xff] %v5860_v13  ;;  %v5878_v13 = vld [vmem:[#allocation10 + $0xa0] sm:$0xff]  ;;  %514 = vmatpush.msra.mxu0 %v5872_v11  ;;  %534 = vmatpush.msra.mxu1 %v238_v12  ;;  %v223_v15 = vld [vmem:[#allocation10 + $0x468] sm:$0xff] }
  0x76   :  { %10628 = vst [vmem:[#allocation94_spill] sm:$0xff] %v5863_v21  ;;  %v5881_v21 = vld [vmem:[#allocation10 + $0xa8] sm:$0xff]  ;;  %554 = vmatpush.msra.mxu2 %v5875_v14  ;;  %574 = vmatpush.msra.mxu3 %v239_v7  ;;  %v214_v12 = vld [vmem:[#allocation10 + $0x420] sm:$0xff] }
  0x77   :  { %10629 = vst [vmem:[#allocation95_spill] sm:$0xff] %v5866_v20  ;;  %v5884_v20 = vld [vmem:[#allocation10 + $0x60] sm:$0xff]  ;;  %515 = vmatpush.msra.mxu0 %v5878_v13  ;;  %535 = vmatpush.msra.mxu1 %v230_v19  ;;  %v215_v7 = vld [vmem:[#allocation10 + $0x428] sm:$0xff]  ;;  %v336_v19 = vld [vmem:[#allocation10 + $0x7f0] sm:$0xff] }
  0x78   :  { %10630 = vst [vmem:[#allocation96_spill] sm:$0xff] %v5869_v18  ;;  %v5887_v18 = vld [vmem:[#allocation10 + $0x68] sm:$0xff]  ;;  %555 = vmatpush.msra.mxu2 %v5881_v21  ;;  %575 = vmatpush.msra.mxu3 %v231_v9  ;;  %v337_v9 = vld [vmem:[#allocation10 + $0x7f8] sm:$0xff] }
  0x79   :  { %10631 = vst [vmem:[#allocation97_spill] sm:$0xff] %v5872_v11  ;;  %v5890_v11 = vld [vmem:[#allocation10 + $0x20] sm:$0xff]  ;;  %516 = vmatpush.msra.mxu0 %v5884_v20  ;;  %536 = vmatpush.msra.mxu1 %v222_v16  ;;  %v5903_v16 = vld [vmem:[#allocation10 + $0x3b0] sm:$0xff] }
  0x7a   :  { %10632 = vst [vmem:[#allocation98_spill] sm:$0xff] %v5875_v14  ;;  %v5893_v14 = vld [vmem:[#allocation10 + $0x28] sm:$0xff]  ;;  %556 = vmatpush.msra.mxu2 %v5887_v18  ;;  %576 = vmatpush.msra.mxu3 %v223_v15  ;;  %v5906_v15 = vld [vmem:[#allocation10 + $0x3b8] sm:$0xff] }
  0x7b   :  { %10633 = vst [vmem:[#allocation99_spill] sm:$0xff] %v5878_v13  ;;  %v5896_v13 = vld [vmem:[#allocation10 + $0x3f0] sm:$0xff]  ;;  %517 = vmatpush.msra.mxu0 %v5890_v11  ;;  %537 = vmatpush.msra.mxu1 %v214_v12 }
  0x7c   :  { %10634 = vst [vmem:[#allocation100_spill] sm:$0xff] %v5881_v21  ;;  %v5899_v21 = vld [vmem:[#allocation10 + $0x3f8] sm:$0xff]  ;;  %557 = vmatpush.msra.mxu2 %v5893_v14  ;;  %577 = vmatpush.msra.mxu3 %v215_v7  ;;  %v5910_v12 = vld [vmem:[#allocation10 + $0x370] sm:$0xff] }
  0x7d   :  { %10635 = vst [vmem:[#allocation101_spill] sm:$0xff] %v5884_v20  ;;  %582 = vmatpush.msrb.mxu0 %v5896_v13  ;;  %602 = vmatpush.msrb.mxu1 %v336_v19  ;;  %v328_v20 = vld [vmem:[#allocation10 + $0x7b0] sm:$0xff]  ;;  %v5913_v7 = vld [vmem:[#allocation10 + $0x378] sm:$0xff] }
  0x7e   :  { %10636 = vst [vmem:[#allocation102_spill] sm:$0xff] %v5887_v18  ;;  %622 = vmatpush.msrb.mxu2 %v5899_v21  ;;  %642 = vmatpush.msrb.mxu3 %v337_v9  ;;  %v329_v18 = vld [vmem:[#allocation10 + $0x7b8] sm:$0xff]  ;;  %v5916_v9 = vld [vmem:[#allocation10 + $0x330] sm:$0xff] }
  0x7f   :  { %10637 = vst [vmem:[#allocation103_spill] sm:$0xff] %v5890_v11  ;;  %558 = vmatmul.f32.vlgmr.msra.gmra.mxu2 %v10582_v17  ;;  %578 = vmatmul.f32.vlgmr.msra.gmra.mxu3 %v10582_v17  ;;  %v321_v19 = vld [vmem:[#allocation10 + $0x778] sm:$0xff] }
  0x80   :  { %10638 = vst [vmem:[#allocation104_spill] sm:$0xff] %v5893_v14  ;;  %v320_v14 = vld [vmem:[#allocation10 + $0x770] sm:$0xff]  ;;  %583 = vmatpush.msrb.mxu0 %v5903_v16  ;;  %603 = vmatpush.msrb.mxu1 %v328_v20  ;;  %v313_v11 = vld [vmem:[#allocation10 + $0x738] sm:$0xff] }
  0x81   :  { %10639 = vst [vmem:[#allocation105_spill] sm:$0xff] %v5896_v13  ;;  %623 = vmatpush.msrb.mxu2 %v5906_v15  ;;  %643 = vmatpush.msrb.mxu3 %v329_v18  ;;  %v5919_v13 = vld [vmem:[#allocation10 + $0x338] sm:$0xff]  ;;  %v5923_v20 = vld [vmem:[#allocation10 + $0x2f0] sm:$0xff] }
  0x82   :  { %10640 = vst [vmem:[#allocation106_spill] sm:$0xff] %v5899_v21  ;;  %v312_v21 = vld [vmem:[#allocation10 + $0x730] sm:$0xff]  ;;  %584 = vmatpush.msrb.mxu0 %v5910_v12  ;;  %604 = vmatpush.msrb.mxu1 %v320_v14  ;;  %v5926_v18 = vld [vmem:[#allocation10 + $0x2f8] sm:$0xff] }
  0x83   :  { %10641 = vst [vmem:[#allocation107_spill] sm:$0xff] %v5903_v16  ;;  %624 = vmatpush.msrb.mxu2 %v5913_v7  ;;  %644 = vmatpush.msrb.mxu3 %v321_v19  ;;  %v304_v16 = vld [vmem:[#allocation10 + $0x6f0] sm:$0xff]  ;;  %v297_v19 = vld [vmem:[#allocation10 + $0x6b8] sm:$0xff] }
  0x84   :  { %10642 = vst [vmem:[#allocation108_spill] sm:$0xff] %v5906_v15  ;;  %585 = vmatpush.msrb.mxu0 %v5916_v9  ;;  %605 = vmatpush.msrb.mxu1 %v312_v21  ;;  %v305_v15 = vld [vmem:[#allocation10 + $0x6f8] sm:$0xff]  ;;  %v5930_v14 = vld [vmem:[#allocation10 + $0x2b0] sm:$0xff] }
  0x85   :  { %10643 = vst [vmem:[#allocation109_spill] sm:$0xff] %v5910_v12  ;;  %625 = vmatpush.msrb.mxu2 %v5919_v13  ;;  %645 = vmatpush.msrb.mxu3 %v313_v11  ;;  %v5933_v21 = vld [vmem:[#allocation10 + $0x2b8] sm:$0xff]  ;;  %v5936_v11 = vld [vmem:[#allocation10 + $0x270] sm:$0xff] }
  0x86   :  { %10644 = vst [vmem:[#allocation110_spill] sm:$0xff] %v5913_v7  ;;  %518 = vmatmul.f32.vlgmr.msra.gmra.mxu0 %v10582_v17  ;;  %538 = vmatmul.f32.vlgmr.msra.gmra.mxu1 %v10582_v17  ;;  %v296_v7 = vld [vmem:[#allocation10 + $0x6b0] sm:$0xff]  ;;  %v289_v12 = vld [vmem:[#allocation10 + $0x678] sm:$0xff] }
  0x87   :  { %10645 = vst [vmem:[#allocation111_spill] sm:$0xff] %v5916_v9  ;;  %586 = vmatpush.msrb.mxu0 %v5923_v20  ;;  %606 = vmatpush.msrb.mxu1 %v304_v16  ;;  %v5939_v9 = vld [vmem:[#allocation10 + $0x278] sm:$0xff]  ;;  %v280_v16 = vld [vmem:[#allocation10 + $0x630] sm:$0xff] }
  0x88   :  { %10646 = vst [vmem:[#allocation112_spill] sm:$0xff] %v5919_v13  ;;  %626 = vmatpush.msrb.mxu2 %v5926_v18  ;;  %646 = vmatpush.msrb.mxu3 %v305_v15  ;;  %v288_v13 = vld [vmem:[#allocation10 + $0x670] sm:$0xff]  ;;  %v281_v15 = vld [vmem:[#allocation10 + $0x638] sm:$0xff] }
  0x89   :  { %10647 = vst [vmem:[#allocation113_spill] sm:$0xff] %v5923_v20  ;;  %587 = vmatpush.msrb.mxu0 %v5930_v14  ;;  %607 = vmatpush.msrb.mxu1 %v296_v7  ;;  %v5942_v20 = vld [vmem:[#allocation10 + $0x230] sm:$0xff] }
  0x8a   :  { %10648 = vst [vmem:[#allocation114_spill] sm:$0xff] %v5926_v18  ;;  %627 = vmatpush.msrb.mxu2 %v5933_v21  ;;  %647 = vmatpush.msrb.mxu3 %v297_v19  ;;  %v5945_v18 = vld [vmem:[#allocation10 + $0x238] sm:$0xff]  ;;  %v272_v7 = vld [vmem:[#allocation10 + $0x5f0] sm:$0xff] }
  0x8b   :  { %10649 = vst [vmem:[#allocation115_spill] sm:$0xff] %v5930_v14  ;;  %588 = vmatpush.msrb.mxu0 %v5936_v11  ;;  %608 = vmatpush.msrb.mxu1 %v288_v13  ;;  %v5948_v14 = vld [vmem:[#allocation10 + $0x1f0] sm:$0xff]  ;;  %v273_v19 = vld [vmem:[#allocation10 + $0x5f8] sm:$0xff] }
  0x8c   :  { %10650 = vst [vmem:[#allocation116_spill] sm:$0xff] %v5933_v21  ;;  %628 = vmatpush.msrb.mxu2 %v5939_v9  ;;  %648 = vmatpush.msrb.mxu3 %v289_v12  ;;  %v5951_v21 = vld [vmem:[#allocation10 + $0x1f8] sm:$0xff]  ;;  %v264_v13 = vld [vmem:[#allocation10 + $0x5b0] sm:$0xff] }
  0x8d   :  { %10651 = vst [vmem:[#allocation117_spill] sm:$0xff] %v5936_v11  ;;  %589 = vmatpush.msrb.mxu0 %v5942_v20  ;;  %609 = vmatpush.msrb.mxu1 %v280_v16  ;;  %v5954_v11 = vld [vmem:[#allocation10 + $0x1b0] sm:$0xff]  ;;  %v265_v12 = vld [vmem:[#allocation10 + $0x5b8] sm:$0xff] }
  0x8e   :  { %10652 = vst [vmem:[#allocation118_spill] sm:$0xff] %v5939_v9  ;;  %629 = vmatpush.msrb.mxu2 %v5945_v18  ;;  %649 = vmatpush.msrb.mxu3 %v281_v15  ;;  %v5957_v9 = vld [vmem:[#allocation10 + $0x1b8] sm:$0xff]  ;;  %v256_v16 = vld [vmem:[#allocation10 + $0x570] sm:$0xff] }
  0x8f   :  { %10653 = vst [vmem:[#allocation119_spill] sm:$0xff] %v5942_v20  ;;  %590 = vmatpush.msrb.mxu0 %v5948_v14  ;;  %610 = vmatpush.msrb.mxu1 %v272_v7  ;;  %v5960_v20 = vld [vmem:[#allocation10 + $0x170] sm:$0xff]  ;;  %v257_v15 = vld [vmem:[#allocation10 + $0x578] sm:$0xff] }
  0x90   :  { %10654 = vst [vmem:[#allocation120_spill] sm:$0xff] %v5945_v18  ;;  %630 = vmatpush.msrb.mxu2 %v5951_v21  ;;  %650 = vmatpush.msrb.mxu3 %v273_v19  ;;  %v5963_v18 = vld [vmem:[#allocation10 + $0x178] sm:$0xff]  ;;  %v248_v7 = vld [vmem:[#allocation10 + $0x530] sm:$0xff] }
  0x91   :  { %10655 = vst [vmem:[#allocation121_spill] sm:$0xff] %v5948_v14  ;;  %591 = vmatpush.msrb.mxu0 %v5954_v11  ;;  %611 = vmatpush.msrb.mxu1 %v264_v13  ;;  %v5966_v14 = vld [vmem:[#allocation10 + $0x130] sm:$0xff]  ;;  %v249_v19 = vld [vmem:[#allocation10 + $0x538] sm:$0xff] }
  0x92   :  { %10656 = vst [vmem:[#allocation122_spill] sm:$0xff] %v5951_v21  ;;  %631 = vmatpush.msrb.mxu2 %v5957_v9  ;;  %651 = vmatpush.msrb.mxu3 %v265_v12  ;;  %v5969_v21 = vld [vmem:[#allocation10 + $0x138] sm:$0xff]  ;;  %v240_v13 = vld [vmem:[#allocation10 + $0x4f0] sm:$0xff] }
  0x93   :  { %10657 = vst [vmem:[#allocation123_spill] sm:$0xff] %v5954_v11  ;;  %592 = vmatpush.msrb.mxu0 %v5960_v20  ;;  %612 = vmatpush.msrb.mxu1 %v256_v16  ;;  %v5972_v11 = vld [vmem:[#allocation10 + $0xf0] sm:$0xff]  ;;  %v241_v12 = vld [vmem:[#allocation10 + $0x4f8] sm:$0xff] }
  0x94   :  { %10658 = vst [vmem:[#allocation124_spill] sm:$0xff] %v5957_v9  ;;  %632 = vmatpush.msrb.mxu2 %v5963_v18  ;;  %652 = vmatpush.msrb.mxu3 %v257_v15  ;;  %v5975_v9 = vld [vmem:[#allocation10 + $0xf8] sm:$0xff]  ;;  %v232_v16 = vld [vmem:[#allocation10 + $0x4b0] sm:$0xff] }
  0x95   :  { %10659 = vst [vmem:[#allocation125_spill] sm:$0xff] %v5960_v20  ;;  %593 = vmatpush.msrb.mxu0 %v5966_v14  ;;  %613 = vmatpush.msrb.mxu1 %v248_v7  ;;  %v5978_v20 = vld [vmem:[#allocation10 + $0xb0] sm:$0xff]  ;;  %v233_v15 = vld [vmem:[#allocation10 + $0x4b8] sm:$0xff] }
  0x96   :  { %10660 = vst [vmem:[#allocation126_spill] sm:$0xff] %v5963_v18  ;;  %633 = vmatpush.msrb.mxu2 %v5969_v21  ;;  %653 = vmatpush.msrb.mxu3 %v249_v19  ;;  %v5981_v18 = vld [vmem:[#allocation10 + $0xb8] sm:$0xff]  ;;  %v224_v7 = vld [vmem:[#allocation10 + $0x470] sm:$0xff] }
  0x97   :  { %10661 = vst [vmem:[#allocation127_spill] sm:$0xff] %v5966_v14  ;;  %594 = vmatpush.msrb.mxu0 %v5972_v11  ;;  %614 = vmatpush.msrb.mxu1 %v240_v13  ;;  %v5984_v14 = vld [vmem:[#allocation10 + $0x70] sm:$0xff]  ;;  %v225_v19 = vld [vmem:[#allocation10 + $0x478] sm:$0xff] }
  0x98   :  { %10662 = vst [vmem:[#allocation128_spill] sm:$0xff] %v5969_v21  ;;  %634 = vmatpush.msrb.mxu2 %v5975_v9  ;;  %654 = vmatpush.msrb.mxu3 %v241_v12  ;;  %v5987_v21 = vld [vmem:[#allocation10 + $0x78] sm:$0xff]  ;;  %v216_v13 = vld [vmem:[#allocation10 + $0x430] sm:$0xff] }
  0x99   :  { %10663 = vst [vmem:[#allocation129_spill] sm:$0xff] %v5972_v11  ;;  %595 = vmatpush.msrb.mxu0 %v5978_v20  ;;  %615 = vmatpush.msrb.mxu1 %v232_v16  ;;  %v5990_v11 = vld [vmem:[#allocation10 + $0x30] sm:$0xff]  ;;  %v217_v12 = vld [vmem:[#allocation10 + $0x438] sm:$0xff]  ;;  %v6002_v16 = vld [vmem:[#allocation10 + $0x3c0] sm:$0xff] }
  0x9a   :  { %10664 = vst [vmem:[#allocation130_spill] sm:$0xff] %v5975_v9  ;;  %635 = vmatpush.msrb.mxu2 %v5981_v18  ;;  %655 = vmatpush.msrb.mxu3 %v233_v15  ;;  %v5993_v9 = vld [vmem:[#allocation10 + $0x38] sm:$0xff]  ;;  %v6005_v15 = vld [vmem:[#allocation10 + $0x3c8] sm:$0xff] }
  0x9b   :  { %596 = vmatpush.msrb.mxu0 %v5984_v14  ;;  %616 = vmatpush.msrb.mxu1 %v224_v7  ;;  %10665 = vst [vmem:[#allocation131_spill] sm:$0xff] %v6005_v15  ;;  %v6008_v7 = vld [vmem:[#allocation10 + $0x7c0] sm:$0xff] }
  0x9c   :  { %636 = vmatpush.msrb.mxu2 %v5987_v21  ;;  %656 = vmatpush.msrb.mxu3 %v225_v19  ;;  %10666 = vst [vmem:[#allocation132_spill] sm:$0xff] %v6008_v7  ;;  %v6011_v19 = vld [vmem:[#allocation10 + $0x7c8] sm:$0xff] }
  0x9d   :  { %597 = vmatpush.msrb.mxu0 %v5990_v11  ;;  %617 = vmatpush.msrb.mxu1 %v216_v13  ;;  %10667 = vst [vmem:[#allocation133_spill] sm:$0xff] %v6011_v19  ;;  %v6014_v13 = vld [vmem:[#allocation10 + $0x380] sm:$0xff] }
  0x9e   :  { %637 = vmatpush.msrb.mxu2 %v5993_v9  ;;  %657 = vmatpush.msrb.mxu3 %v217_v12  ;;  %10668 = vst [vmem:[#allocation134_spill] sm:$0xff] %v6014_v13  ;;  %v6020_v12 = vld [vmem:[#allocation10 + $0x780] sm:$0xff] }
  0x9f   :  { %598 = vmatmul.f32.vlgmr.msrb.gmra.mxu0 %v10582_v17  ;;  %618 = vmatmul.f32.vlgmr.msrb.gmra.mxu1 %v10582_v17  ;;  %10670 = vst [vmem:[#allocation136_spill] sm:$0xff] %v6020_v12 }
  0xa0   :  { %638 = vmatmul.f32.vlgmr.msrb.gmra.mxu2 %v10582_v17  ;;  %658 = vmatmul.f32.vlgmr.msrb.gmra.mxu3 %v10582_v17  ;;  %v6017_v17 = vld [vmem:[#allocation10 + $0x388] sm:$0xff] }
  0xa1   :  { %808 = vmatpush.msra.mxu0 %v6002_v16  ;;  %848 = vmatpush.msra.mxu2 %v6005_v15  ;;  %10669 = vst [vmem:[#allocation135_spill] sm:$0xff] %v6017_v17  ;;  %v6023_v15 = vld [vmem:[#allocation10 + $0x788] sm:$0xff] }
  0xa2   :  { %828 = vmatpush.msra.mxu1 %v6008_v7  ;;  %868 = vmatpush.msra.mxu3 %v6011_v19  ;;  %10671 = vst [vmem:[#allocation137_spill] sm:$0xff] %v6023_v15  ;;  %v6026_v7 = vld [vmem:[#allocation10 + $0x340] sm:$0xff]  ;;  %v6029_v19 = vld [vmem:[#allocation10 + $0x348] sm:$0xff] }
  0xa3   :  { %809 = vmatpush.msra.mxu0 %v6014_v13  ;;  %849 = vmatpush.msra.mxu2 %v6017_v17  ;;  %10672 = vst [vmem:[#allocation138_spill] sm:$0xff] %v6026_v7  ;;  %v6032_v13 = vld [vmem:[#allocation10 + $0x740] sm:$0xff]  ;;  %v6035_v17 = vld [vmem:[#allocation10 + $0x748] sm:$0xff] }
  0xa4   :  { %829 = vmatpush.msra.mxu1 %v6020_v12  ;;  %869 = vmatpush.msra.mxu3 %v6023_v15  ;;  %10673 = vst [vmem:[#allocation139_spill] sm:$0xff] %v6029_v19  ;;  %v6038_v12 = vld [vmem:[#allocation10 + $0x300] sm:$0xff]  ;;  %v6041_v15 = vld [vmem:[#allocation10 + $0x308] sm:$0xff] }
  0xa5   :  { %810 = vmatpush.msra.mxu0 %v6026_v7  ;;  %850 = vmatpush.msra.mxu2 %v6029_v19  ;;  %10674 = vst [vmem:[#allocation140_spill] sm:$0xff] %v6032_v13  ;;  %v6044_v7 = vld [vmem:[#allocation10 + $0x700] sm:$0xff]  ;;  %v6047_v19 = vld [vmem:[#allocation10 + $0x708] sm:$0xff] }
  0xa6   :  { %830 = vmatpush.msra.mxu1 %v6032_v13  ;;  %10675 = vst [vmem:[#allocation141_spill] sm:$0xff] %v6035_v17  ;;  %870 = vmatpush.msra.mxu3 %v6035_v17  ;;  %v6050_v13 = vld [vmem:[#allocation10 + $0x2c0] sm:$0xff]  ;;  %v6053_v17 = vld [vmem:[#allocation10 + $0x2c8] sm:$0xff] }
  0xa7   :  { %10676 = vst [vmem:[#allocation142_spill] sm:$0xff] %v6038_v12  ;;  %811 = vmatpush.msra.mxu0 %v6038_v12  ;;  %851 = vmatpush.msra.mxu2 %v6041_v15  ;;  %v6056_v12 = vld [vmem:[#allocation10 + $0x6c0] sm:$0xff] }
  0xa8   :  { %10677 = vst [vmem:[#allocation143_spill] sm:$0xff] %v6041_v15  ;;  %831 = vmatpush.msra.mxu1 %v6044_v7  ;;  %871 = vmatpush.msra.mxu3 %v6047_v19  ;;  %v6059_v15 = vld [vmem:[#allocation10 + $0x6c8] sm:$0xff] }
  0xa9   :  { %10678 = vst [vmem:[#allocation144_spill] sm:$0xff] %v6044_v7  ;;  %812 = vmatpush.msra.mxu0 %v6050_v13  ;;  %852 = vmatpush.msra.mxu2 %v6053_v17  ;;  %v6062_v7 = vld [vmem:[#allocation10 + $0x280] sm:$0xff] }
  0xaa   :  { %10679 = vst [vmem:[#allocation145_spill] sm:$0xff] %v6047_v19  ;;  %832 = vmatpush.msra.mxu1 %v6056_v12  ;;  %872 = vmatpush.msra.mxu3 %v6059_v15  ;;  %v6066_v19 = vld [vmem:[#allocation10 + $0x680] sm:$0xff] }
  0xab   :  { %813 = vmatpush.msra.mxu0 %v6062_v7  ;;  %853 = vmatpush.msra.mxu2 %v5476_v22  ;;  %v10680_v22 = vld [vmem:[#allocation18_spill] sm:$0xff] }
  0xac   :  { %833 = vmatpush.msra.mxu1 %v6066_v19  ;;  %873 = vmatpush.msra.mxu3 %v5478_v23  ;;  %v10681_v23 = vld [vmem:[#allocation21_spill] sm:$0xff] }
  0xad   :  { %814 = vmatpush.msra.mxu0 %v5480_v24  ;;  %854 = vmatpush.msra.mxu2 %v5484_v26  ;;  %v10682_v24 = vld [vmem:[#allocation23_spill] sm:$0xff]  ;;  %v10684_v26 = vld [vmem:[#allocation20_spill] sm:$0xff] }
  0xae   :  { %834 = vmatpush.msra.mxu1 %v5482_v25  ;;  %874 = vmatpush.msra.mxu3 %v5486_v27  ;;  %v10683_v25 = vld [vmem:[#allocation19_spill] sm:$0xff] }
  0xaf   :  { %815 = vmatpush.msra.mxu0 %v5490_v28  ;;  %855 = vmatpush.msra.mxu2 %v5496_v30  ;;  %v10685_v30 = vld [vmem:[#allocation25_spill] sm:$0xff] }
  0xb0   :  { %835 = vmatpush.msra.mxu1 %v5492_v29  ;;  %875 = vmatpush.msra.mxu3 %v5498_v31  ;;  %v663_v29 = vld [vmem:[#allocation5 + $0x8] sm:$0xff] }
  0xb1   :  { %816 = vmatpush.msra.mxu0 %v5502_v32  ;;  %856 = vmatpush.msra.mxu2 %v5508_v34  ;;  %v10686_v31 = vld [vmem:[#allocation27_spill] sm:$0xff]  ;;  %v662_v34 = vld [vmem:[#allocation5] sm:$0xff] }
  0xb2   :  { %836 = vmatpush.msra.mxu1 %v5504_v33  ;;  %876 = vmatpush.msra.mxu3 %v5510_v35 }
  0xb3   :  { %817 = vmatpush.msra.mxu0 %v5514_v36  ;;  %857 = vmatpush.msra.mxu2 %v5520_v38  ;;  %v10687_v36 = vld [vmem:[#allocation22_spill] sm:$0xff] }
  0xb4   :  { %837 = vmatpush.msra.mxu1 %v5516_v37  ;;  %877 = vmatpush.msra.mxu3 %v5522_v39  ;;  %v10688_v37 = vld [vmem:[#allocation24_spill] sm:$0xff]  ;;  %v10689_v39 = vld [vmem:[#allocation29_spill] sm:$0xff] }
  0xb5   :  { %818 = vmatpush.msra.mxu0 %v5526_v40  ;;  %858 = vmatpush.msra.mxu2 %v5532_v42  ;;  %v10690_v40 = vld [vmem:[#allocation31_spill] sm:$0xff]  ;;  %v10691_v42 = vld [vmem:[#allocation26_spill] sm:$0xff] }
  0xb6   :  { %838 = vmatpush.msra.mxu1 %v5528_v41  ;;  %878 = vmatpush.msra.mxu3 %v5534_v43  ;;  %v10692_v43 = vld [vmem:[#allocation28_spill] sm:$0xff] }
  0xb7   :  { %819 = vmatpush.msra.mxu0 %v5538_v44  ;;  %859 = vmatpush.msra.mxu2 %v5544_v46  ;;  %v10694_v46 = vld [vmem:[#allocation35_spill] sm:$0xff] }
  0xb8   :  { %839 = vmatpush.msra.mxu1 %v5540_v45  ;;  %879 = vmatpush.msra.mxu3 %v5546_v47  ;;  %v10693_v45 = vld [vmem:[#allocation33_spill] sm:$0xff] }
  0xb9   :  { %820 = vmatpush.msra.mxu0 %v5550_v48  ;;  %860 = vmatpush.msra.mxu2 %v5556_v50  ;;  %v10695_v48 = vld [vmem:[#allocation30_spill] sm:$0xff] }
  0xba   :  { %840 = vmatpush.msra.mxu1 %v5552_v49  ;;  %880 = vmatpush.msra.mxu3 %v5558_v51  ;;  %v10696_v49 = vld [vmem:[#allocation32_spill] sm:$0xff]  ;;  %v10697_v51 = vld [vmem:[#allocation37_spill] sm:$0xff] }
  0xbb   :  { %821 = vmatpush.msra.mxu0 %v5562_v52  ;;  %861 = vmatpush.msra.mxu2 %v5568_v54  ;;  %v10698_v52 = vld [vmem:[#allocation39_spill] sm:$0xff]  ;;  %v10700_v54 = vld [vmem:[#allocation36_spill] sm:$0xff] }
  0xbc   :  { %841 = vmatpush.msra.mxu1 %v5564_v53  ;;  %881 = vmatpush.msra.mxu3 %v5570_v55  ;;  %v10699_v53 = vld [vmem:[#allocation34_spill] sm:$0xff]  ;;  %v10701_v55 = vld [vmem:[#allocation41_spill] sm:$0xff] }
  0xbd   :  { %822 = vmatpush.msra.mxu0 %v5574_v56  ;;  %862 = vmatpush.msra.mxu2 %v5580_v58  ;;  %v10702_v56 = vld [vmem:[#allocation43_spill] sm:$0xff]  ;;  %v10704_v58 = vld [vmem:[#allocation40_spill] sm:$0xff] }
  0xbe   :  { %842 = vmatpush.msra.mxu1 %v5576_v57  ;;  %882 = vmatpush.msra.mxu3 %v5582_v59  ;;  %v10703_v57 = vld [vmem:[#allocation38_spill] sm:$0xff]  ;;  %v10705_v59 = vld [vmem:[#allocation45_spill] sm:$0xff] }
  0xbf   :  { %823 = vmatpush.msra.mxu0 %v5586_v60  ;;  %863 = vmatpush.msra.mxu2 %v5592_v62  ;;  %v10706_v60 = vld [vmem:[#allocation47_spill] sm:$0xff]  ;;  %v10708_v62 = vld [vmem:[#allocation44_spill] sm:$0xff] }
  0xc0   :  { %843 = vmatpush.msra.mxu1 %v5588_v61  ;;  %883 = vmatpush.msra.mxu3 %v5594_v63  ;;  %v399_v27 = vpop.f32.mrf.mxu2  ;;  %v419_v28 = vpop.f32.mrf.mxu3  ;;  %v10707_v61 = vld [vmem:[#allocation42_spill] sm:$0xff]  ;;  %v10709_v63 = vld [vmem:[#allocation49_spill] sm:$0xff] }
  0xc1   :  { %888 = vmatpush.msrb.mxu0 %v5598_v0  ;;  %928 = vmatpush.msrb.mxu2 %v5604_v2  ;;  %v359_v32 = vpop.f32.mrf.mxu0  ;;  %v379_v33 = vpop.f32.mrf.mxu1  ;;  %v420_v35 = vadd.f32 %v419_v28, %v399_v27  ;;  %v10710_v0 = vld [vmem:[#allocation51_spill] sm:$0xff]  ;;  %v10711_v2 = vld [vmem:[#allocation46_spill] sm:$0xff]  ;;  %v10717_v27 = vld [vmem:[#allocation57_spill] sm:$0xff] }
  0xc2   :  { %908 = vmatpush.msrb.mxu1 %v5600_v1  ;;  %948 = vmatpush.msrb.mxu3 %v5606_v3  ;;  %v380_v38 = vadd.f32 %v379_v33, %v359_v32  ;;  %v10712_v3 = vld [vmem:[#allocation48_spill] sm:$0xff]  ;;  %v10718_v28 = vld [vmem:[#allocation59_spill] sm:$0xff]  ;;  %v10721_v32 = vld [vmem:[#allocation61_spill] sm:$0xff] }
  0xc3   :  { %889 = vmatpush.msrb.mxu0 %v5610_v4  ;;  %929 = vmatpush.msrb.mxu2 %v5616_v6  ;;  %v667_v41 = vadd.f32 %v663_v29, %v420_v35  ;;  %v10713_v6 = vld [vmem:[#allocation53_spill] sm:$0xff]  ;;  %v10722_v33 = vld [vmem:[#allocation63_spill] sm:$0xff]  ;;  %v10723_v35 = vld [vmem:[#allocation58_spill] sm:$0xff] }
  0xc4   :  { %909 = vmatpush.msrb.mxu1 %v5612_v5  ;;  %949 = vmatpush.msrb.mxu3 %v10680_v22  ;;  %v666_v44 = vadd.f32 %v662_v34, %v380_v38  ;;  %v10715_v22 = vld [vmem:[#allocation50_spill] sm:$0xff]  ;;  %v10726_v38 = vld [vmem:[#allocation67_spill] sm:$0xff] }
  0xc5   :  { %890 = vmatpush.msrb.mxu0 %v5622_v8  ;;  %930 = vmatpush.msrb.mxu2 %v5628_v10  ;;  %v4133_v47 = vmul.f32 -1.442695, %v667_v41  ;;  %v10714_v8 = vld [vmem:[#allocation55_spill] sm:$0xff]  ;;  %v10728_v41 = vld [vmem:[#allocation64_spill] sm:$0xff] }
  0xc6   :  { %910 = vmatpush.msrb.mxu1 %v10683_v25  ;;  %950 = vmatpush.msrb.mxu3 %v10684_v26  ;;  %v4132_v50 = vmul.f32 -1.442695, %v666_v44  ;;  %v664_v26 = vld [vmem:[#allocation5 + $0x10] sm:$0xff]  ;;  %v10730_v44 = vld [vmem:[#allocation71_spill] sm:$0xff] }
  0xc7   :  { %891 = vmatpush.msrb.mxu0 %v10681_v23  ;;  %931 = vmatpush.msrb.mxu2 %v10682_v24  ;;  %4192 = vpow2.f32 %v4133_v47  ;;  %v10716_v23 = vld [vmem:[#allocation52_spill] sm:$0xff]  ;;  %v10731_v47 = vld [vmem:[#allocation66_spill] sm:$0xff] }
  0xc8   :  { %911 = vmatpush.msrb.mxu1 %v10687_v36  ;;  %951 = vmatpush.msrb.mxu3 %v10688_v37  ;;  %4194 = vpow2.f32 %v4132_v50  ;;  %v10724_v36 = vld [vmem:[#allocation60_spill] sm:$0xff]  ;;  %v10725_v37 = vld [vmem:[#allocation65_spill] sm:$0xff] }
  0xc9   :  { %892 = vmatpush.msrb.mxu0 %v10685_v30  ;;  %932 = vmatpush.msrb.mxu2 %v10686_v31  ;;  %v10719_v30 = vld [vmem:[#allocation54_spill] sm:$0xff]  ;;  %v10720_v31 = vld [vmem:[#allocation56_spill] sm:$0xff] }
  0xca   :  { %912 = vmatpush.msrb.mxu1 %v10691_v42  ;;  %952 = vmatpush.msrb.mxu3 %v10692_v43  ;;  %v10729_v43 = vld [vmem:[#allocation69_spill] sm:$0xff] }
  0xcb   :  { %893 = vmatpush.msrb.mxu0 %v10689_v39  ;;  %933 = vmatpush.msrb.mxu2 %v10690_v40  ;;  %v10727_v40 = vld [vmem:[#allocation62_spill] sm:$0xff] }
  0xcc   :  { %913 = vmatpush.msrb.mxu1 %v10695_v48  ;;  %953 = vmatpush.msrb.mxu3 %v10696_v49  ;;  %v10732_v48 = vld [vmem:[#allocation68_spill] sm:$0xff] }
  0xcd   :  { %894 = vmatpush.msrb.mxu0 %v10693_v45  ;;  %934 = vmatpush.msrb.mxu2 %v10694_v46  ;;  %v4193_v1 = vpop.eup %4192 }
  0xce   :  { %914 = vmatpush.msrb.mxu1 %v10699_v53  ;;  %954 = vmatpush.msrb.mxu3 %v10700_v54  ;;  %v4195_v4 = vpop.eup %4194  ;;  %v689_v5 = vadd.f32 1.0, %v4193_v1  ;;  %v665_v54 = vld [vmem:[#allocation5 + $0x18] sm:$0xff] }
  0xcf   :  { %895 = vmatpush.msrb.mxu0 %v10697_v51  ;;  %935 = vmatpush.msrb.mxu2 %v10698_v52  ;;  %v688_v10 = vadd.f32 1.0, %v4195_v4 }
  0xd0   :  { %915 = vmatpush.msrb.mxu1 %v10703_v57  ;;  %955 = vmatpush.msrb.mxu3 %v10704_v58  ;;  %4196 = vrcp.f32 %v689_v5  ;;  %vm711_vm0 = vweird.f32 %v689_v5  ;;  %v717_v51 = vand.u32 2147483648, %v689_v5  ;;  %v10734_v57 = vld [vmem:[#allocation72_spill] sm:$0xff] }
  0xd1   :  { %896 = vmatpush.msrb.mxu0 %v10701_v55  ;;  %936 = vmatpush.msrb.mxu2 %v10702_v56  ;;  %v439_v24 = vpop.f32.mrf.mxu0  ;;  %4198 = vrcp.f32 %v688_v10  ;;  %v715_v55 = vand.u32 2147483647, %v689_v5  ;;  %v10733_v56 = vld [vmem:[#allocation70_spill] sm:$0xff]  ;;  %vm696_vm2 = vweird.f32 %v688_v10 }
  0xd2   :  { %916 = vmatpush.msrb.mxu1 %v10707_v61  ;;  %956 = vmatpush.msrb.mxu3 %v10708_v62  ;;  %v459_v25 = vpop.f32.mrf.mxu1  ;;  %v700_v62 = vand.u32 2147483647, %v688_v10 }
  0xd3   :  { %897 = vmatpush.msrb.mxu0 %v10705_v59  ;;  %937 = vmatpush.msrb.mxu2 %v10706_v60  ;;  %v460_v29 = vadd.f32 %v459_v25, %v439_v24  ;;  %v702_v60 = vand.u32 2147483648, %v688_v10  ;;  %vm716_vm5 = vcmp.eq.f32.partialorder %v715_v55, 8.507059e+37 }
  0xd4   :  { %917 = vmatpush.msrb.mxu1 %v10711_v2  ;;  %957 = vmatpush.msrb.mxu3 %v10712_v3  ;;  %v718_v2 = vor.u32 1.1754944e-38, %v717_v51  ;;  %vm701_vm7 = vcmp.eq.f32.partialorder %v700_v62, 8.507059e+37 }
  0xd5   :  { %898 = vmatpush.msrb.mxu0 %v10709_v63  ;;  %938 = vmatpush.msrb.mxu2 %v10710_v0  ;;  %v668_v34 = vadd.f32 %v664_v26, %v460_v29 }
  0xd6   :  { %918 = vmatpush.msrb.mxu1 %v10715_v22  ;;  %958 = vmatpush.msrb.mxu3 %v10716_v23  ;;  %v4197_v42 = vpop.eup %4196 }
  0xd7   :  { %899 = vmatpush.msrb.mxu0 %v10713_v6  ;;  %939 = vmatpush.msrb.mxu2 %v10714_v8  ;;  %v4134_v39 = vmul.f32 -1.442695, %v668_v34  ;;  %v4199_v45 = vpop.eup %4198  ;;  %v707_v46 = vmul.f32 %v4197_v42, %v689_v5  ;;  %vm712_vm1 = vweird.f32 %v4197_v42  ;;  %v703_v8 = vor.u32 1.1754944e-38, %v702_v60  ;;  %v10745_v60 = vld [vmem:[#allocation83_spill] sm:$0xff] }
  0xd8   :  { %919 = vmatpush.msrb.mxu1 %v10719_v30  ;;  %959 = vmatpush.msrb.mxu3 %v10720_v31  ;;  %v692_v49 = vmul.f32 %v4199_v45, %v688_v10  ;;  %vm697_vm3 = vweird.f32 %v4199_v45  ;;  %vm713_vm4 = vmor %vm711_vm0, %vm712_vm1 }
  0xd9   :  { %900 = vmatpush.msrb.mxu0 %v10717_v27  ;;  %940 = vmatpush.msrb.mxu2 %v10718_v28  ;;  %4200 = vpow2.f32 %v4134_v39  ;;  %v708_v50 = vsub.f32 1.0, %v707_v46  ;;  %v479_v52 = vpop.f32.mrf.mxu2  ;;  %vm698_vm6 = vmor %vm696_vm2, %vm697_vm3 }
  0xda   :  { %920 = vmatpush.msrb.mxu1 %v10723_v35  ;;  %960 = vmatpush.msrb.mxu3 %v10724_v36  ;;  %v499_v53 = vpop.f32.mrf.mxu3  ;;  %v693_v58 = vsub.f32 1.0, %v692_v49  ;;  %v10741_v49 = vld [vmem:[#allocation79_spill] sm:$0xff] }
  0xdb   :  { %901 = vmatpush.msrb.mxu0 %v10721_v32  ;;  %941 = vmatpush.msrb.mxu2 %v10722_v33  ;;  %v500_v59 = vadd.f32 %v499_v53, %v479_v52  ;;  %v709_v61 = vmul.f32 %v4197_v42, %v708_v50  ;;  %v10742_v50 = vld [vmem:[#allocation80_spill] sm:$0xff]  ;;  %v671_v53 = vld [vmem:[#allocation8 + $0xe0] sm:$0xff] }
  0xdc   :  { %921 = vmatpush.msrb.mxu1 %v10727_v40  ;;  %961 = vmatpush.msrb.mxu3 %v10728_v41  ;;  %v694_v0 = vmul.f32 %v4199_v45, %v693_v58  ;;  %v10735_v40 = vld [vmem:[#allocation73_spill] sm:$0xff]  ;;  %v10736_v41 = vld [vmem:[#allocation74_spill] sm:$0xff] }
  0xdd   :  { %902 = vmatpush.msrb.mxu0 %v10725_v37  ;;  %942 = vmatpush.msrb.mxu2 %v10726_v38  ;;  %v669_v63 = vadd.f32 %v665_v54, %v500_v59  ;;  %v710_v3 = vadd.f32 %v4197_v42, %v709_v61  ;;  %v10746_v61 = vld [vmem:[#allocation84_spill] sm:$0xff] }
  0xde   :  { %922 = vmatpush.msrb.mxu1 %v10731_v47  ;;  %962 = vmatpush.msrb.mxu3 %v10732_v48  ;;  %v695_v6 = vadd.f32 %v4199_v45, %v694_v0  ;;  %v672_v48 = vld [vmem:[#allocation8 + $0xe8] sm:$0xff]  ;;  %v10747_v0 = vld [vmem:[#allocation85_spill] sm:$0xff] }
  0xdf   :  { %903 = vmatpush.msrb.mxu0 %v10729_v43  ;;  %943 = vmatpush.msrb.mxu2 %v10730_v44  ;;  %v4201_v1 = vpop.eup %4200  ;;  %4202 = vtanh.f32 %v669_v63  ;;  %v714_v22 = vsel %vm713_vm4, %v4197_v42, %v710_v3  ;;  %v10737_v42 = vld [vmem:[#allocation75_spill] sm:$0xff]  ;;  %v10738_v43 = vld [vmem:[#allocation76_spill] sm:$0xff]  ;;  %v10739_v44 = vld [vmem:[#allocation77_spill] sm:$0xff] }
  0xe0   :  { %923 = vmatpush.msrb.mxu1 %v10733_v56  ;;  %963 = vmatpush.msrb.mxu3 %v10734_v57  ;;  %v690_v4 = vadd.f32 1.0, %v4201_v1  ;;  %v699_v23 = vsel %vm698_vm6, %v4199_v45, %v695_v6  ;;  %v719_v24 = vsel %vm716_vm5, %v718_v2, %v714_v22  ;;  %v10740_v45 = vld [vmem:[#allocation78_spill] sm:$0xff]  ;;  %v10743_v56 = vld [vmem:[#allocation81_spill] sm:$0xff]  ;;  %v10749_v2 = vld [vmem:[#allocation87_spill] sm:$0xff] }
  0xe1   :  { %v704_v25 = vsel %vm701_vm7, %v703_v8, %v699_v23  ;;  %v737_v10 = vmul.f32 0.0, %v719_v24  ;;  %v10744_v57 = vld [vmem:[#allocation82_spill] sm:$0xff]  ;;  %v10750_v3 = vld [vmem:[#allocation88_spill] sm:$0xff]  ;;  %v10753_v8 = vld [vmem:[#allocation91_spill] sm:$0xff] }
  0xe2   :  { %4204 = vrcp.f32 %v690_v4  ;;  %v732_v30 = vand.u32 2147483648, %v690_v4  ;;  %vm726_vm8 = vweird.f32 %v690_v4  ;;  %v730_v32 = vand.u32 2147483647, %v690_v4  ;;  %v10748_v1 = vld [vmem:[#allocation86_spill] sm:$0xff]  ;;  %v10754_v22 = vld [vmem:[#allocation92_spill] sm:$0xff] }
  0xe3   :  { %v10752_v6 = vld [vmem:[#allocation90_spill] sm:$0xff] }
  0xe4   :  { %v733_v34 = vor.u32 1.1754944e-38, %v732_v30  ;;  %vm731_vm11 = vcmp.eq.f32.partialorder %v730_v32, 8.507059e+37  ;;  %v10759_v30 = vld [vmem:[#allocation97_spill] sm:$0xff]  ;;  %v10761_v32 = vld [vmem:[#allocation99_spill] sm:$0xff] }
  0xe5   :  { %v4203_v26 = vpop.eup %4202 }
  0xe6   :  { %v738_v27 = vmul.f32 %v4203_v26, %v704_v25  ;;  %v10756_v26 = vld [vmem:[#allocation94_spill] sm:$0xff] }
  0xe8   :  { %v4205_v5 = vpop.eup %4204  ;;  %v6175_v29 = vadd.f32 %v738_v27, %v737_v10  ;;  %v10755_v10 = vld [vmem:[#allocation93_spill] sm:$0xff] }
  0xe9   :  { %v722_v28 = vmul.f32 %v4205_v5, %v690_v4  ;;  %vm727_vm9 = vweird.f32 %v4205_v5  ;;  %v10751_v4 = vld [vmem:[#allocation89_spill] sm:$0xff] }
  0xea   :  { %4206 = vtanh.f32 %v6175_v29  ;;  %vm728_vm10 = vmor %vm726_vm8, %vm727_vm9 }
  0xeb   :  { %v723_v31 = vsub.f32 1.0, %v722_v28  ;;  %v10758_v28 = vld [vmem:[#allocation96_spill] sm:$0xff] }
  0xed   :  { %v724_v33 = vmul.f32 %v4205_v5, %v723_v31  ;;  %v10760_v31 = vld [vmem:[#allocation98_spill] sm:$0xff] }
  0xef   :  { %v725_v35 = vadd.f32 %v4205_v5, %v724_v33  ;;  %v10762_v33 = vld [vmem:[#allocation100_spill] sm:$0xff] }
  0xf0   :  { %v4207_v37 = vpop.eup %4206 }
  0xf1   :  { %v729_v36 = vsel %vm728_vm10, %v4205_v5, %v725_v35  ;;  %v10757_v5 = vld [vmem:[#allocation95_spill] sm:$0xff]  ;;  %v10763_v35 = vld [vmem:[#allocation101_spill] sm:$0xff] }
  0xf2   :  { %v734_v38 = vsel %vm731_vm11, %v733_v34, %v729_v36  ;;  %v10764_v36 = vld [vmem:[#allocation102_spill] sm:$0xff] }
  0xf3   :  { %v6178_v39 = vmul.f32 %v4207_v37, %v734_v38 }
  0xf5   :  { %805 = vst [vmem:[#allocation11] sm:$0xff] %v6178_v39  ;;  %824 = vmatmul.f32.vlgmr.msra.gmra.mxu0 %v6178_v39  ;;  %864 = vmatmul.f32.vlgmr.msra.gmra.mxu2 %v6178_v39 }
  0xf6   :  { %968 = vmatpush.msra.mxu0 %v10735_v40  ;;  %1008 = vmatpush.msra.mxu2 %v10736_v41  ;;  %v10765_v40 = vld [vmem:[#allocation103_spill] sm:$0xff]  ;;  %v10766_v41 = vld [vmem:[#allocation104_spill] sm:$0xff] }
  0xf8   :  { %969 = vmatpush.msra.mxu0 %v10737_v42  ;;  %1009 = vmatpush.msra.mxu2 %v10738_v43 }
  0xfa   :  { %970 = vmatpush.msra.mxu0 %v10739_v44  ;;  %1010 = vmatpush.msra.mxu2 %v10740_v45  ;;  %v673_v45 = vld [vmem:[#allocation8 + $0xf0] sm:$0xff] }
  0xfc   :  { %971 = vmatpush.msra.mxu0 %v10741_v49  ;;  %1011 = vmatpush.msra.mxu2 %v10742_v50  ;;  %v10769_v50 = vld [vmem:[#allocation107_spill] sm:$0xff] }
  0xfd   :  { %904 = vmatmul.f32.vlgmr.msrb.gmra.mxu0 %v6178_v39  ;;  %944 = vmatmul.f32.vlgmr.msrb.gmra.mxu2 %v6178_v39 }
  0xfe   :  { %972 = vmatpush.msra.mxu0 %v10743_v56  ;;  %1012 = vmatpush.msra.mxu2 %v10744_v57 }
 0x100   :  { %973 = vmatpush.msra.mxu0 %v10745_v60  ;;  %1013 = vmatpush.msra.mxu2 %v10746_v61 }
 0x102   :  { %v559_v46 = vpop.f32.mrf.mxu2  ;;  %v579_v47 = vpop.f32.mrf.mxu3  ;;  %974 = vmatpush.msra.mxu0 %v10747_v0  ;;  %1014 = vmatpush.msra.mxu2 %v10748_v1  ;;  %v10775_v1 = vld [vmem:[#allocation113_spill] sm:$0xff] }
 0x103   :  { %v519_v51 = vpop.f32.mrf.mxu0  ;;  %v539_v52 = vpop.f32.mrf.mxu1  ;;  %v580_v54 = vadd.f32 %v579_v47, %v559_v46  ;;  %v10767_v46 = vld [vmem:[#allocation105_spill] sm:$0xff]  ;;  %v10768_v47 = vld [vmem:[#allocation106_spill] sm:$0xff] }
 0x104   :  { %v540_v55 = vadd.f32 %v539_v52, %v519_v51  ;;  %975 = vmatpush.msra.mxu0 %v10749_v2  ;;  %1015 = vmatpush.msra.mxu2 %v10750_v3  ;;  %v10770_v51 = vld [vmem:[#allocation108_spill] sm:$0xff]  ;;  %v10776_v2 = vld [vmem:[#allocation114_spill] sm:$0xff] }
 0x105   :  { %v676_v58 = vadd.f32 %v672_v48, %v580_v54  ;;  %v10771_v54 = vld [vmem:[#allocation109_spill] sm:$0xff] }
 0x106   :  { %v675_v59 = vadd.f32 %v671_v53, %v540_v55  ;;  %976 = vmatpush.msra.mxu0 %v10751_v4  ;;  %1016 = vmatpush.msra.mxu2 %v10752_v6  ;;  %v10772_v55 = vld [vmem:[#allocation110_spill] sm:$0xff] }
 0x107   :  { %v4136_v62 = vmul.f32 -1.442695, %v676_v58  ;;  %v10773_v58 = vld [vmem:[#allocation111_spill] sm:$0xff] }
 0x108   :  { %v4135_v63 = vmul.f32 -1.442695, %v675_v59  ;;  %977 = vmatpush.msra.mxu0 %v10753_v8  ;;  %1017 = vmatpush.msra.mxu2 %v10754_v22  ;;  %v10774_v59 = vld [vmem:[#allocation112_spill] sm:$0xff] }
 0x109   :  { %4208 = vpow2.f32 %v4136_v62  ;;  %v674_v62 = vld [vmem:[#allocation8 + $0xf8] sm:$0xff] }
 0x10a   :  { %4210 = vpow2.f32 %v4135_v63  ;;  %978 = vmatpush.msra.mxu0 %v10755_v10  ;;  %1018 = vmatpush.msra.mxu2 %v10756_v26 }
 0x10c   :  { %979 = vmatpush.msra.mxu0 %v10757_v5  ;;  %1019 = vmatpush.msra.mxu2 %v10758_v28  ;;  %v6352_v5 = vld [vmem:[#allocation10 + $0x6a8] sm:$0xff]  ;;  %v6355_v28 = vld [vmem:[#allocation10 + $0x240] sm:$0xff] }
 0x10d   :  { %10804 = vst [vmem:[#allocation18_spill] sm:$0xff] %v6355_v28 }
 0x10e   :  { %980 = vmatpush.msra.mxu0 %v10759_v30  ;;  %1020 = vmatpush.msra.mxu2 %v10760_v31  ;;  %v10783_v30 = vld [vmem:[#allocation117_spill] sm:$0xff]  ;;  %v10784_v31 = vld [vmem:[#allocation118_spill] sm:$0xff] }
 0x10f   :  { %v4209_v23 = vpop.eup %4208 }
 0x110   :  { %v4211_v24 = vpop.eup %4210  ;;  %v6205_v25 = vadd.f32 1.0, %v4209_v23  ;;  %981 = vmatpush.msra.mxu0 %v10761_v32  ;;  %1021 = vmatpush.msra.mxu2 %v10762_v33  ;;  %v10777_v23 = vld [vmem:[#allocation115_spill] sm:$0xff] }
 0x111   :  { %v6209_v27 = vadd.f32 1.0, %v4211_v24  ;;  %v10778_v24 = vld [vmem:[#allocation116_spill] sm:$0xff] }
 0x112   :  { %4212 = vrcp.f32 %v6205_v25  ;;  %982 = vmatpush.msra.mxu0 %v10763_v35  ;;  %1022 = vmatpush.msra.mxu2 %v10764_v36  ;;  %vm774_vm12 = vweird.f32 %v6205_v25  ;;  %v780_v3 = vand.u32 2147483648, %v6205_v25  ;;  %v778_v22 = vand.u32 2147483647, %v6205_v25 }
 0x113   :  { %4214 = vrcp.f32 %v6209_v27  ;;  %vm759_vm14 = vweird.f32 %v6209_v27  ;;  %v765_v6 = vand.u32 2147483648, %v6209_v27  ;;  %v763_v26 = vand.u32 2147483647, %v6209_v27 }
 0x114   :  { %983 = vmatpush.msra.mxu0 %v10765_v40  ;;  %1023 = vmatpush.msra.mxu2 %v10766_v41  ;;  %v781_v33 = vor.u32 1.1754944e-38, %v780_v3  ;;  %vm779_vm2 = vcmp.eq.f32.partialorder %v778_v22, 8.507059e+37  ;;  %v10787_v41 = vld [vmem:[#allocation121_spill] sm:$0xff]  ;;  %v6318_v3 = vld [vmem:[#allocation10 + $0x7a8] sm:$0xff] }
 0x115   :  { %984 = vmatmul.f32.vlgmr.msra.gmra.mxu0 %v6178_v39  ;;  %1024 = vmatmul.f32.vlgmr.msra.gmra.mxu2 %v6178_v39  ;;  %v766_v36 = vor.u32 1.1754944e-38, %v765_v6  ;;  %vm764_vm3 = vcmp.eq.f32.partialorder %v763_v26, 8.507059e+37  ;;  %v10803_v6 = vld [vmem:[#allocation143_spill] sm:$0xff] }
 0x116   :  { %1048 = vmatpush.msrb.mxu0 %v10767_v46  ;;  %1088 = vmatpush.msrb.mxu2 %v10768_v47  ;;  %v10789_v46 = vld [vmem:[#allocation123_spill] sm:$0xff] }
 0x117   :  { %v6326_v22 = vld [vmem:[#allocation10 + $0x768] sm:$0xff] }
 0x118   :  { %v6219_v34 = vpop.eup %4212  ;;  %1049 = vmatpush.msrb.mxu0 %v10769_v50  ;;  %1089 = vmatpush.msrb.mxu2 %v10770_v51  ;;  %v10792_v50 = vld [vmem:[#allocation126_spill] sm:$0xff]  ;;  %v6342_v26 = vld [vmem:[#allocation10 + $0x6e8] sm:$0xff] }
 0x119   :  { %v6223_v37 = vpop.eup %4214  ;;  %v770_v38 = vmul.f32 %v6219_v34, %v6205_v25  ;;  %vm775_vm13 = vweird.f32 %v6219_v34 }
 0x11a   :  { %v755_v42 = vmul.f32 %v6223_v37, %v6209_v27  ;;  %1050 = vmatpush.msrb.mxu0 %v10771_v54  ;;  %1090 = vmatpush.msrb.mxu2 %v10772_v55  ;;  %vm760_vm15 = vweird.f32 %v6223_v37  ;;  %vm6259_vm0 = vmor %vm774_vm12, %vm775_vm13  ;;  %v10785_v27 = vld [vmem:[#allocation119_spill] sm:$0xff]  ;;  %v10795_v55 = vld [vmem:[#allocation129_spill] sm:$0xff] }
 0x11b   :  { %v771_v49 = vsub.f32 1.0, %v770_v38  ;;  %vm6263_vm1 = vmor %vm759_vm14, %vm760_vm15  ;;  %v10786_v38 = vld [vmem:[#allocation120_spill] sm:$0xff] }
 0x11c   :  { %v599_v43 = vpop.f32.mrf.mxu0  ;;  %v619_v44 = vpop.f32.mrf.mxu1  ;;  %v756_v52 = vsub.f32 1.0, %v755_v42  ;;  %1051 = vmatpush.msrb.mxu0 %v10773_v58  ;;  %1091 = vmatpush.msrb.mxu2 %v10774_v59  ;;  %v10788_v42 = vld [vmem:[#allocation122_spill] sm:$0xff] }
 0x11d   :  { %v620_v48 = vadd.f32 %v619_v44, %v599_v43  ;;  %v772_v57 = vmul.f32 %v6219_v34, %v771_v49  ;;  %v10791_v49 = vld [vmem:[#allocation125_spill] sm:$0xff] }
 0x11e   :  { %v757_v63 = vmul.f32 %v6223_v37, %v756_v52  ;;  %1052 = vmatpush.msrb.mxu0 %v10775_v1  ;;  %1092 = vmatpush.msrb.mxu2 %v10776_v2  ;;  %v10793_v52 = vld [vmem:[#allocation127_spill] sm:$0xff]  ;;  %v6315_v2 = vld [vmem:[#allocation10 + $0x7a0] sm:$0xff] }
 0x11f   :  { %v677_v53 = vadd.f32 %v673_v45, %v620_v48  ;;  %v773_v8 = vadd.f32 %v6219_v34, %v772_v57  ;;  %v10799_v1 = vld [vmem:[#allocation135_spill] sm:$0xff] }
 0x120   :  { %1053 = vmatpush.msrb.mxu0 %v10777_v23  ;;  %1093 = vmatpush.msrb.mxu2 %v10778_v24  ;;  %v758_v10 = vadd.f32 %v6223_v37, %v757_v63  ;;  %v6331_v23 = vld [vmem:[#allocation10 + $0x720] sm:$0xff]  ;;  %v6334_v24 = vld [vmem:[#allocation10 + $0x728] sm:$0xff] }
 0x121   :  { %v4137_v56 = vmul.f32 -1.442695, %v677_v53  ;;  %v777_v25 = vsel %vm6259_vm0, %v6219_v34, %v773_v8  ;;  %v10790_v34 = vld [vmem:[#allocation124_spill] sm:$0xff]  ;;  %v6323_v8 = vld [vmem:[#allocation10 + $0x760] sm:$0xff] }
 0x122   :  { %1054 = vmatpush.msrb.mxu0 %v10783_v30  ;;  %1094 = vmatpush.msrb.mxu2 %v10784_v31  ;;  %v762_v40 = vsel %vm6263_vm1, %v6223_v37, %v758_v10  ;;  %v782_v43 = vsel %vm779_vm2, %v781_v33, %v777_v25  ;;  %v10794_v53 = vld [vmem:[#allocation128_spill] sm:$0xff]  ;;  %v6339_v10 = vld [vmem:[#allocation10 + $0x6e0] sm:$0xff]  ;;  %v6358_v30 = vld [vmem:[#allocation10 + $0x248] sm:$0xff] }
 0x123   :  { %4216 = vpow2.f32 %v4137_v56  ;;  %v639_v60 = vpop.f32.mrf.mxu2  ;;  %v659_v61 = vpop.f32.mrf.mxu3  ;;  %v767_v45 = vsel %vm764_vm3, %v766_v36, %v762_v40  ;;  %v800_v48 = vmul.f32 0.0, %v782_v43  ;;  %v10796_v56 = vld [vmem:[#allocation130_spill] sm:$0xff]  ;;  %10805 = vst [vmem:[#allocation21_spill] sm:$0xff] %v6358_v30  ;;  %v6364_v31 = vld [vmem:[#allocation10 + $0x668] sm:$0xff] }
 0x124   :  { %v660_v0 = vadd.f32 %v659_v61, %v639_v60  ;;  %1055 = vmatpush.msrb.mxu0 %v10785_v27  ;;  %1095 = vmatpush.msrb.mxu2 %v10786_v38  ;;  %v6370_v33 = vld [vmem:[#allocation10 + $0x208] sm:$0xff]  ;;  %v6379_v25 = vld [vmem:[#allocation10 + $0x1c0] sm:$0xff] }
 0x125   :  { %10807 = vst [vmem:[#allocation19_spill] sm:$0xff] %v6370_v33  ;;  %v6376_v36 = vld [vmem:[#allocation10 + $0x628] sm:$0xff]  ;;  %v6385_v38 = vld [vmem:[#allocation10 + $0x5e0] sm:$0xff] }
 0x126   :  { %v678_v4 = vadd.f32 %v674_v62, %v660_v0  ;;  %1056 = vmatpush.msrb.mxu0 %v10787_v41  ;;  %1096 = vmatpush.msrb.mxu2 %v10788_v42  ;;  %v10798_v0 = vld [vmem:[#allocation134_spill] sm:$0xff]  ;;  %10808 = vst [vmem:[#allocation20_spill] sm:$0xff] %v6379_v25  ;;  %v6382_v27 = vld [vmem:[#allocation10 + $0x1c8] sm:$0xff] }
 0x127   :  { %10809 = vst [vmem:[#allocation25_spill] sm:$0xff] %v6382_v27  ;;  %v6388_v40 = vld [vmem:[#allocation10 + $0x5e8] sm:$0xff]  ;;  %v6391_v41 = vld [vmem:[#allocation10 + $0x180] sm:$0xff] }
 0x128   :  { %4218 = vtanh.f32 %v678_v4  ;;  %1057 = vmatpush.msrb.mxu0 %v10789_v46  ;;  %1097 = vmatpush.msrb.mxu2 %v10790_v34  ;;  %v10802_v4 = vld [vmem:[#allocation142_spill] sm:$0xff]  ;;  %10810 = vst [vmem:[#allocation27_spill] sm:$0xff] %v6391_v41  ;;  %v6394_v42 = vld [vmem:[#allocation10 + $0x188] sm:$0xff] }
 0x129   :  { %v4217_v32 = vpop.eup %4216  ;;  %10811 = vst [vmem:[#allocation22_spill] sm:$0xff] %v6394_v42  ;;  %v6397_v43 = vld [vmem:[#allocation10 + $0x5a0] sm:$0xff]  ;;  %v6406_v46 = vld [vmem:[#allocation10 + $0x148] sm:$0xff] }
 0x12a   :  { %v753_v35 = vadd.f32 1.0, %v4217_v32  ;;  %1058 = vmatpush.msrb.mxu0 %v10791_v49  ;;  %1098 = vmatpush.msrb.mxu2 %v10792_v50  ;;  %v6367_v32 = vld [vmem:[#allocation10 + $0x200] sm:$0xff]  ;;  %10813 = vst [vmem:[#allocation29_spill] sm:$0xff] %v6406_v46  ;;  %v6418_v49 = vld [vmem:[#allocation10 + $0x108] sm:$0xff] }
 0x12b   :  { %10806 = vst [vmem:[#allocation23_spill] sm:$0xff] %v6367_v32  ;;  %v6409_v34 = vld [vmem:[#allocation10 + $0x560] sm:$0xff] }
 0x12c   :  { %4220 = vrcp.f32 %v753_v35  ;;  %1059 = vmatpush.msrb.mxu0 %v10793_v52  ;;  %1099 = vmatpush.msrb.mxu2 %v10794_v53  ;;  %v795_v58 = vand.u32 2147483648, %v753_v35  ;;  %v793_v60 = vand.u32 2147483647, %v753_v35  ;;  %vm789_vm5 = vweird.f32 %v753_v35  ;;  %10815 = vst [vmem:[#allocation26_spill] sm:$0xff] %v6418_v49  ;;  %v6421_v50 = vld [vmem:[#allocation10 + $0x520] sm:$0xff]  ;;  %v6430_v53 = vld [vmem:[#allocation10 + $0xc8] sm:$0xff] }
 0x12d   :  { %v6427_v52 = vld [vmem:[#allocation10 + $0xc0] sm:$0xff]  ;;  %10817 = vst [vmem:[#allocation33_spill] sm:$0xff] %v6430_v53 }
 0x12e   :  { %v4219_v44 = vpop.eup %4218  ;;  %1060 = vmatpush.msrb.mxu0 %v10795_v55  ;;  %1100 = vmatpush.msrb.mxu2 %v10796_v56  ;;  %v796_v62 = vor.u32 1.1754944e-38, %v795_v58  ;;  %vm794_vm7 = vcmp.eq.f32.partialorder %v793_v60, 8.507059e+37  ;;  %10816 = vst [vmem:[#allocation28_spill] sm:$0xff] %v6427_v52  ;;  %v6436_v55 = vld [vmem:[#allocation10 + $0x4e8] sm:$0xff]  ;;  %v6439_v56 = vld [vmem:[#allocation10 + $0x80] sm:$0xff] }
 0x12f   :  { %v801_v47 = vmul.f32 %v4219_v44, %v767_v45  ;;  %v6400_v44 = vld [vmem:[#allocation10 + $0x5a8] sm:$0xff]  ;;  %v6403_v45 = vld [vmem:[#allocation10 + $0x140] sm:$0xff]  ;;  %10818 = vst [vmem:[#allocation35_spill] sm:$0xff] %v6439_v56 }
 0x130   :  { %1061 = vmatpush.msrb.mxu0 %v5978_v20  ;;  %1101 = vmatpush.msrb.mxu2 %v5981_v18  ;;  %10812 = vst [vmem:[#allocation24_spill] sm:$0xff] %v6403_v45  ;;  %v6445_v58 = vld [vmem:[#allocation10 + $0x4a0] sm:$0xff] }
 0x131   :  { %v6283_v51 = vadd.f32 %v801_v47, %v800_v48  ;;  %v6412_v47 = vld [vmem:[#allocation10 + $0x568] sm:$0xff]  ;;  %v6415_v48 = vld [vmem:[#allocation10 + $0x100] sm:$0xff] }
 0x132   :  { %v4221_v37 = vpop.eup %4220  ;;  %1062 = vmatpush.msrb.mxu0 %v5984_v14  ;;  %1102 = vmatpush.msrb.mxu2 %v5987_v21  ;;  %v10797_v14 = vld [vmem:[#allocation131_spill] sm:$0xff]  ;;  %10814 = vst [vmem:[#allocation31_spill] sm:$0xff] %v6415_v48  ;;  %v6451_v60 = vld [vmem:[#allocation10 + $0x40] sm:$0xff] }
 0x133   :  { %v785_v54 = vmul.f32 %v4221_v37, %v753_v35  ;;  %4222 = vtanh.f32 %v6283_v51  ;;  %vm790_vm4 = vweird.f32 %v4221_v37  ;;  %v6373_v35 = vld [vmem:[#allocation10 + $0x620] sm:$0xff]  ;;  %10820 = vst [vmem:[#allocation32_spill] sm:$0xff] %v6451_v60 }
 0x134   :  { %vm791_vm6 = vmor %vm789_vm5, %vm790_vm4  ;;  %1063 = vmatpush.msrb.mxu0 %v5990_v11  ;;  %1103 = vmatpush.msrb.mxu2 %v5993_v9  ;;  %v6307_v9 = vld [vmem:[#allocation10 + $0x7e0] sm:$0xff]  ;;  %v6310_v11 = vld [vmem:[#allocation10 + $0x7e8] sm:$0xff] }
 0x135   :  { %v786_v57 = vsub.f32 1.0, %v785_v54  ;;  %1064 = vmatmul.f32.vlgmr.msrb.gmra.mxu0 %v6178_v39  ;;  %1104 = vmatmul.f32.vlgmr.msrb.gmra.mxu2 %v6178_v39  ;;  %v10801_v39 = vld [vmem:[#allocation139_spill] sm:$0xff]  ;;  %v6433_v54 = vld [vmem:[#allocation10 + $0x4e0] sm:$0xff] }
 0x136   :  { %1276 = vmatpush.msra.mxu0 %v6002_v16  ;;  %1316 = vmatpush.msra.mxu2 %v10797_v14  ;;  %v10800_v16 = vld [vmem:[#allocation138_spill] sm:$0xff] }
 0x137   :  { %v787_v59 = vmul.f32 %v4221_v37, %v786_v57  ;;  %v6442_v57 = vld [vmem:[#allocation10 + $0x88] sm:$0xff]  ;;  %v6469_v14 = vld [vmem:[#allocation10 + $0x420] sm:$0xff] }
 0x138   :  { %1277 = vmatpush.msra.mxu0 %v10798_v0  ;;  %1317 = vmatpush.msra.mxu2 %v10799_v1  ;;  %10819 = vst [vmem:[#allocation30_spill] sm:$0xff] %v6442_v57  ;;  %v6472_v0 = vld [vmem:[#allocation10 + $0x428] sm:$0xff]  ;;  %v6477_v1 = vld [vmem:[#allocation10 + $0x7f0] sm:$0xff] }
 0x139   :  { %v788_v61 = vadd.f32 %v4221_v37, %v787_v59  ;;  %v4223_v20 = vpop.eup %4222  ;;  %v6448_v59 = vld [vmem:[#allocation10 + $0x4a8] sm:$0xff]  ;;  %10824 = vst [vmem:[#allocation36_spill] sm:$0xff] %v6469_v14 }
 0x13a   :  { %1278 = vmatpush.msra.mxu0 %v10800_v16  ;;  %1318 = vmatpush.msra.mxu2 %v10801_v39  ;;  %10825 = vst [vmem:[#allocation41_spill] sm:$0xff] %v6472_v0  ;;  %v6480_v16 = vld [vmem:[#allocation10 + $0x7f8] sm:$0xff]  ;;  %v6483_v39 = vld [vmem:[#allocation10 + $0x3d0] sm:$0xff] }
 0x13b   :  { %v792_v63 = vsel %vm791_vm6, %v4221_v37, %v788_v61  ;;  %v6424_v37 = vld [vmem:[#allocation10 + $0x528] sm:$0xff]  ;;  %10826 = vst [vmem:[#allocation43_spill] sm:$0xff] %v6477_v1 }
 0x13c   :  { %v797_v18 = vsel %vm794_vm7, %v796_v62, %v792_v63  ;;  %1279 = vmatpush.msra.mxu0 %v10802_v4  ;;  %1319 = vmatpush.msra.mxu2 %v10803_v6  ;;  %v6454_v61 = vld [vmem:[#allocation10 + $0x48] sm:$0xff]  ;;  %v6457_v62 = vld [vmem:[#allocation10 + $0x460] sm:$0xff]  ;;  %10827 = vst [vmem:[#allocation38_spill] sm:$0xff] %v6480_v16  ;;  %v6486_v4 = vld [vmem:[#allocation10 + $0x3d8] sm:$0xff] }
 0x13d   :  { %v6300_v21 = vmul.f32 %v4223_v20, %v797_v18  ;;  %10821 = vst [vmem:[#allocation37_spill] sm:$0xff] %v6454_v61  ;;  %v6460_v63 = vld [vmem:[#allocation10 + $0x468] sm:$0xff]  ;;  %v6463_v20 = vld [vmem:[#allocation10] sm:$0xff]  ;;  %v6489_v6 = vld [vmem:[#allocation10 + $0x7b0] sm:$0xff] }
 0x13e   :  { %1280 = vmatpush.msra.mxu0 %v6050_v13  ;;  %1320 = vmatpush.msra.mxu2 %v6053_v17  ;;  %v6346_v13 = vld [vmem:[#allocation10 + $0x288] sm:$0xff]  ;;  %v6349_v17 = vld [vmem:[#allocation10 + $0x6a0] sm:$0xff]  ;;  %10822 = vst [vmem:[#allocation39_spill] sm:$0xff] %v6463_v20 }
 0x13f   :  { %807 = vst [vmem:[#allocation12 + $0x38] sm:$0xff] %v6300_v21  ;;  %844 = vmatmul.f32.vlgmr.msra.gmra.mxu1 %v6300_v21  ;;  %884 = vmatmul.f32.vlgmr.msra.gmra.mxu3 %v6300_v21  ;;  %v6466_v18 = vld [vmem:[#allocation10 + $0x8] sm:$0xff] }
 0x140   :  { %988 = vmatpush.msra.mxu1 %v6307_v9  ;;  %1028 = vmatpush.msra.mxu3 %v6310_v11  ;;  %10823 = vst [vmem:[#allocation34_spill] sm:$0xff] %v6466_v18 }
 0x141   :  { %1281 = vmatpush.msra.mxu0 %v6062_v7  ;;  %1321 = vmatpush.msra.mxu2 %v6346_v13  ;;  %v6361_v7 = vld [vmem:[#allocation10 + $0x660] sm:$0xff]  ;;  %10828 = vst [vmem:[#allocation40_spill] sm:$0xff] %v6483_v39 }
 0x142   :  { %989 = vmatpush.msra.mxu1 %v6315_v2  ;;  %1029 = vmatpush.msra.mxu3 %v6318_v3  ;;  %10829 = vst [vmem:[#allocation45_spill] sm:$0xff] %v6486_v4 }
 0x143   :  { %1282 = vmatpush.msra.mxu0 %v6355_v28  ;;  %1322 = vmatpush.msra.mxu2 %v6358_v30  ;;  %10830 = vst [vmem:[#allocation47_spill] sm:$0xff] %v6489_v6 }
 0x144   :  { %990 = vmatpush.msra.mxu1 %v6323_v8  ;;  %1030 = vmatpush.msra.mxu3 %v6326_v22 }
 0x145   :  { %1283 = vmatpush.msra.mxu0 %v6367_v32  ;;  %1323 = vmatpush.msra.mxu2 %v6370_v33  ;;  %v1139_v32 = vld [vmem:[#allocation8 + $0xc8] sm:$0xff] }
 0x146   :  { %991 = vmatpush.msra.mxu1 %v6331_v23  ;;  %1031 = vmatpush.msra.mxu3 %v6334_v24 }
 0x147   :  { %924 = vmatmul.f32.vlgmr.msrb.gmra.mxu1 %v6300_v21  ;;  %964 = vmatmul.f32.vlgmr.msrb.gmra.mxu3 %v6300_v21 }
 0x148   :  { %992 = vmatpush.msra.mxu1 %v6339_v10  ;;  %1032 = vmatpush.msra.mxu3 %v6342_v26 }
 0x149   :  { %1284 = vmatpush.msra.mxu0 %v6379_v25  ;;  %1324 = vmatpush.msra.mxu2 %v6382_v27 }
 0x14a   :  { %993 = vmatpush.msra.mxu1 %v6349_v17  ;;  %1033 = vmatpush.msra.mxu3 %v6352_v5 }
 0x14b   :  { %1285 = vmatpush.msra.mxu0 %v6391_v41  ;;  %1325 = vmatpush.msra.mxu2 %v6394_v42  ;;  %v1131_v41 = vld [vmem:[#allocation5 + $0x30] sm:$0xff] }
 0x14c   :  { %994 = vmatpush.msra.mxu1 %v6361_v7  ;;  %1034 = vmatpush.msra.mxu3 %v6364_v31 }
 0x14d   :  { %1286 = vmatpush.msra.mxu0 %v6403_v45  ;;  %1326 = vmatpush.msra.mxu2 %v6406_v46  ;;  %v6546_v46 = vld [vmem:[#allocation10 + $0x298] sm:$0xff] }
 0x14e   :  { %995 = vmatpush.msra.mxu1 %v6373_v35  ;;  %1035 = vmatpush.msra.mxu3 %v6376_v36  ;;  %10849 = vst [vmem:[#allocation65_spill] sm:$0xff] %v6546_v46  ;;  %v10893_v45 = vld [vmem:[#allocation137_spill] sm:$0xff] }
 0x14f   :  { %1287 = vmatpush.msra.mxu0 %v6415_v48  ;;  %1327 = vmatpush.msra.mxu2 %v6418_v49  ;;  %v6534_v49 = vld [vmem:[#allocation10 + $0x2d8] sm:$0xff]  ;;  %v6543_v48 = vld [vmem:[#allocation10 + $0x290] sm:$0xff] }
 0x150   :  { %996 = vmatpush.msra.mxu1 %v6385_v38  ;;  %1036 = vmatpush.msra.mxu3 %v6388_v40  ;;  %10845 = vst [vmem:[#allocation61_spill] sm:$0xff] %v6534_v49 }
 0x151   :  { %1288 = vmatpush.msra.mxu0 %v6427_v52  ;;  %1328 = vmatpush.msra.mxu2 %v6430_v53  ;;  %v6522_v53 = vld [vmem:[#allocation10 + $0x318] sm:$0xff]  ;;  %v6531_v52 = vld [vmem:[#allocation10 + $0x2d0] sm:$0xff]  ;;  %10848 = vst [vmem:[#allocation60_spill] sm:$0xff] %v6543_v48 }
 0x152   :  { %997 = vmatpush.msra.mxu1 %v6397_v43  ;;  %1037 = vmatpush.msra.mxu3 %v6400_v44  ;;  %10841 = vst [vmem:[#allocation57_spill] sm:$0xff] %v6522_v53 }
 0x153   :  { %1289 = vmatpush.msra.mxu0 %v6439_v56  ;;  %1329 = vmatpush.msra.mxu2 %v6442_v57  ;;  %v6510_v57 = vld [vmem:[#allocation10 + $0x358] sm:$0xff]  ;;  %v6519_v56 = vld [vmem:[#allocation10 + $0x310] sm:$0xff]  ;;  %10844 = vst [vmem:[#allocation56_spill] sm:$0xff] %v6531_v52 }
 0x154   :  { %998 = vmatpush.msra.mxu1 %v6409_v34  ;;  %1038 = vmatpush.msra.mxu3 %v6412_v47  ;;  %10837 = vst [vmem:[#allocation53_spill] sm:$0xff] %v6510_v57 }
 0x155   :  { %1290 = vmatpush.msra.mxu0 %v6451_v60  ;;  %1330 = vmatpush.msra.mxu2 %v6454_v61  ;;  %v6498_v61 = vld [vmem:[#allocation10 + $0x398] sm:$0xff]  ;;  %v6507_v60 = vld [vmem:[#allocation10 + $0x350] sm:$0xff]  ;;  %10840 = vst [vmem:[#allocation52_spill] sm:$0xff] %v6519_v56 }
 0x156   :  { %999 = vmatpush.msra.mxu1 %v6421_v50  ;;  %1039 = vmatpush.msra.mxu3 %v6424_v37  ;;  %10833 = vst [vmem:[#allocation49_spill] sm:$0xff] %v6498_v61 }
 0x157   :  { %1291 = vmatpush.msra.mxu0 %v6463_v20  ;;  %1331 = vmatpush.msra.mxu2 %v6466_v18  ;;  %v6492_v18 = vld [vmem:[#allocation10 + $0x7b8] sm:$0xff]  ;;  %v6495_v20 = vld [vmem:[#allocation10 + $0x390] sm:$0xff]  ;;  %10836 = vst [vmem:[#allocation48_spill] sm:$0xff] %v6507_v60 }
 0x158   :  { %1000 = vmatpush.msra.mxu1 %v6433_v54  ;;  %1040 = vmatpush.msra.mxu3 %v6436_v55  ;;  %10831 = vst [vmem:[#allocation42_spill] sm:$0xff] %v6492_v18 }
 0x159   :  { %1356 = vmatpush.msrb.mxu0 %v6483_v39  ;;  %1396 = vmatpush.msrb.mxu2 %v6486_v4  ;;  %10832 = vst [vmem:[#allocation44_spill] sm:$0xff] %v6495_v20  ;;  %v6501_v39 = vld [vmem:[#allocation10 + $0x770] sm:$0xff]  ;;  %v6504_v4 = vld [vmem:[#allocation10 + $0x778] sm:$0xff] }
 0x15a   :  { %1001 = vmatpush.msra.mxu1 %v6445_v58  ;;  %1041 = vmatpush.msra.mxu3 %v6448_v59  ;;  %10834 = vst [vmem:[#allocation51_spill] sm:$0xff] %v6501_v39 }
 0x15b   :  { %1357 = vmatpush.msrb.mxu0 %v6495_v20  ;;  %1397 = vmatpush.msrb.mxu2 %v6498_v61  ;;  %10835 = vst [vmem:[#allocation46_spill] sm:$0xff] %v6504_v4  ;;  %v6513_v20 = vld [vmem:[#allocation10 + $0x730] sm:$0xff]  ;;  %v6516_v61 = vld [vmem:[#allocation10 + $0x738] sm:$0xff] }
 0x15c   :  { %1002 = vmatpush.msra.mxu1 %v6457_v62  ;;  %1042 = vmatpush.msra.mxu3 %v6460_v63  ;;  %10838 = vst [vmem:[#allocation55_spill] sm:$0xff] %v6513_v20 }
 0x15d   :  { %1358 = vmatpush.msrb.mxu0 %v6507_v60  ;;  %1398 = vmatpush.msrb.mxu2 %v6510_v57  ;;  %10839 = vst [vmem:[#allocation50_spill] sm:$0xff] %v6516_v61  ;;  %v6525_v60 = vld [vmem:[#allocation10 + $0x6f0] sm:$0xff]  ;;  %v6528_v57 = vld [vmem:[#allocation10 + $0x6f8] sm:$0xff] }
 0x15e   :  { %1003 = vmatpush.msra.mxu1 %v6469_v14  ;;  %1043 = vmatpush.msra.mxu3 %v6472_v0  ;;  %10842 = vst [vmem:[#allocation59_spill] sm:$0xff] %v6525_v60 }
 0x15f   :  { %1004 = vmatmul.f32.vlgmr.msra.gmra.mxu1 %v6300_v21  ;;  %1044 = vmatmul.f32.vlgmr.msra.gmra.mxu3 %v6300_v21  ;;  %10843 = vst [vmem:[#allocation54_spill] sm:$0xff] %v6528_v57 }
 0x160   :  { %1068 = vmatpush.msrb.mxu1 %v6477_v1  ;;  %1108 = vmatpush.msrb.mxu3 %v6480_v16 }
 0x161   :  { %1359 = vmatpush.msrb.mxu0 %v6519_v56  ;;  %1399 = vmatpush.msrb.mxu2 %v6522_v53  ;;  %v6537_v56 = vld [vmem:[#allocation10 + $0x6b0] sm:$0xff]  ;;  %v6540_v53 = vld [vmem:[#allocation10 + $0x6b8] sm:$0xff] }
 0x162   :  { %1069 = vmatpush.msrb.mxu1 %v6489_v6  ;;  %1109 = vmatpush.msrb.mxu3 %v6492_v18  ;;  %10846 = vst [vmem:[#allocation63_spill] sm:$0xff] %v6537_v56 }
 0x163   :  { %1360 = vmatpush.msrb.mxu0 %v6531_v52  ;;  %1400 = vmatpush.msrb.mxu2 %v6534_v49  ;;  %10847 = vst [vmem:[#allocation58_spill] sm:$0xff] %v6540_v53  ;;  %v6549_v52 = vld [vmem:[#allocation10 + $0x670] sm:$0xff]  ;;  %v6552_v49 = vld [vmem:[#allocation10 + $0x678] sm:$0xff] }
 0x164   :  { %1070 = vmatpush.msrb.mxu1 %v6501_v39  ;;  %1110 = vmatpush.msrb.mxu3 %v6504_v4  ;;  %10850 = vst [vmem:[#allocation67_spill] sm:$0xff] %v6549_v52 }
 0x165   :  { %1361 = vmatpush.msrb.mxu0 %v6543_v48  ;;  %1401 = vmatpush.msrb.mxu2 %v6546_v46  ;;  %10851 = vst [vmem:[#allocation62_spill] sm:$0xff] %v6552_v49  ;;  %v6561_v48 = vld [vmem:[#allocation10 + $0x630] sm:$0xff]  ;;  %v6564_v46 = vld [vmem:[#allocation10 + $0x638] sm:$0xff] }
 0x166   :  { %1071 = vmatpush.msrb.mxu1 %v6513_v20  ;;  %1111 = vmatpush.msrb.mxu3 %v6516_v61  ;;  %10854 = vst [vmem:[#allocation71_spill] sm:$0xff] %v6561_v48 }
 0x167   :  { %10855 = vst [vmem:[#allocation66_spill] sm:$0xff] %v6564_v46 }
 0x168   :  { %1072 = vmatpush.msrb.mxu1 %v6525_v60  ;;  %1112 = vmatpush.msrb.mxu3 %v6528_v57  ;;  %v10895_v57 = vld [vmem:[#allocation141_spill] sm:$0xff] }
 0x16a   :  { %1073 = vmatpush.msrb.mxu1 %v6537_v56  ;;  %1113 = vmatpush.msrb.mxu3 %v6540_v53  ;;  %v6555_v56 = vld [vmem:[#allocation10 + $0x250] sm:$0xff]  ;;  %v6558_v53 = vld [vmem:[#allocation10 + $0x258] sm:$0xff] }
 0x16b   :  { %10852 = vst [vmem:[#allocation64_spill] sm:$0xff] %v6555_v56  ;;  %1362 = vmatpush.msrb.mxu0 %v6555_v56  ;;  %1402 = vmatpush.msrb.mxu2 %v6558_v53  ;;  %v6573_v56 = vld [vmem:[#allocation10 + $0x5f0] sm:$0xff] }
 0x16c   :  { %1074 = vmatpush.msrb.mxu1 %v6549_v52  ;;  %1114 = vmatpush.msrb.mxu3 %v6552_v49  ;;  %10853 = vst [vmem:[#allocation69_spill] sm:$0xff] %v6558_v53  ;;  %v6567_v52 = vld [vmem:[#allocation10 + $0x210] sm:$0xff]  ;;  %v6570_v49 = vld [vmem:[#allocation10 + $0x218] sm:$0xff] }
 0x16d   :  { %10856 = vst [vmem:[#allocation68_spill] sm:$0xff] %v6567_v52  ;;  %1363 = vmatpush.msrb.mxu0 %v6567_v52  ;;  %1403 = vmatpush.msrb.mxu2 %v6570_v49  ;;  %v6576_v53 = vld [vmem:[#allocation10 + $0x5f8] sm:$0xff]  ;;  %v6585_v52 = vld [vmem:[#allocation10 + $0x5b0] sm:$0xff] }
 0x16e   :  { %1075 = vmatpush.msrb.mxu1 %v6561_v48  ;;  %1115 = vmatpush.msrb.mxu3 %v6564_v46  ;;  %10857 = vst [vmem:[#allocation70_spill] sm:$0xff] %v6570_v49  ;;  %v6579_v48 = vld [vmem:[#allocation10 + $0x1d0] sm:$0xff]  ;;  %v6582_v46 = vld [vmem:[#allocation10 + $0x1d8] sm:$0xff] }
 0x16f   :  { %10858 = vst [vmem:[#allocation72_spill] sm:$0xff] %v6573_v56  ;;  %1364 = vmatpush.msrb.mxu0 %v6579_v48  ;;  %1404 = vmatpush.msrb.mxu2 %v6582_v46  ;;  %v6588_v49 = vld [vmem:[#allocation10 + $0x5b8] sm:$0xff] }
 0x170   :  { %1076 = vmatpush.msrb.mxu1 %v6573_v56  ;;  %10859 = vst [vmem:[#allocation73_spill] sm:$0xff] %v6576_v53  ;;  %1116 = vmatpush.msrb.mxu3 %v6576_v53  ;;  %v6591_v56 = vld [vmem:[#allocation10 + $0x190] sm:$0xff]  ;;  %v6594_v53 = vld [vmem:[#allocation10 + $0x198] sm:$0xff] }
 0x171   :  { %10860 = vst [vmem:[#allocation74_spill] sm:$0xff] %v6579_v48  ;;  %1365 = vmatpush.msrb.mxu0 %v6591_v56  ;;  %1405 = vmatpush.msrb.mxu2 %v6594_v53  ;;  %v6597_v48 = vld [vmem:[#allocation10 + $0x570] sm:$0xff] }
 0x172   :  { %10861 = vst [vmem:[#allocation75_spill] sm:$0xff] %v6582_v46  ;;  %1077 = vmatpush.msrb.mxu1 %v6585_v52  ;;  %1117 = vmatpush.msrb.mxu3 %v6588_v49  ;;  %v6600_v46 = vld [vmem:[#allocation10 + $0x578] sm:$0xff] }
 0x173   :  { %10862 = vst [vmem:[#allocation76_spill] sm:$0xff] %v6585_v52  ;;  %v6603_v52 = vld [vmem:[#allocation10 + $0x150] sm:$0xff] }
 0x174   :  { %10863 = vst [vmem:[#allocation77_spill] sm:$0xff] %v6588_v49  ;;  %1078 = vmatpush.msrb.mxu1 %v6597_v48  ;;  %1118 = vmatpush.msrb.mxu3 %v6600_v46  ;;  %v6606_v49 = vld [vmem:[#allocation10 + $0x158] sm:$0xff] }
 0x175   :  { %10864 = vst [vmem:[#allocation78_spill] sm:$0xff] %v6591_v56  ;;  %1366 = vmatpush.msrb.mxu0 %v6603_v52  ;;  %1406 = vmatpush.msrb.mxu2 %v6606_v49  ;;  %v6609_v56 = vld [vmem:[#allocation10 + $0x530] sm:$0xff] }
 0x176   :  { %10865 = vst [vmem:[#allocation79_spill] sm:$0xff] %v6594_v53  ;;  %1079 = vmatpush.msrb.mxu1 %v6609_v56  ;;  %v6612_v53 = vld [vmem:[#allocation10 + $0x538] sm:$0xff] }
 0x177   :  { %10866 = vst [vmem:[#allocation80_spill] sm:$0xff] %v6597_v48  ;;  %1119 = vmatpush.msrb.mxu3 %v6612_v53  ;;  %v6615_v48 = vld [vmem:[#allocation10 + $0x110] sm:$0xff] }
 0x178   :  { %10867 = vst [vmem:[#allocation81_spill] sm:$0xff] %v6600_v46  ;;  %1367 = vmatpush.msrb.mxu0 %v6615_v48  ;;  %v6618_v46 = vld [vmem:[#allocation10 + $0x118] sm:$0xff] }
 0x179   :  { %10868 = vst [vmem:[#allocation82_spill] sm:$0xff] %v6603_v52  ;;  %1407 = vmatpush.msrb.mxu2 %v6618_v46  ;;  %v6621_v52 = vld [vmem:[#allocation10 + $0x4f0] sm:$0xff] }
 0x17a   :  { %10869 = vst [vmem:[#allocation83_spill] sm:$0xff] %v6606_v49  ;;  %1080 = vmatpush.msrb.mxu1 %v6621_v52  ;;  %v6624_v49 = vld [vmem:[#allocation10 + $0x4f8] sm:$0xff] }
 0x17b   :  { %10870 = vst [vmem:[#allocation84_spill] sm:$0xff] %v6609_v56  ;;  %1120 = vmatpush.msrb.mxu3 %v6624_v49  ;;  %v6627_v56 = vld [vmem:[#allocation10 + $0xd0] sm:$0xff] }
 0x17c   :  { %10871 = vst [vmem:[#allocation85_spill] sm:$0xff] %v6612_v53  ;;  %1368 = vmatpush.msrb.mxu0 %v6627_v56  ;;  %v6630_v53 = vld [vmem:[#allocation10 + $0xd8] sm:$0xff] }
 0x17d   :  { %10872 = vst [vmem:[#allocation86_spill] sm:$0xff] %v6615_v48  ;;  %1408 = vmatpush.msrb.mxu2 %v6630_v53  ;;  %v6633_v48 = vld [vmem:[#allocation10 + $0x4b0] sm:$0xff] }
 0x17e   :  { %10873 = vst [vmem:[#allocation87_spill] sm:$0xff] %v6618_v46  ;;  %1081 = vmatpush.msrb.mxu1 %v6633_v48  ;;  %v6636_v46 = vld [vmem:[#allocation10 + $0x4b8] sm:$0xff] }
 0x17f   :  { %10874 = vst [vmem:[#allocation88_spill] sm:$0xff] %v6621_v52  ;;  %1121 = vmatpush.msrb.mxu3 %v6636_v46  ;;  %v6639_v52 = vld [vmem:[#allocation10 + $0x90] sm:$0xff] }
 0x180   :  { %10875 = vst [vmem:[#allocation89_spill] sm:$0xff] %v6624_v49  ;;  %1369 = vmatpush.msrb.mxu0 %v6639_v52  ;;  %v6642_v49 = vld [vmem:[#allocation10 + $0x98] sm:$0xff] }
 0x181   :  { %10876 = vst [vmem:[#allocation90_spill] sm:$0xff] %v6627_v56  ;;  %1409 = vmatpush.msrb.mxu2 %v6642_v49  ;;  %v6645_v56 = vld [vmem:[#allocation10 + $0x470] sm:$0xff] }
 0x182   :  { %10877 = vst [vmem:[#allocation91_spill] sm:$0xff] %v6630_v53  ;;  %1082 = vmatpush.msrb.mxu1 %v6645_v56  ;;  %v6648_v53 = vld [vmem:[#allocation10 + $0x478] sm:$0xff] }
 0x183   :  { %10878 = vst [vmem:[#allocation92_spill] sm:$0xff] %v6633_v48  ;;  %1122 = vmatpush.msrb.mxu3 %v6648_v53  ;;  %v6651_v48 = vld [vmem:[#allocation10 + $0x50] sm:$0xff] }
 0x184   :  { %10879 = vst [vmem:[#allocation93_spill] sm:$0xff] %v6636_v46  ;;  %1370 = vmatpush.msrb.mxu0 %v6651_v48  ;;  %v6654_v46 = vld [vmem:[#allocation10 + $0x58] sm:$0xff] }
 0x185   :  { %10880 = vst [vmem:[#allocation94_spill] sm:$0xff] %v6639_v52  ;;  %1410 = vmatpush.msrb.mxu2 %v6654_v46  ;;  %v6657_v52 = vld [vmem:[#allocation10 + $0x430] sm:$0xff] }
 0x186   :  { %10881 = vst [vmem:[#allocation95_spill] sm:$0xff] %v6642_v49  ;;  %1083 = vmatpush.msrb.mxu1 %v6657_v52  ;;  %v6660_v49 = vld [vmem:[#allocation10 + $0x438] sm:$0xff] }
 0x187   :  { %10882 = vst [vmem:[#allocation96_spill] sm:$0xff] %v6645_v56  ;;  %1123 = vmatpush.msrb.mxu3 %v6660_v49  ;;  %1084 = vmatmul.f32.vlgmr.msrb.gmra.mxu1 %v6300_v21  ;;  %v10889_v56 = vld [vmem:[#allocation133_spill] sm:$0xff] }
 0x188   :  { %10883 = vst [vmem:[#allocation97_spill] sm:$0xff] %v6648_v53  ;;  %1124 = vmatmul.f32.vlgmr.msrb.gmra.mxu3 %v6300_v21  ;;  %v10888_v53 = vld [vmem:[#allocation132_spill] sm:$0xff] }
 0x189   :  { %10884 = vst [vmem:[#allocation98_spill] sm:$0xff] %v6651_v48  ;;  %1296 = vmatpush.msra.mxu1 %v10888_v53  ;;  %1336 = vmatpush.msra.mxu3 %v10889_v56  ;;  %v6667_v48 = vld [vmem:[#allocation10 + $0x10] sm:$0xff]  ;;  %v10897_v53 = vld [vmem:[#allocation145_spill] sm:$0xff]  ;;  %v6682_v56 = vld [vmem:[#allocation10 + $0x688] sm:$0xff] }
 0x18a   :  { %10885 = vst [vmem:[#allocation99_spill] sm:$0xff] %v6654_v46  ;;  %1371 = vmatpush.msrb.mxu0 %v6667_v48  ;;  %v6670_v46 = vld [vmem:[#allocation10 + $0x18] sm:$0xff]  ;;  %v10896_v21 = vld [vmem:[#allocation144_spill] sm:$0xff] }
 0x18b   :  { %10886 = vst [vmem:[#allocation100_spill] sm:$0xff] %v6657_v52  ;;  %1411 = vmatpush.msrb.mxu2 %v6670_v46  ;;  %v10892_v52 = vld [vmem:[#allocation136_spill] sm:$0xff]  ;;  %1337 = vmatpush.msra.mxu3 %v10893_v45  ;;  %v6688_v45 = vld [vmem:[#allocation10 + $0x648] sm:$0xff] }
 0x18c   :  { %10887 = vst [vmem:[#allocation101_spill] sm:$0xff] %v6660_v49  ;;  %1297 = vmatpush.msra.mxu1 %v10892_v52  ;;  %v10894_v49 = vld [vmem:[#allocation140_spill] sm:$0xff]  ;;  %v6685_v52 = vld [vmem:[#allocation10 + $0x640] sm:$0xff] }
 0x18d   :  { %10890 = vst [vmem:[#allocation102_spill] sm:$0xff] %v6667_v48  ;;  %1338 = vmatpush.msra.mxu3 %v10895_v57  ;;  %v6703_v57 = vld [vmem:[#allocation10 + $0x580] sm:$0xff] }
 0x18e   :  { %10891 = vst [vmem:[#allocation103_spill] sm:$0xff] %v6670_v46  ;;  %1298 = vmatpush.msra.mxu1 %v10894_v49  ;;  %v6691_v49 = vld [vmem:[#allocation10 + $0x600] sm:$0xff]  ;;  %v6712_v46 = vld [vmem:[#allocation10 + $0x548] sm:$0xff] }
 0x18f   :  { %1339 = vmatpush.msra.mxu3 %v10897_v53  ;;  %10898 = vst [vmem:[#allocation104_spill] sm:$0xff] %v6682_v56  ;;  %v6709_v53 = vld [vmem:[#allocation10 + $0x540] sm:$0xff] }
 0x190   :  { %1299 = vmatpush.msra.mxu1 %v10896_v21  ;;  %10899 = vst [vmem:[#allocation105_spill] sm:$0xff] %v6685_v52  ;;  %v6706_v21 = vld [vmem:[#allocation10 + $0x588] sm:$0xff]  ;;  %v6715_v48 = vld [vmem:[#allocation10 + $0x500] sm:$0xff] }
 0x191   :  { %1340 = vmatpush.msra.mxu3 %v6059_v15  ;;  %10900 = vst [vmem:[#allocation106_spill] sm:$0xff] %v6688_v45  ;;  %v6697_v15 = vld [vmem:[#allocation10 + $0x5c0] sm:$0xff] }
 0x192   :  { %1300 = vmatpush.msra.mxu1 %v6056_v12  ;;  %10901 = vst [vmem:[#allocation107_spill] sm:$0xff] %v6691_v49  ;;  %v6694_v12 = vld [vmem:[#allocation10 + $0x608] sm:$0xff] }
 0x193   :  { %1341 = vmatpush.msra.mxu3 %v6682_v56  ;;  %10902 = vst [vmem:[#allocation108_spill] sm:$0xff] %v6694_v12 }
 0x194   :  { %1301 = vmatpush.msra.mxu1 %v6066_v19  ;;  %10903 = vst [vmem:[#allocation109_spill] sm:$0xff] %v6697_v15  ;;  %v6700_v19 = vld [vmem:[#allocation10 + $0x5c8] sm:$0xff] }
 0x195   :  { %1342 = vmatpush.msra.mxu3 %v6688_v45  ;;  %10904 = vst [vmem:[#allocation110_spill] sm:$0xff] %v6700_v19 }
 0x196   :  { %1302 = vmatpush.msra.mxu1 %v6685_v52  ;;  %10905 = vst [vmem:[#allocation111_spill] sm:$0xff] %v6703_v57  ;;  %v865_v52 = vpop.f32.mrf.mxu2 }
 0x197   :  { %1343 = vmatpush.msra.mxu3 %v6694_v12  ;;  %10906 = vst [vmem:[#allocation112_spill] sm:$0xff] %v6706_v21  ;;  %v1129_v12 = vld [vmem:[#allocation5 + $0x20] sm:$0xff] }
 0x198   :  { %1303 = vmatpush.msra.mxu1 %v6691_v49  ;;  %10907 = vst [vmem:[#allocation113_spill] sm:$0xff] %v6709_v53  ;;  %v6835_v49 = vld [vmem:[#allocation10 + $0x410] sm:$0xff] }
 0x199   :  { %1344 = vmatpush.msra.mxu3 %v6700_v19  ;;  %10908 = vst [vmem:[#allocation114_spill] sm:$0xff] %v6712_v46  ;;  %v6718_v19 = vld [vmem:[#allocation10 + $0x508] sm:$0xff] }
 0x19a   :  { %1304 = vmatpush.msra.mxu1 %v6697_v15  ;;  %10909 = vst [vmem:[#allocation115_spill] sm:$0xff] %v6715_v48  ;;  %v6829_v15 = vld [vmem:[#allocation10 + $0x450] sm:$0xff] }
 0x19b   :  { %1345 = vmatpush.msra.mxu3 %v6706_v21  ;;  %10910 = vst [vmem:[#allocation116_spill] sm:$0xff] %v6718_v19  ;;  %v6724_v21 = vld [vmem:[#allocation10 + $0x4c8] sm:$0xff] }
 0x19c   :  { %1305 = vmatpush.msra.mxu1 %v6703_v57  ;;  %v6721_v57 = vld [vmem:[#allocation10 + $0x4c0] sm:$0xff]  ;;  %10912 = vst [vmem:[#allocation118_spill] sm:$0xff] %v6724_v21 }
 0x19d   :  { %1346 = vmatpush.msra.mxu3 %v6712_v46  ;;  %10911 = vst [vmem:[#allocation117_spill] sm:$0xff] %v6721_v57  ;;  %v6730_v46 = vld [vmem:[#allocation10 + $0x488] sm:$0xff] }
 0x19e   :  { %1306 = vmatpush.msra.mxu1 %v6709_v53  ;;  %v6727_v53 = vld [vmem:[#allocation10 + $0x480] sm:$0xff]  ;;  %10914 = vst [vmem:[#allocation120_spill] sm:$0xff] %v6730_v46 }
 0x19f   :  { %1347 = vmatpush.msra.mxu3 %v6718_v19  ;;  %10913 = vst [vmem:[#allocation119_spill] sm:$0xff] %v6727_v53  ;;  %v6736_v19 = vld [vmem:[#allocation10 + $0x448] sm:$0xff] }
 0x1a0   :  { %1307 = vmatpush.msra.mxu1 %v6715_v48  ;;  %v6733_v48 = vld [vmem:[#allocation10 + $0x440] sm:$0xff]  ;;  %10916 = vst [vmem:[#allocation122_spill] sm:$0xff] %v6736_v19 }
 0x1a1   :  { %1348 = vmatpush.msra.mxu3 %v6724_v21  ;;  %10915 = vst [vmem:[#allocation121_spill] sm:$0xff] %v6733_v48  ;;  %v6742_v21 = vld [vmem:[#allocation10 + $0x408] sm:$0xff] }
 0x1a2   :  { %1308 = vmatpush.msra.mxu1 %v6721_v57  ;;  %v6739_v57 = vld [vmem:[#allocation10 + $0x400] sm:$0xff]  ;;  %10918 = vst [vmem:[#allocation124_spill] sm:$0xff] %v6742_v21 }
 0x1a3   :  { %1349 = vmatpush.msra.mxu3 %v6730_v46  ;;  %10917 = vst [vmem:[#allocation123_spill] sm:$0xff] %v6739_v57  ;;  %v6748_v46 = vld [vmem:[#allocation10 + $0x7d8] sm:$0xff] }
 0x1a4   :  { %1309 = vmatpush.msra.mxu1 %v6727_v53  ;;  %v6745_v53 = vld [vmem:[#allocation10 + $0x7d0] sm:$0xff]  ;;  %10920 = vst [vmem:[#allocation126_spill] sm:$0xff] %v6748_v46 }
 0x1a5   :  { %1350 = vmatpush.msra.mxu3 %v6736_v19  ;;  %10919 = vst [vmem:[#allocation125_spill] sm:$0xff] %v6745_v53  ;;  %v6754_v19 = vld [vmem:[#allocation10 + $0x798] sm:$0xff] }
 0x1a6   :  { %1310 = vmatpush.msra.mxu1 %v6733_v48  ;;  %v6751_v48 = vld [vmem:[#allocation10 + $0x790] sm:$0xff]  ;;  %10922 = vst [vmem:[#allocation128_spill] sm:$0xff] %v6754_v19 }
 0x1a7   :  { %1351 = vmatpush.msra.mxu3 %v6742_v21  ;;  %10921 = vst [vmem:[#allocation127_spill] sm:$0xff] %v6751_v48  ;;  %v6760_v21 = vld [vmem:[#allocation10 + $0x758] sm:$0xff] }
 0x1a8   :  { %1311 = vmatpush.msra.mxu1 %v6739_v57  ;;  %v6757_v57 = vld [vmem:[#allocation10 + $0x750] sm:$0xff]  ;;  %10924 = vst [vmem:[#allocation130_spill] sm:$0xff] %v6760_v21 }
 0x1a9   :  { %1416 = vmatpush.msrb.mxu3 %v6748_v46  ;;  %10923 = vst [vmem:[#allocation129_spill] sm:$0xff] %v6757_v57  ;;  %v6766_v46 = vld [vmem:[#allocation10 + $0x718] sm:$0xff] }
 0x1aa   :  { %1376 = vmatpush.msrb.mxu1 %v6745_v53  ;;  %v6763_v53 = vld [vmem:[#allocation10 + $0x710] sm:$0xff]  ;;  %10926 = vst [vmem:[#allocation134_spill] sm:$0xff] %v6766_v46 }
 0x1ab   :  { %1417 = vmatpush.msrb.mxu3 %v6754_v19  ;;  %10925 = vst [vmem:[#allocation131_spill] sm:$0xff] %v6763_v53  ;;  %v6772_v19 = vld [vmem:[#allocation10 + $0x6d8] sm:$0xff] }
 0x1ac   :  { %1377 = vmatpush.msrb.mxu1 %v6751_v48  ;;  %v6769_v48 = vld [vmem:[#allocation10 + $0x6d0] sm:$0xff]  ;;  %10928 = vst [vmem:[#allocation138_spill] sm:$0xff] %v6772_v19 }
 0x1ad   :  { %1418 = vmatpush.msrb.mxu3 %v6760_v21  ;;  %10927 = vst [vmem:[#allocation135_spill] sm:$0xff] %v6769_v48  ;;  %v6778_v21 = vld [vmem:[#allocation10 + $0x698] sm:$0xff] }
 0x1ae   :  { %1378 = vmatpush.msrb.mxu1 %v6757_v57  ;;  %v6775_v57 = vld [vmem:[#allocation10 + $0x690] sm:$0xff]  ;;  %10930 = vst [vmem:[#allocation142_spill] sm:$0xff] %v6778_v21 }
 0x1af   :  { %1419 = vmatpush.msrb.mxu3 %v6766_v46  ;;  %10929 = vst [vmem:[#allocation139_spill] sm:$0xff] %v6775_v57  ;;  %v6784_v46 = vld [vmem:[#allocation10 + $0x658] sm:$0xff] }
 0x1b0   :  { %1379 = vmatpush.msrb.mxu1 %v6763_v53  ;;  %v6781_v53 = vld [vmem:[#allocation10 + $0x650] sm:$0xff]  ;;  %10932 = vst [vmem:[#allocation132_spill] sm:$0xff] %v6784_v46 }
 0x1b1   :  { %1420 = vmatpush.msrb.mxu3 %v6772_v19  ;;  %10931 = vst [vmem:[#allocation143_spill] sm:$0xff] %v6781_v53  ;;  %v6790_v19 = vld [vmem:[#allocation10 + $0x618] sm:$0xff] }
 0x1b2   :  { %1380 = vmatpush.msrb.mxu1 %v6769_v48  ;;  %v6787_v48 = vld [vmem:[#allocation10 + $0x610] sm:$0xff]  ;;  %10934 = vst [vmem:[#allocation136_spill] sm:$0xff] %v6790_v19 }
 0x1b3   :  { %1421 = vmatpush.msrb.mxu3 %v6778_v21  ;;  %10933 = vst [vmem:[#allocation133_spill] sm:$0xff] %v6787_v48  ;;  %v6796_v21 = vld [vmem:[#allocation10 + $0x5d8] sm:$0xff] }
 0x1b4   :  { %1381 = vmatpush.msrb.mxu1 %v6775_v57  ;;  %v6793_v57 = vld [vmem:[#allocation10 + $0x5d0] sm:$0xff]  ;;  %10936 = vst [vmem:[#allocation140_spill] sm:$0xff] %v6796_v21 }
 0x1b5   :  { %1422 = vmatpush.msrb.mxu3 %v6784_v46  ;;  %10935 = vst [vmem:[#allocation137_spill] sm:$0xff] %v6793_v57  ;;  %v6802_v46 = vld [vmem:[#allocation10 + $0x598] sm:$0xff] }
 0x1b6   :  { %1382 = vmatpush.msrb.mxu1 %v6781_v53  ;;  %v6799_v53 = vld [vmem:[#allocation10 + $0x590] sm:$0xff]  ;;  %10938 = vst [vmem:[#allocation144_spill] sm:$0xff] %v6802_v46 }
 0x1b7   :  { %1423 = vmatpush.msrb.mxu3 %v6790_v19  ;;  %10937 = vst [vmem:[#allocation141_spill] sm:$0xff] %v6799_v53  ;;  %v6808_v19 = vld [vmem:[#allocation10 + $0x558] sm:$0xff] }
 0x1b8   :  { %1383 = vmatpush.msrb.mxu1 %v6787_v48  ;;  %v6805_v48 = vld [vmem:[#allocation10 + $0x550] sm:$0xff]  ;;  %10940 = vst [vmem:[#allocation146_spill] sm:$0xff] %v6808_v19 }
 0x1b9   :  { %1424 = vmatpush.msrb.mxu3 %v6796_v21  ;;  %10939 = vst [vmem:[#allocation145_spill] sm:$0xff] %v6805_v48  ;;  %v6814_v21 = vld [vmem:[#allocation10 + $0x518] sm:$0xff] }
 0x1ba   :  { %1384 = vmatpush.msrb.mxu1 %v6793_v57  ;;  %v6811_v57 = vld [vmem:[#allocation10 + $0x510] sm:$0xff]  ;;  %10942 = vst [vmem:[#allocation148_spill] sm:$0xff] %v6814_v21 }
 0x1bb   :  { %1425 = vmatpush.msrb.mxu3 %v6802_v46  ;;  %10941 = vst [vmem:[#allocation147_spill] sm:$0xff] %v6811_v57  ;;  %v6820_v46 = vld [vmem:[#allocation10 + $0x4d8] sm:$0xff] }
 0x1bc   :  { %1385 = vmatpush.msrb.mxu1 %v6799_v53  ;;  %v6817_v53 = vld [vmem:[#allocation10 + $0x4d0] sm:$0xff]  ;;  %10944 = vst [vmem:[#allocation150_spill] sm:$0xff] %v6820_v46 }
 0x1bd   :  { %1426 = vmatpush.msrb.mxu3 %v6808_v19  ;;  %10943 = vst [vmem:[#allocation149_spill] sm:$0xff] %v6817_v53  ;;  %v6826_v19 = vld [vmem:[#allocation10 + $0x498] sm:$0xff] }
 0x1be   :  { %1386 = vmatpush.msrb.mxu1 %v6805_v48  ;;  %v6823_v48 = vld [vmem:[#allocation10 + $0x490] sm:$0xff]  ;;  %10946 = vst [vmem:[#allocation152_spill] sm:$0xff] %v6826_v19 }
 0x1bf   :  { %1427 = vmatpush.msrb.mxu3 %v6814_v21  ;;  %10945 = vst [vmem:[#allocation151_spill] sm:$0xff] %v6823_v48  ;;  %v6832_v21 = vld [vmem:[#allocation10 + $0x458] sm:$0xff] }
 0x1c0   :  { %1387 = vmatpush.msrb.mxu1 %v6811_v57  ;;  %v825_v57 = vpop.f32.mrf.mxu0  ;;  %10947 = vst [vmem:[#allocation153_spill] sm:$0xff] %v6829_v15 }
 0x1c1   :  { %1428 = vmatpush.msrb.mxu3 %v6820_v46  ;;  %10948 = vst [vmem:[#allocation154_spill] sm:$0xff] %v6832_v21 }
 0x1c2   :  { %1388 = vmatpush.msrb.mxu1 %v6817_v53  ;;  %v845_v53 = vpop.f32.mrf.mxu1  ;;  %10949 = vst [vmem:[#allocation155_spill] sm:$0xff] %v6835_v49  ;;  %v885_v56 = vpop.f32.mrf.mxu3 }
 0x1c3   :  { %1429 = vmatpush.msrb.mxu3 %v6826_v19  ;;  %v846_v46 = vadd.f32 %v845_v53, %v825_v57  ;;  %v886_v60 = vadd.f32 %v885_v56, %v865_v52  ;;  %v945_v52 = vpop.f32.mrf.mxu2 }
 0x1c4   :  { %1389 = vmatpush.msrb.mxu1 %v6823_v48  ;;  %v6838_v48 = vld [vmem:[#allocation10 + $0x418] sm:$0xff] }
 0x1c5   :  { %1430 = vmatpush.msrb.mxu3 %v6832_v21  ;;  %10950 = vst [vmem:[#allocation156_spill] sm:$0xff] %v6838_v48  ;;  %v1133_v19 = vadd.f32 %v1129_v12, %v846_v46 }
 0x1c6   :  { %1390 = vmatpush.msrb.mxu1 %v6829_v15  ;;  %v1130_v15 = vld [vmem:[#allocation5 + $0x28] sm:$0xff] }
 0x1c7   :  { %1431 = vmatpush.msrb.mxu3 %v6838_v48  ;;  %v4138_v45 = vmul.f32 -1.442695, %v1133_v19  ;;  %v1134_v61 = vadd.f32 %v1130_v15, %v886_v60  ;;  %v1132_v60 = vld [vmem:[#allocation5 + $0x38] sm:$0xff] }
 0x1c8   :  { %1391 = vmatpush.msrb.mxu1 %v6835_v49  ;;  %v905_v42 = vpop.f32.mrf.mxu0 }
 0x1c9   :  { %4224 = vpow2.f32 %v4138_v45  ;;  %v4139_v53 = vmul.f32 -1.442695, %v1134_v61 }
 0x1ca   :  { %v925_v21 = vpop.f32.mrf.mxu1  ;;  %v965_v48 = vpop.f32.mrf.mxu3 }
 0x1cb   :  { %v926_v57 = vadd.f32 %v925_v21, %v905_v42  ;;  %4226 = vpow2.f32 %v4139_v53  ;;  %v966_v42 = vadd.f32 %v965_v48, %v945_v52  ;;  %v1025_v1 = vpop.f32.mrf.mxu2 }
 0x1cd   :  { %v1135_v20 = vadd.f32 %v1131_v41, %v926_v57 }
 0x1cf   :  { %v4225_v27 = vpop.eup %4224  ;;  %v4140_v49 = vmul.f32 -1.442695, %v1135_v20 }
 0x1d0   :  { %v1155_v25 = vadd.f32 1.0, %v4225_v27  ;;  %v1136_v27 = vadd.f32 %v1132_v60, %v966_v42  ;;  %v985_v39 = vpop.f32.mrf.mxu0 }
 0x1d1   :  { %4228 = vpow2.f32 %v4140_v49  ;;  %v4227_v46 = vpop.eup %4226 }
 0x1d2   :  { %4230 = vrcp.f32 %v1155_v25  ;;  %v1156_v12 = vadd.f32 1.0, %v4227_v46  ;;  %v1169_v57 = vand.u32 2147483648, %v1155_v25  ;;  %vm1163_vm9 = vweird.f32 %v1155_v25 }
 0x1d4   :  { %4232 = vrcp.f32 %v1156_v12  ;;  %v1184_v33 = vand.u32 2147483648, %v1156_v12  ;;  %v1182_v48 = vand.u32 2147483647, %v1156_v12  ;;  %vm1178_vm12 = vweird.f32 %v1156_v12 }
 0x1d6   :  { %v1185_v6 = vor.u32 1.1754944e-38, %v1184_v33  ;;  %vm1183_vm15 = vcmp.eq.f32.partialorder %v1182_v48, 8.507059e+37  ;;  %v6875_v48 = vld [vmem:[#allocation10 + $0x3a0] sm:$0xff] }
 0x1d7   :  { %v4229_v19 = vpop.eup %4228 }
 0x1d8   :  { %v4231_v4 = vpop.eup %4230  ;;  %v6841_v56 = vadd.f32 1.0, %v4229_v19  ;;  %v1167_v19 = vand.u32 2147483647, %v1155_v25 }
 0x1d9   :  { %v1159_v45 = vmul.f32 %v4231_v4, %v1155_v25  ;;  %vm1164_vm8 = vweird.f32 %v4231_v4 }
 0x1da   :  { %4234 = vrcp.f32 %v6841_v56  ;;  %v4233_v20 = vpop.eup %4232  ;;  %vm6845_vm10 = vmor %vm1163_vm9, %vm1164_vm8  ;;  %vm1168_vm13 = vcmp.eq.f32.partialorder %v1167_v19, 8.507059e+37  ;;  %v1199_v33 = vand.u32 2147483648, %v6841_v56  ;;  %vm1193_vm1 = vweird.f32 %v6841_v56 }
 0x1db   :  { %v1160_v41 = vsub.f32 1.0, %v1159_v45  ;;  %v1174_v49 = vmul.f32 %v4233_v20, %v1156_v12  ;;  %4236 = vtanh.f32 %v1136_v27  ;;  %v1138_v45 = vld [vmem:[#allocation8 + $0xc0] sm:$0xff]  ;;  %vm1179_vm11 = vweird.f32 %v4233_v20 }
 0x1dc   :  { %v1005_v52 = vpop.f32.mrf.mxu1  ;;  %vm1180_vm14 = vmor %vm1178_vm12, %vm1179_vm11 }
 0x1dd   :  { %v1161_v61 = vmul.f32 %v4231_v4, %v1160_v41  ;;  %v1175_v53 = vsub.f32 1.0, %v1174_v49  ;;  %v1006_v60 = vadd.f32 %v1005_v52, %v985_v39  ;;  %v1170_v49 = vor.u32 1.1754944e-38, %v1169_v57  ;;  %v6878_v52 = vld [vmem:[#allocation10 + $0x3a8] sm:$0xff] }
 0x1df   :  { %v1162_v15 = vadd.f32 %v4231_v4, %v1161_v61  ;;  %v1176_v42 = vmul.f32 %v4233_v20, %v1175_v53  ;;  %v1142_v18 = vadd.f32 %v1138_v45, %v1006_v60  ;;  %v6881_v45 = vld [vmem:[#allocation10 + $0x360] sm:$0xff] }
 0x1e0   :  { %v4235_v21 = vpop.eup %4234  ;;  %v6889_v60 = vld [vmem:[#allocation10 + $0x320] sm:$0xff] }
 0x1e1   :  { %v1189_v46 = vmul.f32 %v4235_v21, %v6841_v56  ;;  %v1166_v41 = vsel %vm6845_vm10, %v4231_v4, %v1162_v15  ;;  %v1177_v25 = vadd.f32 %v4233_v20, %v1176_v42  ;;  %v4141_v27 = vmul.f32 -1.442695, %v1142_v18  ;;  %v4237_v16 = vpop.eup %4236  ;;  %v6884_v42 = vld [vmem:[#allocation10 + $0x368] sm:$0xff] }
 0x1e2   :  { %v1171_v30 = vsel %vm1168_vm13, %v1170_v49, %v1166_v41  ;;  %v1045_v14 = vpop.f32.mrf.mxu3  ;;  %vm1194_vm0 = vweird.f32 %v4235_v21 }
 0x1e3   :  { %v1190_v61 = vsub.f32 1.0, %v1189_v46  ;;  %v1181_v28 = vsel %vm1180_vm14, %v4233_v20, %v1177_v25  ;;  %v1205_v4 = vmul.f32 %v4237_v16, %v1171_v30  ;;  %v1046_v15 = vadd.f32 %v1045_v14, %v1025_v1  ;;  %vm1195_vm2 = vmor %vm1193_vm1, %vm1194_vm0  ;;  %v6899_v25 = vld [vmem:[#allocation10 + $0x2e0] sm:$0xff] }
 0x1e4   :  { %v1186_v0 = vsel %vm1183_vm15, %v1185_v6, %v1181_v28  ;;  %4238 = vpow2.f32 %v4141_v27  ;;  %v1197_v28 = vand.u32 2147483647, %v6841_v56  ;;  %v1200_v14 = vor.u32 1.1754944e-38, %v1199_v33  ;;  %v6868_v56 = vld [vmem:[#allocation10 + $0x3e0] sm:$0xff]  ;;  %v6902_v27 = vld [vmem:[#allocation10 + $0x2e8] sm:$0xff] }
 0x1e5   :  { %v1191_v53 = vmul.f32 %v4235_v21, %v1190_v61  ;;  %v1204_v39 = vmul.f32 %v1186_v0, %v6175_v29  ;;  %v1143_v57 = vadd.f32 %v1139_v32, %v1046_v15  ;;  %v6892_v61 = vld [vmem:[#allocation10 + $0x328] sm:$0xff]  ;;  %v1065_v15 = vpop.f32.mrf.mxu0 }
 0x1e6   :  { %vm1198_vm3 = vcmp.eq.f32.partialorder %v1197_v28, 8.507059e+37  ;;  %v6918_v28 = vld [vmem:[#allocation10 + $0x268] sm:$0xff] }
 0x1e7   :  { %v6852_v12 = vadd.f32 %v1205_v4, %v1204_v39  ;;  %v1192_v46 = vadd.f32 %v4235_v21, %v1191_v53  ;;  %v4142_v18 = vmul.f32 -1.442695, %v1143_v57  ;;  %v6909_v39 = vld [vmem:[#allocation10 + $0x2a0] sm:$0xff]  ;;  %v6912_v4 = vld [vmem:[#allocation10 + $0x2a8] sm:$0xff]  ;;  %10955 = vst [vmem:[#allocation159_spill] sm:$0xff] %v6918_v28 }
 0x1e8   :  { %10953 = vst [vmem:[#allocation157_spill] sm:$0xff] %v6912_v4 }
 0x1e9   :  { %4240 = vtanh.f32 %v6852_v12  ;;  %v1196_v30 = vsel %vm1195_vm2, %v4235_v21, %v1192_v46  ;;  %v6871_v21 = vld [vmem:[#allocation10 + $0x3e8] sm:$0xff]  ;;  %v1140_v46 = vld [vmem:[#allocation8 + $0xd0] sm:$0xff] }
 0x1ea   :  { %4242 = vpow2.f32 %v4142_v18  ;;  %v4239_v29 = vpop.eup %4238  ;;  %v1201_v1 = vsel %vm1198_vm3, %v1200_v14, %v1196_v30  ;;  %v6915_v18 = vld [vmem:[#allocation10 + $0x260] sm:$0xff] }
 0x1eb   :  { %v6858_v16 = vadd.f32 1.0, %v4239_v29  ;;  %10954 = vst [vmem:[#allocation158_spill] sm:$0xff] %v6915_v18 }
 0x1ed   :  { %4244 = vrcp.f32 %v6858_v16  ;;  %vm1226_vm6 = vweird.f32 %v6858_v16 }
 0x1ef   :  { %v4241_v0 = vpop.eup %4240 }
 0x1f0   :  { %v6860_v6 = vmul.f32 %v4241_v0, %v1201_v1  ;;  %v4243_v20 = vpop.eup %4242  ;;  %v6921_v0 = vld [vmem:[#allocation10 + $0x220] sm:$0xff]  ;;  %v6924_v1 = vld [vmem:[#allocation10 + $0x228] sm:$0xff] }
 0x1f1   :  { %v6863_v19 = vadd.f32 1.0, %v4243_v20  ;;  %10956 = vst [vmem:[#allocation160_spill] sm:$0xff] %v6921_v0 }
 0x1f2   :  { %1273 = vst [vmem:[#allocation11 + $0x8] sm:$0xff] %v6860_v6  ;;  %1292 = vmatmul.f32.vlgmr.msra.gmra.mxu0 %v6860_v6  ;;  %1332 = vmatmul.f32.vlgmr.msra.gmra.mxu2 %v6860_v6 }
 0x1f3   :  { %1436 = vmatpush.msra.mxu0 %v6868_v56  ;;  %1476 = vmatpush.msra.mxu2 %v6871_v21  ;;  %4246 = vrcp.f32 %v6863_v19  ;;  %v6887_v41 = vpop.eup %4244  ;;  %10957 = vst [vmem:[#allocation161_spill] sm:$0xff] %v6924_v1  ;;  %vm1241_vm7 = vweird.f32 %v6863_v19 }
 0x1f4   :  { %v1222_v53 = vmul.f32 %v6887_v41, %v6858_v16  ;;  %vm1227_vm4 = vweird.f32 %v6887_v41 }
 0x1f5   :  { %1437 = vmatpush.msra.mxu0 %v6875_v48  ;;  %1477 = vmatpush.msra.mxu2 %v6878_v52  ;;  %vm6963_vm8 = vmor %vm1226_vm6, %vm1227_vm4 }
 0x1f6   :  { %v1223_v29 = vsub.f32 1.0, %v1222_v53  ;;  %v1105_v53 = vpop.f32.mrf.mxu2 }
 0x1f7   :  { %1438 = vmatpush.msra.mxu0 %v6881_v45  ;;  %1478 = vmatpush.msra.mxu2 %v6884_v42 }
 0x1f9   :  { %1439 = vmatpush.msra.mxu0 %v6889_v60  ;;  %1479 = vmatpush.msra.mxu2 %v6892_v61  ;;  %v6895_v49 = vpop.eup %4246 }
 0x1fa   :  { %1372 = vmatmul.f32.vlgmr.msrb.gmra.mxu0 %v6860_v6  ;;  %1412 = vmatmul.f32.vlgmr.msrb.gmra.mxu2 %v6860_v6  ;;  %v1237_v32 = vmul.f32 %v6895_v49, %v6863_v19  ;;  %vm1242_vm5 = vweird.f32 %v6895_v49 }
 0x1fb   :  { %1440 = vmatpush.msra.mxu0 %v6899_v25  ;;  %1480 = vmatpush.msra.mxu2 %v6902_v27  ;;  %vm6971_vm9 = vmor %vm1241_vm7, %vm1242_vm5 }
 0x1fc   :  { %v1238_v30 = vsub.f32 1.0, %v1237_v32 }
 0x1fd   :  { %1441 = vmatpush.msra.mxu0 %v6909_v39  ;;  %1481 = vmatpush.msra.mxu2 %v6912_v4  ;;  %v6987_v4 = vld [vmem:[#allocation10 + $0xa0] sm:$0xff] }
 0x1fe   :  { %v1239_v32 = vmul.f32 %v6895_v49, %v1238_v30  ;;  %v6945_v30 = vld [vmem:[#allocation10 + $0x168] sm:$0xff] }
 0x1ff   :  { %1442 = vmatpush.msra.mxu0 %v6915_v18  ;;  %1482 = vmatpush.msra.mxu2 %v6918_v28  ;;  %v6935_v18 = vld [vmem:[#allocation10 + $0x1a0] sm:$0xff]  ;;  %10963 = vst [vmem:[#allocation167_spill] sm:$0xff] %v6945_v30 }
 0x200   :  { %10960 = vst [vmem:[#allocation164_spill] sm:$0xff] %v6935_v18 }
 0x201   :  { %1443 = vmatpush.msra.mxu0 %v6921_v0  ;;  %1483 = vmatpush.msra.mxu2 %v6924_v1  ;;  %v1224_v0 = vmul.f32 %v6887_v41, %v1223_v29 }
 0x203   :  { %v1225_v29 = vadd.f32 %v6887_v41, %v1224_v0 }
 0x204   :  { %v1085_v57 = vpop.f32.mrf.mxu1 }
 0x205   :  { %v1086_v33 = vadd.f32 %v1085_v57, %v1065_v15  ;;  %v6927_v15 = vld [vmem:[#allocation10 + $0x1e0] sm:$0xff]  ;;  %v6930_v57 = vld [vmem:[#allocation10 + $0x1e8] sm:$0xff] }
 0x206   :  { %10958 = vst [vmem:[#allocation162_spill] sm:$0xff] %v6927_v15  ;;  %1444 = vmatpush.msra.mxu0 %v6927_v15  ;;  %1484 = vmatpush.msra.mxu2 %v6930_v57 }
 0x207   :  { %v1144_v14 = vadd.f32 %v1140_v46, %v1086_v33  ;;  %10959 = vst [vmem:[#allocation163_spill] sm:$0xff] %v6930_v57  ;;  %v1141_v33 = vld [vmem:[#allocation8 + $0xd8] sm:$0xff]  ;;  %v6942_v57 = vld [vmem:[#allocation10 + $0x160] sm:$0xff] }
 0x208   :  { %1445 = vmatpush.msra.mxu0 %v6935_v18  ;;  %10962 = vst [vmem:[#allocation166_spill] sm:$0xff] %v6942_v57 }
 0x209   :  { %v4143_v20 = vmul.f32 -1.442695, %v1144_v14  ;;  %v6938_v14 = vld [vmem:[#allocation10 + $0x1a8] sm:$0xff] }
 0x20a   :  { %10961 = vst [vmem:[#allocation165_spill] sm:$0xff] %v6938_v14  ;;  %1485 = vmatpush.msra.mxu2 %v6938_v14  ;;  %1446 = vmatpush.msra.mxu0 %v6942_v57  ;;  %v6978_v57 = vld [vmem:[#allocation10 + $0xe8] sm:$0xff] }
 0x20b   :  { %v1125_v46 = vpop.f32.mrf.mxu3  ;;  %4248 = vpow2.f32 %v4143_v20  ;;  %v1240_v20 = vadd.f32 %v6895_v49, %v1239_v32  ;;  %v1230_v32 = vand.u32 2147483647, %v6858_v16 }
 0x20c   :  { %v1126_v28 = vadd.f32 %v1125_v46, %v1105_v53  ;;  %1486 = vmatpush.msra.mxu2 %v6945_v30  ;;  %v1247_v53 = vand.u32 2147483648, %v6863_v19  ;;  %v6954_v46 = vld [vmem:[#allocation10 + $0x120] sm:$0xff] }
 0x20d   :  { %10964 = vst [vmem:[#allocation168_spill] sm:$0xff] %v6954_v46  ;;  %1447 = vmatpush.msra.mxu0 %v6954_v46  ;;  %vm1231_vm10 = vcmp.eq.f32.partialorder %v1230_v32, 8.507059e+37  ;;  %v7011_v46 = vld [vmem:[#allocation10 + $0x3f8] sm:$0xff] }
 0x20e   :  { %v1145_v15 = vadd.f32 %v1141_v33, %v1126_v28  ;;  %v1232_v28 = vand.u32 2147483648, %v6858_v16  ;;  %v6957_v33 = vld [vmem:[#allocation10 + $0x128] sm:$0xff]  ;;  %v1229_v16 = vsel %vm6963_vm8, %v6887_v41, %v1225_v29  ;;  %v1248_v18 = vor.u32 1.1754944e-38, %v1247_v53  ;;  %v6993_v29 = vld [vmem:[#allocation10 + $0x60] sm:$0xff]  ;;  %10972 = vst [vmem:[#allocation172_spill] sm:$0xff] %v7011_v46 }
 0x20f   :  { %10965 = vst [vmem:[#allocation169_spill] sm:$0xff] %v6957_v33  ;;  %1487 = vmatpush.msra.mxu2 %v6957_v33  ;;  %v6975_v33 = vld [vmem:[#allocation10 + $0xe0] sm:$0xff] }
 0x210   :  { %4250 = vtanh.f32 %v1145_v15  ;;  %v1245_v15 = vand.u32 2147483647, %v6863_v19  ;;  %10970 = vst [vmem:[#allocation170_spill] sm:$0xff] %v6975_v33  ;;  %1448 = vmatpush.msra.mxu0 %v6975_v33  ;;  %v1244_v19 = vsel %vm6971_vm9, %v6895_v49, %v1240_v20  ;;  %v1233_v1 = vor.u32 1.1754944e-38, %v1232_v28  ;;  %v6990_v33 = vld [vmem:[#allocation10 + $0xa8] sm:$0xff]  ;;  %v6999_v53 = vld [vmem:[#allocation10 + $0x20] sm:$0xff] }
 0x211   :  { %v4249_v30 = vpop.eup %4248  ;;  %1488 = vmatpush.msra.mxu2 %v6978_v57  ;;  %v6996_v49 = vld [vmem:[#allocation10 + $0x68] sm:$0xff] }
 0x212   :  { %v1220_v14 = vadd.f32 1.0, %v4249_v30  ;;  %1449 = vmatpush.msra.mxu0 %v6987_v4  ;;  %vm1246_vm11 = vcmp.eq.f32.partialorder %v1245_v15, 8.507059e+37  ;;  %v1234_v0 = vsel %vm1231_vm10, %v1233_v1, %v1229_v16  ;;  %v7002_v28 = vld [vmem:[#allocation10 + $0x28] sm:$0xff] }
 0x213   :  { %1489 = vmatpush.msra.mxu2 %v6990_v33  ;;  %v1249_v41 = vsel %vm1246_vm11, %v1248_v18, %v1244_v19  ;;  %v7008_v18 = vld [vmem:[#allocation10 + $0x3f0] sm:$0xff] }
 0x214   :  { %4252 = vrcp.f32 %v1220_v14  ;;  %1450 = vmatpush.msra.mxu0 %v6993_v29  ;;  %v1267_v1 = vmul.f32 %v1249_v41, %v6283_v51  ;;  %10971 = vst [vmem:[#allocation171_spill] sm:$0xff] %v7008_v18  ;;  %v7016_v19 = vld [vmem:[#allocation10 + $0x3b0] sm:$0xff]  ;;  %v7019_v51 = vld [vmem:[#allocation10 + $0x3b8] sm:$0xff]  ;;  %vm1256_vm13 = vweird.f32 %v1220_v14 }
 0x215   :  { %1490 = vmatpush.msra.mxu2 %v6996_v49  ;;  %10974 = vst [vmem:[#allocation174_spill] sm:$0xff] %v7016_v19  ;;  %v7025_v41 = vld [vmem:[#allocation10 + $0x378] sm:$0xff] }
 0x216   :  { %v4251_v30 = vpop.eup %4250  ;;  %1451 = vmatpush.msra.mxu0 %v6999_v53  ;;  %10975 = vst [vmem:[#allocation175_spill] sm:$0xff] %v7019_v51 }
 0x217   :  { %v1268_v20 = vmul.f32 %v4251_v30, %v1234_v0  ;;  %1491 = vmatpush.msra.mxu2 %v7002_v28  ;;  %1452 = vmatmul.f32.vlgmr.msra.gmra.mxu0 %v6860_v6  ;;  %v7022_v0 = vld [vmem:[#allocation10 + $0x370] sm:$0xff]  ;;  %10977 = vst [vmem:[#allocation177_spill] sm:$0xff] %v7025_v41 }
 0x218   :  { %1492 = vmatmul.f32.vlgmr.msra.gmra.mxu2 %v6860_v6  ;;  %1516 = vmatpush.msrb.mxu0 %v7008_v18  ;;  %10976 = vst [vmem:[#allocation176_spill] sm:$0xff] %v7022_v0  ;;  %v7041_v18 = vld [vmem:[#allocation10 + $0x2b0] sm:$0xff] }
 0x219   :  { %1556 = vmatpush.msrb.mxu2 %v7011_v46  ;;  %v7014_v15 = vadd.f32 %v1268_v20, %v1267_v1  ;;  %v1262_v20 = vand.u32 2147483648, %v1220_v14  ;;  %v1260_v46 = vand.u32 2147483647, %v1220_v14 }
 0x21a   :  { %v4253_v32 = vpop.eup %4252  ;;  %1517 = vmatpush.msrb.mxu0 %v7016_v19  ;;  %v7029_v19 = vld [vmem:[#allocation10 + $0x330] sm:$0xff] }
 0x21b   :  { %10973 = vst [vmem:[#allocation173_spill] sm:$0xff] %v7014_v15  ;;  %v1252_v16 = vmul.f32 %v4253_v32, %v1220_v14  ;;  %1557 = vmatpush.msrb.mxu2 %v7019_v51  ;;  %4254 = vtanh.f32 %v7014_v15  ;;  %vm1257_vm12 = vweird.f32 %v4253_v32  ;;  %v7032_v51 = vld [vmem:[#allocation10 + $0x338] sm:$0xff]  ;;  %vm1261_vm15 = vcmp.eq.f32.partialorder %v1260_v46, 8.507059e+37  ;;  %v7060_v46 = vld [vmem:[#allocation10 + $0x230] sm:$0xff] }
 0x21c   :  { %1518 = vmatpush.msrb.mxu0 %v7022_v0  ;;  %10978 = vst [vmem:[#allocation178_spill] sm:$0xff] %v7029_v19  ;;  %v7035_v0 = vld [vmem:[#allocation10 + $0x2f0] sm:$0xff]  ;;  %vm1258_vm14 = vmor %vm1256_vm13, %vm1257_vm12 }
 0x21d   :  { %v1253_v30 = vsub.f32 1.0, %v1252_v16  ;;  %1558 = vmatpush.msrb.mxu2 %v7025_v41  ;;  %10979 = vst [vmem:[#allocation179_spill] sm:$0xff] %v7032_v51  ;;  %v7038_v41 = vld [vmem:[#allocation10 + $0x2f8] sm:$0xff] }
 0x21e   :  { %1519 = vmatpush.msrb.mxu0 %v7029_v19  ;;  %10980 = vst [vmem:[#allocation180_spill] sm:$0xff] %v7035_v0  ;;  %v7044_v19 = vld [vmem:[#allocation10 + $0x2b8] sm:$0xff] }
 0x21f   :  { %v1254_v1 = vmul.f32 %v4253_v32, %v1253_v30  ;;  %1559 = vmatpush.msrb.mxu2 %v7032_v51  ;;  %10981 = vst [vmem:[#allocation181_spill] sm:$0xff] %v7038_v41  ;;  %v1263_v30 = vor.u32 1.1754944e-38, %v1262_v20  ;;  %v7071_v20 = vld [vmem:[#allocation10 + $0x1f8] sm:$0xff] }
 0x220   :  { %1520 = vmatpush.msrb.mxu0 %v7035_v0  ;;  %v7049_v0 = vld [vmem:[#allocation10 + $0x270] sm:$0xff] }
 0x221   :  { %v1255_v16 = vadd.f32 %v4253_v32, %v1254_v1  ;;  %1560 = vmatpush.msrb.mxu2 %v7038_v41  ;;  %v4255_v14 = vpop.eup %4254  ;;  %v7052_v41 = vld [vmem:[#allocation10 + $0x278] sm:$0xff] }
 0x222   :  { %1521 = vmatpush.msrb.mxu0 %v7041_v18 }
 0x223   :  { %v1259_v15 = vsel %vm1258_vm14, %v4253_v32, %v1255_v16  ;;  %1561 = vmatpush.msrb.mxu2 %v7044_v19  ;;  %v7063_v32 = vld [vmem:[#allocation10 + $0x238] sm:$0xff]  ;;  %v11005_v16 = vld [vmem:[#allocation47_spill] sm:$0xff] }
 0x224   :  { %v1264_v1 = vsel %vm1261_vm15, %v1263_v30, %v1259_v15  ;;  %1522 = vmatpush.msrb.mxu0 %v7049_v0  ;;  %v7068_v15 = vld [vmem:[#allocation10 + $0x1f0] sm:$0xff]  ;;  %v11006_v30 = vld [vmem:[#allocation42_spill] sm:$0xff] }
 0x225   :  { %v7047_v51 = vmul.f32 %v4255_v14, %v1264_v1  ;;  %1562 = vmatpush.msrb.mxu2 %v7052_v41  ;;  %v11008_v14 = vld [vmem:[#allocation19_spill] sm:$0xff] }
 0x226   :  { %1523 = vmatpush.msrb.mxu0 %v7060_v46  ;;  %v11009_v1 = vld [vmem:[#allocation51_spill] sm:$0xff] }
 0x227   :  { %1275 = vst [vmem:[#allocation12 + $0x30] sm:$0xff] %v7047_v51  ;;  %1312 = vmatmul.f32.vlgmr.msra.gmra.mxu1 %v7047_v51  ;;  %1352 = vmatmul.f32.vlgmr.msra.gmra.mxu3 %v7047_v51 }
 0x228   :  { %1456 = vmatpush.msra.mxu1 %v6307_v9  ;;  %1496 = vmatpush.msra.mxu3 %v6310_v11  ;;  %v7076_v9 = vld [vmem:[#allocation10 + $0x1b0] sm:$0xff]  ;;  %v7079_v11 = vld [vmem:[#allocation10 + $0x1b8] sm:$0xff] }
 0x229   :  { %1563 = vmatpush.msrb.mxu2 %v7063_v32  ;;  %1524 = vmatpush.msrb.mxu0 %v7068_v15 }
 0x22a   :  { %1457 = vmatpush.msra.mxu1 %v6315_v2  ;;  %1497 = vmatpush.msra.mxu3 %v6318_v3  ;;  %v7084_v2 = vld [vmem:[#allocation10 + $0x170] sm:$0xff]  ;;  %v7087_v3 = vld [vmem:[#allocation10 + $0x178] sm:$0xff] }
 0x22b   :  { %1564 = vmatpush.msrb.mxu2 %v7071_v20  ;;  %1525 = vmatpush.msrb.mxu0 %v7076_v9 }
 0x22c   :  { %1458 = vmatpush.msra.mxu1 %v6323_v8  ;;  %1498 = vmatpush.msra.mxu3 %v6326_v22  ;;  %v7094_v8 = vld [vmem:[#allocation10 + $0x130] sm:$0xff]  ;;  %v7097_v22 = vld [vmem:[#allocation10 + $0x138] sm:$0xff] }
 0x22d   :  { %1565 = vmatpush.msrb.mxu2 %v7079_v11  ;;  %1526 = vmatpush.msrb.mxu0 %v7084_v2 }
 0x22e   :  { %1459 = vmatpush.msra.mxu1 %v6331_v23  ;;  %1499 = vmatpush.msra.mxu3 %v6334_v24  ;;  %v7102_v23 = vld [vmem:[#allocation10 + $0xf0] sm:$0xff]  ;;  %v7105_v24 = vld [vmem:[#allocation10 + $0xf8] sm:$0xff] }
 0x22f   :  { %1566 = vmatpush.msrb.mxu2 %v7087_v3  ;;  %1392 = vmatmul.f32.vlgmr.msrb.gmra.mxu1 %v7047_v51 }
 0x230   :  { %1432 = vmatmul.f32.vlgmr.msrb.gmra.mxu3 %v7047_v51  ;;  %1460 = vmatpush.msra.mxu1 %v6339_v10  ;;  %v7110_v10 = vld [vmem:[#allocation10 + $0xb0] sm:$0xff] }
 0x231   :  { %1500 = vmatpush.msra.mxu3 %v6342_v26  ;;  %1527 = vmatpush.msrb.mxu0 %v7094_v8  ;;  %10982 = vst [vmem:[#allocation182_spill] sm:$0xff] %v7110_v10  ;;  %v7113_v26 = vld [vmem:[#allocation10 + $0xb8] sm:$0xff] }
 0x232   :  { %1567 = vmatpush.msrb.mxu2 %v7097_v22  ;;  %1461 = vmatpush.msra.mxu1 %v6349_v17  ;;  %10983 = vst [vmem:[#allocation183_spill] sm:$0xff] %v7113_v26  ;;  %v7118_v17 = vld [vmem:[#allocation10 + $0x70] sm:$0xff] }
 0x233   :  { %1501 = vmatpush.msra.mxu3 %v6352_v5  ;;  %1528 = vmatpush.msrb.mxu0 %v7102_v23  ;;  %10984 = vst [vmem:[#allocation184_spill] sm:$0xff] %v7118_v17  ;;  %v7121_v5 = vld [vmem:[#allocation10 + $0x78] sm:$0xff] }
 0x234   :  { %1568 = vmatpush.msrb.mxu2 %v7105_v24  ;;  %1462 = vmatpush.msra.mxu1 %v6361_v7  ;;  %10985 = vst [vmem:[#allocation185_spill] sm:$0xff] %v7121_v5  ;;  %v7126_v7 = vld [vmem:[#allocation10 + $0x30] sm:$0xff] }
 0x235   :  { %1502 = vmatpush.msra.mxu3 %v6364_v31  ;;  %1529 = vmatpush.msrb.mxu0 %v7110_v10  ;;  %10986 = vst [vmem:[#allocation186_spill] sm:$0xff] %v7126_v7  ;;  %v7129_v31 = vld [vmem:[#allocation10 + $0x38] sm:$0xff]  ;;  %v1607_v10 = vld [vmem:[#allocation8 + $0xa8] sm:$0xff] }
 0x236   :  { %1569 = vmatpush.msrb.mxu2 %v7113_v26  ;;  %1463 = vmatpush.msra.mxu1 %v6373_v35  ;;  %10987 = vst [vmem:[#allocation187_spill] sm:$0xff] %v7129_v31  ;;  %v7136_v35 = vld [vmem:[#allocation10 + $0x3c0] sm:$0xff] }
 0x237   :  { %1503 = vmatpush.msra.mxu3 %v6376_v36  ;;  %1530 = vmatpush.msrb.mxu0 %v7118_v17  ;;  %10988 = vst [vmem:[#allocation188_spill] sm:$0xff] %v7136_v35  ;;  %v7139_v36 = vld [vmem:[#allocation10 + $0x3c8] sm:$0xff] }
 0x238   :  { %1570 = vmatpush.msrb.mxu2 %v7121_v5  ;;  %1464 = vmatpush.msra.mxu1 %v6385_v38  ;;  %10989 = vst [vmem:[#allocation189_spill] sm:$0xff] %v7139_v36  ;;  %v7144_v38 = vld [vmem:[#allocation10 + $0x380] sm:$0xff] }
 0x239   :  { %1504 = vmatpush.msra.mxu3 %v6388_v40  ;;  %1531 = vmatpush.msrb.mxu0 %v7126_v7  ;;  %10990 = vst [vmem:[#allocation190_spill] sm:$0xff] %v7144_v38  ;;  %v7147_v40 = vld [vmem:[#allocation10 + $0x388] sm:$0xff] }
 0x23a   :  { %1571 = vmatpush.msrb.mxu2 %v7129_v31  ;;  %1532 = vmatmul.f32.vlgmr.msrb.gmra.mxu0 %v6860_v6  ;;  %10991 = vst [vmem:[#allocation191_spill] sm:$0xff] %v7147_v40 }
 0x23b   :  { %1572 = vmatmul.f32.vlgmr.msrb.gmra.mxu2 %v6860_v6  ;;  %1465 = vmatpush.msra.mxu1 %v6397_v43  ;;  %v7152_v43 = vld [vmem:[#allocation10 + $0x340] sm:$0xff] }
 0x23c   :  { %1505 = vmatpush.msra.mxu3 %v6400_v44  ;;  %1744 = vmatpush.msra.mxu0 %v7136_v35  ;;  %10992 = vst [vmem:[#allocation192_spill] sm:$0xff] %v7152_v43  ;;  %v7155_v44 = vld [vmem:[#allocation10 + $0x348] sm:$0xff]  ;;  %v11002_v6 = vld [vmem:[#allocation38_spill] sm:$0xff] }
 0x23d   :  { %1784 = vmatpush.msra.mxu2 %v7139_v36  ;;  %1466 = vmatpush.msra.mxu1 %v6409_v34  ;;  %10993 = vst [vmem:[#allocation193_spill] sm:$0xff] %v7155_v44  ;;  %v7160_v34 = vld [vmem:[#allocation10 + $0x300] sm:$0xff] }
 0x23e   :  { %1506 = vmatpush.msra.mxu3 %v6412_v47  ;;  %1745 = vmatpush.msra.mxu0 %v7144_v38  ;;  %10994 = vst [vmem:[#allocation194_spill] sm:$0xff] %v7160_v34  ;;  %v7163_v47 = vld [vmem:[#allocation10 + $0x308] sm:$0xff] }
 0x23f   :  { %1785 = vmatpush.msra.mxu2 %v7147_v40  ;;  %1467 = vmatpush.msra.mxu1 %v6421_v50  ;;  %10995 = vst [vmem:[#allocation195_spill] sm:$0xff] %v7163_v47  ;;  %v7168_v50 = vld [vmem:[#allocation10 + $0x2c0] sm:$0xff] }
 0x240   :  { %1507 = vmatpush.msra.mxu3 %v6424_v37  ;;  %1746 = vmatpush.msra.mxu0 %v7152_v43  ;;  %10996 = vst [vmem:[#allocation196_spill] sm:$0xff] %v7168_v50  ;;  %v7171_v37 = vld [vmem:[#allocation10 + $0x2c8] sm:$0xff] }
 0x241   :  { %1786 = vmatpush.msra.mxu2 %v7155_v44  ;;  %1468 = vmatpush.msra.mxu1 %v6433_v54  ;;  %10997 = vst [vmem:[#allocation197_spill] sm:$0xff] %v7171_v37  ;;  %v7176_v54 = vld [vmem:[#allocation10 + $0x280] sm:$0xff] }
 0x242   :  { %1508 = vmatpush.msra.mxu3 %v6436_v55  ;;  %1747 = vmatpush.msra.mxu0 %v7160_v34  ;;  %10998 = vst [vmem:[#allocation198_spill] sm:$0xff] %v7176_v54  ;;  %v10999_v55 = vld [vmem:[#allocation36_spill] sm:$0xff] }
 0x243   :  { %1787 = vmatpush.msra.mxu2 %v7163_v47  ;;  %1469 = vmatpush.msra.mxu1 %v6445_v58  ;;  %v11000_v58 = vld [vmem:[#allocation41_spill] sm:$0xff] }
 0x244   :  { %1509 = vmatpush.msra.mxu3 %v6448_v59  ;;  %1748 = vmatpush.msra.mxu0 %v7168_v50  ;;  %v11001_v59 = vld [vmem:[#allocation43_spill] sm:$0xff] }
 0x245   :  { %1788 = vmatpush.msra.mxu2 %v7171_v37  ;;  %1470 = vmatpush.msra.mxu1 %v6457_v62  ;;  %v11003_v62 = vld [vmem:[#allocation18_spill] sm:$0xff]  ;;  %v1598_v50 = vld [vmem:[#allocation5 + $0x48] sm:$0xff] }
 0x246   :  { %1510 = vmatpush.msra.mxu3 %v6460_v63  ;;  %1749 = vmatpush.msra.mxu0 %v7176_v54  ;;  %v11004_v63 = vld [vmem:[#allocation21_spill] sm:$0xff] }
 0x247   :  { %1789 = vmatpush.msra.mxu2 %v6346_v13  ;;  %1471 = vmatpush.msra.mxu1 %v10999_v55  ;;  %v11007_v13 = vld [vmem:[#allocation23_spill] sm:$0xff]  ;;  %v11010_v55 = vld [vmem:[#allocation46_spill] sm:$0xff]  ;;  %v11145_v54 = vld [vmem:[#allocation153_spill] sm:$0xff] }
 0x248   :  { %1511 = vmatpush.msra.mxu3 %v11000_v58  ;;  %1472 = vmatmul.f32.vlgmr.msra.gmra.mxu1 %v7047_v51  ;;  %v11011_v58 = vld [vmem:[#allocation20_spill] sm:$0xff] }
 0x249   :  { %1512 = vmatmul.f32.vlgmr.msra.gmra.mxu3 %v7047_v51  ;;  %1536 = vmatpush.msrb.mxu1 %v11001_v59  ;;  %v11012_v59 = vld [vmem:[#allocation25_spill] sm:$0xff] }
 0x24a   :  { %1576 = vmatpush.msrb.mxu3 %v11002_v6  ;;  %1750 = vmatpush.msra.mxu0 %v11003_v62  ;;  %v11013_v6 = vld [vmem:[#allocation55_spill] sm:$0xff]  ;;  %v11014_v62 = vld [vmem:[#allocation50_spill] sm:$0xff] }
 0x24b   :  { %1790 = vmatpush.msra.mxu2 %v11004_v63  ;;  %1537 = vmatpush.msrb.mxu1 %v11005_v16  ;;  %v11015_v63 = vld [vmem:[#allocation27_spill] sm:$0xff]  ;;  %v11016_v16 = vld [vmem:[#allocation22_spill] sm:$0xff] }
 0x24c   :  { %1577 = vmatpush.msrb.mxu3 %v11006_v30  ;;  %1751 = vmatpush.msra.mxu0 %v11007_v13  ;;  %v11017_v30 = vld [vmem:[#allocation59_spill] sm:$0xff]  ;;  %v11018_v13 = vld [vmem:[#allocation54_spill] sm:$0xff] }
 0x24d   :  { %1791 = vmatpush.msra.mxu2 %v11008_v14  ;;  %1538 = vmatpush.msrb.mxu1 %v11009_v1  ;;  %v11019_v14 = vld [vmem:[#allocation24_spill] sm:$0xff]  ;;  %v11020_v1 = vld [vmem:[#allocation29_spill] sm:$0xff] }
 0x24e   :  { %1578 = vmatpush.msrb.mxu3 %v11010_v55  ;;  %1752 = vmatpush.msra.mxu0 %v11011_v58  ;;  %v11021_v55 = vld [vmem:[#allocation63_spill] sm:$0xff]  ;;  %v11022_v58 = vld [vmem:[#allocation58_spill] sm:$0xff] }
 0x24f   :  { %1792 = vmatpush.msra.mxu2 %v11012_v59  ;;  %1539 = vmatpush.msrb.mxu1 %v11013_v6  ;;  %v11023_v59 = vld [vmem:[#allocation31_spill] sm:$0xff]  ;;  %v11024_v6 = vld [vmem:[#allocation26_spill] sm:$0xff] }
 0x250   :  { %1579 = vmatpush.msrb.mxu3 %v11014_v62  ;;  %1753 = vmatpush.msra.mxu0 %v11015_v63  ;;  %v11025_v62 = vld [vmem:[#allocation67_spill] sm:$0xff]  ;;  %v11026_v63 = vld [vmem:[#allocation62_spill] sm:$0xff] }
 0x251   :  { %1793 = vmatpush.msra.mxu2 %v11016_v16  ;;  %1540 = vmatpush.msrb.mxu1 %v11017_v30  ;;  %v11027_v16 = vld [vmem:[#allocation28_spill] sm:$0xff]  ;;  %v11028_v30 = vld [vmem:[#allocation33_spill] sm:$0xff] }
 0x252   :  { %1580 = vmatpush.msrb.mxu3 %v11018_v13  ;;  %1754 = vmatpush.msra.mxu0 %v11019_v14  ;;  %v11029_v13 = vld [vmem:[#allocation71_spill] sm:$0xff]  ;;  %v11030_v14 = vld [vmem:[#allocation66_spill] sm:$0xff] }
 0x253   :  { %1794 = vmatpush.msra.mxu2 %v11020_v1  ;;  %1541 = vmatpush.msrb.mxu1 %v11021_v55  ;;  %v11031_v1 = vld [vmem:[#allocation35_spill] sm:$0xff]  ;;  %v11032_v55 = vld [vmem:[#allocation30_spill] sm:$0xff] }
 0x254   :  { %1581 = vmatpush.msrb.mxu3 %v11022_v58  ;;  %1755 = vmatpush.msra.mxu0 %v11023_v59  ;;  %v11033_v58 = vld [vmem:[#allocation72_spill] sm:$0xff]  ;;  %v11034_v59 = vld [vmem:[#allocation73_spill] sm:$0xff] }
 0x255   :  { %1795 = vmatpush.msra.mxu2 %v11024_v6  ;;  %1542 = vmatpush.msrb.mxu1 %v11025_v62  ;;  %v11035_v6 = vld [vmem:[#allocation32_spill] sm:$0xff]  ;;  %v11036_v62 = vld [vmem:[#allocation37_spill] sm:$0xff] }
 0x256   :  { %1582 = vmatpush.msrb.mxu3 %v11026_v63  ;;  %1756 = vmatpush.msra.mxu0 %v11027_v16  ;;  %v11037_v63 = vld [vmem:[#allocation76_spill] sm:$0xff]  ;;  %v11038_v16 = vld [vmem:[#allocation77_spill] sm:$0xff] }
 0x257   :  { %1796 = vmatpush.msra.mxu2 %v11028_v30  ;;  %1543 = vmatpush.msrb.mxu1 %v11029_v13  ;;  %v11039_v30 = vld [vmem:[#allocation39_spill] sm:$0xff]  ;;  %v11040_v13 = vld [vmem:[#allocation34_spill] sm:$0xff] }
 0x258   :  { %1583 = vmatpush.msrb.mxu3 %v11030_v14  ;;  %1757 = vmatpush.msra.mxu0 %v11031_v1  ;;  %v11041_v14 = vld [vmem:[#allocation80_spill] sm:$0xff]  ;;  %v11042_v1 = vld [vmem:[#allocation81_spill] sm:$0xff] }
 0x259   :  { %1797 = vmatpush.msra.mxu2 %v11032_v55  ;;  %1544 = vmatpush.msrb.mxu1 %v11033_v58  ;;  %v11043_v55 = vld [vmem:[#allocation40_spill] sm:$0xff]  ;;  %v11044_v58 = vld [vmem:[#allocation45_spill] sm:$0xff] }
 0x25a   :  { %1584 = vmatpush.msrb.mxu3 %v11034_v59  ;;  %1758 = vmatpush.msra.mxu0 %v11035_v6  ;;  %v11045_v59 = vld [vmem:[#allocation84_spill] sm:$0xff]  ;;  %v11046_v6 = vld [vmem:[#allocation85_spill] sm:$0xff] }
 0x25b   :  { %1798 = vmatpush.msra.mxu2 %v11036_v62  ;;  %1545 = vmatpush.msrb.mxu1 %v11037_v63  ;;  %v11047_v62 = vld [vmem:[#allocation44_spill] sm:$0xff]  ;;  %v11048_v63 = vld [vmem:[#allocation49_spill] sm:$0xff] }
 0x25c   :  { %1585 = vmatpush.msrb.mxu3 %v11038_v16  ;;  %1759 = vmatpush.msra.mxu0 %v11039_v30  ;;  %v11049_v16 = vld [vmem:[#allocation88_spill] sm:$0xff]  ;;  %v11050_v30 = vld [vmem:[#allocation89_spill] sm:$0xff] }
 0x25d   :  { %1799 = vmatpush.msra.mxu2 %v11040_v13  ;;  %1546 = vmatpush.msrb.mxu1 %v11041_v14  ;;  %v11051_v13 = vld [vmem:[#allocation48_spill] sm:$0xff]  ;;  %v11052_v14 = vld [vmem:[#allocation53_spill] sm:$0xff] }
 0x25e   :  { %1586 = vmatpush.msrb.mxu3 %v11042_v1  ;;  %1824 = vmatpush.msrb.mxu0 %v11043_v55  ;;  %v11053_v1 = vld [vmem:[#allocation92_spill] sm:$0xff]  ;;  %v11054_v55 = vld [vmem:[#allocation93_spill] sm:$0xff] }
 0x25f   :  { %1864 = vmatpush.msrb.mxu2 %v11044_v58  ;;  %1547 = vmatpush.msrb.mxu1 %v11045_v59  ;;  %v11055_v58 = vld [vmem:[#allocation52_spill] sm:$0xff]  ;;  %v11056_v59 = vld [vmem:[#allocation57_spill] sm:$0xff] }
 0x260   :  { %1587 = vmatpush.msrb.mxu3 %v11046_v6  ;;  %1825 = vmatpush.msrb.mxu0 %v11047_v62  ;;  %v11057_v6 = vld [vmem:[#allocation96_spill] sm:$0xff]  ;;  %v11058_v62 = vld [vmem:[#allocation97_spill] sm:$0xff] }
 0x261   :  { %1865 = vmatpush.msrb.mxu2 %v11048_v63  ;;  %1548 = vmatpush.msrb.mxu1 %v11049_v16  ;;  %v11059_v63 = vld [vmem:[#allocation56_spill] sm:$0xff]  ;;  %v11060_v16 = vld [vmem:[#allocation61_spill] sm:$0xff] }
 0x262   :  { %1588 = vmatpush.msrb.mxu3 %v11050_v30  ;;  %1826 = vmatpush.msrb.mxu0 %v11051_v13  ;;  %v11061_v30 = vld [vmem:[#allocation100_spill] sm:$0xff]  ;;  %v11062_v13 = vld [vmem:[#allocation101_spill] sm:$0xff] }
 0x263   :  { %1866 = vmatpush.msrb.mxu2 %v11052_v14  ;;  %1549 = vmatpush.msrb.mxu1 %v11053_v1  ;;  %v11063_v14 = vld [vmem:[#allocation60_spill] sm:$0xff]  ;;  %v11064_v1 = vld [vmem:[#allocation65_spill] sm:$0xff] }
 0x264   :  { %1589 = vmatpush.msrb.mxu3 %v11054_v55  ;;  %1827 = vmatpush.msrb.mxu0 %v11055_v58  ;;  %v7250_v55 = vld [vmem:[#allocation10 + $0x7c0] sm:$0xff]  ;;  %v7253_v58 = vld [vmem:[#allocation10 + $0x7c8] sm:$0xff] }
 0x265   :  { %1867 = vmatpush.msrb.mxu2 %v11056_v59  ;;  %1550 = vmatpush.msrb.mxu1 %v11057_v6  ;;  %11065 = vst [vmem:[#allocation36_spill] sm:$0xff] %v7250_v55  ;;  %v11067_v59 = vld [vmem:[#allocation64_spill] sm:$0xff]  ;;  %v11068_v6 = vld [vmem:[#allocation69_spill] sm:$0xff] }
 0x266   :  { %1590 = vmatpush.msrb.mxu3 %v11058_v62  ;;  %1828 = vmatpush.msrb.mxu0 %v11059_v63  ;;  %11066 = vst [vmem:[#allocation41_spill] sm:$0xff] %v7253_v58  ;;  %v7258_v62 = vld [vmem:[#allocation10 + $0x780] sm:$0xff]  ;;  %v11071_v63 = vld [vmem:[#allocation68_spill] sm:$0xff] }
 0x267   :  { %1868 = vmatpush.msrb.mxu2 %v11060_v16  ;;  %1551 = vmatpush.msrb.mxu1 %v11061_v30  ;;  %11069 = vst [vmem:[#allocation43_spill] sm:$0xff] %v7258_v62  ;;  %v11072_v16 = vld [vmem:[#allocation70_spill] sm:$0xff] }
 0x268   :  { %1591 = vmatpush.msrb.mxu3 %v11062_v13  ;;  %1552 = vmatmul.f32.vlgmr.msrb.gmra.mxu1 %v7047_v51  ;;  %v7266_v30 = vld [vmem:[#allocation10 + $0x740] sm:$0xff]  ;;  %v7269_v13 = vld [vmem:[#allocation10 + $0x748] sm:$0xff] }
 0x269   :  { %1592 = vmatmul.f32.vlgmr.msrb.gmra.mxu3 %v7047_v51  ;;  %1829 = vmatpush.msrb.mxu0 %v11063_v14  ;;  %v7261_v51 = vld [vmem:[#allocation10 + $0x788] sm:$0xff]  ;;  %11073 = vst [vmem:[#allocation18_spill] sm:$0xff] %v7266_v30  ;;  %v11075_v14 = vld [vmem:[#allocation74_spill] sm:$0xff] }
 0x26a   :  { %1869 = vmatpush.msrb.mxu2 %v11064_v1  ;;  %1764 = vmatpush.msra.mxu1 %v7250_v55  ;;  %11070 = vst [vmem:[#allocation38_spill] sm:$0xff] %v7261_v51  ;;  %v11076_v1 = vld [vmem:[#allocation75_spill] sm:$0xff]  ;;  %v1597_v55 = vld [vmem:[#allocation5 + $0x40] sm:$0xff] }
 0x26b   :  { %1804 = vmatpush.msra.mxu3 %v7253_v58  ;;  %1830 = vmatpush.msrb.mxu0 %v11067_v59  ;;  %11074 = vst [vmem:[#allocation21_spill] sm:$0xff] %v7269_v13  ;;  %v7274_v59 = vld [vmem:[#allocation10 + $0x700] sm:$0xff] }
 0x26c   :  { %1870 = vmatpush.msrb.mxu2 %v11068_v6  ;;  %1765 = vmatpush.msra.mxu1 %v7258_v62  ;;  %11077 = vst [vmem:[#allocation47_spill] sm:$0xff] %v7274_v59  ;;  %v7277_v6 = vld [vmem:[#allocation10 + $0x708] sm:$0xff]  ;;  %v11091_v62 = vld [vmem:[#allocation90_spill] sm:$0xff] }
 0x26d   :  { %1805 = vmatpush.msra.mxu3 %v7261_v51  ;;  %1831 = vmatpush.msrb.mxu0 %v11071_v63  ;;  %11078 = vst [vmem:[#allocation42_spill] sm:$0xff] %v7277_v6  ;;  %v11079_v63 = vld [vmem:[#allocation78_spill] sm:$0xff]  ;;  %v11089_v51 = vld [vmem:[#allocation105_spill] sm:$0xff] }
 0x26e   :  { %1871 = vmatpush.msrb.mxu2 %v11072_v16  ;;  %1766 = vmatpush.msra.mxu1 %v7266_v30  ;;  %v11080_v16 = vld [vmem:[#allocation79_spill] sm:$0xff]  ;;  %v7282_v30 = vld [vmem:[#allocation10 + $0x6c0] sm:$0xff] }
 0x26f   :  { %1806 = vmatpush.msra.mxu3 %v7269_v13  ;;  %1832 = vmatpush.msrb.mxu0 %v11075_v14  ;;  %11081 = vst [vmem:[#allocation23_spill] sm:$0xff] %v7282_v30  ;;  %v7285_v13 = vld [vmem:[#allocation10 + $0x6c8] sm:$0xff]  ;;  %v11083_v14 = vld [vmem:[#allocation82_spill] sm:$0xff] }
 0x270   :  { %1872 = vmatpush.msrb.mxu2 %v11076_v1  ;;  %1767 = vmatpush.msra.mxu1 %v7274_v59  ;;  %11082 = vst [vmem:[#allocation19_spill] sm:$0xff] %v7285_v13  ;;  %v11084_v1 = vld [vmem:[#allocation83_spill] sm:$0xff]  ;;  %v7290_v59 = vld [vmem:[#allocation10 + $0x680] sm:$0xff] }
 0x271   :  { %1807 = vmatpush.msra.mxu3 %v7277_v6  ;;  %1833 = vmatpush.msrb.mxu0 %v11079_v63  ;;  %11085 = vst [vmem:[#allocation51_spill] sm:$0xff] %v7290_v59  ;;  %v11086_v6 = vld [vmem:[#allocation104_spill] sm:$0xff]  ;;  %v11087_v63 = vld [vmem:[#allocation86_spill] sm:$0xff] }
 0x272   :  { %1873 = vmatpush.msrb.mxu2 %v11080_v16  ;;  %1768 = vmatpush.msra.mxu1 %v7282_v30  ;;  %v11088_v16 = vld [vmem:[#allocation87_spill] sm:$0xff]  ;;  %v11090_v30 = vld [vmem:[#allocation106_spill] sm:$0xff] }
 0x273   :  { %1808 = vmatpush.msra.mxu3 %v7285_v13  ;;  %1834 = vmatpush.msrb.mxu0 %v11083_v14  ;;  %v11092_v13 = vld [vmem:[#allocation91_spill] sm:$0xff]  ;;  %v11095_v58 = vld [vmem:[#allocation94_spill] sm:$0xff] }
 0x274   :  { %1874 = vmatpush.msrb.mxu2 %v11084_v1  ;;  %1769 = vmatpush.msra.mxu1 %v7290_v59  ;;  %v11093_v14 = vld [vmem:[#allocation107_spill] sm:$0xff]  ;;  %v11094_v1 = vld [vmem:[#allocation108_spill] sm:$0xff] }
 0x275   :  { %1809 = vmatpush.msra.mxu3 %v11086_v6  ;;  %1835 = vmatpush.msrb.mxu0 %v11087_v63  ;;  %v11096_v59 = vld [vmem:[#allocation95_spill] sm:$0xff]  ;;  %v11097_v6 = vld [vmem:[#allocation109_spill] sm:$0xff]  ;;  %v11098_v63 = vld [vmem:[#allocation110_spill] sm:$0xff]  ;;  %v1333_v37 = vpop.f32.mrf.mxu2 }
 0x276   :  { %1875 = vmatpush.msrb.mxu2 %v11088_v16  ;;  %1770 = vmatpush.msra.mxu1 %v11089_v51  ;;  %v11099_v16 = vld [vmem:[#allocation98_spill] sm:$0xff]  ;;  %v11100_v51 = vld [vmem:[#allocation99_spill] sm:$0xff] }
 0x277   :  { %1810 = vmatpush.msra.mxu3 %v11090_v30  ;;  %1836 = vmatpush.msrb.mxu0 %v11091_v62  ;;  %v11101_v30 = vld [vmem:[#allocation111_spill] sm:$0xff]  ;;  %v11102_v62 = vld [vmem:[#allocation112_spill] sm:$0xff] }
 0x278   :  { %1876 = vmatpush.msrb.mxu2 %v11092_v13  ;;  %1771 = vmatpush.msra.mxu1 %v11093_v14  ;;  %v11103_v13 = vld [vmem:[#allocation102_spill] sm:$0xff]  ;;  %v11104_v14 = vld [vmem:[#allocation103_spill] sm:$0xff] }
 0x279   :  { %1811 = vmatpush.msra.mxu3 %v11094_v1  ;;  %1837 = vmatpush.msrb.mxu0 %v11095_v58  ;;  %v11105_v1 = vld [vmem:[#allocation113_spill] sm:$0xff]  ;;  %v11106_v58 = vld [vmem:[#allocation114_spill] sm:$0xff] }
 0x27a   :  { %1877 = vmatpush.msrb.mxu2 %v11096_v59  ;;  %1772 = vmatpush.msra.mxu1 %v11097_v6  ;;  %v11107_v59 = vld [vmem:[#allocation115_spill] sm:$0xff]  ;;  %v11108_v6 = vld [vmem:[#allocation116_spill] sm:$0xff] }
 0x27b   :  { %1812 = vmatpush.msra.mxu3 %v11098_v63  ;;  %1838 = vmatpush.msrb.mxu0 %v11099_v16  ;;  %v11109_v63 = vld [vmem:[#allocation117_spill] sm:$0xff]  ;;  %v11110_v16 = vld [vmem:[#allocation118_spill] sm:$0xff] }
 0x27c   :  { %1878 = vmatpush.msrb.mxu2 %v11100_v51  ;;  %1773 = vmatpush.msra.mxu1 %v11101_v30  ;;  %v11111_v51 = vld [vmem:[#allocation119_spill] sm:$0xff]  ;;  %v11112_v30 = vld [vmem:[#allocation120_spill] sm:$0xff] }
 0x27d   :  { %1813 = vmatpush.msra.mxu3 %v11102_v62  ;;  %1839 = vmatpush.msrb.mxu0 %v11103_v13  ;;  %v11113_v62 = vld [vmem:[#allocation121_spill] sm:$0xff]  ;;  %v11114_v13 = vld [vmem:[#allocation122_spill] sm:$0xff] }
 0x27e   :  { %1879 = vmatpush.msrb.mxu2 %v11104_v14  ;;  %1774 = vmatpush.msra.mxu1 %v11105_v1  ;;  %v11115_v14 = vld [vmem:[#allocation123_spill] sm:$0xff]  ;;  %v11116_v1 = vld [vmem:[#allocation124_spill] sm:$0xff] }
 0x27f   :  { %1814 = vmatpush.msra.mxu3 %v11106_v58  ;;  %v11117_v58 = vld [vmem:[#allocation125_spill] sm:$0xff] }
 0x280   :  { %1775 = vmatpush.msra.mxu1 %v11107_v59  ;;  %v11118_v59 = vld [vmem:[#allocation126_spill] sm:$0xff] }
 0x281   :  { %1815 = vmatpush.msra.mxu3 %v11108_v6  ;;  %v11119_v6 = vld [vmem:[#allocation127_spill] sm:$0xff] }
 0x282   :  { %1776 = vmatpush.msra.mxu1 %v11109_v63  ;;  %v11120_v63 = vld [vmem:[#allocation128_spill] sm:$0xff] }
 0x283   :  { %1816 = vmatpush.msra.mxu3 %v11110_v16  ;;  %v11121_v16 = vld [vmem:[#allocation129_spill] sm:$0xff] }
 0x284   :  { %1777 = vmatpush.msra.mxu1 %v11111_v51  ;;  %v11122_v51 = vld [vmem:[#allocation130_spill] sm:$0xff] }
 0x285   :  { %1817 = vmatpush.msra.mxu3 %v11112_v30  ;;  %v11123_v30 = vld [vmem:[#allocation131_spill] sm:$0xff] }
 0x286   :  { %1778 = vmatpush.msra.mxu1 %v11113_v62  ;;  %v11124_v62 = vld [vmem:[#allocation134_spill] sm:$0xff] }
 0x287   :  { %1818 = vmatpush.msra.mxu3 %v11114_v13  ;;  %v11125_v13 = vld [vmem:[#allocation135_spill] sm:$0xff] }
 0x288   :  { %1779 = vmatpush.msra.mxu1 %v11115_v14  ;;  %v11126_v14 = vld [vmem:[#allocation138_spill] sm:$0xff] }
 0x289   :  { %1819 = vmatpush.msra.mxu3 %v11116_v1  ;;  %v11127_v1 = vld [vmem:[#allocation139_spill] sm:$0xff] }
 0x28a   :  { %1844 = vmatpush.msrb.mxu1 %v11117_v58  ;;  %v11128_v58 = vld [vmem:[#allocation142_spill] sm:$0xff] }
 0x28b   :  { %1884 = vmatpush.msrb.mxu3 %v11118_v59  ;;  %v11129_v59 = vld [vmem:[#allocation143_spill] sm:$0xff] }
 0x28c   :  { %1845 = vmatpush.msrb.mxu1 %v11119_v6  ;;  %v11130_v6 = vld [vmem:[#allocation132_spill] sm:$0xff] }
 0x28d   :  { %1885 = vmatpush.msrb.mxu3 %v11120_v63  ;;  %v11131_v63 = vld [vmem:[#allocation133_spill] sm:$0xff] }
 0x28e   :  { %1846 = vmatpush.msrb.mxu1 %v11121_v16  ;;  %v11132_v16 = vld [vmem:[#allocation136_spill] sm:$0xff] }
 0x28f   :  { %1886 = vmatpush.msrb.mxu3 %v11122_v51  ;;  %v11133_v51 = vld [vmem:[#allocation137_spill] sm:$0xff] }
 0x290   :  { %1847 = vmatpush.msrb.mxu1 %v11123_v30  ;;  %v11134_v30 = vld [vmem:[#allocation140_spill] sm:$0xff] }
 0x291   :  { %1887 = vmatpush.msrb.mxu3 %v11124_v62  ;;  %v11135_v62 = vld [vmem:[#allocation141_spill] sm:$0xff] }
 0x292   :  { %1848 = vmatpush.msrb.mxu1 %v11125_v13  ;;  %v11136_v13 = vld [vmem:[#allocation144_spill] sm:$0xff] }
 0x293   :  { %1888 = vmatpush.msrb.mxu3 %v11126_v14  ;;  %v11137_v14 = vld [vmem:[#allocation145_spill] sm:$0xff] }
 0x294   :  { %1849 = vmatpush.msrb.mxu1 %v11127_v1  ;;  %v11138_v1 = vld [vmem:[#allocation146_spill] sm:$0xff] }
 0x295   :  { %1889 = vmatpush.msrb.mxu3 %v11128_v58  ;;  %v11139_v58 = vld [vmem:[#allocation147_spill] sm:$0xff] }
 0x296   :  { %1850 = vmatpush.msrb.mxu1 %v11129_v59  ;;  %v11140_v59 = vld [vmem:[#allocation148_spill] sm:$0xff] }
 0x297   :  { %1890 = vmatpush.msrb.mxu3 %v11130_v6  ;;  %v11141_v6 = vld [vmem:[#allocation149_spill] sm:$0xff] }
 0x298   :  { %1851 = vmatpush.msrb.mxu1 %v11131_v63  ;;  %v11142_v63 = vld [vmem:[#allocation150_spill] sm:$0xff] }
 0x299   :  { %1891 = vmatpush.msrb.mxu3 %v11132_v16  ;;  %v1293_v16 = vpop.f32.mrf.mxu0 }
 0x29a   :  { %1852 = vmatpush.msrb.mxu1 %v11133_v51 }
 0x29b   :  { %1892 = vmatpush.msrb.mxu3 %v11134_v30  ;;  %v11143_v30 = vld [vmem:[#allocation151_spill] sm:$0xff] }
 0x29c   :  { %1853 = vmatpush.msrb.mxu1 %v11135_v62  ;;  %v11144_v62 = vld [vmem:[#allocation152_spill] sm:$0xff] }
 0x29d   :  { %1893 = vmatpush.msrb.mxu3 %v11136_v13 }
 0x29e   :  { %1854 = vmatpush.msrb.mxu1 %v11137_v14  ;;  %v11146_v14 = vld [vmem:[#allocation154_spill] sm:$0xff] }
 0x29f   :  { %1894 = vmatpush.msrb.mxu3 %v11138_v1 }
 0x2a0   :  { %1855 = vmatpush.msrb.mxu1 %v11139_v58  ;;  %v11147_v58 = vld [vmem:[#allocation155_spill] sm:$0xff] }
 0x2a1   :  { %1895 = vmatpush.msrb.mxu3 %v11140_v59  ;;  %v11148_v59 = vld [vmem:[#allocation156_spill] sm:$0xff]  ;;  %v1373_v34 = vpop.f32.mrf.mxu0 }
 0x2a2   :  { %1856 = vmatpush.msrb.mxu1 %v11141_v6 }
 0x2a3   :  { %1896 = vmatpush.msrb.mxu3 %v11142_v63 }
 0x2a4   :  { %v1313_v51 = vpop.f32.mrf.mxu1  ;;  %1857 = vmatpush.msrb.mxu1 %v11143_v30 }
 0x2a5   :  { %1897 = vmatpush.msrb.mxu3 %v11144_v62  ;;  %v1314_v13 = vadd.f32 %v1313_v51, %v1293_v16  ;;  %v1599_v62 = vld [vmem:[#allocation5 + $0x50] sm:$0xff] }
 0x2a6   :  { %1858 = vmatpush.msrb.mxu1 %v11145_v54 }
 0x2a7   :  { %1898 = vmatpush.msrb.mxu3 %v11146_v14  ;;  %v1601_v1 = vadd.f32 %v1597_v55, %v1314_v13 }
 0x2a8   :  { %1859 = vmatpush.msrb.mxu1 %v11147_v58 }
 0x2a9   :  { %1899 = vmatpush.msrb.mxu3 %v11148_v59  ;;  %v4144_v6 = vmul.f32 -1.442695, %v1601_v1 }
 0x2aa   :  { %v1353_v63 = vpop.f32.mrf.mxu3 }
 0x2ab   :  { %4256 = vpow2.f32 %v4144_v6  ;;  %v1354_v47 = vadd.f32 %v1353_v63, %v1333_v37  ;;  %v1413_v37 = vpop.f32.mrf.mxu2 }
 0x2ac   :  { %v1393_v44 = vpop.f32.mrf.mxu1 }
 0x2ad   :  { %v1602_v30 = vadd.f32 %v1598_v50, %v1354_v47  ;;  %v1394_v16 = vadd.f32 %v1393_v44, %v1373_v34  ;;  %v1600_v34 = vld [vmem:[#allocation5 + $0x58] sm:$0xff] }
 0x2af   :  { %v4145_v51 = vmul.f32 -1.442695, %v1602_v30  ;;  %v1603_v54 = vadd.f32 %v1599_v62, %v1394_v16 }
 0x2b1   :  { %v4257_v43 = vpop.eup %4256  ;;  %4258 = vpow2.f32 %v4145_v51  ;;  %v4146_v13 = vmul.f32 -1.442695, %v1603_v54 }
 0x2b2   :  { %v1623_v55 = vadd.f32 1.0, %v4257_v43 }
 0x2b3   :  { %v1433_v58 = vpop.f32.mrf.mxu3 }
 0x2b4   :  { %4260 = vrcp.f32 %v1623_v55  ;;  %v1434_v50 = vadd.f32 %v1433_v58, %v1413_v37  ;;  %v1635_v54 = vand.u32 2147483647, %v1623_v55  ;;  %vm1631_vm1 = vweird.f32 %v1623_v55 }
 0x2b5   :  { %4262 = vpow2.f32 %v4146_v13  ;;  %v1637_v13 = vand.u32 2147483648, %v1623_v55 }
 0x2b6   :  { %v1604_v62 = vadd.f32 %v1600_v34, %v1434_v50  ;;  %vm1636_vm4 = vcmp.eq.f32.partialorder %v1635_v54, 8.507059e+37 }
 0x2b7   :  { %v4259_v14 = vpop.eup %4258  ;;  %v1638_v34 = vor.u32 1.1754944e-38, %v1637_v13  ;;  %v1493_v13 = vpop.f32.mrf.mxu2 }
 0x2b8   :  { %v1624_v1 = vadd.f32 1.0, %v4259_v14 }
 0x2ba   :  { %v4261_v59 = vpop.eup %4260  ;;  %4264 = vrcp.f32 %v1624_v1  ;;  %v1652_v38 = vand.u32 2147483648, %v1624_v1  ;;  %v1650_v58 = vand.u32 2147483647, %v1624_v1  ;;  %vm1646_vm5 = vweird.f32 %v1624_v1 }
 0x2bb   :  { %v4263_v6 = vpop.eup %4262  ;;  %v1627_v63 = vmul.f32 %v4261_v59, %v1623_v55  ;;  %vm1632_vm0 = vweird.f32 %v4261_v59  ;;  %v1606_v55 = vld [vmem:[#allocation8 + $0xa0] sm:$0xff] }
 0x2bc   :  { %v7356_v47 = vadd.f32 1.0, %v4263_v6  ;;  %vm7359_vm2 = vmor %vm1631_vm1, %vm1632_vm0  ;;  %v1653_v31 = vor.u32 1.1754944e-38, %v1652_v38  ;;  %vm1651_vm7 = vcmp.eq.f32.partialorder %v1650_v58, 8.507059e+37 }
 0x2bd   :  { %v1628_v44 = vsub.f32 1.0, %v1627_v63 }
 0x2be   :  { %4266 = vrcp.f32 %v7356_v47  ;;  %vm1661_vm9 = vweird.f32 %v7356_v47 }
 0x2bf   :  { %v1629_v30 = vmul.f32 %v4261_v59, %v1628_v44  ;;  %4268 = vtanh.f32 %v1604_v62  ;;  %v1453_v44 = vpop.f32.mrf.mxu0 }
 0x2c0   :  { %v4265_v43 = vpop.eup %4264 }
 0x2c1   :  { %v1642_v16 = vmul.f32 %v4265_v43, %v1624_v1  ;;  %v1630_v51 = vadd.f32 %v4261_v59, %v1629_v30  ;;  %vm1647_vm3 = vweird.f32 %v4265_v43 }
 0x2c2   :  { %vm1648_vm6 = vmor %vm1646_vm5, %vm1647_vm3 }
 0x2c3   :  { %v1643_v14 = vsub.f32 1.0, %v1642_v16  ;;  %v1634_v50 = vsel %vm7359_vm2, %v4261_v59, %v1630_v51 }
 0x2c4   :  { %v4267_v40 = vpop.eup %4266  ;;  %v1639_v7 = vsel %vm1636_vm4, %v1638_v34, %v1634_v50  ;;  %v11154_v50 = vld [vmem:[#allocation160_spill] sm:$0xff] }
 0x2c5   :  { %v1644_v37 = vmul.f32 %v4265_v43, %v1643_v14  ;;  %v1657_v63 = vmul.f32 %v4267_v40, %v7356_v47  ;;  %v1473_v30 = vpop.f32.mrf.mxu1  ;;  %v4269_v5 = vpop.eup %4268  ;;  %vm1662_vm8 = vweird.f32 %v4267_v40 }
 0x2c6   :  { %v1474_v35 = vadd.f32 %v1473_v30, %v1453_v44  ;;  %v1673_v51 = vmul.f32 %v4269_v5, %v1639_v7  ;;  %vm1663_vm10 = vmor %vm1661_vm9, %vm1662_vm8  ;;  %v11155_v44 = vld [vmem:[#allocation161_spill] sm:$0xff] }
 0x2c7   :  { %v1658_v16 = vsub.f32 1.0, %v1657_v63  ;;  %v1645_v36 = vadd.f32 %v4265_v43, %v1644_v37 }
 0x2c8   :  { %v1610_v14 = vadd.f32 %v1606_v55, %v1474_v35  ;;  %v11156_v55 = vld [vmem:[#allocation162_spill] sm:$0xff] }
 0x2c9   :  { %v1649_v62 = vsel %vm1648_vm6, %v4265_v43, %v1645_v36  ;;  %v1659_v17 = vmul.f32 %v4267_v40, %v1658_v16  ;;  %v1667_v36 = vand.u32 2147483648, %v7356_v47  ;;  %v11157_v16 = vld [vmem:[#allocation163_spill] sm:$0xff] }
 0x2ca   :  { %v1654_v26 = vsel %vm1651_vm7, %v1653_v31, %v1649_v62  ;;  %v4147_v54 = vmul.f32 -1.442695, %v1610_v14  ;;  %v11158_v14 = vld [vmem:[#allocation164_spill] sm:$0xff] }
 0x2cb   :  { %v1672_v59 = vmul.f32 %v1654_v26, %v6852_v12  ;;  %v1660_v63 = vadd.f32 %v4267_v40, %v1659_v17  ;;  %v1665_v12 = vand.u32 2147483647, %v7356_v47  ;;  %v1668_v7 = vor.u32 1.1754944e-38, %v1667_v36  ;;  %v1608_v47 = vld [vmem:[#allocation8 + $0xb0] sm:$0xff]  ;;  %v11160_v36 = vld [vmem:[#allocation166_spill] sm:$0xff] }
 0x2cc   :  { %v1513_v6 = vpop.f32.mrf.mxu3  ;;  %4270 = vpow2.f32 %v4147_v54 }
 0x2cd   :  { %v7367_v1 = vadd.f32 %v1673_v51, %v1672_v59  ;;  %v1514_v37 = vadd.f32 %v1513_v6, %v1493_v13  ;;  %v1664_v5 = vsel %vm1663_vm10, %v4267_v40, %v1660_v63  ;;  %vm1666_vm11 = vcmp.eq.f32.partialorder %v1665_v12, 8.507059e+37  ;;  %v11159_v59 = vld [vmem:[#allocation165_spill] sm:$0xff]  ;;  %v1573_v51 = vpop.f32.mrf.mxu2 }
 0x2ce   :  { %v1669_v17 = vsel %vm1666_vm11, %v1668_v7, %v1664_v5  ;;  %v1609_v6 = vld [vmem:[#allocation8 + $0xb8] sm:$0xff] }
 0x2cf   :  { %4272 = vtanh.f32 %v7367_v1  ;;  %v1611_v35 = vadd.f32 %v1607_v10, %v1514_v37  ;;  %v11163_v5 = vld [vmem:[#allocation169_spill] sm:$0xff] }
 0x2d1   :  { %v4148_v26 = vmul.f32 -1.442695, %v1611_v35  ;;  %v11161_v35 = vld [vmem:[#allocation167_spill] sm:$0xff] }
 0x2d2   :  { %v4271_v31 = vpop.eup %4270 }
 0x2d3   :  { %4274 = vpow2.f32 %v4148_v26  ;;  %v7375_v58 = vadd.f32 1.0, %v4271_v31  ;;  %v11162_v26 = vld [vmem:[#allocation168_spill] sm:$0xff] }
 0x2d5   :  { %v4273_v38 = vpop.eup %4272  ;;  %4276 = vrcp.f32 %v7375_v58  ;;  %vm1694_vm14 = vweird.f32 %v7375_v58 }
 0x2d6   :  { %v7373_v43 = vmul.f32 %v4273_v38, %v1669_v17  ;;  %v1700_v17 = vand.u32 2147483648, %v7375_v58 }
 0x2d8   :  { %1741 = vst [vmem:[#allocation11 + $0x10] sm:$0xff] %v7373_v43  ;;  %1760 = vmatmul.f32.vlgmr.msra.gmra.mxu0 %v7373_v43  ;;  %1800 = vmatmul.f32.vlgmr.msra.gmra.mxu2 %v7373_v43 }
 0x2d9   :  { %v4275_v10 = vpop.eup %4274  ;;  %1904 = vmatpush.msra.mxu0 %v6868_v56  ;;  %1944 = vmatpush.msra.mxu2 %v6871_v21 }
 0x2da   :  { %v7382_v40 = vadd.f32 1.0, %v4275_v10  ;;  %v11164_v10 = vld [vmem:[#allocation170_spill] sm:$0xff] }
 0x2db   :  { %1905 = vmatpush.msra.mxu0 %v6875_v48  ;;  %1945 = vmatpush.msra.mxu2 %v6878_v52  ;;  %v7394_v56 = vpop.eup %4276  ;;  %v11151_v48 = vld [vmem:[#allocation157_spill] sm:$0xff] }
 0x2dc   :  { %4278 = vrcp.f32 %v7382_v40  ;;  %v1690_v52 = vmul.f32 %v7394_v56, %v7375_v58  ;;  %vm1695_vm12 = vweird.f32 %v7394_v56  ;;  %v1715_v38 = vand.u32 2147483648, %v7382_v40 }
 0x2dd   :  { %1906 = vmatpush.msra.mxu0 %v6881_v45  ;;  %1946 = vmatpush.msra.mxu2 %v6884_v42  ;;  %v11152_v42 = vld [vmem:[#allocation158_spill] sm:$0xff]  ;;  %vm1709_vm15 = vweird.f32 %v7382_v40  ;;  %vm7430_vm0 = vmor %vm1694_vm14, %vm1695_vm12 }
 0x2df   :  { %1907 = vmatpush.msra.mxu0 %v6889_v60  ;;  %1947 = vmatpush.msra.mxu2 %v6892_v61  ;;  %v11153_v60 = vld [vmem:[#allocation159_spill] sm:$0xff]  ;;  %v1533_v61 = vpop.f32.mrf.mxu0 }
 0x2e0   :  { %1840 = vmatmul.f32.vlgmr.msrb.gmra.mxu0 %v7373_v43  ;;  %1880 = vmatmul.f32.vlgmr.msrb.gmra.mxu2 %v7373_v43 }
 0x2e1   :  { %1908 = vmatpush.msra.mxu0 %v6899_v25  ;;  %1948 = vmatpush.msra.mxu2 %v6902_v27 }
 0x2e2   :  { %v7398_v21 = vpop.eup %4278 }
 0x2e3   :  { %1909 = vmatpush.msra.mxu0 %v6909_v39  ;;  %1949 = vmatpush.msra.mxu2 %v11151_v48  ;;  %v1705_v45 = vmul.f32 %v7398_v21, %v7382_v40  ;;  %v1691_v39 = vsub.f32 1.0, %v1690_v52  ;;  %vm1710_vm13 = vweird.f32 %v7398_v21  ;;  %v1698_v52 = vand.u32 2147483647, %v7375_v58  ;;  %v11185_v48 = vld [vmem:[#allocation187_spill] sm:$0xff] }
 0x2e4   :  { %vm7436_vm1 = vmor %vm1709_vm15, %vm1710_vm13 }
 0x2e5   :  { %1910 = vmatpush.msra.mxu0 %v11152_v42  ;;  %1950 = vmatpush.msra.mxu2 %v11153_v60  ;;  %v1553_v25 = vpop.f32.mrf.mxu1  ;;  %v1706_v34 = vsub.f32 1.0, %v1705_v45  ;;  %v1692_v37 = vmul.f32 %v7394_v56, %v1691_v39  ;;  %v1713_v45 = vand.u32 2147483647, %v7382_v40  ;;  %v1701_v40 = vor.u32 1.1754944e-38, %v1700_v17  ;;  %v7546_v17 = vld [vmem:[#allocation10 + $0x5e8] sm:$0xff]  ;;  %v11187_v60 = vld [vmem:[#allocation189_spill] sm:$0xff] }
 0x2e6   :  { %v1554_v27 = vadd.f32 %v1553_v25, %v1533_v61  ;;  %v1716_v25 = vor.u32 1.1754944e-38, %v1715_v38  ;;  %vm1699_vm2 = vcmp.eq.f32.partialorder %v1698_v52, 8.507059e+37  ;;  %v7543_v38 = vld [vmem:[#allocation10 + $0x5e0] sm:$0xff] }
 0x2e7   :  { %1911 = vmatpush.msra.mxu0 %v11154_v50  ;;  %1951 = vmatpush.msra.mxu2 %v11155_v44  ;;  %v1707_v54 = vmul.f32 %v7398_v21, %v1706_v34  ;;  %v1693_v7 = vadd.f32 %v7394_v56, %v1692_v37  ;;  %vm1714_vm3 = vcmp.eq.f32.partialorder %v1713_v45, 8.507059e+37  ;;  %v11172_v50 = vld [vmem:[#allocation174_spill] sm:$0xff]  ;;  %v11173_v44 = vld [vmem:[#allocation175_spill] sm:$0xff] }
 0x2e8   :  { %v1612_v30 = vadd.f32 %v1608_v47, %v1554_v27  ;;  %v7553_v52 = vld [vmem:[#allocation10 + $0x5a0] sm:$0xff]  ;;  %v7556_v45 = vld [vmem:[#allocation10 + $0x5a8] sm:$0xff] }
 0x2e9   :  { %1912 = vmatpush.msra.mxu0 %v11156_v55  ;;  %1952 = vmatpush.msra.mxu2 %v11157_v16  ;;  %v1708_v31 = vadd.f32 %v7398_v21, %v1707_v54  ;;  %v1697_v61 = vsel %vm7430_vm0, %v7394_v56, %v1693_v7  ;;  %v11176_v16 = vld [vmem:[#allocation178_spill] sm:$0xff]  ;;  %v11178_v54 = vld [vmem:[#allocation180_spill] sm:$0xff] }
 0x2ea   :  { %v4149_v62 = vmul.f32 -1.442695, %v1612_v30  ;;  %v11175_v30 = vld [vmem:[#allocation177_spill] sm:$0xff]  ;;  %v7535_v7 = vld [vmem:[#allocation10 + $0x620] sm:$0xff] }
 0x2eb   :  { %1913 = vmatpush.msra.mxu0 %v11158_v14  ;;  %1953 = vmatpush.msra.mxu2 %v11159_v59  ;;  %v1712_v58 = vsel %vm7436_vm1, %v7398_v21, %v1708_v31  ;;  %v11169_v21 = vld [vmem:[#allocation171_spill] sm:$0xff] }
 0x2ec   :  { %v1593_v13 = vpop.f32.mrf.mxu3  ;;  %4280 = vpow2.f32 %v4149_v62  ;;  %v1717_v47 = vsel %vm1714_vm3, %v1716_v25, %v1712_v58  ;;  %v11177_v62 = vld [vmem:[#allocation179_spill] sm:$0xff]  ;;  %v7569_v25 = vld [vmem:[#allocation10 + $0x520] sm:$0xff] }
 0x2ed   :  { %v1594_v63 = vadd.f32 %v1593_v13, %v1573_v51  ;;  %1914 = vmatpush.msra.mxu0 %v11160_v36  ;;  %1954 = vmatpush.msra.mxu2 %v11161_v35  ;;  %v11179_v13 = vld [vmem:[#allocation181_spill] sm:$0xff]  ;;  %v7538_v31 = vld [vmem:[#allocation10 + $0x628] sm:$0xff] }
 0x2ee   :  { %v11189_v58 = vld [vmem:[#allocation191_spill] sm:$0xff] }
 0x2ef   :  { %v1613_v12 = vadd.f32 %v1609_v6, %v1594_v63  ;;  %1915 = vmatpush.msra.mxu0 %v11162_v26  ;;  %1955 = vmatpush.msra.mxu2 %v11163_v5  ;;  %v7527_v26 = vld [vmem:[#allocation10 + $0x660] sm:$0xff]  ;;  %v7530_v5 = vld [vmem:[#allocation10 + $0x668] sm:$0xff] }
 0x2f1   :  { %4282 = vtanh.f32 %v1613_v12  ;;  %1916 = vmatpush.msra.mxu0 %v11164_v10  ;;  %1956 = vmatpush.msra.mxu2 %v6978_v57  ;;  %v11184_v10 = vld [vmem:[#allocation186_spill] sm:$0xff] }
 0x2f2   :  { %v4281_v42 = vpop.eup %4280 }
 0x2f3   :  { %1917 = vmatpush.msra.mxu0 %v6987_v4  ;;  %1957 = vmatpush.msra.mxu2 %v6990_v33  ;;  %v1688_v57 = vadd.f32 1.0, %v4281_v42  ;;  %v1702_v33 = vsel %vm1699_vm2, %v1701_v40, %v1697_v61  ;;  %v11186_v42 = vld [vmem:[#allocation188_spill] sm:$0xff]  ;;  %v7564_v61 = vld [vmem:[#allocation10 + $0x568] sm:$0xff] }
 0x2f4   :  { %v7572_v40 = vld [vmem:[#allocation10 + $0x528] sm:$0xff] }
 0x2f5   :  { %1918 = vmatpush.msra.mxu0 %v6993_v29  ;;  %1958 = vmatpush.msra.mxu2 %v6996_v49  ;;  %4284 = vrcp.f32 %v1688_v57  ;;  %v11170_v29 = vld [vmem:[#allocation172_spill] sm:$0xff]  ;;  %v11171_v49 = vld [vmem:[#allocation173_spill] sm:$0xff]  ;;  %v1730_v14 = vand.u32 2147483648, %v1688_v57  ;;  %v1728_v51 = vand.u32 2147483647, %v1688_v57  ;;  %vm1724_vm5 = vweird.f32 %v1688_v57 }
 0x2f6   :  { %v1735_v27 = vmul.f32 %v1717_v47, %v11171_v49  ;;  %v7577_v47 = vld [vmem:[#allocation10 + $0x4e0] sm:$0xff] }
 0x2f7   :  { %v4283_v4 = vpop.eup %4282  ;;  %1919 = vmatpush.msra.mxu0 %v6999_v53  ;;  %1959 = vmatpush.msra.mxu2 %v7002_v28  ;;  %v11174_v28 = vld [vmem:[#allocation176_spill] sm:$0xff]  ;;  %v1731_v37 = vor.u32 1.1754944e-38, %v1730_v14  ;;  %vm1729_vm7 = vcmp.eq.f32.partialorder %v1728_v51, 8.507059e+37  ;;  %v7585_v49 = vld [vmem:[#allocation10 + $0x4a0] sm:$0xff]  ;;  %v7614_v14 = vld [vmem:[#allocation10 + $0x7f8] sm:$0xff] }
 0x2f8   :  { %v1736_v56 = vmul.f32 %v4283_v4, %v1702_v33  ;;  %1920 = vmatmul.f32.vlgmr.msra.gmra.mxu0 %v7373_v43  ;;  %1960 = vmatmul.f32.vlgmr.msra.gmra.mxu2 %v7373_v43  ;;  %v11190_v4 = vld [vmem:[#allocation192_spill] sm:$0xff]  ;;  %v11191_v33 = vld [vmem:[#allocation193_spill] sm:$0xff]  ;;  %11198 = vst [vmem:[#allocation20_spill] sm:$0xff] %v7614_v14  ;;  %v7620_v51 = vld [vmem:[#allocation10 + $0x248] sm:$0xff] }
 0x2f9   :  { %1984 = vmatpush.msrb.mxu0 %v11169_v21  ;;  %2024 = vmatpush.msrb.mxu2 %v11170_v29  ;;  %v11192_v21 = vld [vmem:[#allocation194_spill] sm:$0xff]  ;;  %v11193_v29 = vld [vmem:[#allocation195_spill] sm:$0xff]  ;;  %11200 = vst [vmem:[#allocation55_spill] sm:$0xff] %v7620_v51 }
 0x2fa   :  { %v7459_v34 = vadd.f32 %v1736_v56, %v1735_v27  ;;  %v7580_v56 = vld [vmem:[#allocation10 + $0x4e8] sm:$0xff] }
 0x2fb   :  { %1985 = vmatpush.msrb.mxu0 %v11172_v50  ;;  %2025 = vmatpush.msrb.mxu2 %v11173_v44  ;;  %v4285_v39 = vpop.eup %4284  ;;  %v7588_v27 = vld [vmem:[#allocation10 + $0x4a8] sm:$0xff]  ;;  %v11194_v50 = vld [vmem:[#allocation196_spill] sm:$0xff]  ;;  %v11195_v44 = vld [vmem:[#allocation197_spill] sm:$0xff] }
 0x2fc   :  { %v1720_v53 = vmul.f32 %v4285_v39, %v1688_v57  ;;  %4286 = vtanh.f32 %v7459_v34  ;;  %vm1725_vm4 = vweird.f32 %v4285_v39  ;;  %v7561_v57 = vld [vmem:[#allocation10 + $0x560] sm:$0xff] }
 0x2fd   :  { %1986 = vmatpush.msrb.mxu0 %v11174_v28  ;;  %2026 = vmatpush.msrb.mxu2 %v11175_v30  ;;  %vm1726_vm6 = vmor %vm1724_vm5, %vm1725_vm4  ;;  %v11196_v28 = vld [vmem:[#allocation198_spill] sm:$0xff]  ;;  %v7600_v30 = vld [vmem:[#allocation10 + $0x288] sm:$0xff] }
 0x2fe   :  { %v1721_v55 = vsub.f32 1.0, %v1720_v53  ;;  %v7596_v53 = vld [vmem:[#allocation10 + $0x468] sm:$0xff] }
 0x2ff   :  { %1987 = vmatpush.msrb.mxu0 %v11176_v16  ;;  %2027 = vmatpush.msrb.mxu2 %v11177_v62  ;;  %v7606_v16 = vld [vmem:[#allocation10 + $0x428] sm:$0xff]  ;;  %v7611_v62 = vld [vmem:[#allocation10 + $0x7f0] sm:$0xff] }
 0x300   :  { %v1722_v59 = vmul.f32 %v4285_v39, %v1721_v55  ;;  %v7603_v55 = vld [vmem:[#allocation10 + $0x420] sm:$0xff]  ;;  %11197 = vst [vmem:[#allocation46_spill] sm:$0xff] %v7611_v62 }
 0x301   :  { %1988 = vmatpush.msrb.mxu0 %v11178_v54  ;;  %2028 = vmatpush.msrb.mxu2 %v11179_v13  ;;  %v7623_v54 = vld [vmem:[#allocation10 + $0x7b0] sm:$0xff]  ;;  %v7626_v13 = vld [vmem:[#allocation10 + $0x7b8] sm:$0xff] }
 0x302   :  { %v1723_v6 = vadd.f32 %v4285_v39, %v1722_v59  ;;  %v4287_v36 = vpop.eup %4286  ;;  %v7617_v59 = vld [vmem:[#allocation10 + $0x240] sm:$0xff]  ;;  %11201 = vst [vmem:[#allocation50_spill] sm:$0xff] %v7623_v54 }
 0x303   :  { %1989 = vmatpush.msrb.mxu0 %v7041_v18  ;;  %2029 = vmatpush.msrb.mxu2 %v7044_v19  ;;  %v7479_v18 = vld [vmem:[#allocation10 + $0x7e0] sm:$0xff]  ;;  %v7482_v19 = vld [vmem:[#allocation10 + $0x7e8] sm:$0xff]  ;;  %11199 = vst [vmem:[#allocation25_spill] sm:$0xff] %v7617_v59 }
 0x304   :  { %v1727_v63 = vsel %vm1726_vm6, %v4285_v39, %v1723_v6  ;;  %v7593_v39 = vld [vmem:[#allocation10 + $0x460] sm:$0xff]  ;;  %11202 = vst [vmem:[#allocation27_spill] sm:$0xff] %v7626_v13 }
 0x305   :  { %1990 = vmatpush.msrb.mxu0 %v7049_v0  ;;  %2030 = vmatpush.msrb.mxu2 %v7052_v41  ;;  %v1732_v35 = vsel %vm1729_vm7, %v1731_v37, %v1727_v63  ;;  %v7487_v0 = vld [vmem:[#allocation10 + $0x7a0] sm:$0xff]  ;;  %v7490_v41 = vld [vmem:[#allocation10 + $0x7a8] sm:$0xff]  ;;  %v7635_v63 = vld [vmem:[#allocation10 + $0x770] sm:$0xff] }
 0x306   :  { %v7472_v12 = vmul.f32 %v4287_v36, %v1732_v35  ;;  %v7629_v6 = vld [vmem:[#allocation10 + $0x200] sm:$0xff]  ;;  %v7632_v37 = vld [vmem:[#allocation10 + $0x208] sm:$0xff]  ;;  %11205 = vst [vmem:[#allocation54_spill] sm:$0xff] %v7635_v63  ;;  %v7638_v36 = vld [vmem:[#allocation10 + $0x778] sm:$0xff] }
 0x307   :  { %1991 = vmatpush.msrb.mxu0 %v7060_v46  ;;  %2031 = vmatpush.msrb.mxu2 %v7063_v32  ;;  %v7495_v46 = vld [vmem:[#allocation10 + $0x760] sm:$0xff]  ;;  %v7498_v32 = vld [vmem:[#allocation10 + $0x768] sm:$0xff]  ;;  %11203 = vst [vmem:[#allocation22_spill] sm:$0xff] %v7629_v6 }
 0x308   :  { %1743 = vst [vmem:[#allocation12 + $0x28] sm:$0xff] %v7472_v12  ;;  %1780 = vmatmul.f32.vlgmr.msra.gmra.mxu1 %v7472_v12  ;;  %1820 = vmatmul.f32.vlgmr.msra.gmra.mxu3 %v7472_v12  ;;  %v7641_v35 = vld [vmem:[#allocation10 + $0x1c0] sm:$0xff] }
 0x309   :  { %1924 = vmatpush.msra.mxu1 %v7479_v18  ;;  %1964 = vmatpush.msra.mxu3 %v7482_v19  ;;  %11204 = vst [vmem:[#allocation59_spill] sm:$0xff] %v7632_v37 }
 0x30a   :  { %1992 = vmatpush.msrb.mxu0 %v7068_v15  ;;  %2032 = vmatpush.msrb.mxu2 %v7071_v20  ;;  %v7503_v15 = vld [vmem:[#allocation10 + $0x720] sm:$0xff]  ;;  %v7506_v20 = vld [vmem:[#allocation10 + $0x728] sm:$0xff]  ;;  %11206 = vst [vmem:[#allocation24_spill] sm:$0xff] %v7638_v36 }
 0x30b   :  { %1925 = vmatpush.msra.mxu1 %v7487_v0  ;;  %1965 = vmatpush.msra.mxu3 %v7490_v41  ;;  %11207 = vst [vmem:[#allocation29_spill] sm:$0xff] %v7641_v35 }
 0x30c   :  { %1993 = vmatpush.msrb.mxu0 %v7076_v9  ;;  %2033 = vmatpush.msrb.mxu2 %v7079_v11  ;;  %v7511_v9 = vld [vmem:[#allocation10 + $0x6e0] sm:$0xff]  ;;  %v7514_v11 = vld [vmem:[#allocation10 + $0x6e8] sm:$0xff] }
 0x30d   :  { %1926 = vmatpush.msra.mxu1 %v7495_v46  ;;  %1966 = vmatpush.msra.mxu3 %v7498_v32 }
 0x30e   :  { %1994 = vmatpush.msrb.mxu0 %v7084_v2  ;;  %2034 = vmatpush.msrb.mxu2 %v7087_v3  ;;  %v7519_v2 = vld [vmem:[#allocation10 + $0x6a0] sm:$0xff]  ;;  %v7522_v3 = vld [vmem:[#allocation10 + $0x6a8] sm:$0xff] }
 0x30f   :  { %1927 = vmatpush.msra.mxu1 %v7503_v15  ;;  %1967 = vmatpush.msra.mxu3 %v7506_v20 }
 0x310   :  { %1860 = vmatmul.f32.vlgmr.msrb.gmra.mxu1 %v7472_v12  ;;  %1900 = vmatmul.f32.vlgmr.msrb.gmra.mxu3 %v7472_v12 }
 0x311   :  { %1928 = vmatpush.msra.mxu1 %v7511_v9  ;;  %1968 = vmatpush.msra.mxu3 %v7514_v11 }
 0x312   :  { %1995 = vmatpush.msrb.mxu0 %v7094_v8  ;;  %2035 = vmatpush.msrb.mxu2 %v7097_v22  ;;  %v11180_v8 = vld [vmem:[#allocation182_spill] sm:$0xff]  ;;  %v11181_v22 = vld [vmem:[#allocation183_spill] sm:$0xff] }
 0x313   :  { %1929 = vmatpush.msra.mxu1 %v7519_v2  ;;  %1969 = vmatpush.msra.mxu3 %v7522_v3 }
 0x314   :  { %1996 = vmatpush.msrb.mxu0 %v7102_v23  ;;  %2036 = vmatpush.msrb.mxu2 %v7105_v24  ;;  %v11182_v23 = vld [vmem:[#allocation184_spill] sm:$0xff]  ;;  %v11183_v24 = vld [vmem:[#allocation185_spill] sm:$0xff] }
 0x315   :  { %1930 = vmatpush.msra.mxu1 %v7527_v26  ;;  %1970 = vmatpush.msra.mxu3 %v7530_v5 }
 0x316   :  { %1997 = vmatpush.msrb.mxu0 %v11180_v8  ;;  %2037 = vmatpush.msrb.mxu2 %v11181_v22  ;;  %v7644_v8 = vld [vmem:[#allocation10 + $0x1c8] sm:$0xff]  ;;  %v7647_v22 = vld [vmem:[#allocation10 + $0x730] sm:$0xff] }
 0x317   :  { %1931 = vmatpush.msra.mxu1 %v7535_v7  ;;  %1971 = vmatpush.msra.mxu3 %v7538_v31  ;;  %11208 = vst [vmem:[#allocation63_spill] sm:$0xff] %v7644_v8 }
 0x318   :  { %1998 = vmatpush.msrb.mxu0 %v11182_v23  ;;  %2038 = vmatpush.msrb.mxu2 %v11183_v24  ;;  %11209 = vst [vmem:[#allocation58_spill] sm:$0xff] %v7647_v22  ;;  %v7650_v23 = vld [vmem:[#allocation10 + $0x738] sm:$0xff]  ;;  %v7653_v24 = vld [vmem:[#allocation10 + $0x180] sm:$0xff] }
 0x319   :  { %1932 = vmatpush.msra.mxu1 %v7543_v38  ;;  %1972 = vmatpush.msra.mxu3 %v7546_v17  ;;  %11210 = vst [vmem:[#allocation31_spill] sm:$0xff] %v7650_v23 }
 0x31a   :  { %1999 = vmatpush.msrb.mxu0 %v11184_v10  ;;  %2039 = vmatpush.msrb.mxu2 %v11185_v48  ;;  %11211 = vst [vmem:[#allocation26_spill] sm:$0xff] %v7653_v24  ;;  %v7656_v10 = vld [vmem:[#allocation10 + $0x188] sm:$0xff]  ;;  %v7659_v48 = vld [vmem:[#allocation10 + $0x6f0] sm:$0xff] }
 0x31b   :  { %2000 = vmatmul.f32.vlgmr.msrb.gmra.mxu0 %v7373_v43  ;;  %2040 = vmatmul.f32.vlgmr.msrb.gmra.mxu2 %v7373_v43  ;;  %v11188_v43 = vld [vmem:[#allocation190_spill] sm:$0xff]  ;;  %11212 = vst [vmem:[#allocation67_spill] sm:$0xff] %v7656_v10 }
 0x31c   :  { %1933 = vmatpush.msra.mxu1 %v7553_v52  ;;  %1973 = vmatpush.msra.mxu3 %v7556_v45  ;;  %11213 = vst [vmem:[#allocation62_spill] sm:$0xff] %v7659_v48 }
 0x31d   :  { %2212 = vmatpush.msra.mxu0 %v11186_v42  ;;  %2252 = vmatpush.msra.mxu2 %v11187_v60  ;;  %v7662_v42 = vld [vmem:[#allocation10 + $0x6f8] sm:$0xff]  ;;  %v7665_v60 = vld [vmem:[#allocation10 + $0x140] sm:$0xff] }
 0x31e   :  { %1934 = vmatpush.msra.mxu1 %v7561_v57  ;;  %1974 = vmatpush.msra.mxu3 %v7564_v61  ;;  %11214 = vst [vmem:[#allocation28_spill] sm:$0xff] %v7662_v42 }
 0x31f   :  { %2213 = vmatpush.msra.mxu0 %v11188_v43  ;;  %2253 = vmatpush.msra.mxu2 %v11189_v58  ;;  %11215 = vst [vmem:[#allocation33_spill] sm:$0xff] %v7665_v60  ;;  %v7668_v43 = vld [vmem:[#allocation10 + $0x148] sm:$0xff]  ;;  %v7671_v58 = vld [vmem:[#allocation10 + $0x6b0] sm:$0xff] }
 0x320   :  { %1935 = vmatpush.msra.mxu1 %v7569_v25  ;;  %1975 = vmatpush.msra.mxu3 %v7572_v40  ;;  %11216 = vst [vmem:[#allocation71_spill] sm:$0xff] %v7668_v43 }
 0x321   :  { %2214 = vmatpush.msra.mxu0 %v11190_v4  ;;  %2254 = vmatpush.msra.mxu2 %v11191_v33  ;;  %11217 = vst [vmem:[#allocation66_spill] sm:$0xff] %v7671_v58  ;;  %v7674_v4 = vld [vmem:[#allocation10 + $0x6b8] sm:$0xff]  ;;  %v7677_v33 = vld [vmem:[#allocation10 + $0x100] sm:$0xff] }
 0x322   :  { %1936 = vmatpush.msra.mxu1 %v7577_v47  ;;  %1976 = vmatpush.msra.mxu3 %v7580_v56  ;;  %11218 = vst [vmem:[#allocation35_spill] sm:$0xff] %v7674_v4 }
 0x323   :  { %2215 = vmatpush.msra.mxu0 %v11192_v21  ;;  %2255 = vmatpush.msra.mxu2 %v11193_v29  ;;  %11219 = vst [vmem:[#allocation30_spill] sm:$0xff] %v7677_v33  ;;  %v7680_v21 = vld [vmem:[#allocation10 + $0x108] sm:$0xff]  ;;  %v7683_v29 = vld [vmem:[#allocation10 + $0x670] sm:$0xff] }
 0x324   :  { %1937 = vmatpush.msra.mxu1 %v7585_v49  ;;  %1977 = vmatpush.msra.mxu3 %v7588_v27  ;;  %11220 = vst [vmem:[#allocation72_spill] sm:$0xff] %v7680_v21 }
 0x325   :  { %2216 = vmatpush.msra.mxu0 %v11194_v50  ;;  %2256 = vmatpush.msra.mxu2 %v11195_v44  ;;  %11221 = vst [vmem:[#allocation73_spill] sm:$0xff] %v7683_v29  ;;  %v7686_v50 = vld [vmem:[#allocation10 + $0x678] sm:$0xff]  ;;  %v7689_v44 = vld [vmem:[#allocation10 + $0xc0] sm:$0xff] }
 0x326   :  { %1938 = vmatpush.msra.mxu1 %v7593_v39  ;;  %1978 = vmatpush.msra.mxu3 %v7596_v53  ;;  %11222 = vst [vmem:[#allocation32_spill] sm:$0xff] %v7686_v50 }
 0x327   :  { %2217 = vmatpush.msra.mxu0 %v11196_v28  ;;  %2257 = vmatpush.msra.mxu2 %v7600_v30  ;;  %11223 = vst [vmem:[#allocation37_spill] sm:$0xff] %v7689_v44  ;;  %v7692_v28 = vld [vmem:[#allocation10 + $0xc8] sm:$0xff] }
 0x328   :  { %1939 = vmatpush.msra.mxu1 %v7603_v55  ;;  %1979 = vmatpush.msra.mxu3 %v7606_v16  ;;  %11224 = vst [vmem:[#allocation76_spill] sm:$0xff] %v7692_v28 }
 0x329   :  { %1940 = vmatmul.f32.vlgmr.msra.gmra.mxu1 %v7472_v12  ;;  %1980 = vmatmul.f32.vlgmr.msra.gmra.mxu3 %v7472_v12 }
 0x32a   :  { %2004 = vmatpush.msrb.mxu1 %v7611_v62  ;;  %2044 = vmatpush.msrb.mxu3 %v7614_v14 }
 0x32b   :  { %2218 = vmatpush.msra.mxu0 %v7617_v59  ;;  %2258 = vmatpush.msra.mxu2 %v7620_v51 }
 0x32c   :  { %2005 = vmatpush.msrb.mxu1 %v7623_v54  ;;  %2045 = vmatpush.msrb.mxu3 %v7626_v13 }
 0x32d   :  { %2219 = vmatpush.msra.mxu0 %v7629_v6  ;;  %2259 = vmatpush.msra.mxu2 %v7632_v37 }
 0x32e   :  { %2006 = vmatpush.msrb.mxu1 %v7635_v63  ;;  %2046 = vmatpush.msrb.mxu3 %v7638_v36 }
 0x32f   :  { %2220 = vmatpush.msra.mxu0 %v7641_v35  ;;  %2260 = vmatpush.msra.mxu2 %v7644_v8 }
 0x330   :  { %2007 = vmatpush.msrb.mxu1 %v7647_v22  ;;  %2047 = vmatpush.msrb.mxu3 %v7650_v23 }
 0x331   :  { %2221 = vmatpush.msra.mxu0 %v7653_v24  ;;  %2261 = vmatpush.msra.mxu2 %v7656_v10  ;;  %v2067_v10 = vld [vmem:[#allocation5 + $0x70] sm:$0xff] }
 0x332   :  { %2008 = vmatpush.msrb.mxu1 %v7659_v48  ;;  %2048 = vmatpush.msrb.mxu3 %v7662_v42 }
 0x333   :  { %2222 = vmatpush.msra.mxu0 %v7665_v60  ;;  %2262 = vmatpush.msra.mxu2 %v7668_v43  ;;  %v8029_v43 = vld [vmem:[#allocation10 + $0x410] sm:$0xff] }
 0x334   :  { %2009 = vmatpush.msrb.mxu1 %v7671_v58  ;;  %2049 = vmatpush.msrb.mxu3 %v7674_v4  ;;  %v11266_v4 = vld [vmem:[#allocation38_spill] sm:$0xff]  ;;  %v8023_v58 = vld [vmem:[#allocation10 + $0x450] sm:$0xff]  ;;  %11343 = vst [vmem:[#allocation164_spill] sm:$0xff] %v8029_v43 }
 0x335   :  { %2223 = vmatpush.msra.mxu0 %v7677_v33  ;;  %2263 = vmatpush.msra.mxu2 %v7680_v21  ;;  %v7695_v33 = vld [vmem:[#allocation10 + $0x630] sm:$0xff]  ;;  %v7698_v21 = vld [vmem:[#allocation10 + $0x638] sm:$0xff]  ;;  %11341 = vst [vmem:[#allocation162_spill] sm:$0xff] %v8023_v58 }
 0x336   :  { %2010 = vmatpush.msrb.mxu1 %v7683_v29  ;;  %2050 = vmatpush.msrb.mxu3 %v7686_v50  ;;  %11225 = vst [vmem:[#allocation77_spill] sm:$0xff] %v7695_v33  ;;  %v7701_v29 = vld [vmem:[#allocation10 + $0x80] sm:$0xff]  ;;  %v7704_v50 = vld [vmem:[#allocation10 + $0x88] sm:$0xff] }
 0x337   :  { %2224 = vmatpush.msra.mxu0 %v7689_v44  ;;  %2264 = vmatpush.msra.mxu2 %v7692_v28  ;;  %11226 = vst [vmem:[#allocation39_spill] sm:$0xff] %v7698_v21  ;;  %v7707_v44 = vld [vmem:[#allocation10 + $0x5f0] sm:$0xff]  ;;  %v7710_v28 = vld [vmem:[#allocation10 + $0x5f8] sm:$0xff] }
 0x338   :  { %2011 = vmatpush.msrb.mxu1 %v7695_v33  ;;  %2051 = vmatpush.msrb.mxu3 %v7698_v21  ;;  %11227 = vst [vmem:[#allocation34_spill] sm:$0xff] %v7701_v29  ;;  %v7713_v33 = vld [vmem:[#allocation10 + $0x40] sm:$0xff]  ;;  %v7716_v21 = vld [vmem:[#allocation10 + $0x48] sm:$0xff] }
 0x339   :  { %2225 = vmatpush.msra.mxu0 %v7701_v29  ;;  %11228 = vst [vmem:[#allocation80_spill] sm:$0xff] %v7704_v50  ;;  %2265 = vmatpush.msra.mxu2 %v7704_v50  ;;  %v7719_v29 = vld [vmem:[#allocation10 + $0x5b0] sm:$0xff]  ;;  %v7722_v50 = vld [vmem:[#allocation10 + $0x5b8] sm:$0xff] }
 0x33a   :  { %11229 = vst [vmem:[#allocation81_spill] sm:$0xff] %v7707_v44  ;;  %2012 = vmatpush.msrb.mxu1 %v7707_v44  ;;  %2052 = vmatpush.msrb.mxu3 %v7710_v28  ;;  %v7725_v44 = vld [vmem:[#allocation10] sm:$0xff] }
 0x33b   :  { %11230 = vst [vmem:[#allocation40_spill] sm:$0xff] %v7710_v28  ;;  %2226 = vmatpush.msra.mxu0 %v7713_v33  ;;  %2266 = vmatpush.msra.mxu2 %v7716_v21  ;;  %v7728_v28 = vld [vmem:[#allocation10 + $0x8] sm:$0xff] }
 0x33c   :  { %11231 = vst [vmem:[#allocation45_spill] sm:$0xff] %v7713_v33  ;;  %2013 = vmatpush.msrb.mxu1 %v7719_v29  ;;  %2053 = vmatpush.msrb.mxu3 %v7722_v50  ;;  %v7731_v33 = vld [vmem:[#allocation10 + $0x570] sm:$0xff] }
 0x33d   :  { %11232 = vst [vmem:[#allocation84_spill] sm:$0xff] %v7716_v21  ;;  %2227 = vmatpush.msra.mxu0 %v7725_v44  ;;  %2267 = vmatpush.msra.mxu2 %v7728_v28  ;;  %v7734_v21 = vld [vmem:[#allocation10 + $0x578] sm:$0xff] }
 0x33e   :  { %11233 = vst [vmem:[#allocation85_spill] sm:$0xff] %v7719_v29  ;;  %2014 = vmatpush.msrb.mxu1 %v7731_v33  ;;  %2054 = vmatpush.msrb.mxu3 %v7734_v21  ;;  %v7737_v29 = vld [vmem:[#allocation10 + $0x3d0] sm:$0xff] }
 0x33f   :  { %11234 = vst [vmem:[#allocation44_spill] sm:$0xff] %v7722_v50  ;;  %2292 = vmatpush.msrb.mxu0 %v7737_v29  ;;  %v7740_v50 = vld [vmem:[#allocation10 + $0x3d8] sm:$0xff] }
 0x340   :  { %11235 = vst [vmem:[#allocation49_spill] sm:$0xff] %v7725_v44  ;;  %2332 = vmatpush.msrb.mxu2 %v7740_v50  ;;  %v7743_v44 = vld [vmem:[#allocation10 + $0x530] sm:$0xff] }
 0x341   :  { %11236 = vst [vmem:[#allocation88_spill] sm:$0xff] %v7728_v28  ;;  %2015 = vmatpush.msrb.mxu1 %v7743_v44  ;;  %v7746_v28 = vld [vmem:[#allocation10 + $0x538] sm:$0xff] }
 0x342   :  { %11237 = vst [vmem:[#allocation89_spill] sm:$0xff] %v7731_v33  ;;  %2055 = vmatpush.msrb.mxu3 %v7746_v28  ;;  %v7749_v33 = vld [vmem:[#allocation10 + $0x390] sm:$0xff] }
 0x343   :  { %11238 = vst [vmem:[#allocation48_spill] sm:$0xff] %v7734_v21  ;;  %2293 = vmatpush.msrb.mxu0 %v7749_v33  ;;  %v7752_v21 = vld [vmem:[#allocation10 + $0x398] sm:$0xff] }
 0x344   :  { %11239 = vst [vmem:[#allocation53_spill] sm:$0xff] %v7737_v29  ;;  %2333 = vmatpush.msrb.mxu2 %v7752_v21  ;;  %v7755_v29 = vld [vmem:[#allocation10 + $0x4f0] sm:$0xff] }
 0x345   :  { %11240 = vst [vmem:[#allocation92_spill] sm:$0xff] %v7740_v50  ;;  %2016 = vmatpush.msrb.mxu1 %v7755_v29  ;;  %v7758_v50 = vld [vmem:[#allocation10 + $0x4f8] sm:$0xff] }
 0x346   :  { %11241 = vst [vmem:[#allocation93_spill] sm:$0xff] %v7743_v44  ;;  %2056 = vmatpush.msrb.mxu3 %v7758_v50  ;;  %v7761_v44 = vld [vmem:[#allocation10 + $0x350] sm:$0xff] }
 0x347   :  { %11242 = vst [vmem:[#allocation52_spill] sm:$0xff] %v7746_v28  ;;  %2294 = vmatpush.msrb.mxu0 %v7761_v44  ;;  %v7764_v28 = vld [vmem:[#allocation10 + $0x358] sm:$0xff] }
 0x348   :  { %11243 = vst [vmem:[#allocation57_spill] sm:$0xff] %v7749_v33  ;;  %2334 = vmatpush.msrb.mxu2 %v7764_v28  ;;  %v7767_v33 = vld [vmem:[#allocation10 + $0x4b0] sm:$0xff] }
 0x349   :  { %11244 = vst [vmem:[#allocation96_spill] sm:$0xff] %v7752_v21  ;;  %2017 = vmatpush.msrb.mxu1 %v7767_v33  ;;  %v7770_v21 = vld [vmem:[#allocation10 + $0x4b8] sm:$0xff] }
 0x34a   :  { %11245 = vst [vmem:[#allocation97_spill] sm:$0xff] %v7755_v29  ;;  %2057 = vmatpush.msrb.mxu3 %v7770_v21  ;;  %v7773_v29 = vld [vmem:[#allocation10 + $0x310] sm:$0xff] }
 0x34b   :  { %11246 = vst [vmem:[#allocation56_spill] sm:$0xff] %v7758_v50  ;;  %2295 = vmatpush.msrb.mxu0 %v7773_v29  ;;  %v7776_v50 = vld [vmem:[#allocation10 + $0x318] sm:$0xff] }
 0x34c   :  { %11247 = vst [vmem:[#allocation61_spill] sm:$0xff] %v7761_v44  ;;  %2335 = vmatpush.msrb.mxu2 %v7776_v50  ;;  %v7779_v44 = vld [vmem:[#allocation10 + $0x470] sm:$0xff] }
 0x34d   :  { %11248 = vst [vmem:[#allocation100_spill] sm:$0xff] %v7764_v28  ;;  %2018 = vmatpush.msrb.mxu1 %v7779_v44  ;;  %v7782_v28 = vld [vmem:[#allocation10 + $0x478] sm:$0xff] }
 0x34e   :  { %11249 = vst [vmem:[#allocation101_spill] sm:$0xff] %v7767_v33  ;;  %2058 = vmatpush.msrb.mxu3 %v7782_v28  ;;  %v7785_v33 = vld [vmem:[#allocation10 + $0x2d0] sm:$0xff] }
 0x34f   :  { %11250 = vst [vmem:[#allocation60_spill] sm:$0xff] %v7770_v21  ;;  %2296 = vmatpush.msrb.mxu0 %v7785_v33  ;;  %v7788_v21 = vld [vmem:[#allocation10 + $0x2d8] sm:$0xff] }
 0x350   :  { %11251 = vst [vmem:[#allocation65_spill] sm:$0xff] %v7773_v29  ;;  %2336 = vmatpush.msrb.mxu2 %v7788_v21  ;;  %v7791_v29 = vld [vmem:[#allocation10 + $0x430] sm:$0xff] }
 0x351   :  { %11252 = vst [vmem:[#allocation64_spill] sm:$0xff] %v7776_v50  ;;  %2019 = vmatpush.msrb.mxu1 %v7791_v29  ;;  %v7794_v50 = vld [vmem:[#allocation10 + $0x438] sm:$0xff] }
 0x352   :  { %11253 = vst [vmem:[#allocation69_spill] sm:$0xff] %v7779_v44  ;;  %2059 = vmatpush.msrb.mxu3 %v7794_v50  ;;  %2020 = vmatmul.f32.vlgmr.msrb.gmra.mxu1 %v7472_v12  ;;  %v11262_v44 = vld [vmem:[#allocation41_spill] sm:$0xff] }
 0x353   :  { %11254 = vst [vmem:[#allocation68_spill] sm:$0xff] %v7782_v28  ;;  %2060 = vmatmul.f32.vlgmr.msrb.gmra.mxu3 %v7472_v12  ;;  %v7799_v28 = vld [vmem:[#allocation10 + $0x290] sm:$0xff]  ;;  %v11265_v12 = vld [vmem:[#allocation43_spill] sm:$0xff] }
 0x354   :  { %11255 = vst [vmem:[#allocation70_spill] sm:$0xff] %v7785_v33  ;;  %2297 = vmatpush.msrb.mxu0 %v7799_v28  ;;  %v7802_v33 = vld [vmem:[#allocation10 + $0x298] sm:$0xff]  ;;  %2272 = vmatpush.msra.mxu3 %v11262_v44 }
 0x355   :  { %11256 = vst [vmem:[#allocation74_spill] sm:$0xff] %v7788_v21  ;;  %2337 = vmatpush.msrb.mxu2 %v7802_v33  ;;  %v11261_v21 = vld [vmem:[#allocation36_spill] sm:$0xff]  ;;  %v11270_v44 = vld [vmem:[#allocation21_spill] sm:$0xff] }
 0x356   :  { %11257 = vst [vmem:[#allocation75_spill] sm:$0xff] %v7791_v29  ;;  %2232 = vmatpush.msra.mxu1 %v11261_v21  ;;  %v7807_v29 = vld [vmem:[#allocation10 + $0x250] sm:$0xff]  ;;  %2273 = vmatpush.msra.mxu3 %v11266_v4  ;;  %v11269_v21 = vld [vmem:[#allocation18_spill] sm:$0xff]  ;;  %v11273_v4 = vld [vmem:[#allocation47_spill] sm:$0xff] }
 0x357   :  { %11258 = vst [vmem:[#allocation78_spill] sm:$0xff] %v7794_v50  ;;  %2298 = vmatpush.msrb.mxu0 %v7807_v29  ;;  %v7810_v50 = vld [vmem:[#allocation10 + $0x258] sm:$0xff] }
 0x358   :  { %11259 = vst [vmem:[#allocation79_spill] sm:$0xff] %v7799_v28  ;;  %2338 = vmatpush.msrb.mxu2 %v7810_v50  ;;  %2233 = vmatpush.msra.mxu1 %v11265_v12  ;;  %v7815_v28 = vld [vmem:[#allocation10 + $0x210] sm:$0xff]  ;;  %v11274_v12 = vld [vmem:[#allocation42_spill] sm:$0xff] }
 0x359   :  { %11260 = vst [vmem:[#allocation82_spill] sm:$0xff] %v7802_v33  ;;  %2299 = vmatpush.msrb.mxu0 %v7815_v28  ;;  %v7818_v33 = vld [vmem:[#allocation10 + $0x218] sm:$0xff]  ;;  %2274 = vmatpush.msra.mxu3 %v11270_v44  ;;  %v11278_v44 = vld [vmem:[#allocation19_spill] sm:$0xff] }
 0x35a   :  { %11263 = vst [vmem:[#allocation83_spill] sm:$0xff] %v7807_v29  ;;  %2339 = vmatpush.msrb.mxu2 %v7818_v33  ;;  %2234 = vmatpush.msra.mxu1 %v11269_v21  ;;  %v7823_v29 = vld [vmem:[#allocation10 + $0x1d0] sm:$0xff]  ;;  %v11277_v21 = vld [vmem:[#allocation23_spill] sm:$0xff] }
 0x35b   :  { %11264 = vst [vmem:[#allocation104_spill] sm:$0xff] %v7810_v50  ;;  %2300 = vmatpush.msrb.mxu0 %v7823_v29  ;;  %v7826_v50 = vld [vmem:[#allocation10 + $0x1d8] sm:$0xff]  ;;  %2275 = vmatpush.msra.mxu3 %v11274_v12  ;;  %v7846_v12 = vld [vmem:[#allocation10 + $0x688] sm:$0xff]  ;;  %v1801_v60 = vpop.f32.mrf.mxu2 }
 0x35c   :  { %11267 = vst [vmem:[#allocation86_spill] sm:$0xff] %v7815_v28  ;;  %2340 = vmatpush.msrb.mxu2 %v7826_v50  ;;  %2235 = vmatpush.msra.mxu1 %v11273_v4  ;;  %v7831_v28 = vld [vmem:[#allocation10 + $0x190] sm:$0xff]  ;;  %v11281_v4 = vld [vmem:[#allocation51_spill] sm:$0xff] }
 0x35d   :  { %11268 = vst [vmem:[#allocation87_spill] sm:$0xff] %v7818_v33  ;;  %2301 = vmatpush.msrb.mxu0 %v7831_v28  ;;  %v7834_v33 = vld [vmem:[#allocation10 + $0x198] sm:$0xff]  ;;  %2276 = vmatpush.msra.mxu3 %v11278_v44  ;;  %v7855_v44 = vld [vmem:[#allocation10 + $0x640] sm:$0xff] }
 0x35e   :  { %11271 = vst [vmem:[#allocation105_spill] sm:$0xff] %v7823_v29  ;;  %2341 = vmatpush.msrb.mxu2 %v7834_v33  ;;  %2236 = vmatpush.msra.mxu1 %v11277_v21  ;;  %v7839_v29 = vld [vmem:[#allocation10 + $0x150] sm:$0xff]  ;;  %v7852_v21 = vld [vmem:[#allocation10 + $0x118] sm:$0xff] }
 0x35f   :  { %11272 = vst [vmem:[#allocation106_spill] sm:$0xff] %v7826_v50  ;;  %2302 = vmatpush.msrb.mxu0 %v7839_v29  ;;  %v7842_v50 = vld [vmem:[#allocation10 + $0x158] sm:$0xff]  ;;  %2277 = vmatpush.msra.mxu3 %v7846_v12 }
 0x360   :  { %11275 = vst [vmem:[#allocation90_spill] sm:$0xff] %v7831_v28  ;;  %2342 = vmatpush.msrb.mxu2 %v7842_v50  ;;  %2237 = vmatpush.msra.mxu1 %v11281_v4  ;;  %v7849_v28 = vld [vmem:[#allocation10 + $0x110] sm:$0xff] }
 0x361   :  { %11276 = vst [vmem:[#allocation91_spill] sm:$0xff] %v7834_v33  ;;  %2303 = vmatpush.msrb.mxu0 %v7849_v28  ;;  %v7861_v4 = vld [vmem:[#allocation10 + $0xd0] sm:$0xff]  ;;  %v2065_v33 = vld [vmem:[#allocation5 + $0x60] sm:$0xff] }
 0x362   :  { %11279 = vst [vmem:[#allocation107_spill] sm:$0xff] %v7839_v29  ;;  %2343 = vmatpush.msrb.mxu2 %v7852_v21  ;;  %2238 = vmatpush.msra.mxu1 %v7855_v44  ;;  %v7858_v29 = vld [vmem:[#allocation10 + $0x648] sm:$0xff] }
 0x363   :  { %11280 = vst [vmem:[#allocation108_spill] sm:$0xff] %v7842_v50  ;;  %2278 = vmatpush.msra.mxu3 %v7858_v29  ;;  %2304 = vmatpush.msrb.mxu0 %v7861_v4  ;;  %v8017_v50 = vld [vmem:[#allocation10 + $0x490] sm:$0xff] }
 0x364   :  { %11282 = vst [vmem:[#allocation94_spill] sm:$0xff] %v7846_v12  ;;  %v7864_v12 = vld [vmem:[#allocation10 + $0xd8] sm:$0xff] }
 0x365   :  { %11283 = vst [vmem:[#allocation95_spill] sm:$0xff] %v7849_v28  ;;  %2344 = vmatpush.msrb.mxu2 %v7864_v12  ;;  %v7867_v28 = vld [vmem:[#allocation10 + $0x600] sm:$0xff] }
 0x366   :  { %11284 = vst [vmem:[#allocation109_spill] sm:$0xff] %v7852_v21  ;;  %2239 = vmatpush.msra.mxu1 %v7867_v28  ;;  %v7870_v21 = vld [vmem:[#allocation10 + $0x608] sm:$0xff] }
 0x367   :  { %11285 = vst [vmem:[#allocation110_spill] sm:$0xff] %v7855_v44  ;;  %2279 = vmatpush.msra.mxu3 %v7870_v21  ;;  %v7873_v44 = vld [vmem:[#allocation10 + $0x90] sm:$0xff] }
 0x368   :  { %11286 = vst [vmem:[#allocation98_spill] sm:$0xff] %v7858_v29  ;;  %2305 = vmatpush.msrb.mxu0 %v7873_v44  ;;  %v7876_v29 = vld [vmem:[#allocation10 + $0x98] sm:$0xff] }
 0x369   :  { %11287 = vst [vmem:[#allocation99_spill] sm:$0xff] %v7861_v4  ;;  %2345 = vmatpush.msrb.mxu2 %v7876_v29  ;;  %v7879_v4 = vld [vmem:[#allocation10 + $0x5c0] sm:$0xff] }
 0x36a   :  { %11288 = vst [vmem:[#allocation111_spill] sm:$0xff] %v7864_v12  ;;  %2240 = vmatpush.msra.mxu1 %v7879_v4  ;;  %v7882_v12 = vld [vmem:[#allocation10 + $0x5c8] sm:$0xff] }
 0x36b   :  { %11289 = vst [vmem:[#allocation112_spill] sm:$0xff] %v7867_v28  ;;  %2280 = vmatpush.msra.mxu3 %v7882_v12  ;;  %v7885_v28 = vld [vmem:[#allocation10 + $0x50] sm:$0xff] }
 0x36c   :  { %11290 = vst [vmem:[#allocation102_spill] sm:$0xff] %v7870_v21  ;;  %2306 = vmatpush.msrb.mxu0 %v7885_v28  ;;  %v7888_v21 = vld [vmem:[#allocation10 + $0x58] sm:$0xff] }
 0x36d   :  { %11291 = vst [vmem:[#allocation103_spill] sm:$0xff] %v7873_v44  ;;  %2346 = vmatpush.msrb.mxu2 %v7888_v21  ;;  %v7891_v44 = vld [vmem:[#allocation10 + $0x580] sm:$0xff] }
 0x36e   :  { %11292 = vst [vmem:[#allocation113_spill] sm:$0xff] %v7876_v29  ;;  %2241 = vmatpush.msra.mxu1 %v7891_v44  ;;  %v7894_v29 = vld [vmem:[#allocation10 + $0x588] sm:$0xff] }
 0x36f   :  { %11293 = vst [vmem:[#allocation114_spill] sm:$0xff] %v7879_v4  ;;  %2281 = vmatpush.msra.mxu3 %v7894_v29  ;;  %v7897_v4 = vld [vmem:[#allocation10 + $0x10] sm:$0xff] }
 0x370   :  { %11294 = vst [vmem:[#allocation115_spill] sm:$0xff] %v7882_v12  ;;  %2307 = vmatpush.msrb.mxu0 %v7897_v4  ;;  %v7900_v12 = vld [vmem:[#allocation10 + $0x18] sm:$0xff] }
 0x371   :  { %11295 = vst [vmem:[#allocation116_spill] sm:$0xff] %v7885_v28  ;;  %2347 = vmatpush.msrb.mxu2 %v7900_v12  ;;  %v7903_v28 = vld [vmem:[#allocation10 + $0x540] sm:$0xff] }
 0x372   :  { %11296 = vst [vmem:[#allocation117_spill] sm:$0xff] %v7888_v21  ;;  %2242 = vmatpush.msra.mxu1 %v7903_v28  ;;  %v7906_v21 = vld [vmem:[#allocation10 + $0x548] sm:$0xff] }
 0x373   :  { %11297 = vst [vmem:[#allocation118_spill] sm:$0xff] %v7891_v44  ;;  %2282 = vmatpush.msra.mxu3 %v7906_v21  ;;  %v7909_v44 = vld [vmem:[#allocation10 + $0x500] sm:$0xff] }
 0x374   :  { %11298 = vst [vmem:[#allocation119_spill] sm:$0xff] %v7894_v29  ;;  %2243 = vmatpush.msra.mxu1 %v7909_v44  ;;  %v7912_v29 = vld [vmem:[#allocation10 + $0x508] sm:$0xff] }
 0x375   :  { %11299 = vst [vmem:[#allocation120_spill] sm:$0xff] %v7897_v4  ;;  %2283 = vmatpush.msra.mxu3 %v7912_v29  ;;  %v7915_v4 = vld [vmem:[#allocation10 + $0x4c0] sm:$0xff] }
 0x376   :  { %11300 = vst [vmem:[#allocation121_spill] sm:$0xff] %v7900_v12  ;;  %2244 = vmatpush.msra.mxu1 %v7915_v4  ;;  %v7918_v12 = vld [vmem:[#allocation10 + $0x4c8] sm:$0xff] }
 0x377   :  { %11301 = vst [vmem:[#allocation122_spill] sm:$0xff] %v7903_v28  ;;  %2284 = vmatpush.msra.mxu3 %v7918_v12  ;;  %v7921_v28 = vld [vmem:[#allocation10 + $0x480] sm:$0xff] }
 0x378   :  { %11302 = vst [vmem:[#allocation123_spill] sm:$0xff] %v7906_v21  ;;  %2245 = vmatpush.msra.mxu1 %v7921_v28  ;;  %v7924_v21 = vld [vmem:[#allocation10 + $0x488] sm:$0xff] }
 0x379   :  { %11303 = vst [vmem:[#allocation124_spill] sm:$0xff] %v7909_v44  ;;  %2285 = vmatpush.msra.mxu3 %v7924_v21  ;;  %v7927_v44 = vld [vmem:[#allocation10 + $0x440] sm:$0xff] }
 0x37a   :  { %11304 = vst [vmem:[#allocation125_spill] sm:$0xff] %v7912_v29  ;;  %2246 = vmatpush.msra.mxu1 %v7927_v44  ;;  %v7930_v29 = vld [vmem:[#allocation10 + $0x448] sm:$0xff] }
 0x37b   :  { %11305 = vst [vmem:[#allocation126_spill] sm:$0xff] %v7915_v4  ;;  %2286 = vmatpush.msra.mxu3 %v7930_v29  ;;  %v7933_v4 = vld [vmem:[#allocation10 + $0x400] sm:$0xff] }
 0x37c   :  { %11306 = vst [vmem:[#allocation127_spill] sm:$0xff] %v7918_v12  ;;  %2247 = vmatpush.msra.mxu1 %v7933_v4  ;;  %v7936_v12 = vld [vmem:[#allocation10 + $0x408] sm:$0xff] }
 0x37d   :  { %11307 = vst [vmem:[#allocation128_spill] sm:$0xff] %v7921_v28  ;;  %2287 = vmatpush.msra.mxu3 %v7936_v12  ;;  %v7939_v28 = vld [vmem:[#allocation10 + $0x7d0] sm:$0xff] }
 0x37e   :  { %11308 = vst [vmem:[#allocation129_spill] sm:$0xff] %v7924_v21  ;;  %2312 = vmatpush.msrb.mxu1 %v7939_v28  ;;  %v7942_v21 = vld [vmem:[#allocation10 + $0x7d8] sm:$0xff] }
 0x37f   :  { %11309 = vst [vmem:[#allocation130_spill] sm:$0xff] %v7927_v44  ;;  %2352 = vmatpush.msrb.mxu3 %v7942_v21  ;;  %v7945_v44 = vld [vmem:[#allocation10 + $0x790] sm:$0xff] }
 0x380   :  { %11310 = vst [vmem:[#allocation131_spill] sm:$0xff] %v7930_v29  ;;  %2313 = vmatpush.msrb.mxu1 %v7945_v44  ;;  %v7948_v29 = vld [vmem:[#allocation10 + $0x798] sm:$0xff] }
 0x381   :  { %11311 = vst [vmem:[#allocation134_spill] sm:$0xff] %v7933_v4  ;;  %2353 = vmatpush.msrb.mxu3 %v7948_v29  ;;  %v7951_v4 = vld [vmem:[#allocation10 + $0x750] sm:$0xff] }
 0x382   :  { %11312 = vst [vmem:[#allocation135_spill] sm:$0xff] %v7936_v12  ;;  %2314 = vmatpush.msrb.mxu1 %v7951_v4  ;;  %v7954_v12 = vld [vmem:[#allocation10 + $0x758] sm:$0xff] }
 0x383   :  { %11313 = vst [vmem:[#allocation138_spill] sm:$0xff] %v7939_v28  ;;  %2354 = vmatpush.msrb.mxu3 %v7954_v12  ;;  %v7957_v28 = vld [vmem:[#allocation10 + $0x710] sm:$0xff] }
 0x384   :  { %11314 = vst [vmem:[#allocation139_spill] sm:$0xff] %v7942_v21  ;;  %2315 = vmatpush.msrb.mxu1 %v7957_v28  ;;  %v7960_v21 = vld [vmem:[#allocation10 + $0x718] sm:$0xff] }
 0x385   :  { %11315 = vst [vmem:[#allocation142_spill] sm:$0xff] %v7945_v44  ;;  %2355 = vmatpush.msrb.mxu3 %v7960_v21  ;;  %v7963_v44 = vld [vmem:[#allocation10 + $0x6d0] sm:$0xff] }
 0x386   :  { %11316 = vst [vmem:[#allocation143_spill] sm:$0xff] %v7948_v29  ;;  %2316 = vmatpush.msrb.mxu1 %v7963_v44  ;;  %v7966_v29 = vld [vmem:[#allocation10 + $0x6d8] sm:$0xff] }
 0x387   :  { %11317 = vst [vmem:[#allocation132_spill] sm:$0xff] %v7951_v4  ;;  %2356 = vmatpush.msrb.mxu3 %v7966_v29  ;;  %v7969_v4 = vld [vmem:[#allocation10 + $0x690] sm:$0xff] }
 0x388   :  { %11318 = vst [vmem:[#allocation133_spill] sm:$0xff] %v7954_v12  ;;  %2317 = vmatpush.msrb.mxu1 %v7969_v4  ;;  %v7972_v12 = vld [vmem:[#allocation10 + $0x698] sm:$0xff] }
 0x389   :  { %11319 = vst [vmem:[#allocation136_spill] sm:$0xff] %v7957_v28  ;;  %2357 = vmatpush.msrb.mxu3 %v7972_v12  ;;  %v7975_v28 = vld [vmem:[#allocation10 + $0x650] sm:$0xff] }
 0x38a   :  { %11320 = vst [vmem:[#allocation137_spill] sm:$0xff] %v7960_v21  ;;  %2318 = vmatpush.msrb.mxu1 %v7975_v28  ;;  %v7978_v21 = vld [vmem:[#allocation10 + $0x658] sm:$0xff] }
 0x38b   :  { %11321 = vst [vmem:[#allocation140_spill] sm:$0xff] %v7963_v44  ;;  %2358 = vmatpush.msrb.mxu3 %v7978_v21  ;;  %v7981_v44 = vld [vmem:[#allocation10 + $0x610] sm:$0xff] }
 0x38c   :  { %11322 = vst [vmem:[#allocation141_spill] sm:$0xff] %v7966_v29  ;;  %2319 = vmatpush.msrb.mxu1 %v7981_v44  ;;  %v7984_v29 = vld [vmem:[#allocation10 + $0x618] sm:$0xff] }
 0x38d   :  { %11323 = vst [vmem:[#allocation144_spill] sm:$0xff] %v7969_v4  ;;  %2359 = vmatpush.msrb.mxu3 %v7984_v29  ;;  %v7987_v4 = vld [vmem:[#allocation10 + $0x5d0] sm:$0xff] }
 0x38e   :  { %11324 = vst [vmem:[#allocation145_spill] sm:$0xff] %v7972_v12  ;;  %2320 = vmatpush.msrb.mxu1 %v7987_v4  ;;  %v7990_v12 = vld [vmem:[#allocation10 + $0x5d8] sm:$0xff] }
 0x38f   :  { %11325 = vst [vmem:[#allocation146_spill] sm:$0xff] %v7975_v28  ;;  %2360 = vmatpush.msrb.mxu3 %v7990_v12  ;;  %v7993_v28 = vld [vmem:[#allocation10 + $0x590] sm:$0xff] }
 0x390   :  { %11326 = vst [vmem:[#allocation147_spill] sm:$0xff] %v7978_v21  ;;  %2321 = vmatpush.msrb.mxu1 %v7993_v28  ;;  %v7996_v21 = vld [vmem:[#allocation10 + $0x598] sm:$0xff] }
 0x391   :  { %11327 = vst [vmem:[#allocation148_spill] sm:$0xff] %v7981_v44  ;;  %2361 = vmatpush.msrb.mxu3 %v7996_v21  ;;  %v7999_v44 = vld [vmem:[#allocation10 + $0x550] sm:$0xff] }
 0x392   :  { %11328 = vst [vmem:[#allocation149_spill] sm:$0xff] %v7984_v29  ;;  %2322 = vmatpush.msrb.mxu1 %v7999_v44  ;;  %v8002_v29 = vld [vmem:[#allocation10 + $0x558] sm:$0xff] }
 0x393   :  { %11329 = vst [vmem:[#allocation150_spill] sm:$0xff] %v7987_v4  ;;  %2362 = vmatpush.msrb.mxu3 %v8002_v29  ;;  %v8005_v4 = vld [vmem:[#allocation10 + $0x510] sm:$0xff] }
 0x394   :  { %11330 = vst [vmem:[#allocation151_spill] sm:$0xff] %v7990_v12  ;;  %2323 = vmatpush.msrb.mxu1 %v8005_v4  ;;  %v8008_v12 = vld [vmem:[#allocation10 + $0x518] sm:$0xff] }
 0x395   :  { %11331 = vst [vmem:[#allocation152_spill] sm:$0xff] %v7993_v28  ;;  %2363 = vmatpush.msrb.mxu3 %v8008_v12  ;;  %v8011_v28 = vld [vmem:[#allocation10 + $0x4d0] sm:$0xff] }
 0x396   :  { %11332 = vst [vmem:[#allocation153_spill] sm:$0xff] %v7996_v21  ;;  %2324 = vmatpush.msrb.mxu1 %v8011_v28  ;;  %v8014_v21 = vld [vmem:[#allocation10 + $0x4d8] sm:$0xff] }
 0x397   :  { %11333 = vst [vmem:[#allocation154_spill] sm:$0xff] %v7999_v44  ;;  %2364 = vmatpush.msrb.mxu3 %v8014_v21  ;;  %v1761_v44 = vpop.f32.mrf.mxu0 }
 0x398   :  { %11334 = vst [vmem:[#allocation155_spill] sm:$0xff] %v8002_v29  ;;  %2325 = vmatpush.msrb.mxu1 %v8017_v50  ;;  %v8020_v29 = vld [vmem:[#allocation10 + $0x498] sm:$0xff] }
 0x399   :  { %11335 = vst [vmem:[#allocation156_spill] sm:$0xff] %v8005_v4  ;;  %2365 = vmatpush.msrb.mxu3 %v8020_v29  ;;  %v1781_v4 = vpop.f32.mrf.mxu1 }
 0x39a   :  { %11336 = vst [vmem:[#allocation157_spill] sm:$0xff] %v8008_v12  ;;  %v1782_v12 = vadd.f32 %v1781_v4, %v1761_v44  ;;  %2326 = vmatpush.msrb.mxu1 %v8023_v58  ;;  %v1821_v44 = vpop.f32.mrf.mxu3  ;;  %v2066_v4 = vld [vmem:[#allocation5 + $0x68] sm:$0xff] }
 0x39b   :  { %11337 = vst [vmem:[#allocation158_spill] sm:$0xff] %v8011_v28  ;;  %v8026_v28 = vld [vmem:[#allocation10 + $0x458] sm:$0xff]  ;;  %v1822_v42 = vadd.f32 %v1821_v44, %v1801_v60 }
 0x39c   :  { %11338 = vst [vmem:[#allocation159_spill] sm:$0xff] %v8014_v21  ;;  %2366 = vmatpush.msrb.mxu3 %v8026_v28  ;;  %v2069_v21 = vadd.f32 %v2065_v33, %v1782_v12  ;;  %2327 = vmatpush.msrb.mxu1 %v8029_v43 }
 0x39d   :  { %11339 = vst [vmem:[#allocation160_spill] sm:$0xff] %v8017_v50  ;;  %v8032_v50 = vld [vmem:[#allocation10 + $0x418] sm:$0xff]  ;;  %v2070_v24 = vadd.f32 %v2066_v4, %v1822_v42 }
 0x39e   :  { %11340 = vst [vmem:[#allocation161_spill] sm:$0xff] %v8020_v29  ;;  %2367 = vmatpush.msrb.mxu3 %v8032_v50  ;;  %v4150_v29 = vmul.f32 -1.442695, %v2069_v21 }
 0x39f   :  { %11342 = vst [vmem:[#allocation163_spill] sm:$0xff] %v8026_v28  ;;  %v1841_v58 = vpop.f32.mrf.mxu0  ;;  %v4151_v33 = vmul.f32 -1.442695, %v2070_v24 }
 0x3a0   :  { %11344 = vst [vmem:[#allocation165_spill] sm:$0xff] %v8032_v50  ;;  %4288 = vpow2.f32 %v4150_v29  ;;  %v1881_v29 = vpop.f32.mrf.mxu2 }
 0x3a1   :  { %v1861_v48 = vpop.f32.mrf.mxu1  ;;  %4290 = vpow2.f32 %v4151_v33 }
 0x3a2   :  { %v1862_v28 = vadd.f32 %v1861_v48, %v1841_v58  ;;  %v1901_v35 = vpop.f32.mrf.mxu3  ;;  %v2068_v48 = vld [vmem:[#allocation5 + $0x78] sm:$0xff] }
 0x3a3   :  { %v1902_v24 = vadd.f32 %v1901_v35, %v1881_v29 }
 0x3a4   :  { %v2071_v12 = vadd.f32 %v2067_v10, %v1862_v28 }
 0x3a6   :  { %v4289_v23 = vpop.eup %4288  ;;  %v4152_v43 = vmul.f32 -1.442695, %v2071_v12 }
 0x3a7   :  { %v2091_v22 = vadd.f32 1.0, %v4289_v23  ;;  %v4291_v50 = vpop.eup %4290  ;;  %v2072_v23 = vadd.f32 %v2068_v48, %v1902_v24  ;;  %v1921_v35 = vpop.f32.mrf.mxu0  ;;  %v2074_v48 = vld [vmem:[#allocation8 + $0x80] sm:$0xff] }
 0x3a8   :  { %4292 = vpow2.f32 %v4152_v43  ;;  %v2092_v21 = vadd.f32 1.0, %v4291_v50 }
 0x3a9   :  { %4294 = vrcp.f32 %v2091_v22  ;;  %v2105_v4 = vand.u32 2147483648, %v2091_v22  ;;  %vm2099_vm9 = vweird.f32 %v2091_v22 }
 0x3aa   :  { %4296 = vrcp.f32 %v2092_v21  ;;  %v2120_v63 = vand.u32 2147483648, %v2092_v21  ;;  %v2118_v24 = vand.u32 2147483647, %v2092_v21  ;;  %vm2114_vm12 = vweird.f32 %v2092_v21 }
 0x3ac   :  { %v2121_v13 = vor.u32 1.1754944e-38, %v2120_v63  ;;  %vm2119_vm15 = vcmp.eq.f32.partialorder %v2118_v24, 8.507059e+37  ;;  %v8064_v24 = vld [vmem:[#allocation10 + $0x3e8] sm:$0xff] }
 0x3ae   :  { %v4293_v8 = vpop.eup %4292 }
 0x3af   :  { %v4295_v36 = vpop.eup %4294  ;;  %v8035_v60 = vadd.f32 1.0, %v4293_v8  ;;  %v2103_v8 = vand.u32 2147483647, %v2091_v22 }
 0x3b0   :  { %v2095_v44 = vmul.f32 %v4295_v36, %v2091_v22  ;;  %v4297_v58 = vpop.eup %4296  ;;  %vm2100_vm8 = vweird.f32 %v4295_v36 }
 0x3b1   :  { %4298 = vrcp.f32 %v8035_v60  ;;  %v2110_v43 = vmul.f32 %v4297_v58, %v2092_v21  ;;  %vm8039_vm10 = vmor %vm2099_vm9, %vm2100_vm8  ;;  %vm2115_vm11 = vweird.f32 %v4297_v58  ;;  %vm2104_vm13 = vcmp.eq.f32.partialorder %v2103_v8, 8.507059e+37 }
 0x3b2   :  { %v2096_v10 = vsub.f32 1.0, %v2095_v44  ;;  %4300 = vtanh.f32 %v2072_v23  ;;  %vm2116_vm14 = vmor %vm2114_vm12, %vm2115_vm11  ;;  %vm2129_vm1 = vweird.f32 %v8035_v60 }
 0x3b3   :  { %v2111_v33 = vsub.f32 1.0, %v2110_v43  ;;  %v2106_v43 = vor.u32 1.1754944e-38, %v2105_v4  ;;  %v2075_v4 = vld [vmem:[#allocation8 + $0x88] sm:$0xff] }
 0x3b4   :  { %v2097_v42 = vmul.f32 %v4295_v36, %v2096_v10  ;;  %v1941_v10 = vpop.f32.mrf.mxu1 }
 0x3b5   :  { %v2112_v29 = vmul.f32 %v4297_v58, %v2111_v33  ;;  %v1942_v6 = vadd.f32 %v1941_v10, %v1921_v35  ;;  %v8069_v10 = vld [vmem:[#allocation10 + $0x3a0] sm:$0xff] }
 0x3b6   :  { %v2098_v28 = vadd.f32 %v4295_v36, %v2097_v42 }
 0x3b7   :  { %v4299_v50 = vpop.eup %4298  ;;  %v2113_v22 = vadd.f32 %v4297_v58, %v2112_v29  ;;  %v2078_v51 = vadd.f32 %v2074_v48, %v1942_v6  ;;  %v2135_v6 = vand.u32 2147483648, %v8035_v60  ;;  %v8072_v48 = vld [vmem:[#allocation10 + $0x3a8] sm:$0xff] }
 0x3b8   :  { %v2125_v12 = vmul.f32 %v4299_v50, %v8035_v60  ;;  %v2102_v44 = vsel %vm8039_vm10, %v4295_v36, %v2098_v28  ;;  %v4301_v33 = vpop.eup %4300  ;;  %v1961_v36 = vpop.f32.mrf.mxu2  ;;  %vm2130_vm0 = vweird.f32 %v4299_v50 }
 0x3b9   :  { %v2107_v54 = vsel %vm2104_vm13, %v2106_v43, %v2102_v44  ;;  %v2117_v23 = vsel %vm2116_vm14, %v4297_v58, %v2113_v22  ;;  %v4153_v37 = vmul.f32 -1.442695, %v2078_v51  ;;  %v2133_v51 = vand.u32 2147483647, %v8035_v60  ;;  %vm2131_vm2 = vmor %vm2129_vm1, %vm2130_vm0  ;;  %v8078_v43 = vld [vmem:[#allocation10 + $0x368] sm:$0xff]  ;;  %v8081_v22 = vld [vmem:[#allocation10 + $0x320] sm:$0xff] }
 0x3ba   :  { %v2126_v42 = vsub.f32 1.0, %v2125_v12  ;;  %v2122_v14 = vsel %vm2119_vm15, %v2121_v13, %v2117_v23  ;;  %v2141_v62 = vmul.f32 %v4301_v33, %v2107_v54  ;;  %v1981_v12 = vpop.f32.mrf.mxu3  ;;  %v2136_v54 = vor.u32 1.1754944e-38, %v2135_v6  ;;  %v8084_v23 = vld [vmem:[#allocation10 + $0x328] sm:$0xff] }
 0x3bb   :  { %v2140_v28 = vmul.f32 %v2122_v14, %v7367_v1  ;;  %v1982_v35 = vadd.f32 %v1981_v12, %v1961_v36  ;;  %4302 = vpow2.f32 %v4153_v37  ;;  %vm2134_vm3 = vcmp.eq.f32.partialorder %v2133_v51, 8.507059e+37  ;;  %v8093_v36 = vld [vmem:[#allocation10 + $0x2e0] sm:$0xff]  ;;  %v2076_v51 = vld [vmem:[#allocation8 + $0x90] sm:$0xff] }
 0x3bc   :  { %v2127_v59 = vmul.f32 %v4299_v50, %v2126_v42  ;;  %v8075_v42 = vld [vmem:[#allocation10 + $0x360] sm:$0xff] }
 0x3bd   :  { %v8046_v21 = vadd.f32 %v2141_v62, %v2140_v28  ;;  %v2079_v63 = vadd.f32 %v2075_v4, %v1982_v35  ;;  %v8096_v28 = vld [vmem:[#allocation10 + $0x2e8] sm:$0xff]  ;;  %v8103_v35 = vld [vmem:[#allocation10 + $0x2a0] sm:$0xff] }
 0x3be   :  { %v2128_v8 = vadd.f32 %v4299_v50, %v2127_v59  ;;  %11347 = vst [vmem:[#allocation166_spill] sm:$0xff] %v8096_v28 }
 0x3bf   :  { %4304 = vtanh.f32 %v8046_v21  ;;  %v4154_v13 = vmul.f32 -1.442695, %v2079_v63  ;;  %11348 = vst [vmem:[#allocation167_spill] sm:$0xff] %v8103_v35  ;;  %v2001_v63 = vpop.f32.mrf.mxu0 }
 0x3c0   :  { %v2132_v1 = vsel %vm2131_vm2, %v4299_v50, %v2128_v8  ;;  %v8061_v50 = vld [vmem:[#allocation10 + $0x3e0] sm:$0xff]  ;;  %v8106_v8 = vld [vmem:[#allocation10 + $0x2a8] sm:$0xff] }
 0x3c1   :  { %4306 = vpow2.f32 %v4154_v13  ;;  %v4303_v14 = vpop.eup %4302  ;;  %v2137_v58 = vsel %vm2134_vm3, %v2136_v54, %v2132_v1  ;;  %11349 = vst [vmem:[#allocation168_spill] sm:$0xff] %v8106_v8  ;;  %v8109_v13 = vld [vmem:[#allocation10 + $0x260] sm:$0xff]  ;;  %v8112_v1 = vld [vmem:[#allocation10 + $0x268] sm:$0xff] }
 0x3c2   :  { %v8054_v29 = vadd.f32 1.0, %v4303_v14  ;;  %11350 = vst [vmem:[#allocation169_spill] sm:$0xff] %v8109_v13 }
 0x3c3   :  { %11351 = vst [vmem:[#allocation170_spill] sm:$0xff] %v8112_v1 }
 0x3c4   :  { %4308 = vrcp.f32 %v8054_v29  ;;  %vm2162_vm6 = vweird.f32 %v8054_v29 }
 0x3c5   :  { %v4305_v62 = vpop.eup %4304 }
 0x3c6   :  { %v8052_v59 = vmul.f32 %v4305_v62, %v2137_v58  ;;  %v8115_v58 = vld [vmem:[#allocation10 + $0x220] sm:$0xff] }
 0x3c7   :  { %v4307_v44 = vpop.eup %4306  ;;  %11352 = vst [vmem:[#allocation171_spill] sm:$0xff] %v8115_v58 }
 0x3c8   :  { %2209 = vst [vmem:[#allocation11 + $0x18] sm:$0xff] %v8052_v59  ;;  %2228 = vmatmul.f32.vlgmr.msra.gmra.mxu0 %v8052_v59  ;;  %2268 = vmatmul.f32.vlgmr.msra.gmra.mxu2 %v8052_v59  ;;  %v8059_v60 = vadd.f32 1.0, %v4307_v44  ;;  %v8118_v44 = vld [vmem:[#allocation10 + $0x228] sm:$0xff] }
 0x3c9   :  { %2372 = vmatpush.msra.mxu0 %v8061_v50  ;;  %2412 = vmatpush.msra.mxu2 %v8064_v24 }
 0x3ca   :  { %4310 = vrcp.f32 %v8059_v60  ;;  %v8087_v33 = vpop.eup %4308  ;;  %vm2177_vm7 = vweird.f32 %v8059_v60 }
 0x3cb   :  { %2373 = vmatpush.msra.mxu0 %v8069_v10  ;;  %2413 = vmatpush.msra.mxu2 %v8072_v48  ;;  %v2158_v12 = vmul.f32 %v8087_v33, %v8054_v29  ;;  %vm2163_vm4 = vweird.f32 %v8087_v33 }
 0x3cc   :  { %vm8155_vm8 = vmor %vm2162_vm6, %vm2163_vm4 }
 0x3cd   :  { %2374 = vmatpush.msra.mxu0 %v8075_v42  ;;  %2414 = vmatpush.msra.mxu2 %v8078_v43  ;;  %v2159_v54 = vsub.f32 1.0, %v2158_v12  ;;  %v2041_v12 = vpop.f32.mrf.mxu2 }
 0x3cf   :  { %2375 = vmatpush.msra.mxu0 %v8081_v22  ;;  %2415 = vmatpush.msra.mxu2 %v8084_v23  ;;  %v2021_v6 = vpop.f32.mrf.mxu1 }
 0x3d0   :  { %2308 = vmatmul.f32.vlgmr.msrb.gmra.mxu0 %v8052_v59  ;;  %2348 = vmatmul.f32.vlgmr.msrb.gmra.mxu2 %v8052_v59  ;;  %v8091_v37 = vpop.eup %4310  ;;  %v2022_v14 = vadd.f32 %v2021_v6, %v2001_v63 }
 0x3d1   :  { %2376 = vmatpush.msra.mxu0 %v8093_v36  ;;  %2416 = vmatpush.msra.mxu2 %v8096_v28  ;;  %v2173_v4 = vmul.f32 %v8091_v37, %v8059_v60  ;;  %v8129_v28 = vld [vmem:[#allocation10 + $0x1a0] sm:$0xff]  ;;  %vm2178_vm5 = vweird.f32 %v8091_v37 }
 0x3d2   :  { %11355 = vst [vmem:[#allocation174_spill] sm:$0xff] %v8129_v28  ;;  %vm8169_vm9 = vmor %vm2177_vm7, %vm2178_vm5 }
 0x3d3   :  { %2377 = vmatpush.msra.mxu0 %v8103_v35  ;;  %2417 = vmatpush.msra.mxu2 %v8106_v8  ;;  %v2174_v62 = vsub.f32 1.0, %v2173_v4  ;;  %v2080_v8 = vadd.f32 %v2076_v51, %v2022_v14  ;;  %v8121_v35 = vld [vmem:[#allocation10 + $0x1e0] sm:$0xff]  ;;  %v8132_v51 = vld [vmem:[#allocation10 + $0x1a8] sm:$0xff] }
 0x3d4   :  { %11353 = vst [vmem:[#allocation172_spill] sm:$0xff] %v8121_v35 }
 0x3d5   :  { %2378 = vmatpush.msra.mxu0 %v8109_v13  ;;  %2418 = vmatpush.msra.mxu2 %v8112_v1  ;;  %v8124_v13 = vld [vmem:[#allocation10 + $0x1e8] sm:$0xff]  ;;  %v4155_v63 = vmul.f32 -1.442695, %v2080_v8  ;;  %v2175_v4 = vmul.f32 %v8091_v37, %v2174_v62  ;;  %v2077_v1 = vld [vmem:[#allocation8 + $0x98] sm:$0xff]  ;;  %11356 = vst [vmem:[#allocation175_spill] sm:$0xff] %v8132_v51 }
 0x3d6   :  { %11354 = vst [vmem:[#allocation173_spill] sm:$0xff] %v8124_v13  ;;  %v2061_v6 = vpop.f32.mrf.mxu3  ;;  %v8138_v8 = vld [vmem:[#allocation10 + $0x168] sm:$0xff] }
 0x3d7   :  { %2379 = vmatpush.msra.mxu0 %v8115_v58  ;;  %2419 = vmatpush.msra.mxu2 %v8118_v44  ;;  %v2160_v58 = vmul.f32 %v8087_v33, %v2159_v54  ;;  %4312 = vpow2.f32 %v4155_v63  ;;  %v2062_v14 = vadd.f32 %v2061_v6, %v2041_v12  ;;  %11358 = vst [vmem:[#allocation177_spill] sm:$0xff] %v8138_v8  ;;  %v8148_v63 = vld [vmem:[#allocation10 + $0x128] sm:$0xff]  ;;  %v2183_v12 = vand.u32 2147483648, %v8059_v60 }
 0x3d8   :  { %11360 = vst [vmem:[#allocation179_spill] sm:$0xff] %v8148_v63  ;;  %v2181_v6 = vand.u32 2147483647, %v8059_v60 }
 0x3d9   :  { %2380 = vmatpush.msra.mxu0 %v8121_v35  ;;  %2420 = vmatpush.msra.mxu2 %v8124_v13  ;;  %v8135_v35 = vld [vmem:[#allocation10 + $0x160] sm:$0xff]  ;;  %v2081_v62 = vadd.f32 %v2077_v1, %v2062_v14  ;;  %v2161_v54 = vadd.f32 %v8087_v33, %v2160_v58  ;;  %v2168_v1 = vand.u32 2147483648, %v8054_v29 }
 0x3da   :  { %11357 = vst [vmem:[#allocation176_spill] sm:$0xff] %v8135_v35  ;;  %v8161_v14 = vld [vmem:[#allocation10 + $0xe0] sm:$0xff]  ;;  %vm2182_vm11 = vcmp.eq.f32.partialorder %v2181_v6, 8.507059e+37 }
 0x3db   :  { %2381 = vmatpush.msra.mxu0 %v8129_v28  ;;  %2421 = vmatpush.msra.mxu2 %v8132_v51  ;;  %v2176_v28 = vadd.f32 %v8091_v37, %v2175_v4  ;;  %v8145_v51 = vld [vmem:[#allocation10 + $0x120] sm:$0xff]  ;;  %4314 = vtanh.f32 %v2081_v62  ;;  %v2166_v4 = vand.u32 2147483647, %v8054_v29  ;;  %11363 = vst [vmem:[#allocation180_spill] sm:$0xff] %v8161_v14  ;;  %v2165_v29 = vsel %vm8155_vm8, %v8087_v33, %v2161_v54  ;;  %v8191_v33 = vld [vmem:[#allocation10 + $0x68] sm:$0xff] }
 0x3dc   :  { %11359 = vst [vmem:[#allocation178_spill] sm:$0xff] %v8145_v51  ;;  %v2169_v13 = vor.u32 1.1754944e-38, %v2168_v1  ;;  %v8194_v62 = vld [vmem:[#allocation10 + $0x20] sm:$0xff] }
 0x3dd   :  { %2382 = vmatpush.msra.mxu0 %v8135_v35  ;;  %2422 = vmatpush.msra.mxu2 %v8138_v8  ;;  %v2180_v60 = vsel %vm8169_vm9, %v8091_v37, %v2176_v28  ;;  %v2184_v35 = vor.u32 1.1754944e-38, %v2183_v12  ;;  %vm2167_vm10 = vcmp.eq.f32.partialorder %v2166_v4, 8.507059e+37  ;;  %v8197_v12 = vld [vmem:[#allocation10 + $0x28] sm:$0xff]  ;;  %v8203_v4 = vld [vmem:[#allocation10 + $0x3f0] sm:$0xff] }
 0x3de   :  { %v2170_v28 = vsel %vm2167_vm10, %v2169_v13, %v2165_v29  ;;  %11367 = vst [vmem:[#allocation182_spill] sm:$0xff] %v8197_v12  ;;  %v8211_v29 = vld [vmem:[#allocation10 + $0x3b0] sm:$0xff] }
 0x3df   :  { %2383 = vmatpush.msra.mxu0 %v8145_v51  ;;  %2423 = vmatpush.msra.mxu2 %v8148_v63  ;;  %v8164_v63 = vld [vmem:[#allocation10 + $0xe8] sm:$0xff]  ;;  %v4313_v51 = vpop.eup %4312  ;;  %v2185_v54 = vsel %vm2182_vm11, %v2184_v35, %v2180_v60  ;;  %11368 = vst [vmem:[#allocation183_spill] sm:$0xff] %v8203_v4  ;;  %v8206_v35 = vld [vmem:[#allocation10 + $0x3f8] sm:$0xff] }
 0x3e0   :  { %11364 = vst [vmem:[#allocation181_spill] sm:$0xff] %v8164_v63  ;;  %v8173_v8 = vadd.f32 1.0, %v4313_v51  ;;  %v8188_v51 = vld [vmem:[#allocation10 + $0x60] sm:$0xff]  ;;  %v2203_v1 = vmul.f32 %v2185_v54, %v7459_v34  ;;  %v8214_v60 = vld [vmem:[#allocation10 + $0x3b8] sm:$0xff] }
 0x3e1   :  { %2384 = vmatpush.msra.mxu0 %v8161_v14  ;;  %2424 = vmatpush.msra.mxu2 %v8164_v63  ;;  %v8181_v14 = vld [vmem:[#allocation10 + $0xa0] sm:$0xff]  ;;  %v8184_v63 = vld [vmem:[#allocation10 + $0xa8] sm:$0xff]  ;;  %v4315_v37 = vpop.eup %4314  ;;  %11369 = vst [vmem:[#allocation184_spill] sm:$0xff] %v8206_v35 }
 0x3e2   :  { %4316 = vrcp.f32 %v8173_v8  ;;  %v2204_v58 = vmul.f32 %v4315_v37, %v2170_v28  ;;  %11371 = vst [vmem:[#allocation186_spill] sm:$0xff] %v8211_v29  ;;  %v8218_v37 = vld [vmem:[#allocation10 + $0x370] sm:$0xff]  ;;  %v8221_v28 = vld [vmem:[#allocation10 + $0x378] sm:$0xff]  ;;  %vm2192_vm13 = vweird.f32 %v8173_v8 }
 0x3e3   :  { %2385 = vmatpush.msra.mxu0 %v8181_v14  ;;  %2425 = vmatpush.msra.mxu2 %v8184_v63  ;;  %11372 = vst [vmem:[#allocation187_spill] sm:$0xff] %v8214_v60 }
 0x3e4   :  { %v8209_v6 = vadd.f32 %v2204_v58, %v2203_v1  ;;  %11373 = vst [vmem:[#allocation188_spill] sm:$0xff] %v8218_v37  ;;  %v2198_v58 = vand.u32 2147483648, %v8173_v8  ;;  %v8226_v1 = vld [vmem:[#allocation10 + $0x330] sm:$0xff] }
 0x3e5   :  { %2386 = vmatpush.msra.mxu0 %v8188_v51  ;;  %2426 = vmatpush.msra.mxu2 %v8191_v33  ;;  %11374 = vst [vmem:[#allocation189_spill] sm:$0xff] %v8221_v28 }
 0x3e6   :  { %11370 = vst [vmem:[#allocation185_spill] sm:$0xff] %v8209_v6  ;;  %4318 = vtanh.f32 %v8209_v6 }
 0x3e7   :  { %2387 = vmatpush.msra.mxu0 %v8194_v62  ;;  %2427 = vmatpush.msra.mxu2 %v8197_v12  ;;  %11375 = vst [vmem:[#allocation190_spill] sm:$0xff] %v8226_v1  ;;  %v8246_v12 = vld [vmem:[#allocation10 + $0x270] sm:$0xff] }
 0x3e8   :  { %2388 = vmatmul.f32.vlgmr.msra.gmra.mxu0 %v8052_v59  ;;  %2428 = vmatmul.f32.vlgmr.msra.gmra.mxu2 %v8052_v59  ;;  %v4317_v13 = vpop.eup %4316 }
 0x3e9   :  { %2452 = vmatpush.msrb.mxu0 %v8203_v4  ;;  %2492 = vmatpush.msrb.mxu2 %v8206_v35  ;;  %v2188_v34 = vmul.f32 %v4317_v13, %v8173_v8  ;;  %vm2193_vm12 = vweird.f32 %v4317_v13  ;;  %v8233_v35 = vld [vmem:[#allocation10 + $0x2f0] sm:$0xff] }
 0x3ea   :  { %11377 = vst [vmem:[#allocation192_spill] sm:$0xff] %v8233_v35  ;;  %vm2194_vm14 = vmor %vm2192_vm13, %vm2193_vm12  ;;  %v8240_v4 = vld [vmem:[#allocation10 + $0x2b0] sm:$0xff] }
 0x3eb   :  { %2453 = vmatpush.msrb.mxu0 %v8211_v29  ;;  %2493 = vmatpush.msrb.mxu2 %v8214_v60  ;;  %v2189_v54 = vsub.f32 1.0, %v2188_v34  ;;  %v8229_v60 = vld [vmem:[#allocation10 + $0x338] sm:$0xff]  ;;  %11378 = vst [vmem:[#allocation193_spill] sm:$0xff] %v8240_v4 }
 0x3ec   :  { %11376 = vst [vmem:[#allocation191_spill] sm:$0xff] %v8229_v60  ;;  %v8236_v34 = vld [vmem:[#allocation10 + $0x2f8] sm:$0xff] }
 0x3ed   :  { %2454 = vmatpush.msrb.mxu0 %v8218_v37  ;;  %2494 = vmatpush.msrb.mxu2 %v8221_v28  ;;  %v2190_v29 = vmul.f32 %v4317_v13, %v2189_v54  ;;  %v2196_v37 = vand.u32 2147483647, %v8173_v8  ;;  %v8243_v54 = vld [vmem:[#allocation10 + $0x2b8] sm:$0xff] }
 0x3ef   :  { %2455 = vmatpush.msrb.mxu0 %v8226_v1  ;;  %2495 = vmatpush.msrb.mxu2 %v8229_v60  ;;  %v2191_v28 = vadd.f32 %v4317_v13, %v2190_v29  ;;  %v2199_v1 = vor.u32 1.1754944e-38, %v2198_v58  ;;  %vm2197_vm15 = vcmp.eq.f32.partialorder %v2196_v37, 8.507059e+37  ;;  %v8249_v29 = vld [vmem:[#allocation10 + $0x278] sm:$0xff]  ;;  %v8254_v58 = vld [vmem:[#allocation10 + $0x230] sm:$0xff]  ;;  %v11404_v37 = vld [vmem:[#allocation63_spill] sm:$0xff] }
 0x3f1   :  { %2456 = vmatpush.msrb.mxu0 %v8233_v35  ;;  %2496 = vmatpush.msrb.mxu2 %v8236_v34  ;;  %v2195_v60 = vsel %vm2194_vm14, %v4317_v13, %v2191_v28  ;;  %v4319_v35 = vpop.eup %4318  ;;  %v8268_v13 = vld [vmem:[#allocation10 + $0x1f8] sm:$0xff]  ;;  %v11405_v28 = vld [vmem:[#allocation58_spill] sm:$0xff] }
 0x3f2   :  { %v2200_v6 = vsel %vm2197_vm15, %v2199_v1, %v2195_v60  ;;  %v8276_v60 = vld [vmem:[#allocation10 + $0x1b8] sm:$0xff]  ;;  %v11406_v1 = vld [vmem:[#allocation31_spill] sm:$0xff] }
 0x3f3   :  { %2457 = vmatpush.msrb.mxu0 %v8240_v4  ;;  %2497 = vmatpush.msrb.mxu2 %v8243_v54  ;;  %v8252_v8 = vmul.f32 %v4319_v35, %v2200_v6  ;;  %v8257_v4 = vld [vmem:[#allocation10 + $0x238] sm:$0xff]  ;;  %v8265_v35 = vld [vmem:[#allocation10 + $0x1f0] sm:$0xff] }
 0x3f4   :  { %v8273_v6 = vld [vmem:[#allocation10 + $0x1b0] sm:$0xff] }
 0x3f5   :  { %2458 = vmatpush.msrb.mxu0 %v8246_v12  ;;  %2498 = vmatpush.msrb.mxu2 %v8249_v29  ;;  %2211 = vst [vmem:[#allocation12 + $0x20] sm:$0xff] %v8252_v8 }
 0x3f6   :  { %2248 = vmatmul.f32.vlgmr.msra.gmra.mxu1 %v8252_v8  ;;  %2288 = vmatmul.f32.vlgmr.msra.gmra.mxu3 %v8252_v8 }
 0x3f7   :  { %2459 = vmatpush.msrb.mxu0 %v8254_v58  ;;  %2499 = vmatpush.msrb.mxu2 %v8257_v4 }
 0x3f8   :  { %2392 = vmatpush.msra.mxu1 %v7479_v18  ;;  %2432 = vmatpush.msra.mxu3 %v7482_v19  ;;  %v8281_v18 = vld [vmem:[#allocation10 + $0x170] sm:$0xff]  ;;  %v8284_v19 = vld [vmem:[#allocation10 + $0x178] sm:$0xff] }
 0x3f9   :  { %2460 = vmatpush.msrb.mxu0 %v8265_v35  ;;  %2500 = vmatpush.msrb.mxu2 %v8268_v13 }
 0x3fa   :  { %2393 = vmatpush.msra.mxu1 %v7487_v0  ;;  %2433 = vmatpush.msra.mxu3 %v7490_v41  ;;  %v8293_v0 = vld [vmem:[#allocation10 + $0x130] sm:$0xff]  ;;  %v8296_v41 = vld [vmem:[#allocation10 + $0x138] sm:$0xff] }
 0x3fb   :  { %2461 = vmatpush.msrb.mxu0 %v8273_v6  ;;  %2501 = vmatpush.msrb.mxu2 %v8276_v60 }
 0x3fc   :  { %2394 = vmatpush.msra.mxu1 %v7495_v46  ;;  %2434 = vmatpush.msra.mxu3 %v7498_v32  ;;  %v8301_v46 = vld [vmem:[#allocation10 + $0xf0] sm:$0xff]  ;;  %v8304_v32 = vld [vmem:[#allocation10 + $0xf8] sm:$0xff] }
 0x3fd   :  { %2462 = vmatpush.msrb.mxu0 %v8281_v18  ;;  %2502 = vmatpush.msrb.mxu2 %v8284_v19 }
 0x3fe   :  { %2395 = vmatpush.msra.mxu1 %v7503_v15  ;;  %2435 = vmatpush.msra.mxu3 %v7506_v20  ;;  %v8309_v15 = vld [vmem:[#allocation10 + $0xb0] sm:$0xff]  ;;  %v8312_v20 = vld [vmem:[#allocation10 + $0xb8] sm:$0xff] }
 0x3ff   :  { %2328 = vmatmul.f32.vlgmr.msrb.gmra.mxu1 %v8252_v8  ;;  %2368 = vmatmul.f32.vlgmr.msrb.gmra.mxu3 %v8252_v8 }
 0x400   :  { %2396 = vmatpush.msra.mxu1 %v7511_v9  ;;  %2436 = vmatpush.msra.mxu3 %v7514_v11  ;;  %v8317_v9 = vld [vmem:[#allocation10 + $0x70] sm:$0xff]  ;;  %v8320_v11 = vld [vmem:[#allocation10 + $0x78] sm:$0xff] }
 0x401   :  { %2463 = vmatpush.msrb.mxu0 %v8293_v0  ;;  %2503 = vmatpush.msrb.mxu2 %v8296_v41  ;;  %11379 = vst [vmem:[#allocation194_spill] sm:$0xff] %v8320_v11 }
 0x402   :  { %2397 = vmatpush.msra.mxu1 %v7519_v2  ;;  %2437 = vmatpush.msra.mxu3 %v7522_v3  ;;  %v8325_v2 = vld [vmem:[#allocation10 + $0x30] sm:$0xff]  ;;  %v8328_v3 = vld [vmem:[#allocation10 + $0x38] sm:$0xff] }
 0x403   :  { %2464 = vmatpush.msrb.mxu0 %v8301_v46  ;;  %2504 = vmatpush.msrb.mxu2 %v8304_v32  ;;  %11380 = vst [vmem:[#allocation195_spill] sm:$0xff] %v8325_v2 }
 0x404   :  { %2398 = vmatpush.msra.mxu1 %v7527_v26  ;;  %2438 = vmatpush.msra.mxu3 %v7530_v5  ;;  %11381 = vst [vmem:[#allocation196_spill] sm:$0xff] %v8328_v3  ;;  %v8335_v26 = vld [vmem:[#allocation10 + $0x3c0] sm:$0xff]  ;;  %v8338_v5 = vld [vmem:[#allocation10 + $0x3c8] sm:$0xff] }
 0x405   :  { %2465 = vmatpush.msrb.mxu0 %v8309_v15  ;;  %2505 = vmatpush.msrb.mxu2 %v8312_v20  ;;  %11382 = vst [vmem:[#allocation197_spill] sm:$0xff] %v8335_v26 }
 0x406   :  { %2399 = vmatpush.msra.mxu1 %v7535_v7  ;;  %2439 = vmatpush.msra.mxu3 %v7538_v31  ;;  %11383 = vst [vmem:[#allocation198_spill] sm:$0xff] %v8338_v5  ;;  %v8343_v7 = vld [vmem:[#allocation10 + $0x380] sm:$0xff]  ;;  %v8346_v31 = vld [vmem:[#allocation10 + $0x388] sm:$0xff] }
 0x407   :  { %2466 = vmatpush.msrb.mxu0 %v8317_v9  ;;  %2506 = vmatpush.msrb.mxu2 %v8320_v11  ;;  %11384 = vst [vmem:[#allocation36_spill] sm:$0xff] %v8343_v7 }
 0x408   :  { %2400 = vmatpush.msra.mxu1 %v7543_v38  ;;  %2440 = vmatpush.msra.mxu3 %v7546_v17  ;;  %11385 = vst [vmem:[#allocation41_spill] sm:$0xff] %v8346_v31  ;;  %v8351_v38 = vld [vmem:[#allocation10 + $0x340] sm:$0xff]  ;;  %v8354_v17 = vld [vmem:[#allocation10 + $0x348] sm:$0xff] }
 0x409   :  { %2467 = vmatpush.msrb.mxu0 %v8325_v2  ;;  %2507 = vmatpush.msrb.mxu2 %v8328_v3  ;;  %11386 = vst [vmem:[#allocation43_spill] sm:$0xff] %v8351_v38 }
 0x40a   :  { %2468 = vmatmul.f32.vlgmr.msrb.gmra.mxu0 %v8052_v59  ;;  %2508 = vmatmul.f32.vlgmr.msrb.gmra.mxu2 %v8052_v59  ;;  %11387 = vst [vmem:[#allocation38_spill] sm:$0xff] %v8354_v17  ;;  %v11403_v59 = vld [vmem:[#allocation29_spill] sm:$0xff] }
 0x40b   :  { %2401 = vmatpush.msra.mxu1 %v7553_v52  ;;  %2441 = vmatpush.msra.mxu3 %v7556_v45  ;;  %v8359_v52 = vld [vmem:[#allocation10 + $0x300] sm:$0xff]  ;;  %v8362_v45 = vld [vmem:[#allocation10 + $0x308] sm:$0xff] }
 0x40c   :  { %2680 = vmatpush.msra.mxu0 %v8335_v26  ;;  %2720 = vmatpush.msra.mxu2 %v8338_v5  ;;  %11388 = vst [vmem:[#allocation18_spill] sm:$0xff] %v8359_v52 }
 0x40d   :  { %2402 = vmatpush.msra.mxu1 %v7561_v57  ;;  %2442 = vmatpush.msra.mxu3 %v7564_v61  ;;  %11389 = vst [vmem:[#allocation21_spill] sm:$0xff] %v8362_v45  ;;  %v8367_v57 = vld [vmem:[#allocation10 + $0x2c0] sm:$0xff]  ;;  %v8370_v61 = vld [vmem:[#allocation10 + $0x2c8] sm:$0xff] }
 0x40e   :  { %2681 = vmatpush.msra.mxu0 %v8343_v7  ;;  %2721 = vmatpush.msra.mxu2 %v8346_v31  ;;  %11390 = vst [vmem:[#allocation47_spill] sm:$0xff] %v8367_v57 }
 0x40f   :  { %2403 = vmatpush.msra.mxu1 %v7569_v25  ;;  %2443 = vmatpush.msra.mxu3 %v7572_v40  ;;  %11391 = vst [vmem:[#allocation42_spill] sm:$0xff] %v8370_v61  ;;  %v8375_v25 = vld [vmem:[#allocation10 + $0x280] sm:$0xff] }
 0x410   :  { %2682 = vmatpush.msra.mxu0 %v8351_v38  ;;  %2722 = vmatpush.msra.mxu2 %v8354_v17  ;;  %11392 = vst [vmem:[#allocation23_spill] sm:$0xff] %v8375_v25  ;;  %v11393_v40 = vld [vmem:[#allocation46_spill] sm:$0xff] }
 0x411   :  { %2404 = vmatpush.msra.mxu1 %v7577_v47  ;;  %2444 = vmatpush.msra.mxu3 %v7580_v56  ;;  %v11394_v47 = vld [vmem:[#allocation20_spill] sm:$0xff]  ;;  %v11395_v56 = vld [vmem:[#allocation25_spill] sm:$0xff] }
 0x412   :  { %2683 = vmatpush.msra.mxu0 %v8359_v52  ;;  %2723 = vmatpush.msra.mxu2 %v8362_v45 }
 0x413   :  { %2405 = vmatpush.msra.mxu1 %v7585_v49  ;;  %2445 = vmatpush.msra.mxu3 %v7588_v27  ;;  %v11396_v49 = vld [vmem:[#allocation55_spill] sm:$0xff]  ;;  %v11397_v27 = vld [vmem:[#allocation50_spill] sm:$0xff] }
 0x414   :  { %2684 = vmatpush.msra.mxu0 %v8367_v57  ;;  %2724 = vmatpush.msra.mxu2 %v8370_v61  ;;  %v2535_v61 = vld [vmem:[#allocation5 + $0x90] sm:$0xff] }
 0x415   :  { %2406 = vmatpush.msra.mxu1 %v7593_v39  ;;  %2446 = vmatpush.msra.mxu3 %v7596_v53  ;;  %v11398_v39 = vld [vmem:[#allocation27_spill] sm:$0xff]  ;;  %v11399_v53 = vld [vmem:[#allocation22_spill] sm:$0xff] }
 0x416   :  { %2685 = vmatpush.msra.mxu0 %v8375_v25  ;;  %2725 = vmatpush.msra.mxu2 %v7600_v30  ;;  %v11400_v30 = vld [vmem:[#allocation59_spill] sm:$0xff] }
 0x417   :  { %2407 = vmatpush.msra.mxu1 %v7603_v55  ;;  %2447 = vmatpush.msra.mxu3 %v7606_v16  ;;  %v11401_v55 = vld [vmem:[#allocation54_spill] sm:$0xff]  ;;  %v11402_v16 = vld [vmem:[#allocation24_spill] sm:$0xff] }
 0x418   :  { %2408 = vmatmul.f32.vlgmr.msra.gmra.mxu1 %v8252_v8  ;;  %2448 = vmatmul.f32.vlgmr.msra.gmra.mxu3 %v8252_v8 }
 0x419   :  { %2472 = vmatpush.msrb.mxu1 %v11393_v40  ;;  %2512 = vmatpush.msrb.mxu3 %v11394_v47  ;;  %v11407_v40 = vld [vmem:[#allocation26_spill] sm:$0xff]  ;;  %v11408_v47 = vld [vmem:[#allocation67_spill] sm:$0xff] }
 0x41a   :  { %2686 = vmatpush.msra.mxu0 %v11395_v56  ;;  %2726 = vmatpush.msra.mxu2 %v11396_v49  ;;  %v11409_v56 = vld [vmem:[#allocation62_spill] sm:$0xff]  ;;  %v11410_v49 = vld [vmem:[#allocation28_spill] sm:$0xff] }
 0x41b   :  { %2473 = vmatpush.msrb.mxu1 %v11397_v27  ;;  %2513 = vmatpush.msrb.mxu3 %v11398_v39  ;;  %v11411_v27 = vld [vmem:[#allocation33_spill] sm:$0xff]  ;;  %v11412_v39 = vld [vmem:[#allocation71_spill] sm:$0xff] }
 0x41c   :  { %2687 = vmatpush.msra.mxu0 %v11399_v53  ;;  %2727 = vmatpush.msra.mxu2 %v11400_v30  ;;  %v11413_v53 = vld [vmem:[#allocation66_spill] sm:$0xff]  ;;  %v11414_v30 = vld [vmem:[#allocation35_spill] sm:$0xff] }
 0x41d   :  { %2474 = vmatpush.msrb.mxu1 %v11401_v55  ;;  %2514 = vmatpush.msrb.mxu3 %v11402_v16  ;;  %v11415_v55 = vld [vmem:[#allocation30_spill] sm:$0xff]  ;;  %v11416_v16 = vld [vmem:[#allocation72_spill] sm:$0xff] }
 0x41e   :  { %2688 = vmatpush.msra.mxu0 %v11403_v59  ;;  %2728 = vmatpush.msra.mxu2 %v11404_v37  ;;  %v11417_v59 = vld [vmem:[#allocation73_spill] sm:$0xff]  ;;  %v11418_v37 = vld [vmem:[#allocation32_spill] sm:$0xff] }
 0x41f   :  { %2475 = vmatpush.msrb.mxu1 %v11405_v28  ;;  %2515 = vmatpush.msrb.mxu3 %v11406_v1  ;;  %v11419_v28 = vld [vmem:[#allocation37_spill] sm:$0xff]  ;;  %v11420_v1 = vld [vmem:[#allocation76_spill] sm:$0xff] }
 0x420   :  { %2689 = vmatpush.msra.mxu0 %v11407_v40  ;;  %2729 = vmatpush.msra.mxu2 %v11408_v47  ;;  %v11421_v40 = vld [vmem:[#allocation77_spill] sm:$0xff]  ;;  %v11422_v47 = vld [vmem:[#allocation39_spill] sm:$0xff] }
 0x421   :  { %2476 = vmatpush.msrb.mxu1 %v11409_v56  ;;  %2516 = vmatpush.msrb.mxu3 %v11410_v49  ;;  %v11423_v56 = vld [vmem:[#allocation34_spill] sm:$0xff]  ;;  %v11424_v49 = vld [vmem:[#allocation80_spill] sm:$0xff] }
 0x422   :  { %2690 = vmatpush.msra.mxu0 %v11411_v27  ;;  %2730 = vmatpush.msra.mxu2 %v11412_v39  ;;  %v11425_v27 = vld [vmem:[#allocation81_spill] sm:$0xff]  ;;  %v11426_v39 = vld [vmem:[#allocation40_spill] sm:$0xff] }
 0x423   :  { %2477 = vmatpush.msrb.mxu1 %v11413_v53  ;;  %2517 = vmatpush.msrb.mxu3 %v11414_v30  ;;  %v11427_v53 = vld [vmem:[#allocation45_spill] sm:$0xff]  ;;  %v11428_v30 = vld [vmem:[#allocation84_spill] sm:$0xff] }
 0x424   :  { %2691 = vmatpush.msra.mxu0 %v11415_v55  ;;  %2731 = vmatpush.msra.mxu2 %v11416_v16  ;;  %v11429_v55 = vld [vmem:[#allocation85_spill] sm:$0xff]  ;;  %v11430_v16 = vld [vmem:[#allocation44_spill] sm:$0xff] }
 0x425   :  { %2478 = vmatpush.msrb.mxu1 %v11417_v59  ;;  %2518 = vmatpush.msrb.mxu3 %v11418_v37  ;;  %v11431_v59 = vld [vmem:[#allocation49_spill] sm:$0xff]  ;;  %v11432_v37 = vld [vmem:[#allocation88_spill] sm:$0xff] }
 0x426   :  { %2692 = vmatpush.msra.mxu0 %v11419_v28  ;;  %2732 = vmatpush.msra.mxu2 %v11420_v1  ;;  %v11433_v28 = vld [vmem:[#allocation89_spill] sm:$0xff]  ;;  %v11434_v1 = vld [vmem:[#allocation48_spill] sm:$0xff] }
 0x427   :  { %2479 = vmatpush.msrb.mxu1 %v11421_v40  ;;  %2519 = vmatpush.msrb.mxu3 %v11422_v47  ;;  %v11435_v40 = vld [vmem:[#allocation53_spill] sm:$0xff]  ;;  %v11436_v47 = vld [vmem:[#allocation92_spill] sm:$0xff] }
 0x428   :  { %2693 = vmatpush.msra.mxu0 %v11423_v56  ;;  %2733 = vmatpush.msra.mxu2 %v11424_v49  ;;  %v11437_v56 = vld [vmem:[#allocation93_spill] sm:$0xff]  ;;  %v11438_v49 = vld [vmem:[#allocation52_spill] sm:$0xff] }
 0x429   :  { %2480 = vmatpush.msrb.mxu1 %v11425_v27  ;;  %2520 = vmatpush.msrb.mxu3 %v11426_v39  ;;  %v11439_v27 = vld [vmem:[#allocation57_spill] sm:$0xff]  ;;  %v11440_v39 = vld [vmem:[#allocation96_spill] sm:$0xff] }
 0x42a   :  { %2694 = vmatpush.msra.mxu0 %v11427_v53  ;;  %2734 = vmatpush.msra.mxu2 %v11428_v30  ;;  %v11441_v53 = vld [vmem:[#allocation97_spill] sm:$0xff]  ;;  %v11442_v30 = vld [vmem:[#allocation56_spill] sm:$0xff] }
 0x42b   :  { %2481 = vmatpush.msrb.mxu1 %v11429_v55  ;;  %2521 = vmatpush.msrb.mxu3 %v11430_v16  ;;  %v11443_v55 = vld [vmem:[#allocation61_spill] sm:$0xff]  ;;  %v11444_v16 = vld [vmem:[#allocation100_spill] sm:$0xff] }
 0x42c   :  { %2695 = vmatpush.msra.mxu0 %v11431_v59  ;;  %2735 = vmatpush.msra.mxu2 %v11432_v37  ;;  %v11445_v59 = vld [vmem:[#allocation101_spill] sm:$0xff]  ;;  %v11446_v37 = vld [vmem:[#allocation60_spill] sm:$0xff] }
 0x42d   :  { %2482 = vmatpush.msrb.mxu1 %v11433_v28  ;;  %2522 = vmatpush.msrb.mxu3 %v11434_v1  ;;  %v11447_v28 = vld [vmem:[#allocation65_spill] sm:$0xff]  ;;  %v11448_v1 = vld [vmem:[#allocation64_spill] sm:$0xff] }
 0x42e   :  { %2760 = vmatpush.msrb.mxu0 %v11435_v40  ;;  %2800 = vmatpush.msrb.mxu2 %v11436_v47  ;;  %v11449_v40 = vld [vmem:[#allocation69_spill] sm:$0xff]  ;;  %v11450_v47 = vld [vmem:[#allocation68_spill] sm:$0xff] }
 0x42f   :  { %2483 = vmatpush.msrb.mxu1 %v11437_v56  ;;  %2523 = vmatpush.msrb.mxu3 %v11438_v49  ;;  %v11451_v56 = vld [vmem:[#allocation70_spill] sm:$0xff] }
 0x430   :  { %2761 = vmatpush.msrb.mxu0 %v11439_v27  ;;  %2801 = vmatpush.msrb.mxu2 %v11440_v39  ;;  %v11452_v49 = vld [vmem:[#allocation74_spill] sm:$0xff]  ;;  %v11453_v27 = vld [vmem:[#allocation75_spill] sm:$0xff] }
 0x431   :  { %2484 = vmatpush.msrb.mxu1 %v11441_v53  ;;  %2524 = vmatpush.msrb.mxu3 %v11442_v30  ;;  %v11454_v39 = vld [vmem:[#allocation78_spill] sm:$0xff]  ;;  %v11455_v53 = vld [vmem:[#allocation79_spill] sm:$0xff] }
 0x432   :  { %2762 = vmatpush.msrb.mxu0 %v11443_v55  ;;  %2802 = vmatpush.msrb.mxu2 %v11444_v16  ;;  %v11456_v30 = vld [vmem:[#allocation82_spill] sm:$0xff]  ;;  %v8452_v16 = vld [vmem:[#allocation10 + $0x7c8] sm:$0xff] }
 0x433   :  { %2485 = vmatpush.msrb.mxu1 %v11445_v59  ;;  %2525 = vmatpush.msrb.mxu3 %v11446_v37  ;;  %v8449_v55 = vld [vmem:[#allocation10 + $0x7c0] sm:$0xff]  ;;  %11458 = vst [vmem:[#allocation51_spill] sm:$0xff] %v8452_v16  ;;  %v11459_v59 = vld [vmem:[#allocation83_spill] sm:$0xff]  ;;  %v11460_v37 = vld [vmem:[#allocation104_spill] sm:$0xff] }
 0x434   :  { %2763 = vmatpush.msrb.mxu0 %v11447_v28  ;;  %2803 = vmatpush.msrb.mxu2 %v11448_v1  ;;  %11457 = vst [vmem:[#allocation19_spill] sm:$0xff] %v8449_v55  ;;  %v8457_v28 = vld [vmem:[#allocation10 + $0x780] sm:$0xff] }
 0x435   :  { %2486 = vmatpush.msrb.mxu1 %v11449_v40  ;;  %2526 = vmatpush.msrb.mxu3 %v11450_v47  ;;  %11461 = vst [vmem:[#allocation46_spill] sm:$0xff] %v8457_v28  ;;  %v11463_v1 = vld [vmem:[#allocation86_spill] sm:$0xff]  ;;  %v11464_v40 = vld [vmem:[#allocation87_spill] sm:$0xff] }
 0x436   :  { %2764 = vmatpush.msrb.mxu0 %v11451_v56  ;;  %2804 = vmatpush.msrb.mxu2 %v11452_v49  ;;  %v8465_v47 = vld [vmem:[#allocation10 + $0x740] sm:$0xff]  ;;  %v8468_v56 = vld [vmem:[#allocation10 + $0x748] sm:$0xff]  ;;  %v11467_v49 = vld [vmem:[#allocation105_spill] sm:$0xff] }
 0x437   :  { %2487 = vmatpush.msrb.mxu1 %v11453_v27  ;;  %2527 = vmatpush.msrb.mxu3 %v11454_v39  ;;  %11465 = vst [vmem:[#allocation25_spill] sm:$0xff] %v8465_v47  ;;  %v11468_v27 = vld [vmem:[#allocation106_spill] sm:$0xff] }
 0x438   :  { %2488 = vmatmul.f32.vlgmr.msrb.gmra.mxu1 %v8252_v8  ;;  %2528 = vmatmul.f32.vlgmr.msrb.gmra.mxu3 %v8252_v8  ;;  %v8460_v8 = vld [vmem:[#allocation10 + $0x788] sm:$0xff]  ;;  %11466 = vst [vmem:[#allocation55_spill] sm:$0xff] %v8468_v56  ;;  %v8473_v39 = vld [vmem:[#allocation10 + $0x700] sm:$0xff] }
 0x439   :  { %2765 = vmatpush.msrb.mxu0 %v11455_v53  ;;  %2805 = vmatpush.msrb.mxu2 %v11456_v30  ;;  %11462 = vst [vmem:[#allocation20_spill] sm:$0xff] %v8460_v8  ;;  %v8476_v53 = vld [vmem:[#allocation10 + $0x708] sm:$0xff]  ;;  %v11471_v30 = vld [vmem:[#allocation90_spill] sm:$0xff] }
 0x43a   :  { %2700 = vmatpush.msra.mxu1 %v8449_v55  ;;  %2740 = vmatpush.msra.mxu3 %v8452_v16  ;;  %11469 = vst [vmem:[#allocation50_spill] sm:$0xff] %v8473_v39  ;;  %v2534_v55 = vld [vmem:[#allocation5 + $0x88] sm:$0xff] }
 0x43b   :  { %2766 = vmatpush.msrb.mxu0 %v11459_v59  ;;  %2806 = vmatpush.msrb.mxu2 %v11460_v37  ;;  %11470 = vst [vmem:[#allocation27_spill] sm:$0xff] %v8476_v53  ;;  %v11472_v59 = vld [vmem:[#allocation91_spill] sm:$0xff]  ;;  %v8481_v37 = vld [vmem:[#allocation10 + $0x6c0] sm:$0xff] }
 0x43c   :  { %2701 = vmatpush.msra.mxu1 %v8457_v28  ;;  %2741 = vmatpush.msra.mxu3 %v8460_v8  ;;  %11473 = vst [vmem:[#allocation22_spill] sm:$0xff] %v8481_v37  ;;  %v2533_v8 = vld [vmem:[#allocation5 + $0x80] sm:$0xff] }
 0x43d   :  { %2767 = vmatpush.msrb.mxu0 %v11463_v1  ;;  %2807 = vmatpush.msrb.mxu2 %v11464_v40  ;;  %v8484_v1 = vld [vmem:[#allocation10 + $0x6c8] sm:$0xff]  ;;  %v11537_v28 = vld [vmem:[#allocation162_spill] sm:$0xff] }
 0x43e   :  { %2702 = vmatpush.msra.mxu1 %v8465_v47  ;;  %2742 = vmatpush.msra.mxu3 %v8468_v56  ;;  %11474 = vst [vmem:[#allocation59_spill] sm:$0xff] %v8484_v1  ;;  %v11475_v40 = vld [vmem:[#allocation107_spill] sm:$0xff] }
 0x43f   :  { %2768 = vmatpush.msrb.mxu0 %v11467_v49  ;;  %2808 = vmatpush.msrb.mxu2 %v11468_v27  ;;  %v11476_v49 = vld [vmem:[#allocation108_spill] sm:$0xff]  ;;  %v8489_v27 = vld [vmem:[#allocation10 + $0x680] sm:$0xff]  ;;  %v11483_v56 = vld [vmem:[#allocation99_spill] sm:$0xff] }
 0x440   :  { %2703 = vmatpush.msra.mxu1 %v8473_v39  ;;  %2743 = vmatpush.msra.mxu3 %v8476_v53  ;;  %11477 = vst [vmem:[#allocation54_spill] sm:$0xff] %v8489_v27  ;;  %v11478_v53 = vld [vmem:[#allocation94_spill] sm:$0xff]  ;;  %v11487_v47 = vld [vmem:[#allocation103_spill] sm:$0xff] }
 0x441   :  { %2769 = vmatpush.msrb.mxu0 %v11471_v30  ;;  %2809 = vmatpush.msrb.mxu2 %v11472_v59  ;;  %v11479_v30 = vld [vmem:[#allocation95_spill] sm:$0xff]  ;;  %v11480_v59 = vld [vmem:[#allocation109_spill] sm:$0xff]  ;;  %v11481_v39 = vld [vmem:[#allocation110_spill] sm:$0xff] }
 0x442   :  { %2704 = vmatpush.msra.mxu1 %v8481_v37  ;;  %2744 = vmatpush.msra.mxu3 %v8484_v1  ;;  %v11482_v37 = vld [vmem:[#allocation98_spill] sm:$0xff]  ;;  %v11484_v1 = vld [vmem:[#allocation111_spill] sm:$0xff] }
 0x443   :  { %2770 = vmatpush.msrb.mxu0 %v11475_v40  ;;  %2810 = vmatpush.msrb.mxu2 %v11476_v49  ;;  %v11485_v40 = vld [vmem:[#allocation112_spill] sm:$0xff]  ;;  %v11486_v49 = vld [vmem:[#allocation102_spill] sm:$0xff] }
 0x444   :  { %2705 = vmatpush.msra.mxu1 %v8489_v27  ;;  %2745 = vmatpush.msra.mxu3 %v11478_v53  ;;  %v11488_v27 = vld [vmem:[#allocation113_spill] sm:$0xff]  ;;  %v11489_v53 = vld [vmem:[#allocation114_spill] sm:$0xff] }
 0x445   :  { %2771 = vmatpush.msrb.mxu0 %v11479_v30  ;;  %2811 = vmatpush.msrb.mxu2 %v11480_v59  ;;  %v11490_v30 = vld [vmem:[#allocation115_spill] sm:$0xff]  ;;  %v11491_v59 = vld [vmem:[#allocation116_spill] sm:$0xff] }
 0x446   :  { %2706 = vmatpush.msra.mxu1 %v11481_v39  ;;  %2746 = vmatpush.msra.mxu3 %v11482_v37  ;;  %v11492_v39 = vld [vmem:[#allocation117_spill] sm:$0xff]  ;;  %v11493_v37 = vld [vmem:[#allocation118_spill] sm:$0xff] }
 0x447   :  { %2772 = vmatpush.msrb.mxu0 %v11483_v56  ;;  %2812 = vmatpush.msrb.mxu2 %v11484_v1  ;;  %v11494_v56 = vld [vmem:[#allocation119_spill] sm:$0xff]  ;;  %v11495_v1 = vld [vmem:[#allocation120_spill] sm:$0xff] }
 0x448   :  { %2707 = vmatpush.msra.mxu1 %v11485_v40  ;;  %2747 = vmatpush.msra.mxu3 %v11486_v49  ;;  %v11496_v40 = vld [vmem:[#allocation121_spill] sm:$0xff]  ;;  %v11497_v49 = vld [vmem:[#allocation122_spill] sm:$0xff] }
 0x449   :  { %2773 = vmatpush.msrb.mxu0 %v11487_v47  ;;  %2813 = vmatpush.msrb.mxu2 %v11488_v27  ;;  %v11498_v47 = vld [vmem:[#allocation123_spill] sm:$0xff]  ;;  %v11499_v27 = vld [vmem:[#allocation124_spill] sm:$0xff] }
 0x44a   :  { %2708 = vmatpush.msra.mxu1 %v11489_v53  ;;  %2748 = vmatpush.msra.mxu3 %v11490_v30  ;;  %v11500_v53 = vld [vmem:[#allocation125_spill] sm:$0xff]  ;;  %v11501_v30 = vld [vmem:[#allocation126_spill] sm:$0xff] }
 0x44b   :  { %2774 = vmatpush.msrb.mxu0 %v11491_v59  ;;  %2814 = vmatpush.msrb.mxu2 %v11492_v39  ;;  %v11502_v59 = vld [vmem:[#allocation127_spill] sm:$0xff]  ;;  %v11503_v39 = vld [vmem:[#allocation128_spill] sm:$0xff]  ;;  %v2269_v16 = vpop.f32.mrf.mxu2 }
 0x44c   :  { %2709 = vmatpush.msra.mxu1 %v11493_v37  ;;  %2749 = vmatpush.msra.mxu3 %v11494_v56  ;;  %v11504_v37 = vld [vmem:[#allocation129_spill] sm:$0xff]  ;;  %v11505_v56 = vld [vmem:[#allocation130_spill] sm:$0xff] }
 0x44d   :  { %2775 = vmatpush.msrb.mxu0 %v11495_v1  ;;  %2815 = vmatpush.msrb.mxu2 %v11496_v40  ;;  %v11506_v1 = vld [vmem:[#allocation131_spill] sm:$0xff]  ;;  %v11507_v40 = vld [vmem:[#allocation134_spill] sm:$0xff] }
 0x44e   :  { %2710 = vmatpush.msra.mxu1 %v11497_v49  ;;  %2750 = vmatpush.msra.mxu3 %v11498_v47  ;;  %v11508_v49 = vld [vmem:[#allocation135_spill] sm:$0xff]  ;;  %v11509_v47 = vld [vmem:[#allocation138_spill] sm:$0xff] }
 0x450   :  { %2711 = vmatpush.msra.mxu1 %v11499_v27  ;;  %2751 = vmatpush.msra.mxu3 %v11500_v53  ;;  %v11510_v27 = vld [vmem:[#allocation139_spill] sm:$0xff]  ;;  %v11511_v53 = vld [vmem:[#allocation142_spill] sm:$0xff] }
 0x452   :  { %2712 = vmatpush.msra.mxu1 %v11501_v30  ;;  %2752 = vmatpush.msra.mxu3 %v11502_v59  ;;  %v11512_v30 = vld [vmem:[#allocation143_spill] sm:$0xff]  ;;  %v11513_v59 = vld [vmem:[#allocation132_spill] sm:$0xff] }
 0x454   :  { %2713 = vmatpush.msra.mxu1 %v11503_v39  ;;  %2753 = vmatpush.msra.mxu3 %v11504_v37  ;;  %v11514_v39 = vld [vmem:[#allocation133_spill] sm:$0xff]  ;;  %v11515_v37 = vld [vmem:[#allocation136_spill] sm:$0xff] }
 0x456   :  { %2714 = vmatpush.msra.mxu1 %v11505_v56  ;;  %2754 = vmatpush.msra.mxu3 %v11506_v1  ;;  %v11516_v56 = vld [vmem:[#allocation137_spill] sm:$0xff]  ;;  %v11517_v1 = vld [vmem:[#allocation140_spill] sm:$0xff] }
 0x458   :  { %2715 = vmatpush.msra.mxu1 %v11507_v40  ;;  %2755 = vmatpush.msra.mxu3 %v11508_v49  ;;  %v11518_v40 = vld [vmem:[#allocation141_spill] sm:$0xff]  ;;  %v11519_v49 = vld [vmem:[#allocation144_spill] sm:$0xff] }
 0x45a   :  { %2780 = vmatpush.msrb.mxu1 %v11509_v47  ;;  %2820 = vmatpush.msrb.mxu3 %v11510_v27  ;;  %v11520_v47 = vld [vmem:[#allocation145_spill] sm:$0xff]  ;;  %v11521_v27 = vld [vmem:[#allocation146_spill] sm:$0xff] }
 0x45c   :  { %2781 = vmatpush.msrb.mxu1 %v11511_v53  ;;  %2821 = vmatpush.msrb.mxu3 %v11512_v30  ;;  %v11522_v53 = vld [vmem:[#allocation147_spill] sm:$0xff]  ;;  %v11523_v30 = vld [vmem:[#allocation148_spill] sm:$0xff] }
 0x45e   :  { %2782 = vmatpush.msrb.mxu1 %v11513_v59  ;;  %2822 = vmatpush.msrb.mxu3 %v11514_v39  ;;  %v11524_v59 = vld [vmem:[#allocation149_spill] sm:$0xff]  ;;  %v11525_v39 = vld [vmem:[#allocation150_spill] sm:$0xff] }
 0x460   :  { %2783 = vmatpush.msrb.mxu1 %v11515_v37  ;;  %2823 = vmatpush.msrb.mxu3 %v11516_v56  ;;  %v11526_v37 = vld [vmem:[#allocation151_spill] sm:$0xff]  ;;  %v11527_v56 = vld [vmem:[#allocation152_spill] sm:$0xff] }
 0x462   :  { %2784 = vmatpush.msrb.mxu1 %v11517_v1  ;;  %2824 = vmatpush.msrb.mxu3 %v11518_v40  ;;  %v11528_v1 = vld [vmem:[#allocation153_spill] sm:$0xff]  ;;  %v11529_v40 = vld [vmem:[#allocation154_spill] sm:$0xff] }
 0x464   :  { %2785 = vmatpush.msrb.mxu1 %v11519_v49  ;;  %2825 = vmatpush.msrb.mxu3 %v11520_v47  ;;  %v11530_v49 = vld [vmem:[#allocation155_spill] sm:$0xff]  ;;  %v11531_v47 = vld [vmem:[#allocation156_spill] sm:$0xff] }
 0x466   :  { %2786 = vmatpush.msrb.mxu1 %v11521_v27  ;;  %2826 = vmatpush.msrb.mxu3 %v11522_v53  ;;  %v11532_v27 = vld [vmem:[#allocation157_spill] sm:$0xff]  ;;  %v11533_v53 = vld [vmem:[#allocation158_spill] sm:$0xff] }
 0x468   :  { %2787 = vmatpush.msrb.mxu1 %v11523_v30  ;;  %2827 = vmatpush.msrb.mxu3 %v11524_v59  ;;  %v11534_v30 = vld [vmem:[#allocation159_spill] sm:$0xff]  ;;  %v2229_v59 = vpop.f32.mrf.mxu0 }
 0x46a   :  { %2788 = vmatpush.msrb.mxu1 %v11525_v39  ;;  %2828 = vmatpush.msrb.mxu3 %v11526_v37  ;;  %v11535_v39 = vld [vmem:[#allocation160_spill] sm:$0xff]  ;;  %v11536_v37 = vld [vmem:[#allocation161_spill] sm:$0xff] }
 0x46c   :  { %2789 = vmatpush.msrb.mxu1 %v11527_v56  ;;  %2829 = vmatpush.msrb.mxu3 %v11528_v1 }
 0x46e   :  { %2790 = vmatpush.msrb.mxu1 %v11529_v40  ;;  %2830 = vmatpush.msrb.mxu3 %v11530_v49  ;;  %v11538_v40 = vld [vmem:[#allocation163_spill] sm:$0xff] }
 0x470   :  { %2791 = vmatpush.msrb.mxu1 %v11531_v47  ;;  %2831 = vmatpush.msrb.mxu3 %v11532_v27  ;;  %v11539_v47 = vld [vmem:[#allocation164_spill] sm:$0xff]  ;;  %v11540_v27 = vld [vmem:[#allocation165_spill] sm:$0xff]  ;;  %v2309_v25 = vpop.f32.mrf.mxu0 }
 0x472   :  { %2792 = vmatpush.msrb.mxu1 %v11533_v53  ;;  %2832 = vmatpush.msrb.mxu3 %v11534_v30 }
 0x473   :  { %v2249_v56 = vpop.f32.mrf.mxu1 }
 0x474   :  { %2793 = vmatpush.msrb.mxu1 %v11535_v39  ;;  %2833 = vmatpush.msrb.mxu3 %v11536_v37  ;;  %v2250_v1 = vadd.f32 %v2249_v56, %v2229_v59 }
 0x476   :  { %2794 = vmatpush.msrb.mxu1 %v11537_v28  ;;  %2834 = vmatpush.msrb.mxu3 %v11538_v40  ;;  %v2537_v49 = vadd.f32 %v2533_v8, %v2250_v1 }
 0x478   :  { %2795 = vmatpush.msrb.mxu1 %v11539_v47  ;;  %2835 = vmatpush.msrb.mxu3 %v11540_v27  ;;  %v4156_v53 = vmul.f32 -1.442695, %v2537_v49 }
 0x479   :  { %v2289_v30 = vpop.f32.mrf.mxu3 }
 0x47a   :  { %4320 = vpow2.f32 %v4156_v53  ;;  %v2290_v39 = vadd.f32 %v2289_v30, %v2269_v16  ;;  %v2349_v53 = vpop.f32.mrf.mxu2 }
 0x47c   :  { %v2329_v37 = vpop.f32.mrf.mxu1  ;;  %v2538_v57 = vadd.f32 %v2534_v55, %v2290_v39 }
 0x47d   :  { %v2330_v59 = vadd.f32 %v2329_v37, %v2309_v25  ;;  %v2536_v25 = vld [vmem:[#allocation5 + $0x98] sm:$0xff] }
 0x47e   :  { %v4157_v56 = vmul.f32 -1.442695, %v2538_v57 }
 0x47f   :  { %v2539_v28 = vadd.f32 %v2535_v61, %v2330_v59 }
 0x480   :  { %v4321_v45 = vpop.eup %4320  ;;  %4322 = vpow2.f32 %v4157_v56 }
 0x481   :  { %v4158_v8 = vmul.f32 -1.442695, %v2539_v28  ;;  %v2559_v1 = vadd.f32 1.0, %v4321_v45 }
 0x482   :  { %v2369_v27 = vpop.f32.mrf.mxu3 }
 0x483   :  { %4324 = vpow2.f32 %v4158_v8  ;;  %v2370_v57 = vadd.f32 %v2369_v27, %v2349_v53  ;;  %v2573_v28 = vand.u32 2147483648, %v2559_v1  ;;  %vm2567_vm1 = vweird.f32 %v2559_v1  ;;  %v2389_v27 = vpop.f32.mrf.mxu0 }
 0x484   :  { %4326 = vrcp.f32 %v2559_v1 }
 0x485   :  { %v2540_v45 = vadd.f32 %v2536_v25, %v2370_v57  ;;  %v2542_v25 = vld [vmem:[#allocation8 + $0x60] sm:$0xff] }
 0x486   :  { %v4323_v40 = vpop.eup %4322 }
 0x487   :  { %v2560_v49 = vadd.f32 1.0, %v4323_v40 }
 0x489   :  { %v4325_v47 = vpop.eup %4324  ;;  %4328 = vrcp.f32 %v2560_v49  ;;  %v2588_v17 = vand.u32 2147483648, %v2560_v49  ;;  %v2586_v57 = vand.u32 2147483647, %v2560_v49  ;;  %vm2582_vm4 = vweird.f32 %v2560_v49 }
 0x48a   :  { %v4327_v52 = vpop.eup %4326  ;;  %v8555_v16 = vadd.f32 1.0, %v4325_v47  ;;  %v2571_v47 = vand.u32 2147483647, %v2559_v1 }
 0x48b   :  { %v2563_v30 = vmul.f32 %v4327_v52, %v2559_v1  ;;  %vm2568_vm0 = vweird.f32 %v4327_v52  ;;  %v2589_v7 = vor.u32 1.1754944e-38, %v2588_v17  ;;  %vm2587_vm7 = vcmp.eq.f32.partialorder %v2586_v57, 8.507059e+37  ;;  %v2544_v57 = vld [vmem:[#allocation8 + $0x70] sm:$0xff] }
 0x48c   :  { %4330 = vrcp.f32 %v8555_v16  ;;  %vm8559_vm2 = vmor %vm2567_vm1, %vm2568_vm0  ;;  %vm2572_vm5 = vcmp.eq.f32.partialorder %v2571_v47, 8.507059e+37  ;;  %vm2597_vm9 = vweird.f32 %v8555_v16 }
 0x48d   :  { %v2564_v61 = vsub.f32 1.0, %v2563_v30  ;;  %4332 = vtanh.f32 %v2540_v45 }
 0x48f   :  { %v2565_v55 = vmul.f32 %v4327_v52, %v2564_v61  ;;  %v4329_v39 = vpop.eup %4328 }
 0x490   :  { %v2578_v37 = vmul.f32 %v4329_v39, %v2560_v49  ;;  %vm2583_vm3 = vweird.f32 %v4329_v39 }
 0x491   :  { %v2566_v59 = vadd.f32 %v4327_v52, %v2565_v55  ;;  %vm2584_vm6 = vmor %vm2582_vm4, %vm2583_vm3 }
 0x492   :  { %v4331_v56 = vpop.eup %4330  ;;  %v2579_v8 = vsub.f32 1.0, %v2578_v37  ;;  %v2574_v37 = vor.u32 1.1754944e-38, %v2573_v28  ;;  %v2543_v28 = vld [vmem:[#allocation8 + $0x68] sm:$0xff] }
 0x493   :  { %v2593_v40 = vmul.f32 %v4331_v56, %v8555_v16  ;;  %v2570_v30 = vsel %vm8559_vm2, %v4327_v52, %v2566_v59  ;;  %v2429_v52 = vpop.f32.mrf.mxu2  ;;  %vm2598_vm8 = vweird.f32 %v4331_v56 }
 0x494   :  { %v2580_v53 = vmul.f32 %v4329_v39, %v2579_v8  ;;  %v2575_v5 = vsel %vm2572_vm5, %v2574_v37, %v2570_v30  ;;  %v4333_v8 = vpop.eup %4332  ;;  %vm2599_vm10 = vmor %vm2597_vm9, %vm2598_vm8 }
 0x495   :  { %v2409_v61 = vpop.f32.mrf.mxu1  ;;  %v2594_v55 = vsub.f32 1.0, %v2593_v40  ;;  %v2609_v11 = vmul.f32 %v4333_v8, %v2575_v5  ;;  %v11549_v8 = vld [vmem:[#allocation172_spill] sm:$0xff] }
 0x496   :  { %v2410_v31 = vadd.f32 %v2409_v61, %v2389_v27  ;;  %v2581_v1 = vadd.f32 %v4329_v39, %v2580_v53  ;;  %v11546_v61 = vld [vmem:[#allocation169_spill] sm:$0xff] }
 0x497   :  { %v2595_v3 = vmul.f32 %v4331_v56, %v2594_v55 }
 0x498   :  { %v2546_v26 = vadd.f32 %v2542_v25, %v2410_v31  ;;  %v2585_v45 = vsel %vm2584_vm6, %v4329_v39, %v2581_v1  ;;  %v2603_v31 = vand.u32 2147483648, %v8555_v16  ;;  %v11547_v25 = vld [vmem:[#allocation170_spill] sm:$0xff]  ;;  %v11548_v1 = vld [vmem:[#allocation171_spill] sm:$0xff] }
 0x499   :  { %v2590_v2 = vsel %vm2587_vm7, %v2589_v7, %v2585_v45  ;;  %v2596_v47 = vadd.f32 %v4331_v56, %v2595_v3 }
 0x49a   :  { %v4159_v38 = vmul.f32 -1.442695, %v2546_v26  ;;  %v2608_v59 = vmul.f32 %v2590_v2, %v8046_v21  ;;  %v2601_v26 = vand.u32 2147483647, %v8555_v16  ;;  %v2604_v5 = vor.u32 1.1754944e-38, %v2603_v31  ;;  %v11552_v31 = vld [vmem:[#allocation175_spill] sm:$0xff] }
 0x49b   :  { %v2449_v40 = vpop.f32.mrf.mxu3  ;;  %v2600_v21 = vsel %vm2599_vm10, %v4331_v56, %v2596_v47 }
 0x49c   :  { %v2450_v27 = vadd.f32 %v2449_v40, %v2429_v52  ;;  %v8566_v49 = vadd.f32 %v2609_v11, %v2608_v59  ;;  %4334 = vpow2.f32 %v4159_v38  ;;  %vm2602_vm11 = vcmp.eq.f32.partialorder %v2601_v26, 8.507059e+37  ;;  %v11550_v38 = vld [vmem:[#allocation173_spill] sm:$0xff]  ;;  %v2509_v59 = vpop.f32.mrf.mxu2 }
 0x49d   :  { %v2605_v39 = vsel %vm2602_vm11, %v2604_v5, %v2600_v21 }
 0x49e   :  { %v2547_v17 = vadd.f32 %v2543_v28, %v2450_v27  ;;  %4336 = vtanh.f32 %v8566_v49  ;;  %v2545_v27 = vld [vmem:[#allocation8 + $0x78] sm:$0xff] }
 0x4a0   :  { %v4160_v7 = vmul.f32 -1.442695, %v2547_v17  ;;  %v11551_v17 = vld [vmem:[#allocation174_spill] sm:$0xff] }
 0x4a2   :  { %4338 = vpow2.f32 %v4160_v7  ;;  %v4335_v2 = vpop.eup %4334  ;;  %v11554_v7 = vld [vmem:[#allocation177_spill] sm:$0xff] }
 0x4a3   :  { %v8574_v53 = vadd.f32 1.0, %v4335_v2 }
 0x4a4   :  { %v4337_v11 = vpop.eup %4336 }
 0x4a5   :  { %v8572_v3 = vmul.f32 %v4337_v11, %v2605_v39  ;;  %4340 = vrcp.f32 %v8574_v53  ;;  %v11555_v11 = vld [vmem:[#allocation178_spill] sm:$0xff]  ;;  %v11556_v39 = vld [vmem:[#allocation179_spill] sm:$0xff]  ;;  %vm2630_vm14 = vweird.f32 %v8574_v53 }
 0x4a7   :  { %2677 = vst [vmem:[#allocation11 + $0x20] sm:$0xff] %v8572_v3  ;;  %2696 = vmatmul.f32.vlgmr.msra.gmra.mxu0 %v8572_v3  ;;  %2736 = vmatmul.f32.vlgmr.msra.gmra.mxu2 %v8572_v3 }
 0x4a8   :  { %v4339_v30 = vpop.eup %4338  ;;  %2840 = vmatpush.msra.mxu0 %v8061_v50  ;;  %2880 = vmatpush.msra.mxu2 %v8064_v24  ;;  %v11543_v24 = vld [vmem:[#allocation166_spill] sm:$0xff] }
 0x4a9   :  { %v8579_v16 = vadd.f32 1.0, %v4339_v30 }
 0x4aa   :  { %2841 = vmatpush.msra.mxu0 %v8069_v10  ;;  %2881 = vmatpush.msra.mxu2 %v8072_v48 }
 0x4ab   :  { %4342 = vrcp.f32 %v8579_v16  ;;  %v8591_v56 = vpop.eup %4340  ;;  %v2651_v30 = vand.u32 2147483648, %v8579_v16  ;;  %vm2645_vm15 = vweird.f32 %v8579_v16 }
 0x4ac   :  { %2842 = vmatpush.msra.mxu0 %v8075_v42  ;;  %2882 = vmatpush.msra.mxu2 %v8078_v43  ;;  %v2626_v10 = vmul.f32 %v8591_v56, %v8574_v53  ;;  %v11544_v42 = vld [vmem:[#allocation167_spill] sm:$0xff]  ;;  %v11545_v43 = vld [vmem:[#allocation168_spill] sm:$0xff]  ;;  %vm2631_vm12 = vweird.f32 %v8591_v56 }
 0x4ad   :  { %vm8627_vm0 = vmor %vm2630_vm14, %vm2631_vm12 }
 0x4ae   :  { %2843 = vmatpush.msra.mxu0 %v8081_v22  ;;  %2883 = vmatpush.msra.mxu2 %v8084_v23  ;;  %v2469_v22 = vpop.f32.mrf.mxu0  ;;  %v2627_v55 = vsub.f32 1.0, %v2626_v10  ;;  %v8731_v10 = vld [vmem:[#allocation10 + $0x668] sm:$0xff] }
 0x4af   :  { %2776 = vmatmul.f32.vlgmr.msrb.gmra.mxu0 %v8572_v3  ;;  %2816 = vmatmul.f32.vlgmr.msrb.gmra.mxu2 %v8572_v3 }
 0x4b0   :  { %2844 = vmatpush.msra.mxu0 %v8093_v36  ;;  %2884 = vmatpush.msra.mxu2 %v11543_v24  ;;  %v2628_v47 = vmul.f32 %v8591_v56, %v2627_v55  ;;  %v2636_v24 = vand.u32 2147483648, %v8574_v53 }
 0x4b1   :  { %v8595_v50 = vpop.eup %4342 }
 0x4b2   :  { %v2641_v48 = vmul.f32 %v8595_v50, %v8579_v16  ;;  %2845 = vmatpush.msra.mxu0 %v11544_v42  ;;  %2885 = vmatpush.msra.mxu2 %v11545_v43  ;;  %vm2646_vm13 = vweird.f32 %v8595_v50  ;;  %v2629_v2 = vadd.f32 %v8591_v56, %v2628_v47  ;;  %v2649_v42 = vand.u32 2147483647, %v8579_v16  ;;  %v11559_v43 = vld [vmem:[#allocation180_spill] sm:$0xff]  ;;  %v11571_v47 = vld [vmem:[#allocation190_spill] sm:$0xff] }
 0x4b3   :  { %vm8637_vm1 = vmor %vm2645_vm15, %vm2646_vm13  ;;  %v2652_v16 = vor.u32 1.1754944e-38, %v2651_v30 }
 0x4b4   :  { %2846 = vmatpush.msra.mxu0 %v11546_v61  ;;  %2886 = vmatpush.msra.mxu2 %v11547_v25  ;;  %v2642_v37 = vsub.f32 1.0, %v2641_v48  ;;  %v2634_v48 = vand.u32 2147483647, %v8574_v53  ;;  %v2633_v25 = vsel %vm8627_vm0, %v8591_v56, %v2629_v2  ;;  %vm2650_vm3 = vcmp.eq.f32.partialorder %v2649_v42, 8.507059e+37  ;;  %v11574_v2 = vld [vmem:[#allocation193_spill] sm:$0xff]  ;;  %v8754_v42 = vld [vmem:[#allocation10 + $0x5a0] sm:$0xff] }
 0x4b5   :  { %v2489_v23 = vpop.f32.mrf.mxu1 }
 0x4b6   :  { %v2490_v36 = vadd.f32 %v2489_v23, %v2469_v22  ;;  %2847 = vmatpush.msra.mxu0 %v11548_v1  ;;  %2887 = vmatpush.msra.mxu2 %v8118_v44  ;;  %v2643_v40 = vmul.f32 %v8595_v50, %v2642_v37  ;;  %v11553_v44 = vld [vmem:[#allocation176_spill] sm:$0xff]  ;;  %v11560_v22 = vld [vmem:[#allocation181_spill] sm:$0xff]  ;;  %vm2635_vm2 = vcmp.eq.f32.partialorder %v2634_v48, 8.507059e+37  ;;  %v8747_v48 = vld [vmem:[#allocation10 + $0x5e8] sm:$0xff] }
 0x4b8   :  { %v2548_v45 = vadd.f32 %v2544_v57, %v2490_v36  ;;  %2848 = vmatpush.msra.mxu0 %v11549_v8  ;;  %2888 = vmatpush.msra.mxu2 %v11550_v38  ;;  %v2644_v5 = vadd.f32 %v8595_v50, %v2643_v40  ;;  %v2637_v36 = vor.u32 1.1754944e-38, %v2636_v24  ;;  %v11566_v8 = vld [vmem:[#allocation184_spill] sm:$0xff]  ;;  %v11567_v38 = vld [vmem:[#allocation186_spill] sm:$0xff]  ;;  %v11570_v40 = vld [vmem:[#allocation189_spill] sm:$0xff] }
 0x4b9   :  { %v8728_v24 = vld [vmem:[#allocation10 + $0x660] sm:$0xff]  ;;  %v8765_v57 = vld [vmem:[#allocation10 + $0x568] sm:$0xff] }
 0x4ba   :  { %v4161_v52 = vmul.f32 -1.442695, %v2548_v45  ;;  %2849 = vmatpush.msra.mxu0 %v11551_v17  ;;  %2889 = vmatpush.msra.mxu2 %v11552_v31  ;;  %v2648_v53 = vsel %vm8637_vm1, %v8595_v50, %v2644_v5  ;;  %v2638_v37 = vsel %vm2635_vm2, %v2637_v36, %v2633_v25  ;;  %v11563_v50 = vld [vmem:[#allocation182_spill] sm:$0xff]  ;;  %v11565_v45 = vld [vmem:[#allocation183_spill] sm:$0xff] }
 0x4bb   :  { %v2529_v28 = vpop.f32.mrf.mxu3  ;;  %v2653_v56 = vsel %vm2650_vm3, %v2652_v16, %v2648_v53  ;;  %v11572_v17 = vld [vmem:[#allocation191_spill] sm:$0xff]  ;;  %v8770_v25 = vld [vmem:[#allocation10 + $0x520] sm:$0xff] }
 0x4bc   :  { %4344 = vpow2.f32 %v4161_v52  ;;  %v2530_v26 = vadd.f32 %v2529_v28, %v2509_v59  ;;  %2850 = vmatpush.msra.mxu0 %v11553_v44  ;;  %2890 = vmatpush.msra.mxu2 %v11554_v7  ;;  %v11568_v52 = vld [vmem:[#allocation187_spill] sm:$0xff]  ;;  %v11569_v59 = vld [vmem:[#allocation188_spill] sm:$0xff]  ;;  %v11583_v36 = vld [vmem:[#allocation38_spill] sm:$0xff] }
 0x4bd   :  { %v11573_v44 = vld [vmem:[#allocation192_spill] sm:$0xff]  ;;  %v8773_v53 = vld [vmem:[#allocation10 + $0x528] sm:$0xff] }
 0x4be   :  { %v2549_v21 = vadd.f32 %v2545_v27, %v2530_v26  ;;  %2851 = vmatpush.msra.mxu0 %v11555_v11  ;;  %2891 = vmatpush.msra.mxu2 %v11556_v39  ;;  %v11582_v16 = vld [vmem:[#allocation43_spill] sm:$0xff] }
 0x4c0   :  { %4346 = vtanh.f32 %v2549_v21  ;;  %2852 = vmatpush.msra.mxu0 %v11559_v43  ;;  %2892 = vmatpush.msra.mxu2 %v11560_v22  ;;  %v11578_v43 = vld [vmem:[#allocation197_spill] sm:$0xff]  ;;  %v11579_v22 = vld [vmem:[#allocation198_spill] sm:$0xff] }
 0x4c2   :  { %v4345_v23 = vpop.eup %4344  ;;  %2853 = vmatpush.msra.mxu0 %v8181_v14  ;;  %2893 = vmatpush.msra.mxu2 %v8184_v63  ;;  %v11564_v63 = vld [vmem:[#allocation185_spill] sm:$0xff] }
 0x4c3   :  { %v2624_v61 = vadd.f32 1.0, %v4345_v23  ;;  %v2671_v14 = vmul.f32 %v2653_v56, %v11564_v63  ;;  %v8762_v23 = vld [vmem:[#allocation10 + $0x560] sm:$0xff]  ;;  %v8789_v63 = vld [vmem:[#allocation10 + $0x4a8] sm:$0xff] }
 0x4c4   :  { %2854 = vmatpush.msra.mxu0 %v8188_v51  ;;  %2894 = vmatpush.msra.mxu2 %v8191_v33  ;;  %v11584_v56 = vld [vmem:[#allocation18_spill] sm:$0xff] }
 0x4c5   :  { %4348 = vrcp.f32 %v2624_v61  ;;  %v2666_v27 = vand.u32 2147483648, %v2624_v61  ;;  %v2664_v26 = vand.u32 2147483647, %v2624_v61  ;;  %vm2660_vm5 = vweird.f32 %v2624_v61 }
 0x4c6   :  { %v4347_v55 = vpop.eup %4346  ;;  %2855 = vmatpush.msra.mxu0 %v8194_v62  ;;  %2895 = vmatpush.msra.mxu2 %v11563_v50  ;;  %v8786_v50 = vld [vmem:[#allocation10 + $0x4a0] sm:$0xff] }
 0x4c7   :  { %v2672_v1 = vmul.f32 %v4347_v55, %v2638_v37  ;;  %2856 = vmatmul.f32.vlgmr.msra.gmra.mxu0 %v8572_v3  ;;  %2896 = vmatmul.f32.vlgmr.msra.gmra.mxu2 %v8572_v3  ;;  %v2667_v21 = vor.u32 1.1754944e-38, %v2666_v27  ;;  %vm2665_vm7 = vcmp.eq.f32.partialorder %v2664_v26, 8.507059e+37  ;;  %v8778_v55 = vld [vmem:[#allocation10 + $0x4e0] sm:$0xff]  ;;  %v8781_v37 = vld [vmem:[#allocation10 + $0x4e8] sm:$0xff] }
 0x4c8   :  { %2920 = vmatpush.msrb.mxu0 %v11565_v45  ;;  %2960 = vmatpush.msrb.mxu2 %v11566_v8  ;;  %v11587_v45 = vld [vmem:[#allocation42_spill] sm:$0xff] }
 0x4c9   :  { %v8658_v33 = vadd.f32 %v2672_v1, %v2671_v14  ;;  %v11585_v1 = vld [vmem:[#allocation21_spill] sm:$0xff]  ;;  %v11586_v14 = vld [vmem:[#allocation47_spill] sm:$0xff]  ;;  %v8794_v8 = vld [vmem:[#allocation10 + $0x460] sm:$0xff] }
 0x4ca   :  { %2921 = vmatpush.msrb.mxu0 %v11567_v38  ;;  %2961 = vmatpush.msrb.mxu2 %v11568_v52  ;;  %v11588_v38 = vld [vmem:[#allocation23_spill] sm:$0xff]  ;;  %v8818_v27 = vld [vmem:[#allocation10 + $0x240] sm:$0xff] }
 0x4cb   :  { %v4349_v51 = vpop.eup %4348  ;;  %4350 = vtanh.f32 %v8658_v33  ;;  %v8801_v52 = vld [vmem:[#allocation10 + $0x288] sm:$0xff]  ;;  %11591 = vst [vmem:[#allocation63_spill] sm:$0xff] %v8818_v27  ;;  %v8830_v26 = vld [vmem:[#allocation10 + $0x200] sm:$0xff] }
 0x4cc   :  { %v2656_v62 = vmul.f32 %v4349_v51, %v2624_v61  ;;  %2922 = vmatpush.msrb.mxu0 %v11569_v59  ;;  %2962 = vmatpush.msrb.mxu2 %v11570_v40  ;;  %vm2661_vm4 = vweird.f32 %v4349_v51  ;;  %v11581_v61 = vld [vmem:[#allocation41_spill] sm:$0xff]  ;;  %v8807_v59 = vld [vmem:[#allocation10 + $0x428] sm:$0xff]  ;;  %v8812_v40 = vld [vmem:[#allocation10 + $0x7f0] sm:$0xff]  ;;  %11595 = vst [vmem:[#allocation67_spill] sm:$0xff] %v8830_v26 }
 0x4cd   :  { %vm2662_vm6 = vmor %vm2660_vm5, %vm2661_vm4  ;;  %11589 = vst [vmem:[#allocation24_spill] sm:$0xff] %v8812_v40 }
 0x4ce   :  { %v2657_v28 = vsub.f32 1.0, %v2656_v62  ;;  %2923 = vmatpush.msrb.mxu0 %v11571_v47  ;;  %2963 = vmatpush.msrb.mxu2 %v11572_v17  ;;  %v8804_v62 = vld [vmem:[#allocation10 + $0x420] sm:$0xff]  ;;  %v8821_v47 = vld [vmem:[#allocation10 + $0x248] sm:$0xff]  ;;  %v8824_v17 = vld [vmem:[#allocation10 + $0x7b0] sm:$0xff] }
 0x4cf   :  { %11592 = vst [vmem:[#allocation58_spill] sm:$0xff] %v8821_v47 }
 0x4d0   :  { %v2658_v31 = vmul.f32 %v4349_v51, %v2657_v28  ;;  %2924 = vmatpush.msrb.mxu0 %v11573_v44  ;;  %2964 = vmatpush.msrb.mxu2 %v8236_v34  ;;  %v8680_v34 = vld [vmem:[#allocation10 + $0x7e0] sm:$0xff]  ;;  %v8815_v28 = vld [vmem:[#allocation10 + $0x7f8] sm:$0xff]  ;;  %11593 = vst [vmem:[#allocation31_spill] sm:$0xff] %v8824_v17  ;;  %v8833_v44 = vld [vmem:[#allocation10 + $0x208] sm:$0xff] }
 0x4d1   :  { %v4351_v11 = vpop.eup %4350  ;;  %11590 = vst [vmem:[#allocation29_spill] sm:$0xff] %v8815_v28 }
 0x4d2   :  { %v2659_v7 = vadd.f32 %v4349_v51, %v2658_v31  ;;  %2925 = vmatpush.msrb.mxu0 %v11574_v2  ;;  %2965 = vmatpush.msrb.mxu2 %v8243_v54  ;;  %v8683_v54 = vld [vmem:[#allocation10 + $0x7e8] sm:$0xff]  ;;  %v8827_v31 = vld [vmem:[#allocation10 + $0x7b8] sm:$0xff]  ;;  %11596 = vst [vmem:[#allocation62_spill] sm:$0xff] %v8833_v44  ;;  %v8842_v2 = vld [vmem:[#allocation10 + $0x1c0] sm:$0xff] }
 0x4d3   :  { %11594 = vst [vmem:[#allocation26_spill] sm:$0xff] %v8827_v31 }
 0x4d4   :  { %v2663_v5 = vsel %vm2662_vm6, %v4349_v51, %v2659_v7  ;;  %2926 = vmatpush.msrb.mxu0 %v8246_v12  ;;  %2966 = vmatpush.msrb.mxu2 %v8249_v29  ;;  %v8688_v12 = vld [vmem:[#allocation10 + $0x7a0] sm:$0xff]  ;;  %v8797_v51 = vld [vmem:[#allocation10 + $0x468] sm:$0xff]  ;;  %v8836_v7 = vld [vmem:[#allocation10 + $0x770] sm:$0xff]  ;;  %11599 = vst [vmem:[#allocation71_spill] sm:$0xff] %v8842_v2 }
 0x4d5   :  { %v2668_v39 = vsel %vm2665_vm7, %v2667_v21, %v2663_v5  ;;  %v8696_v29 = vld [vmem:[#allocation10 + $0x760] sm:$0xff]  ;;  %11597 = vst [vmem:[#allocation28_spill] sm:$0xff] %v8836_v7  ;;  %v8839_v21 = vld [vmem:[#allocation10 + $0x778] sm:$0xff]  ;;  %v8845_v5 = vld [vmem:[#allocation10 + $0x1c8] sm:$0xff] }
 0x4d6   :  { %v8673_v30 = vmul.f32 %v4351_v11, %v2668_v39  ;;  %2927 = vmatpush.msrb.mxu0 %v8254_v58  ;;  %2967 = vmatpush.msrb.mxu2 %v8257_v4  ;;  %v8691_v4 = vld [vmem:[#allocation10 + $0x7a8] sm:$0xff]  ;;  %11598 = vst [vmem:[#allocation33_spill] sm:$0xff] %v8839_v21  ;;  %v8848_v11 = vld [vmem:[#allocation10 + $0x730] sm:$0xff]  ;;  %v8851_v39 = vld [vmem:[#allocation10 + $0x738] sm:$0xff] }
 0x4d7   :  { %v8699_v58 = vld [vmem:[#allocation10 + $0x768] sm:$0xff]  ;;  %11600 = vst [vmem:[#allocation66_spill] sm:$0xff] %v8845_v5 }
 0x4d8   :  { %2679 = vst [vmem:[#allocation12 + $0x18] sm:$0xff] %v8673_v30  ;;  %2716 = vmatmul.f32.vlgmr.msra.gmra.mxu1 %v8673_v30  ;;  %2756 = vmatmul.f32.vlgmr.msra.gmra.mxu3 %v8673_v30 }
 0x4d9   :  { %2860 = vmatpush.msra.mxu1 %v8680_v34  ;;  %2900 = vmatpush.msra.mxu3 %v8683_v54  ;;  %11601 = vst [vmem:[#allocation35_spill] sm:$0xff] %v8848_v11 }
 0x4da   :  { %2928 = vmatpush.msrb.mxu0 %v8265_v35  ;;  %2968 = vmatpush.msrb.mxu2 %v8268_v13  ;;  %v8704_v35 = vld [vmem:[#allocation10 + $0x720] sm:$0xff]  ;;  %v8707_v13 = vld [vmem:[#allocation10 + $0x728] sm:$0xff]  ;;  %11602 = vst [vmem:[#allocation30_spill] sm:$0xff] %v8851_v39 }
 0x4db   :  { %2861 = vmatpush.msra.mxu1 %v8688_v12  ;;  %2901 = vmatpush.msra.mxu3 %v8691_v4 }
 0x4dc   :  { %2929 = vmatpush.msrb.mxu0 %v8273_v6  ;;  %2969 = vmatpush.msrb.mxu2 %v8276_v60  ;;  %v8712_v6 = vld [vmem:[#allocation10 + $0x6e0] sm:$0xff]  ;;  %v8715_v60 = vld [vmem:[#allocation10 + $0x6e8] sm:$0xff] }
 0x4dd   :  { %2862 = vmatpush.msra.mxu1 %v8696_v29  ;;  %2902 = vmatpush.msra.mxu3 %v8699_v58 }
 0x4de   :  { %2930 = vmatpush.msrb.mxu0 %v8281_v18  ;;  %2970 = vmatpush.msrb.mxu2 %v8284_v19  ;;  %v8720_v18 = vld [vmem:[#allocation10 + $0x6a0] sm:$0xff]  ;;  %v8723_v19 = vld [vmem:[#allocation10 + $0x6a8] sm:$0xff] }
 0x4df   :  { %2863 = vmatpush.msra.mxu1 %v8704_v35  ;;  %2903 = vmatpush.msra.mxu3 %v8707_v13 }
 0x4e0   :  { %2796 = vmatmul.f32.vlgmr.msrb.gmra.mxu1 %v8673_v30  ;;  %2836 = vmatmul.f32.vlgmr.msrb.gmra.mxu3 %v8673_v30 }
 0x4e1   :  { %2864 = vmatpush.msra.mxu1 %v8712_v6  ;;  %2904 = vmatpush.msra.mxu3 %v8715_v60 }
 0x4e2   :  { %2931 = vmatpush.msrb.mxu0 %v8293_v0  ;;  %2971 = vmatpush.msrb.mxu2 %v8296_v41  ;;  %v8736_v0 = vld [vmem:[#allocation10 + $0x620] sm:$0xff]  ;;  %v8739_v41 = vld [vmem:[#allocation10 + $0x628] sm:$0xff] }
 0x4e3   :  { %2865 = vmatpush.msra.mxu1 %v8720_v18  ;;  %2905 = vmatpush.msra.mxu3 %v8723_v19 }
 0x4e4   :  { %2932 = vmatpush.msrb.mxu0 %v8301_v46  ;;  %2972 = vmatpush.msrb.mxu2 %v8304_v32  ;;  %v11575_v46 = vld [vmem:[#allocation194_spill] sm:$0xff] }
 0x4e5   :  { %2866 = vmatpush.msra.mxu1 %v8728_v24  ;;  %2906 = vmatpush.msra.mxu3 %v8731_v10  ;;  %v8744_v32 = vld [vmem:[#allocation10 + $0x5e0] sm:$0xff] }
 0x4e6   :  { %2933 = vmatpush.msrb.mxu0 %v8309_v15  ;;  %2973 = vmatpush.msrb.mxu2 %v8312_v20  ;;  %v11576_v15 = vld [vmem:[#allocation195_spill] sm:$0xff]  ;;  %v11577_v20 = vld [vmem:[#allocation196_spill] sm:$0xff] }
 0x4e7   :  { %2867 = vmatpush.msra.mxu1 %v8736_v0  ;;  %2907 = vmatpush.msra.mxu3 %v8739_v41 }
 0x4e8   :  { %2934 = vmatpush.msrb.mxu0 %v8317_v9  ;;  %2974 = vmatpush.msrb.mxu2 %v11575_v46  ;;  %v8757_v9 = vld [vmem:[#allocation10 + $0x5a8] sm:$0xff]  ;;  %v8854_v46 = vld [vmem:[#allocation10 + $0x180] sm:$0xff] }
 0x4e9   :  { %2868 = vmatpush.msra.mxu1 %v8744_v32  ;;  %2908 = vmatpush.msra.mxu3 %v8747_v48  ;;  %11603 = vst [vmem:[#allocation72_spill] sm:$0xff] %v8854_v46 }
 0x4ea   :  { %2935 = vmatpush.msrb.mxu0 %v11576_v15  ;;  %2975 = vmatpush.msrb.mxu2 %v11577_v20  ;;  %v8857_v15 = vld [vmem:[#allocation10 + $0x188] sm:$0xff]  ;;  %v8860_v20 = vld [vmem:[#allocation10 + $0x6f0] sm:$0xff] }
 0x4eb   :  { %2936 = vmatmul.f32.vlgmr.msrb.gmra.mxu0 %v8572_v3  ;;  %2976 = vmatmul.f32.vlgmr.msrb.gmra.mxu2 %v8572_v3  ;;  %v11580_v3 = vld [vmem:[#allocation36_spill] sm:$0xff]  ;;  %11604 = vst [vmem:[#allocation73_spill] sm:$0xff] %v8857_v15 }
 0x4ec   :  { %2869 = vmatpush.msra.mxu1 %v8754_v42  ;;  %2909 = vmatpush.msra.mxu3 %v8757_v9  ;;  %11605 = vst [vmem:[#allocation32_spill] sm:$0xff] %v8860_v20 }
 0x4ed   :  { %3148 = vmatpush.msra.mxu0 %v11578_v43  ;;  %3188 = vmatpush.msra.mxu2 %v11579_v22  ;;  %v8863_v43 = vld [vmem:[#allocation10 + $0x6f8] sm:$0xff]  ;;  %v8866_v22 = vld [vmem:[#allocation10 + $0x140] sm:$0xff] }
 0x4ee   :  { %2870 = vmatpush.msra.mxu1 %v8762_v23  ;;  %2910 = vmatpush.msra.mxu3 %v8765_v57  ;;  %11606 = vst [vmem:[#allocation37_spill] sm:$0xff] %v8863_v43 }
 0x4ef   :  { %3149 = vmatpush.msra.mxu0 %v11580_v3  ;;  %3189 = vmatpush.msra.mxu2 %v11581_v61  ;;  %11607 = vst [vmem:[#allocation76_spill] sm:$0xff] %v8866_v22  ;;  %v8869_v3 = vld [vmem:[#allocation10 + $0x148] sm:$0xff]  ;;  %v8872_v61 = vld [vmem:[#allocation10 + $0x6b0] sm:$0xff] }
 0x4f0   :  { %2871 = vmatpush.msra.mxu1 %v8770_v25  ;;  %2911 = vmatpush.msra.mxu3 %v8773_v53  ;;  %11608 = vst [vmem:[#allocation77_spill] sm:$0xff] %v8869_v3 }
 0x4f1   :  { %3150 = vmatpush.msra.mxu0 %v11582_v16  ;;  %3190 = vmatpush.msra.mxu2 %v11583_v36  ;;  %11609 = vst [vmem:[#allocation39_spill] sm:$0xff] %v8872_v61  ;;  %v8875_v16 = vld [vmem:[#allocation10 + $0x6b8] sm:$0xff]  ;;  %v8878_v36 = vld [vmem:[#allocation10 + $0x100] sm:$0xff] }
 0x4f2   :  { %2872 = vmatpush.msra.mxu1 %v8778_v55  ;;  %2912 = vmatpush.msra.mxu3 %v8781_v37  ;;  %11610 = vst [vmem:[#allocation34_spill] sm:$0xff] %v8875_v16 }
 0x4f3   :  { %3151 = vmatpush.msra.mxu0 %v11584_v56  ;;  %3191 = vmatpush.msra.mxu2 %v11585_v1  ;;  %11611 = vst [vmem:[#allocation80_spill] sm:$0xff] %v8878_v36  ;;  %v8881_v56 = vld [vmem:[#allocation10 + $0x108] sm:$0xff]  ;;  %v8884_v1 = vld [vmem:[#allocation10 + $0x670] sm:$0xff] }
 0x4f4   :  { %2873 = vmatpush.msra.mxu1 %v8786_v50  ;;  %2913 = vmatpush.msra.mxu3 %v8789_v63  ;;  %11612 = vst [vmem:[#allocation81_spill] sm:$0xff] %v8881_v56 }
 0x4f5   :  { %3152 = vmatpush.msra.mxu0 %v11586_v14  ;;  %3192 = vmatpush.msra.mxu2 %v11587_v45  ;;  %11613 = vst [vmem:[#allocation40_spill] sm:$0xff] %v8884_v1  ;;  %v8887_v14 = vld [vmem:[#allocation10 + $0x678] sm:$0xff]  ;;  %v8890_v45 = vld [vmem:[#allocation10 + $0xc0] sm:$0xff] }
 0x4f6   :  { %2874 = vmatpush.msra.mxu1 %v8794_v8  ;;  %2914 = vmatpush.msra.mxu3 %v8797_v51  ;;  %11614 = vst [vmem:[#allocation45_spill] sm:$0xff] %v8887_v14 }
 0x4f7   :  { %3153 = vmatpush.msra.mxu0 %v11588_v38  ;;  %3193 = vmatpush.msra.mxu2 %v8801_v52  ;;  %11615 = vst [vmem:[#allocation84_spill] sm:$0xff] %v8890_v45  ;;  %v8893_v38 = vld [vmem:[#allocation10 + $0xc8] sm:$0xff] }
 0x4f8   :  { %2875 = vmatpush.msra.mxu1 %v8804_v62  ;;  %2915 = vmatpush.msra.mxu3 %v8807_v59  ;;  %11616 = vst [vmem:[#allocation85_spill] sm:$0xff] %v8893_v38 }
 0x4f9   :  { %2876 = vmatmul.f32.vlgmr.msra.gmra.mxu1 %v8673_v30  ;;  %2916 = vmatmul.f32.vlgmr.msra.gmra.mxu3 %v8673_v30 }
 0x4fa   :  { %2940 = vmatpush.msrb.mxu1 %v8812_v40  ;;  %2980 = vmatpush.msrb.mxu3 %v8815_v28 }
 0x4fb   :  { %3154 = vmatpush.msra.mxu0 %v8818_v27  ;;  %3194 = vmatpush.msra.mxu2 %v8821_v47 }
 0x4fc   :  { %2941 = vmatpush.msrb.mxu1 %v8824_v17  ;;  %2981 = vmatpush.msrb.mxu3 %v8827_v31 }
 0x4fd   :  { %3155 = vmatpush.msra.mxu0 %v8830_v26  ;;  %3195 = vmatpush.msra.mxu2 %v8833_v44 }
 0x4fe   :  { %2942 = vmatpush.msrb.mxu1 %v8836_v7  ;;  %2982 = vmatpush.msrb.mxu3 %v8839_v21 }
 0x4ff   :  { %3156 = vmatpush.msra.mxu0 %v8842_v2  ;;  %3196 = vmatpush.msra.mxu2 %v8845_v5 }
 0x500   :  { %2943 = vmatpush.msrb.mxu1 %v8848_v11  ;;  %2983 = vmatpush.msrb.mxu3 %v8851_v39 }
 0x501   :  { %3157 = vmatpush.msra.mxu0 %v8854_v46  ;;  %3197 = vmatpush.msra.mxu2 %v8857_v15  ;;  %v3003_v15 = vld [vmem:[#allocation5 + $0xb0] sm:$0xff] }
 0x502   :  { %2944 = vmatpush.msrb.mxu1 %v8860_v20  ;;  %2984 = vmatpush.msrb.mxu3 %v8863_v43 }
 0x503   :  { %3158 = vmatpush.msra.mxu0 %v8866_v22  ;;  %3198 = vmatpush.msra.mxu2 %v8869_v3  ;;  %v9230_v3 = vld [vmem:[#allocation10 + $0x410] sm:$0xff] }
 0x504   :  { %2945 = vmatpush.msrb.mxu1 %v8872_v61  ;;  %2985 = vmatpush.msrb.mxu3 %v8875_v16  ;;  %v11658_v16 = vld [vmem:[#allocation20_spill] sm:$0xff]  ;;  %11735 = vst [vmem:[#allocation173_spill] sm:$0xff] %v9230_v3 }
 0x505   :  { %3159 = vmatpush.msra.mxu0 %v8878_v36  ;;  %3199 = vmatpush.msra.mxu2 %v8881_v56  ;;  %v8896_v36 = vld [vmem:[#allocation10 + $0x630] sm:$0xff]  ;;  %v8899_v56 = vld [vmem:[#allocation10 + $0x638] sm:$0xff] }
 0x506   :  { %2946 = vmatpush.msrb.mxu1 %v8884_v1  ;;  %2986 = vmatpush.msrb.mxu3 %v8887_v14  ;;  %11617 = vst [vmem:[#allocation44_spill] sm:$0xff] %v8896_v36  ;;  %v8902_v1 = vld [vmem:[#allocation10 + $0x80] sm:$0xff]  ;;  %v8905_v14 = vld [vmem:[#allocation10 + $0x88] sm:$0xff]  ;;  %v9224_v61 = vld [vmem:[#allocation10 + $0x450] sm:$0xff] }
 0x507   :  { %3160 = vmatpush.msra.mxu0 %v8890_v45  ;;  %3200 = vmatpush.msra.mxu2 %v8893_v38  ;;  %11618 = vst [vmem:[#allocation49_spill] sm:$0xff] %v8899_v56  ;;  %v8908_v45 = vld [vmem:[#allocation10 + $0x5f0] sm:$0xff]  ;;  %v8911_v38 = vld [vmem:[#allocation10 + $0x5f8] sm:$0xff] }
 0x508   :  { %2947 = vmatpush.msrb.mxu1 %v8896_v36  ;;  %2987 = vmatpush.msrb.mxu3 %v8899_v56  ;;  %11619 = vst [vmem:[#allocation88_spill] sm:$0xff] %v8902_v1  ;;  %v8914_v36 = vld [vmem:[#allocation10 + $0x40] sm:$0xff]  ;;  %v8917_v56 = vld [vmem:[#allocation10 + $0x48] sm:$0xff] }
 0x509   :  { %3161 = vmatpush.msra.mxu0 %v8902_v1  ;;  %11620 = vst [vmem:[#allocation89_spill] sm:$0xff] %v8905_v14  ;;  %3201 = vmatpush.msra.mxu2 %v8905_v14  ;;  %v8920_v1 = vld [vmem:[#allocation10 + $0x5b0] sm:$0xff]  ;;  %v8923_v14 = vld [vmem:[#allocation10 + $0x5b8] sm:$0xff] }
 0x50a   :  { %11621 = vst [vmem:[#allocation48_spill] sm:$0xff] %v8908_v45  ;;  %2948 = vmatpush.msrb.mxu1 %v8908_v45  ;;  %2988 = vmatpush.msrb.mxu3 %v8911_v38  ;;  %v8926_v45 = vld [vmem:[#allocation10] sm:$0xff] }
 0x50b   :  { %11622 = vst [vmem:[#allocation53_spill] sm:$0xff] %v8911_v38  ;;  %3162 = vmatpush.msra.mxu0 %v8914_v36  ;;  %3202 = vmatpush.msra.mxu2 %v8917_v56  ;;  %v8929_v38 = vld [vmem:[#allocation10 + $0x8] sm:$0xff] }
 0x50c   :  { %11623 = vst [vmem:[#allocation92_spill] sm:$0xff] %v8914_v36  ;;  %2949 = vmatpush.msrb.mxu1 %v8920_v1  ;;  %2989 = vmatpush.msrb.mxu3 %v8923_v14  ;;  %v8932_v36 = vld [vmem:[#allocation10 + $0x570] sm:$0xff] }
 0x50d   :  { %11624 = vst [vmem:[#allocation93_spill] sm:$0xff] %v8917_v56  ;;  %3163 = vmatpush.msra.mxu0 %v8926_v45  ;;  %3203 = vmatpush.msra.mxu2 %v8929_v38  ;;  %v8935_v56 = vld [vmem:[#allocation10 + $0x578] sm:$0xff] }
 0x50e   :  { %11625 = vst [vmem:[#allocation52_spill] sm:$0xff] %v8920_v1  ;;  %2950 = vmatpush.msrb.mxu1 %v8932_v36  ;;  %2990 = vmatpush.msrb.mxu3 %v8935_v56  ;;  %v8938_v1 = vld [vmem:[#allocation10 + $0x3d0] sm:$0xff] }
 0x50f   :  { %11626 = vst [vmem:[#allocation57_spill] sm:$0xff] %v8923_v14  ;;  %3228 = vmatpush.msrb.mxu0 %v8938_v1  ;;  %v8941_v14 = vld [vmem:[#allocation10 + $0x3d8] sm:$0xff] }
 0x510   :  { %11627 = vst [vmem:[#allocation96_spill] sm:$0xff] %v8926_v45  ;;  %3268 = vmatpush.msrb.mxu2 %v8941_v14  ;;  %v8944_v45 = vld [vmem:[#allocation10 + $0x530] sm:$0xff] }
 0x511   :  { %11628 = vst [vmem:[#allocation97_spill] sm:$0xff] %v8929_v38  ;;  %2951 = vmatpush.msrb.mxu1 %v8944_v45  ;;  %v8947_v38 = vld [vmem:[#allocation10 + $0x538] sm:$0xff] }
 0x512   :  { %11629 = vst [vmem:[#allocation56_spill] sm:$0xff] %v8932_v36  ;;  %2991 = vmatpush.msrb.mxu3 %v8947_v38  ;;  %v8950_v36 = vld [vmem:[#allocation10 + $0x390] sm:$0xff] }
 0x513   :  { %11630 = vst [vmem:[#allocation61_spill] sm:$0xff] %v8935_v56  ;;  %3229 = vmatpush.msrb.mxu0 %v8950_v36  ;;  %v8953_v56 = vld [vmem:[#allocation10 + $0x398] sm:$0xff] }
 0x514   :  { %11631 = vst [vmem:[#allocation100_spill] sm:$0xff] %v8938_v1  ;;  %3269 = vmatpush.msrb.mxu2 %v8953_v56  ;;  %v8956_v1 = vld [vmem:[#allocation10 + $0x4f0] sm:$0xff] }
 0x515   :  { %11632 = vst [vmem:[#allocation101_spill] sm:$0xff] %v8941_v14  ;;  %2952 = vmatpush.msrb.mxu1 %v8956_v1  ;;  %v8959_v14 = vld [vmem:[#allocation10 + $0x4f8] sm:$0xff] }
 0x516   :  { %11633 = vst [vmem:[#allocation60_spill] sm:$0xff] %v8944_v45  ;;  %2992 = vmatpush.msrb.mxu3 %v8959_v14  ;;  %v8962_v45 = vld [vmem:[#allocation10 + $0x350] sm:$0xff] }
 0x517   :  { %11634 = vst [vmem:[#allocation65_spill] sm:$0xff] %v8947_v38  ;;  %3230 = vmatpush.msrb.mxu0 %v8962_v45  ;;  %v8965_v38 = vld [vmem:[#allocation10 + $0x358] sm:$0xff] }
 0x518   :  { %11635 = vst [vmem:[#allocation64_spill] sm:$0xff] %v8950_v36  ;;  %3270 = vmatpush.msrb.mxu2 %v8965_v38  ;;  %v8968_v36 = vld [vmem:[#allocation10 + $0x4b0] sm:$0xff] }
 0x519   :  { %11636 = vst [vmem:[#allocation69_spill] sm:$0xff] %v8953_v56  ;;  %2953 = vmatpush.msrb.mxu1 %v8968_v36  ;;  %v8971_v56 = vld [vmem:[#allocation10 + $0x4b8] sm:$0xff] }
 0x51a   :  { %11637 = vst [vmem:[#allocation68_spill] sm:$0xff] %v8956_v1  ;;  %2993 = vmatpush.msrb.mxu3 %v8971_v56  ;;  %v8974_v1 = vld [vmem:[#allocation10 + $0x310] sm:$0xff] }
 0x51b   :  { %11638 = vst [vmem:[#allocation70_spill] sm:$0xff] %v8959_v14  ;;  %3231 = vmatpush.msrb.mxu0 %v8974_v1  ;;  %v8977_v14 = vld [vmem:[#allocation10 + $0x318] sm:$0xff] }
 0x51c   :  { %11639 = vst [vmem:[#allocation74_spill] sm:$0xff] %v8962_v45  ;;  %3271 = vmatpush.msrb.mxu2 %v8977_v14  ;;  %v8980_v45 = vld [vmem:[#allocation10 + $0x470] sm:$0xff] }
 0x51d   :  { %11640 = vst [vmem:[#allocation75_spill] sm:$0xff] %v8965_v38  ;;  %2954 = vmatpush.msrb.mxu1 %v8980_v45  ;;  %v8983_v38 = vld [vmem:[#allocation10 + $0x478] sm:$0xff] }
 0x51e   :  { %11641 = vst [vmem:[#allocation78_spill] sm:$0xff] %v8968_v36  ;;  %2994 = vmatpush.msrb.mxu3 %v8983_v38  ;;  %v8986_v36 = vld [vmem:[#allocation10 + $0x2d0] sm:$0xff] }
 0x51f   :  { %11642 = vst [vmem:[#allocation79_spill] sm:$0xff] %v8971_v56  ;;  %3232 = vmatpush.msrb.mxu0 %v8986_v36  ;;  %v8989_v56 = vld [vmem:[#allocation10 + $0x2d8] sm:$0xff] }
 0x520   :  { %11643 = vst [vmem:[#allocation82_spill] sm:$0xff] %v8974_v1  ;;  %3272 = vmatpush.msrb.mxu2 %v8989_v56  ;;  %v8992_v1 = vld [vmem:[#allocation10 + $0x430] sm:$0xff] }
 0x521   :  { %11644 = vst [vmem:[#allocation83_spill] sm:$0xff] %v8977_v14  ;;  %2955 = vmatpush.msrb.mxu1 %v8992_v1  ;;  %v8995_v14 = vld [vmem:[#allocation10 + $0x438] sm:$0xff] }
 0x522   :  { %11645 = vst [vmem:[#allocation104_spill] sm:$0xff] %v8980_v45  ;;  %2995 = vmatpush.msrb.mxu3 %v8995_v14  ;;  %2956 = vmatmul.f32.vlgmr.msrb.gmra.mxu1 %v8673_v30  ;;  %v11654_v45 = vld [vmem:[#allocation51_spill] sm:$0xff] }
 0x523   :  { %11646 = vst [vmem:[#allocation86_spill] sm:$0xff] %v8983_v38  ;;  %2996 = vmatmul.f32.vlgmr.msrb.gmra.mxu3 %v8673_v30  ;;  %v9000_v38 = vld [vmem:[#allocation10 + $0x290] sm:$0xff]  ;;  %v11657_v30 = vld [vmem:[#allocation46_spill] sm:$0xff] }
 0x524   :  { %11647 = vst [vmem:[#allocation87_spill] sm:$0xff] %v8986_v36  ;;  %3233 = vmatpush.msrb.mxu0 %v9000_v38  ;;  %v9003_v36 = vld [vmem:[#allocation10 + $0x298] sm:$0xff]  ;;  %3208 = vmatpush.msra.mxu3 %v11654_v45  ;;  %v11662_v45 = vld [vmem:[#allocation55_spill] sm:$0xff] }
 0x525   :  { %11648 = vst [vmem:[#allocation105_spill] sm:$0xff] %v8989_v56  ;;  %3273 = vmatpush.msrb.mxu2 %v9003_v36  ;;  %v11653_v56 = vld [vmem:[#allocation19_spill] sm:$0xff] }
 0x526   :  { %11649 = vst [vmem:[#allocation106_spill] sm:$0xff] %v8992_v1  ;;  %3168 = vmatpush.msra.mxu1 %v11653_v56  ;;  %v9008_v1 = vld [vmem:[#allocation10 + $0x250] sm:$0xff]  ;;  %3209 = vmatpush.msra.mxu3 %v11658_v16  ;;  %v11661_v56 = vld [vmem:[#allocation25_spill] sm:$0xff]  ;;  %v11665_v16 = vld [vmem:[#allocation50_spill] sm:$0xff] }
 0x527   :  { %11650 = vst [vmem:[#allocation90_spill] sm:$0xff] %v8995_v14  ;;  %3234 = vmatpush.msrb.mxu0 %v9008_v1  ;;  %v9011_v14 = vld [vmem:[#allocation10 + $0x258] sm:$0xff] }
 0x528   :  { %11651 = vst [vmem:[#allocation91_spill] sm:$0xff] %v9000_v38  ;;  %3274 = vmatpush.msrb.mxu2 %v9011_v14  ;;  %3169 = vmatpush.msra.mxu1 %v11657_v30  ;;  %v9016_v38 = vld [vmem:[#allocation10 + $0x210] sm:$0xff]  ;;  %v11666_v30 = vld [vmem:[#allocation27_spill] sm:$0xff] }
 0x529   :  { %11652 = vst [vmem:[#allocation107_spill] sm:$0xff] %v9003_v36  ;;  %3235 = vmatpush.msrb.mxu0 %v9016_v38  ;;  %v9019_v36 = vld [vmem:[#allocation10 + $0x218] sm:$0xff]  ;;  %3210 = vmatpush.msra.mxu3 %v11662_v45  ;;  %v11670_v45 = vld [vmem:[#allocation59_spill] sm:$0xff] }
 0x52a   :  { %11655 = vst [vmem:[#allocation108_spill] sm:$0xff] %v9008_v1  ;;  %3275 = vmatpush.msrb.mxu2 %v9019_v36  ;;  %3170 = vmatpush.msra.mxu1 %v11661_v56  ;;  %v9024_v1 = vld [vmem:[#allocation10 + $0x1d0] sm:$0xff]  ;;  %v11669_v56 = vld [vmem:[#allocation22_spill] sm:$0xff]  ;;  %v2737_v22 = vpop.f32.mrf.mxu2 }
 0x52b   :  { %11656 = vst [vmem:[#allocation94_spill] sm:$0xff] %v9011_v14  ;;  %3236 = vmatpush.msrb.mxu0 %v9024_v1  ;;  %v9027_v14 = vld [vmem:[#allocation10 + $0x1d8] sm:$0xff]  ;;  %3211 = vmatpush.msra.mxu3 %v11666_v30  ;;  %v9047_v30 = vld [vmem:[#allocation10 + $0x688] sm:$0xff] }
 0x52c   :  { %11659 = vst [vmem:[#allocation95_spill] sm:$0xff] %v9016_v38  ;;  %3276 = vmatpush.msrb.mxu2 %v9027_v14  ;;  %3171 = vmatpush.msra.mxu1 %v11665_v16  ;;  %v9032_v38 = vld [vmem:[#allocation10 + $0x190] sm:$0xff]  ;;  %v11673_v16 = vld [vmem:[#allocation54_spill] sm:$0xff] }
 0x52d   :  { %11660 = vst [vmem:[#allocation109_spill] sm:$0xff] %v9019_v36  ;;  %3237 = vmatpush.msrb.mxu0 %v9032_v38  ;;  %v9035_v36 = vld [vmem:[#allocation10 + $0x198] sm:$0xff]  ;;  %3212 = vmatpush.msra.mxu3 %v11670_v45  ;;  %v9056_v45 = vld [vmem:[#allocation10 + $0x640] sm:$0xff] }
 0x52e   :  { %11663 = vst [vmem:[#allocation110_spill] sm:$0xff] %v9024_v1  ;;  %3277 = vmatpush.msrb.mxu2 %v9035_v36  ;;  %3172 = vmatpush.msra.mxu1 %v11669_v56  ;;  %v9040_v1 = vld [vmem:[#allocation10 + $0x150] sm:$0xff]  ;;  %v9053_v56 = vld [vmem:[#allocation10 + $0x118] sm:$0xff] }
 0x52f   :  { %11664 = vst [vmem:[#allocation98_spill] sm:$0xff] %v9027_v14  ;;  %3238 = vmatpush.msrb.mxu0 %v9040_v1  ;;  %v9043_v14 = vld [vmem:[#allocation10 + $0x158] sm:$0xff]  ;;  %3213 = vmatpush.msra.mxu3 %v9047_v30 }
 0x530   :  { %11667 = vst [vmem:[#allocation99_spill] sm:$0xff] %v9032_v38  ;;  %3278 = vmatpush.msrb.mxu2 %v9043_v14  ;;  %3173 = vmatpush.msra.mxu1 %v11673_v16  ;;  %v9050_v38 = vld [vmem:[#allocation10 + $0x110] sm:$0xff] }
 0x531   :  { %11668 = vst [vmem:[#allocation111_spill] sm:$0xff] %v9035_v36  ;;  %3239 = vmatpush.msrb.mxu0 %v9050_v38  ;;  %v9062_v16 = vld [vmem:[#allocation10 + $0xd0] sm:$0xff]  ;;  %v3001_v36 = vld [vmem:[#allocation5 + $0xa0] sm:$0xff] }
 0x532   :  { %11671 = vst [vmem:[#allocation112_spill] sm:$0xff] %v9040_v1  ;;  %3279 = vmatpush.msrb.mxu2 %v9053_v56  ;;  %3174 = vmatpush.msra.mxu1 %v9056_v45  ;;  %v9059_v1 = vld [vmem:[#allocation10 + $0x648] sm:$0xff] }
 0x533   :  { %11672 = vst [vmem:[#allocation102_spill] sm:$0xff] %v9043_v14  ;;  %3214 = vmatpush.msra.mxu3 %v9059_v1  ;;  %3240 = vmatpush.msrb.mxu0 %v9062_v16  ;;  %v9218_v14 = vld [vmem:[#allocation10 + $0x490] sm:$0xff] }
 0x534   :  { %11674 = vst [vmem:[#allocation103_spill] sm:$0xff] %v9047_v30  ;;  %v9065_v30 = vld [vmem:[#allocation10 + $0xd8] sm:$0xff] }
 0x535   :  { %11675 = vst [vmem:[#allocation113_spill] sm:$0xff] %v9050_v38  ;;  %3280 = vmatpush.msrb.mxu2 %v9065_v30  ;;  %v9068_v38 = vld [vmem:[#allocation10 + $0x600] sm:$0xff] }
 0x536   :  { %11676 = vst [vmem:[#allocation114_spill] sm:$0xff] %v9053_v56  ;;  %3175 = vmatpush.msra.mxu1 %v9068_v38  ;;  %v9071_v56 = vld [vmem:[#allocation10 + $0x608] sm:$0xff] }
 0x537   :  { %11677 = vst [vmem:[#allocation115_spill] sm:$0xff] %v9056_v45  ;;  %3215 = vmatpush.msra.mxu3 %v9071_v56  ;;  %v9074_v45 = vld [vmem:[#allocation10 + $0x90] sm:$0xff] }
 0x538   :  { %11678 = vst [vmem:[#allocation116_spill] sm:$0xff] %v9059_v1  ;;  %3241 = vmatpush.msrb.mxu0 %v9074_v45  ;;  %v9077_v1 = vld [vmem:[#allocation10 + $0x98] sm:$0xff] }
 0x539   :  { %11679 = vst [vmem:[#allocation117_spill] sm:$0xff] %v9062_v16  ;;  %3281 = vmatpush.msrb.mxu2 %v9077_v1  ;;  %v9080_v16 = vld [vmem:[#allocation10 + $0x5c0] sm:$0xff] }
 0x53a   :  { %11680 = vst [vmem:[#allocation118_spill] sm:$0xff] %v9065_v30  ;;  %3176 = vmatpush.msra.mxu1 %v9080_v16  ;;  %v9083_v30 = vld [vmem:[#allocation10 + $0x5c8] sm:$0xff] }
 0x53b   :  { %11681 = vst [vmem:[#allocation119_spill] sm:$0xff] %v9068_v38  ;;  %3216 = vmatpush.msra.mxu3 %v9083_v30  ;;  %v9086_v38 = vld [vmem:[#allocation10 + $0x50] sm:$0xff] }
 0x53c   :  { %11682 = vst [vmem:[#allocation120_spill] sm:$0xff] %v9071_v56  ;;  %3242 = vmatpush.msrb.mxu0 %v9086_v38  ;;  %v9089_v56 = vld [vmem:[#allocation10 + $0x58] sm:$0xff] }
 0x53d   :  { %11683 = vst [vmem:[#allocation121_spill] sm:$0xff] %v9074_v45  ;;  %3282 = vmatpush.msrb.mxu2 %v9089_v56  ;;  %v9092_v45 = vld [vmem:[#allocation10 + $0x580] sm:$0xff] }
 0x53e   :  { %11684 = vst [vmem:[#allocation122_spill] sm:$0xff] %v9077_v1  ;;  %3177 = vmatpush.msra.mxu1 %v9092_v45  ;;  %v9095_v1 = vld [vmem:[#allocation10 + $0x588] sm:$0xff] }
 0x53f   :  { %11685 = vst [vmem:[#allocation123_spill] sm:$0xff] %v9080_v16  ;;  %3217 = vmatpush.msra.mxu3 %v9095_v1  ;;  %v9098_v16 = vld [vmem:[#allocation10 + $0x10] sm:$0xff] }
 0x540   :  { %11686 = vst [vmem:[#allocation124_spill] sm:$0xff] %v9083_v30  ;;  %3243 = vmatpush.msrb.mxu0 %v9098_v16  ;;  %v9101_v30 = vld [vmem:[#allocation10 + $0x18] sm:$0xff] }
 0x541   :  { %11687 = vst [vmem:[#allocation125_spill] sm:$0xff] %v9086_v38  ;;  %3283 = vmatpush.msrb.mxu2 %v9101_v30  ;;  %v9104_v38 = vld [vmem:[#allocation10 + $0x540] sm:$0xff] }
 0x542   :  { %11688 = vst [vmem:[#allocation126_spill] sm:$0xff] %v9089_v56  ;;  %3178 = vmatpush.msra.mxu1 %v9104_v38  ;;  %v9107_v56 = vld [vmem:[#allocation10 + $0x548] sm:$0xff] }
 0x543   :  { %11689 = vst [vmem:[#allocation127_spill] sm:$0xff] %v9092_v45  ;;  %3218 = vmatpush.msra.mxu3 %v9107_v56  ;;  %v9110_v45 = vld [vmem:[#allocation10 + $0x500] sm:$0xff] }
 0x544   :  { %11690 = vst [vmem:[#allocation128_spill] sm:$0xff] %v9095_v1  ;;  %3179 = vmatpush.msra.mxu1 %v9110_v45  ;;  %v9113_v1 = vld [vmem:[#allocation10 + $0x508] sm:$0xff] }
 0x545   :  { %11691 = vst [vmem:[#allocation129_spill] sm:$0xff] %v9098_v16  ;;  %3219 = vmatpush.msra.mxu3 %v9113_v1  ;;  %v9116_v16 = vld [vmem:[#allocation10 + $0x4c0] sm:$0xff] }
 0x546   :  { %11692 = vst [vmem:[#allocation130_spill] sm:$0xff] %v9101_v30  ;;  %3180 = vmatpush.msra.mxu1 %v9116_v16  ;;  %v9119_v30 = vld [vmem:[#allocation10 + $0x4c8] sm:$0xff] }
 0x547   :  { %11693 = vst [vmem:[#allocation131_spill] sm:$0xff] %v9104_v38  ;;  %3220 = vmatpush.msra.mxu3 %v9119_v30  ;;  %v9122_v38 = vld [vmem:[#allocation10 + $0x480] sm:$0xff] }
 0x548   :  { %11694 = vst [vmem:[#allocation134_spill] sm:$0xff] %v9107_v56  ;;  %3181 = vmatpush.msra.mxu1 %v9122_v38  ;;  %v9125_v56 = vld [vmem:[#allocation10 + $0x488] sm:$0xff] }
 0x549   :  { %11695 = vst [vmem:[#allocation135_spill] sm:$0xff] %v9110_v45  ;;  %3221 = vmatpush.msra.mxu3 %v9125_v56  ;;  %v9128_v45 = vld [vmem:[#allocation10 + $0x440] sm:$0xff] }
 0x54a   :  { %11696 = vst [vmem:[#allocation138_spill] sm:$0xff] %v9113_v1  ;;  %3182 = vmatpush.msra.mxu1 %v9128_v45  ;;  %v9131_v1 = vld [vmem:[#allocation10 + $0x448] sm:$0xff] }
 0x54b   :  { %11697 = vst [vmem:[#allocation139_spill] sm:$0xff] %v9116_v16  ;;  %3222 = vmatpush.msra.mxu3 %v9131_v1  ;;  %v9134_v16 = vld [vmem:[#allocation10 + $0x400] sm:$0xff] }
 0x54c   :  { %11698 = vst [vmem:[#allocation142_spill] sm:$0xff] %v9119_v30  ;;  %3183 = vmatpush.msra.mxu1 %v9134_v16  ;;  %v9137_v30 = vld [vmem:[#allocation10 + $0x408] sm:$0xff] }
 0x54d   :  { %11699 = vst [vmem:[#allocation143_spill] sm:$0xff] %v9122_v38  ;;  %3223 = vmatpush.msra.mxu3 %v9137_v30  ;;  %v9140_v38 = vld [vmem:[#allocation10 + $0x7d0] sm:$0xff] }
 0x54e   :  { %11700 = vst [vmem:[#allocation132_spill] sm:$0xff] %v9125_v56  ;;  %3248 = vmatpush.msrb.mxu1 %v9140_v38  ;;  %v9143_v56 = vld [vmem:[#allocation10 + $0x7d8] sm:$0xff] }
 0x54f   :  { %11701 = vst [vmem:[#allocation133_spill] sm:$0xff] %v9128_v45  ;;  %3288 = vmatpush.msrb.mxu3 %v9143_v56  ;;  %v9146_v45 = vld [vmem:[#allocation10 + $0x790] sm:$0xff] }
 0x550   :  { %11702 = vst [vmem:[#allocation136_spill] sm:$0xff] %v9131_v1  ;;  %3249 = vmatpush.msrb.mxu1 %v9146_v45  ;;  %v9149_v1 = vld [vmem:[#allocation10 + $0x798] sm:$0xff] }
 0x551   :  { %11703 = vst [vmem:[#allocation137_spill] sm:$0xff] %v9134_v16  ;;  %3289 = vmatpush.msrb.mxu3 %v9149_v1  ;;  %v9152_v16 = vld [vmem:[#allocation10 + $0x750] sm:$0xff] }
 0x552   :  { %11704 = vst [vmem:[#allocation140_spill] sm:$0xff] %v9137_v30  ;;  %3250 = vmatpush.msrb.mxu1 %v9152_v16  ;;  %v9155_v30 = vld [vmem:[#allocation10 + $0x758] sm:$0xff] }
 0x553   :  { %11705 = vst [vmem:[#allocation141_spill] sm:$0xff] %v9140_v38  ;;  %3290 = vmatpush.msrb.mxu3 %v9155_v30  ;;  %v9158_v38 = vld [vmem:[#allocation10 + $0x710] sm:$0xff] }
 0x554   :  { %11706 = vst [vmem:[#allocation144_spill] sm:$0xff] %v9143_v56  ;;  %3251 = vmatpush.msrb.mxu1 %v9158_v38  ;;  %v9161_v56 = vld [vmem:[#allocation10 + $0x718] sm:$0xff] }
 0x555   :  { %11707 = vst [vmem:[#allocation145_spill] sm:$0xff] %v9146_v45  ;;  %3291 = vmatpush.msrb.mxu3 %v9161_v56  ;;  %v9164_v45 = vld [vmem:[#allocation10 + $0x6d0] sm:$0xff] }
 0x556   :  { %11708 = vst [vmem:[#allocation146_spill] sm:$0xff] %v9149_v1  ;;  %3252 = vmatpush.msrb.mxu1 %v9164_v45  ;;  %v9167_v1 = vld [vmem:[#allocation10 + $0x6d8] sm:$0xff] }
 0x557   :  { %11709 = vst [vmem:[#allocation147_spill] sm:$0xff] %v9152_v16  ;;  %3292 = vmatpush.msrb.mxu3 %v9167_v1  ;;  %v9170_v16 = vld [vmem:[#allocation10 + $0x690] sm:$0xff] }
 0x558   :  { %11710 = vst [vmem:[#allocation148_spill] sm:$0xff] %v9155_v30  ;;  %3253 = vmatpush.msrb.mxu1 %v9170_v16  ;;  %v9173_v30 = vld [vmem:[#allocation10 + $0x698] sm:$0xff] }
 0x559   :  { %11711 = vst [vmem:[#allocation149_spill] sm:$0xff] %v9158_v38  ;;  %3293 = vmatpush.msrb.mxu3 %v9173_v30  ;;  %v9176_v38 = vld [vmem:[#allocation10 + $0x650] sm:$0xff] }
 0x55a   :  { %11712 = vst [vmem:[#allocation150_spill] sm:$0xff] %v9161_v56  ;;  %3254 = vmatpush.msrb.mxu1 %v9176_v38  ;;  %v9179_v56 = vld [vmem:[#allocation10 + $0x658] sm:$0xff] }
 0x55b   :  { %11713 = vst [vmem:[#allocation151_spill] sm:$0xff] %v9164_v45  ;;  %3294 = vmatpush.msrb.mxu3 %v9179_v56  ;;  %v9182_v45 = vld [vmem:[#allocation10 + $0x610] sm:$0xff] }
 0x55c   :  { %11714 = vst [vmem:[#allocation152_spill] sm:$0xff] %v9167_v1  ;;  %3255 = vmatpush.msrb.mxu1 %v9182_v45  ;;  %v9185_v1 = vld [vmem:[#allocation10 + $0x618] sm:$0xff] }
 0x55d   :  { %11715 = vst [vmem:[#allocation153_spill] sm:$0xff] %v9170_v16  ;;  %3295 = vmatpush.msrb.mxu3 %v9185_v1  ;;  %v9188_v16 = vld [vmem:[#allocation10 + $0x5d0] sm:$0xff] }
 0x55e   :  { %11716 = vst [vmem:[#allocation154_spill] sm:$0xff] %v9173_v30  ;;  %3256 = vmatpush.msrb.mxu1 %v9188_v16  ;;  %v9191_v30 = vld [vmem:[#allocation10 + $0x5d8] sm:$0xff] }
 0x55f   :  { %11717 = vst [vmem:[#allocation155_spill] sm:$0xff] %v9176_v38  ;;  %3296 = vmatpush.msrb.mxu3 %v9191_v30  ;;  %v9194_v38 = vld [vmem:[#allocation10 + $0x590] sm:$0xff] }
 0x560   :  { %11718 = vst [vmem:[#allocation156_spill] sm:$0xff] %v9179_v56  ;;  %3257 = vmatpush.msrb.mxu1 %v9194_v38  ;;  %v9197_v56 = vld [vmem:[#allocation10 + $0x598] sm:$0xff] }
 0x561   :  { %11719 = vst [vmem:[#allocation157_spill] sm:$0xff] %v9182_v45  ;;  %3297 = vmatpush.msrb.mxu3 %v9197_v56  ;;  %v9200_v45 = vld [vmem:[#allocation10 + $0x550] sm:$0xff] }
 0x562   :  { %11720 = vst [vmem:[#allocation158_spill] sm:$0xff] %v9185_v1  ;;  %3258 = vmatpush.msrb.mxu1 %v9200_v45  ;;  %v9203_v1 = vld [vmem:[#allocation10 + $0x558] sm:$0xff] }
 0x563   :  { %11721 = vst [vmem:[#allocation159_spill] sm:$0xff] %v9188_v16  ;;  %3298 = vmatpush.msrb.mxu3 %v9203_v1  ;;  %v9206_v16 = vld [vmem:[#allocation10 + $0x510] sm:$0xff] }
 0x564   :  { %11722 = vst [vmem:[#allocation160_spill] sm:$0xff] %v9191_v30  ;;  %3259 = vmatpush.msrb.mxu1 %v9206_v16  ;;  %v9209_v30 = vld [vmem:[#allocation10 + $0x518] sm:$0xff] }
 0x565   :  { %11723 = vst [vmem:[#allocation161_spill] sm:$0xff] %v9194_v38  ;;  %3299 = vmatpush.msrb.mxu3 %v9209_v30  ;;  %v9212_v38 = vld [vmem:[#allocation10 + $0x4d0] sm:$0xff] }
 0x566   :  { %11724 = vst [vmem:[#allocation162_spill] sm:$0xff] %v9197_v56  ;;  %3260 = vmatpush.msrb.mxu1 %v9212_v38  ;;  %v9215_v56 = vld [vmem:[#allocation10 + $0x4d8] sm:$0xff] }
 0x567   :  { %11725 = vst [vmem:[#allocation163_spill] sm:$0xff] %v9200_v45  ;;  %3300 = vmatpush.msrb.mxu3 %v9215_v56  ;;  %v2697_v45 = vpop.f32.mrf.mxu0 }
 0x568   :  { %11726 = vst [vmem:[#allocation164_spill] sm:$0xff] %v9203_v1  ;;  %3261 = vmatpush.msrb.mxu1 %v9218_v14  ;;  %v9221_v1 = vld [vmem:[#allocation10 + $0x498] sm:$0xff] }
 0x569   :  { %11727 = vst [vmem:[#allocation165_spill] sm:$0xff] %v9206_v16  ;;  %3301 = vmatpush.msrb.mxu3 %v9221_v1  ;;  %v2717_v16 = vpop.f32.mrf.mxu1 }
 0x56a   :  { %11728 = vst [vmem:[#allocation166_spill] sm:$0xff] %v9209_v30  ;;  %v2718_v30 = vadd.f32 %v2717_v16, %v2697_v45  ;;  %3262 = vmatpush.msrb.mxu1 %v9224_v61  ;;  %v2757_v45 = vpop.f32.mrf.mxu3  ;;  %v3002_v16 = vld [vmem:[#allocation5 + $0xa8] sm:$0xff] }
 0x56b   :  { %11729 = vst [vmem:[#allocation167_spill] sm:$0xff] %v9212_v38  ;;  %v9227_v38 = vld [vmem:[#allocation10 + $0x458] sm:$0xff]  ;;  %v2758_v43 = vadd.f32 %v2757_v45, %v2737_v22 }
 0x56c   :  { %11730 = vst [vmem:[#allocation168_spill] sm:$0xff] %v9215_v56  ;;  %3302 = vmatpush.msrb.mxu3 %v9227_v38  ;;  %v3005_v56 = vadd.f32 %v3001_v36, %v2718_v30  ;;  %3263 = vmatpush.msrb.mxu1 %v9230_v3 }
 0x56d   :  { %11731 = vst [vmem:[#allocation169_spill] sm:$0xff] %v9218_v14  ;;  %v9233_v14 = vld [vmem:[#allocation10 + $0x418] sm:$0xff]  ;;  %v3006_v46 = vadd.f32 %v3002_v16, %v2758_v43 }
 0x56e   :  { %11732 = vst [vmem:[#allocation170_spill] sm:$0xff] %v9221_v1  ;;  %3303 = vmatpush.msrb.mxu3 %v9233_v14  ;;  %v4162_v1 = vmul.f32 -1.442695, %v3005_v56 }
 0x56f   :  { %11733 = vst [vmem:[#allocation171_spill] sm:$0xff] %v9224_v61  ;;  %v2777_v61 = vpop.f32.mrf.mxu0  ;;  %v4163_v36 = vmul.f32 -1.442695, %v3006_v46 }
 0x570   :  { %11734 = vst [vmem:[#allocation172_spill] sm:$0xff] %v9227_v38  ;;  %4352 = vpow2.f32 %v4162_v1  ;;  %v2817_v1 = vpop.f32.mrf.mxu2 }
 0x571   :  { %11736 = vst [vmem:[#allocation174_spill] sm:$0xff] %v9233_v14  ;;  %v2797_v20 = vpop.f32.mrf.mxu1  ;;  %4354 = vpow2.f32 %v4163_v36 }
 0x572   :  { %v2798_v38 = vadd.f32 %v2797_v20, %v2777_v61  ;;  %v2837_v2 = vpop.f32.mrf.mxu3  ;;  %v3004_v20 = vld [vmem:[#allocation5 + $0xb8] sm:$0xff] }
 0x573   :  { %v2838_v46 = vadd.f32 %v2837_v2, %v2817_v1 }
 0x574   :  { %v3007_v30 = vadd.f32 %v3003_v15, %v2798_v38 }
 0x576   :  { %v4353_v39 = vpop.eup %4352  ;;  %v4164_v3 = vmul.f32 -1.442695, %v3007_v30 }
 0x577   :  { %v3027_v11 = vadd.f32 1.0, %v4353_v39  ;;  %v4355_v14 = vpop.eup %4354  ;;  %v3008_v39 = vadd.f32 %v3004_v20, %v2838_v46  ;;  %v2857_v2 = vpop.f32.mrf.mxu0  ;;  %v3010_v20 = vld [vmem:[#allocation8 + $0x40] sm:$0xff] }
 0x578   :  { %4356 = vpow2.f32 %v4164_v3  ;;  %v3028_v56 = vadd.f32 1.0, %v4355_v14 }
 0x579   :  { %4358 = vrcp.f32 %v3027_v11  ;;  %v3041_v16 = vand.u32 2147483648, %v3027_v11  ;;  %vm3035_vm9 = vweird.f32 %v3027_v11 }
 0x57a   :  { %4360 = vrcp.f32 %v3028_v56  ;;  %v3056_v7 = vand.u32 2147483648, %v3028_v56  ;;  %v3054_v46 = vand.u32 2147483647, %v3028_v56  ;;  %vm3050_vm12 = vweird.f32 %v3028_v56 }
 0x57c   :  { %v3057_v31 = vor.u32 1.1754944e-38, %v3056_v7  ;;  %vm3055_vm15 = vcmp.eq.f32.partialorder %v3054_v46, 8.507059e+37  ;;  %v9265_v46 = vld [vmem:[#allocation10 + $0x3e8] sm:$0xff] }
 0x57e   :  { %v4357_v5 = vpop.eup %4356 }
 0x57f   :  { %v4359_v21 = vpop.eup %4358  ;;  %v9236_v22 = vadd.f32 1.0, %v4357_v5  ;;  %v3039_v5 = vand.u32 2147483647, %v3027_v11 }
 0x580   :  { %v3031_v45 = vmul.f32 %v4359_v21, %v3027_v11  ;;  %v4361_v61 = vpop.eup %4360  ;;  %vm3036_vm8 = vweird.f32 %v4359_v21 }
 0x581   :  { %4362 = vrcp.f32 %v9236_v22  ;;  %v3046_v3 = vmul.f32 %v4361_v61, %v3028_v56  ;;  %vm9240_vm10 = vmor %vm3035_vm9, %vm3036_vm8  ;;  %vm3051_vm11 = vweird.f32 %v4361_v61  ;;  %vm3040_vm13 = vcmp.eq.f32.partialorder %v3039_v5, 8.507059e+37 }
 0x582   :  { %v3032_v15 = vsub.f32 1.0, %v3031_v45  ;;  %4364 = vtanh.f32 %v3008_v39  ;;  %vm3052_vm14 = vmor %vm3050_vm12, %vm3051_vm11  ;;  %vm3065_vm1 = vweird.f32 %v9236_v22 }
 0x583   :  { %v3047_v36 = vsub.f32 1.0, %v3046_v3  ;;  %v3042_v3 = vor.u32 1.1754944e-38, %v3041_v16  ;;  %v3011_v16 = vld [vmem:[#allocation8 + $0x48] sm:$0xff] }
 0x584   :  { %v3033_v43 = vmul.f32 %v4359_v21, %v3032_v15  ;;  %v2877_v15 = vpop.f32.mrf.mxu1 }
 0x585   :  { %v3048_v1 = vmul.f32 %v4361_v61, %v3047_v36  ;;  %v2878_v26 = vadd.f32 %v2877_v15, %v2857_v2  ;;  %v9270_v15 = vld [vmem:[#allocation10 + $0x3a0] sm:$0xff] }
 0x586   :  { %v3034_v38 = vadd.f32 %v4359_v21, %v3033_v43 }
 0x587   :  { %v4363_v14 = vpop.eup %4362  ;;  %v3049_v11 = vadd.f32 %v4361_v61, %v3048_v1  ;;  %v3014_v47 = vadd.f32 %v3010_v20, %v2878_v26  ;;  %v3071_v26 = vand.u32 2147483648, %v9236_v22  ;;  %v9273_v20 = vld [vmem:[#allocation10 + $0x3a8] sm:$0xff] }
 0x588   :  { %v3061_v30 = vmul.f32 %v4363_v14, %v9236_v22  ;;  %v3038_v45 = vsel %vm9240_vm10, %v4359_v21, %v3034_v38  ;;  %v4365_v36 = vpop.eup %4364  ;;  %v2897_v21 = vpop.f32.mrf.mxu2  ;;  %vm3066_vm0 = vweird.f32 %v4363_v14 }
 0x589   :  { %v3043_v17 = vsel %vm3040_vm13, %v3042_v3, %v3038_v45  ;;  %v3053_v39 = vsel %vm3052_vm14, %v4361_v61, %v3049_v11  ;;  %v4165_v44 = vmul.f32 -1.442695, %v3014_v47  ;;  %v3069_v47 = vand.u32 2147483647, %v9236_v22  ;;  %vm3067_vm2 = vmor %vm3065_vm1, %vm3066_vm0  ;;  %v9279_v3 = vld [vmem:[#allocation10 + $0x368] sm:$0xff]  ;;  %v9282_v11 = vld [vmem:[#allocation10 + $0x320] sm:$0xff] }
 0x58a   :  { %v3062_v43 = vsub.f32 1.0, %v3061_v30  ;;  %v3058_v28 = vsel %vm3055_vm15, %v3057_v31, %v3053_v39  ;;  %v3077_v40 = vmul.f32 %v4365_v36, %v3043_v17  ;;  %v2917_v30 = vpop.f32.mrf.mxu3  ;;  %v3072_v17 = vor.u32 1.1754944e-38, %v3071_v26  ;;  %v9285_v39 = vld [vmem:[#allocation10 + $0x328] sm:$0xff] }
 0x58b   :  { %v3076_v38 = vmul.f32 %v3058_v28, %v8566_v49  ;;  %v2918_v2 = vadd.f32 %v2917_v30, %v2897_v21  ;;  %4366 = vpow2.f32 %v4165_v44  ;;  %vm3070_vm3 = vcmp.eq.f32.partialorder %v3069_v47, 8.507059e+37  ;;  %v9294_v21 = vld [vmem:[#allocation10 + $0x2e0] sm:$0xff]  ;;  %v3012_v47 = vld [vmem:[#allocation8 + $0x50] sm:$0xff] }
 0x58c   :  { %v3063_v27 = vmul.f32 %v4363_v14, %v3062_v43  ;;  %v9276_v43 = vld [vmem:[#allocation10 + $0x360] sm:$0xff] }
 0x58d   :  { %v9247_v56 = vadd.f32 %v3077_v40, %v3076_v38  ;;  %v3015_v7 = vadd.f32 %v3011_v16, %v2918_v2  ;;  %v9297_v38 = vld [vmem:[#allocation10 + $0x2e8] sm:$0xff]  ;;  %v9304_v2 = vld [vmem:[#allocation10 + $0x2a0] sm:$0xff] }
 0x58e   :  { %v3064_v5 = vadd.f32 %v4363_v14, %v3063_v27  ;;  %11739 = vst [vmem:[#allocation175_spill] sm:$0xff] %v9297_v38 }
 0x58f   :  { %4368 = vtanh.f32 %v9247_v56  ;;  %v4166_v31 = vmul.f32 -1.442695, %v3015_v7  ;;  %11740 = vst [vmem:[#allocation176_spill] sm:$0xff] %v9304_v2  ;;  %v2937_v7 = vpop.f32.mrf.mxu0 }
 0x590   :  { %v3068_v49 = vsel %vm3067_vm2, %v4363_v14, %v3064_v5  ;;  %v9262_v14 = vld [vmem:[#allocation10 + $0x3e0] sm:$0xff]  ;;  %v9307_v5 = vld [vmem:[#allocation10 + $0x2a8] sm:$0xff] }
 0x591   :  { %4370 = vpow2.f32 %v4166_v31  ;;  %v4367_v28 = vpop.eup %4366  ;;  %v3073_v61 = vsel %vm3070_vm3, %v3072_v17, %v3068_v49  ;;  %11741 = vst [vmem:[#allocation177_spill] sm:$0xff] %v9307_v5  ;;  %v9310_v31 = vld [vmem:[#allocation10 + $0x260] sm:$0xff]  ;;  %v9313_v49 = vld [vmem:[#allocation10 + $0x268] sm:$0xff] }
 0x592   :  { %v9255_v1 = vadd.f32 1.0, %v4367_v28  ;;  %11742 = vst [vmem:[#allocation178_spill] sm:$0xff] %v9310_v31 }
 0x593   :  { %11743 = vst [vmem:[#allocation179_spill] sm:$0xff] %v9313_v49 }
 0x594   :  { %4372 = vrcp.f32 %v9255_v1  ;;  %vm3098_vm6 = vweird.f32 %v9255_v1 }
 0x595   :  { %v4369_v40 = vpop.eup %4368 }
 0x596   :  { %v9253_v27 = vmul.f32 %v4369_v40, %v3073_v61  ;;  %v9316_v61 = vld [vmem:[#allocation10 + $0x220] sm:$0xff] }
 0x597   :  { %v4371_v45 = vpop.eup %4370  ;;  %11744 = vst [vmem:[#allocation180_spill] sm:$0xff] %v9316_v61 }
 0x598   :  { %3145 = vst [vmem:[#allocation11 + $0x28] sm:$0xff] %v9253_v27  ;;  %3164 = vmatmul.f32.vlgmr.msra.gmra.mxu0 %v9253_v27  ;;  %3204 = vmatmul.f32.vlgmr.msra.gmra.mxu2 %v9253_v27  ;;  %v9260_v22 = vadd.f32 1.0, %v4371_v45  ;;  %v9319_v45 = vld [vmem:[#allocation10 + $0x228] sm:$0xff] }
 0x599   :  { %3308 = vmatpush.msra.mxu0 %v9262_v14  ;;  %3348 = vmatpush.msra.mxu2 %v9265_v46 }
 0x59a   :  { %4374 = vrcp.f32 %v9260_v22  ;;  %v9288_v36 = vpop.eup %4372  ;;  %vm3113_vm7 = vweird.f32 %v9260_v22 }
 0x59b   :  { %3309 = vmatpush.msra.mxu0 %v9270_v15  ;;  %3349 = vmatpush.msra.mxu2 %v9273_v20  ;;  %v3094_v30 = vmul.f32 %v9288_v36, %v9255_v1  ;;  %vm3099_vm4 = vweird.f32 %v9288_v36 }
 0x59c   :  { %vm9356_vm8 = vmor %vm3098_vm6, %vm3099_vm4 }
 0x59d   :  { %3310 = vmatpush.msra.mxu0 %v9276_v43  ;;  %3350 = vmatpush.msra.mxu2 %v9279_v3  ;;  %v3095_v17 = vsub.f32 1.0, %v3094_v30  ;;  %v2977_v30 = vpop.f32.mrf.mxu2 }
 0x59f   :  { %3311 = vmatpush.msra.mxu0 %v9282_v11  ;;  %3351 = vmatpush.msra.mxu2 %v9285_v39  ;;  %v2957_v26 = vpop.f32.mrf.mxu1 }
 0x5a0   :  { %3244 = vmatmul.f32.vlgmr.msrb.gmra.mxu0 %v9253_v27  ;;  %3284 = vmatmul.f32.vlgmr.msrb.gmra.mxu2 %v9253_v27  ;;  %v9292_v44 = vpop.eup %4374  ;;  %v2958_v28 = vadd.f32 %v2957_v26, %v2937_v7 }
 0x5a1   :  { %3312 = vmatpush.msra.mxu0 %v9294_v21  ;;  %3352 = vmatpush.msra.mxu2 %v9297_v38  ;;  %v3109_v16 = vmul.f32 %v9292_v44, %v9260_v22  ;;  %v9330_v38 = vld [vmem:[#allocation10 + $0x1a0] sm:$0xff]  ;;  %vm3114_vm5 = vweird.f32 %v9292_v44 }
 0x5a2   :  { %11747 = vst [vmem:[#allocation185_spill] sm:$0xff] %v9330_v38  ;;  %vm9370_vm9 = vmor %vm3113_vm7, %vm3114_vm5 }
 0x5a3   :  { %3313 = vmatpush.msra.mxu0 %v9304_v2  ;;  %3353 = vmatpush.msra.mxu2 %v9307_v5  ;;  %v3110_v40 = vsub.f32 1.0, %v3109_v16  ;;  %v3016_v5 = vadd.f32 %v3012_v47, %v2958_v28  ;;  %v9322_v2 = vld [vmem:[#allocation10 + $0x1e0] sm:$0xff]  ;;  %v9333_v47 = vld [vmem:[#allocation10 + $0x1a8] sm:$0xff] }
 0x5a4   :  { %11745 = vst [vmem:[#allocation181_spill] sm:$0xff] %v9322_v2 }
 0x5a5   :  { %3314 = vmatpush.msra.mxu0 %v9310_v31  ;;  %3354 = vmatpush.msra.mxu2 %v9313_v49  ;;  %v9325_v31 = vld [vmem:[#allocation10 + $0x1e8] sm:$0xff]  ;;  %v4167_v7 = vmul.f32 -1.442695, %v3016_v5  ;;  %v3111_v16 = vmul.f32 %v9292_v44, %v3110_v40  ;;  %v3013_v49 = vld [vmem:[#allocation8 + $0x58] sm:$0xff]  ;;  %11748 = vst [vmem:[#allocation183_spill] sm:$0xff] %v9333_v47 }
 0x5a6   :  { %11746 = vst [vmem:[#allocation182_spill] sm:$0xff] %v9325_v31  ;;  %v2997_v26 = vpop.f32.mrf.mxu3  ;;  %v9339_v5 = vld [vmem:[#allocation10 + $0x168] sm:$0xff] }
 0x5a7   :  { %3315 = vmatpush.msra.mxu0 %v9316_v61  ;;  %3355 = vmatpush.msra.mxu2 %v9319_v45  ;;  %v3096_v61 = vmul.f32 %v9288_v36, %v3095_v17  ;;  %4376 = vpow2.f32 %v4167_v7  ;;  %v2998_v28 = vadd.f32 %v2997_v26, %v2977_v30  ;;  %11750 = vst [vmem:[#allocation186_spill] sm:$0xff] %v9339_v5  ;;  %v9349_v7 = vld [vmem:[#allocation10 + $0x128] sm:$0xff]  ;;  %v3119_v30 = vand.u32 2147483648, %v9260_v22 }
 0x5a8   :  { %11752 = vst [vmem:[#allocation188_spill] sm:$0xff] %v9349_v7  ;;  %v3117_v26 = vand.u32 2147483647, %v9260_v22 }
 0x5a9   :  { %3316 = vmatpush.msra.mxu0 %v9322_v2  ;;  %3356 = vmatpush.msra.mxu2 %v9325_v31  ;;  %v9336_v2 = vld [vmem:[#allocation10 + $0x160] sm:$0xff]  ;;  %v3017_v40 = vadd.f32 %v3013_v49, %v2998_v28  ;;  %v3097_v17 = vadd.f32 %v9288_v36, %v3096_v61  ;;  %v3104_v49 = vand.u32 2147483648, %v9255_v1 }
 0x5aa   :  { %11749 = vst [vmem:[#allocation184_spill] sm:$0xff] %v9336_v2  ;;  %v9362_v28 = vld [vmem:[#allocation10 + $0xe0] sm:$0xff]  ;;  %vm3118_vm11 = vcmp.eq.f32.partialorder %v3117_v26, 8.507059e+37 }
 0x5ab   :  { %3317 = vmatpush.msra.mxu0 %v9330_v38  ;;  %3357 = vmatpush.msra.mxu2 %v9333_v47  ;;  %v3112_v38 = vadd.f32 %v9292_v44, %v3111_v16  ;;  %v9346_v47 = vld [vmem:[#allocation10 + $0x120] sm:$0xff]  ;;  %4378 = vtanh.f32 %v3017_v40  ;;  %v3102_v16 = vand.u32 2147483647, %v9255_v1  ;;  %11755 = vst [vmem:[#allocation189_spill] sm:$0xff] %v9362_v28  ;;  %v3101_v1 = vsel %vm9356_vm8, %v9288_v36, %v3097_v17  ;;  %v9392_v36 = vld [vmem:[#allocation10 + $0x68] sm:$0xff] }
 0x5ac   :  { %11751 = vst [vmem:[#allocation187_spill] sm:$0xff] %v9346_v47  ;;  %v3105_v31 = vor.u32 1.1754944e-38, %v3104_v49  ;;  %v9395_v40 = vld [vmem:[#allocation10 + $0x20] sm:$0xff] }
 0x5ad   :  { %3318 = vmatpush.msra.mxu0 %v9336_v2  ;;  %3358 = vmatpush.msra.mxu2 %v9339_v5  ;;  %v3116_v22 = vsel %vm9370_vm9, %v9292_v44, %v3112_v38  ;;  %v3120_v2 = vor.u32 1.1754944e-38, %v3119_v30  ;;  %vm3103_vm10 = vcmp.eq.f32.partialorder %v3102_v16, 8.507059e+37  ;;  %v9398_v30 = vld [vmem:[#allocation10 + $0x28] sm:$0xff]  ;;  %v9404_v16 = vld [vmem:[#allocation10 + $0x3f0] sm:$0xff] }
 0x5ae   :  { %v3106_v38 = vsel %vm3103_vm10, %v3105_v31, %v3101_v1  ;;  %11759 = vst [vmem:[#allocation191_spill] sm:$0xff] %v9398_v30  ;;  %v9412_v1 = vld [vmem:[#allocation10 + $0x3b0] sm:$0xff] }
 0x5af   :  { %3319 = vmatpush.msra.mxu0 %v9346_v47  ;;  %3359 = vmatpush.msra.mxu2 %v9349_v7  ;;  %v9365_v7 = vld [vmem:[#allocation10 + $0xe8] sm:$0xff]  ;;  %v4377_v47 = vpop.eup %4376  ;;  %v3121_v17 = vsel %vm3118_vm11, %v3120_v2, %v3116_v22  ;;  %11760 = vst [vmem:[#allocation192_spill] sm:$0xff] %v9404_v16  ;;  %v9407_v2 = vld [vmem:[#allocation10 + $0x3f8] sm:$0xff] }
 0x5b0   :  { %11756 = vst [vmem:[#allocation190_spill] sm:$0xff] %v9365_v7  ;;  %v9374_v5 = vadd.f32 1.0, %v4377_v47  ;;  %v9389_v47 = vld [vmem:[#allocation10 + $0x60] sm:$0xff]  ;;  %v3139_v49 = vmul.f32 %v3121_v17, %v8658_v33  ;;  %v9415_v22 = vld [vmem:[#allocation10 + $0x3b8] sm:$0xff] }
 0x5b1   :  { %3320 = vmatpush.msra.mxu0 %v9362_v28  ;;  %3360 = vmatpush.msra.mxu2 %v9365_v7  ;;  %v9382_v28 = vld [vmem:[#allocation10 + $0xa0] sm:$0xff]  ;;  %v9385_v7 = vld [vmem:[#allocation10 + $0xa8] sm:$0xff]  ;;  %v4379_v44 = vpop.eup %4378  ;;  %11761 = vst [vmem:[#allocation193_spill] sm:$0xff] %v9407_v2 }
 0x5b2   :  { %4380 = vrcp.f32 %v9374_v5  ;;  %v3140_v61 = vmul.f32 %v4379_v44, %v3106_v38  ;;  %11763 = vst [vmem:[#allocation195_spill] sm:$0xff] %v9412_v1  ;;  %v9419_v44 = vld [vmem:[#allocation10 + $0x370] sm:$0xff]  ;;  %v9422_v38 = vld [vmem:[#allocation10 + $0x378] sm:$0xff]  ;;  %vm3128_vm13 = vweird.f32 %v9374_v5 }
 0x5b3   :  { %3321 = vmatpush.msra.mxu0 %v9382_v28  ;;  %3361 = vmatpush.msra.mxu2 %v9385_v7  ;;  %11764 = vst [vmem:[#allocation196_spill] sm:$0xff] %v9415_v22 }
 0x5b4   :  { %v9410_v26 = vadd.f32 %v3140_v61, %v3139_v49  ;;  %11765 = vst [vmem:[#allocation197_spill] sm:$0xff] %v9419_v44  ;;  %v3134_v61 = vand.u32 2147483648, %v9374_v5  ;;  %v9427_v49 = vld [vmem:[#allocation10 + $0x330] sm:$0xff] }
 0x5b5   :  { %3322 = vmatpush.msra.mxu0 %v9389_v47  ;;  %3362 = vmatpush.msra.mxu2 %v9392_v36  ;;  %11766 = vst [vmem:[#allocation198_spill] sm:$0xff] %v9422_v38 }
 0x5b6   :  { %11762 = vst [vmem:[#allocation194_spill] sm:$0xff] %v9410_v26  ;;  %4382 = vtanh.f32 %v9410_v26 }
 0x5b7   :  { %3323 = vmatpush.msra.mxu0 %v9395_v40  ;;  %3363 = vmatpush.msra.mxu2 %v9398_v30  ;;  %11767 = vst [vmem:[#allocation36_spill] sm:$0xff] %v9427_v49  ;;  %v9447_v30 = vld [vmem:[#allocation10 + $0x270] sm:$0xff] }
 0x5b8   :  { %3324 = vmatmul.f32.vlgmr.msra.gmra.mxu0 %v9253_v27  ;;  %3364 = vmatmul.f32.vlgmr.msra.gmra.mxu2 %v9253_v27  ;;  %v4381_v31 = vpop.eup %4380 }
 0x5b9   :  { %3388 = vmatpush.msrb.mxu0 %v9404_v16  ;;  %3428 = vmatpush.msrb.mxu2 %v9407_v2  ;;  %v3124_v33 = vmul.f32 %v4381_v31, %v9374_v5  ;;  %vm3129_vm12 = vweird.f32 %v4381_v31  ;;  %v9434_v2 = vld [vmem:[#allocation10 + $0x2f0] sm:$0xff] }
 0x5ba   :  { %11769 = vst [vmem:[#allocation43_spill] sm:$0xff] %v9434_v2  ;;  %vm3130_vm14 = vmor %vm3128_vm13, %vm3129_vm12  ;;  %v9441_v16 = vld [vmem:[#allocation10 + $0x2b0] sm:$0xff] }
 0x5bb   :  { %3389 = vmatpush.msrb.mxu0 %v9412_v1  ;;  %3429 = vmatpush.msrb.mxu2 %v9415_v22  ;;  %v3125_v17 = vsub.f32 1.0, %v3124_v33  ;;  %v9430_v22 = vld [vmem:[#allocation10 + $0x338] sm:$0xff]  ;;  %11770 = vst [vmem:[#allocation38_spill] sm:$0xff] %v9441_v16 }
 0x5bc   :  { %11768 = vst [vmem:[#allocation41_spill] sm:$0xff] %v9430_v22  ;;  %v9437_v33 = vld [vmem:[#allocation10 + $0x2f8] sm:$0xff] }
 0x5bd   :  { %3390 = vmatpush.msrb.mxu0 %v9419_v44  ;;  %3430 = vmatpush.msrb.mxu2 %v9422_v38  ;;  %v3126_v1 = vmul.f32 %v4381_v31, %v3125_v17  ;;  %v3132_v44 = vand.u32 2147483647, %v9374_v5  ;;  %v9444_v17 = vld [vmem:[#allocation10 + $0x2b8] sm:$0xff] }
 0x5bf   :  { %3391 = vmatpush.msrb.mxu0 %v9427_v49  ;;  %3431 = vmatpush.msrb.mxu2 %v9430_v22  ;;  %v3127_v38 = vadd.f32 %v4381_v31, %v3126_v1  ;;  %v3135_v49 = vor.u32 1.1754944e-38, %v3134_v61  ;;  %vm3133_vm15 = vcmp.eq.f32.partialorder %v3132_v44, 8.507059e+37  ;;  %v9450_v1 = vld [vmem:[#allocation10 + $0x278] sm:$0xff]  ;;  %v9455_v61 = vld [vmem:[#allocation10 + $0x230] sm:$0xff]  ;;  %v11785_v44 = vld [vmem:[#allocation66_spill] sm:$0xff] }
 0x5c1   :  { %3392 = vmatpush.msrb.mxu0 %v9434_v2  ;;  %3432 = vmatpush.msrb.mxu2 %v9437_v33  ;;  %v3131_v22 = vsel %vm3130_vm14, %v4381_v31, %v3127_v38  ;;  %v4383_v2 = vpop.eup %4382  ;;  %v9469_v31 = vld [vmem:[#allocation10 + $0x1f8] sm:$0xff]  ;;  %v11786_v38 = vld [vmem:[#allocation35_spill] sm:$0xff] }
 0x5c2   :  { %v3136_v26 = vsel %vm3133_vm15, %v3135_v49, %v3131_v22  ;;  %v9477_v22 = vld [vmem:[#allocation10 + $0x1b8] sm:$0xff]  ;;  %v11787_v49 = vld [vmem:[#allocation30_spill] sm:$0xff] }
 0x5c3   :  { %3393 = vmatpush.msrb.mxu0 %v9441_v16  ;;  %3433 = vmatpush.msrb.mxu2 %v9444_v17  ;;  %v9453_v5 = vmul.f32 %v4383_v2, %v3136_v26  ;;  %v9458_v16 = vld [vmem:[#allocation10 + $0x238] sm:$0xff]  ;;  %v9466_v2 = vld [vmem:[#allocation10 + $0x1f0] sm:$0xff] }
 0x5c4   :  { %v9474_v26 = vld [vmem:[#allocation10 + $0x1b0] sm:$0xff] }
 0x5c5   :  { %3394 = vmatpush.msrb.mxu0 %v9447_v30  ;;  %3434 = vmatpush.msrb.mxu2 %v9450_v1  ;;  %3147 = vst [vmem:[#allocation12 + $0x10] sm:$0xff] %v9453_v5 }
 0x5c6   :  { %3184 = vmatmul.f32.vlgmr.msra.gmra.mxu1 %v9453_v5  ;;  %3224 = vmatmul.f32.vlgmr.msra.gmra.mxu3 %v9453_v5 }
 0x5c7   :  { %3395 = vmatpush.msrb.mxu0 %v9455_v61  ;;  %3435 = vmatpush.msrb.mxu2 %v9458_v16 }
 0x5c8   :  { %3328 = vmatpush.msra.mxu1 %v8680_v34  ;;  %3368 = vmatpush.msra.mxu3 %v8683_v54  ;;  %v9482_v34 = vld [vmem:[#allocation10 + $0x170] sm:$0xff]  ;;  %v9485_v54 = vld [vmem:[#allocation10 + $0x178] sm:$0xff] }
 0x5c9   :  { %3396 = vmatpush.msrb.mxu0 %v9466_v2  ;;  %3436 = vmatpush.msrb.mxu2 %v9469_v31 }
 0x5ca   :  { %3329 = vmatpush.msra.mxu1 %v8688_v12  ;;  %3369 = vmatpush.msra.mxu3 %v8691_v4  ;;  %v9494_v12 = vld [vmem:[#allocation10 + $0x130] sm:$0xff]  ;;  %v9497_v4 = vld [vmem:[#allocation10 + $0x138] sm:$0xff] }
 0x5cb   :  { %3397 = vmatpush.msrb.mxu0 %v9474_v26  ;;  %3437 = vmatpush.msrb.mxu2 %v9477_v22 }
 0x5cc   :  { %3330 = vmatpush.msra.mxu1 %v8696_v29  ;;  %3370 = vmatpush.msra.mxu3 %v8699_v58  ;;  %v9502_v29 = vld [vmem:[#allocation10 + $0xf0] sm:$0xff]  ;;  %v9505_v58 = vld [vmem:[#allocation10 + $0xf8] sm:$0xff] }
 0x5cd   :  { %3398 = vmatpush.msrb.mxu0 %v9482_v34  ;;  %3438 = vmatpush.msrb.mxu2 %v9485_v54 }
 0x5ce   :  { %3331 = vmatpush.msra.mxu1 %v8704_v35  ;;  %3371 = vmatpush.msra.mxu3 %v8707_v13  ;;  %v9510_v35 = vld [vmem:[#allocation10 + $0xb0] sm:$0xff]  ;;  %v9513_v13 = vld [vmem:[#allocation10 + $0xb8] sm:$0xff] }
 0x5cf   :  { %3264 = vmatmul.f32.vlgmr.msrb.gmra.mxu1 %v9453_v5  ;;  %3304 = vmatmul.f32.vlgmr.msrb.gmra.mxu3 %v9453_v5 }
 0x5d0   :  { %3332 = vmatpush.msra.mxu1 %v8712_v6  ;;  %3372 = vmatpush.msra.mxu3 %v8715_v60  ;;  %v9518_v6 = vld [vmem:[#allocation10 + $0x70] sm:$0xff]  ;;  %v9521_v60 = vld [vmem:[#allocation10 + $0x78] sm:$0xff] }
 0x5d1   :  { %3399 = vmatpush.msrb.mxu0 %v9494_v12  ;;  %3439 = vmatpush.msrb.mxu2 %v9497_v4  ;;  %11771 = vst [vmem:[#allocation18_spill] sm:$0xff] %v9521_v60 }
 0x5d2   :  { %3333 = vmatpush.msra.mxu1 %v8720_v18  ;;  %3373 = vmatpush.msra.mxu3 %v8723_v19  ;;  %v9526_v18 = vld [vmem:[#allocation10 + $0x30] sm:$0xff]  ;;  %v9529_v19 = vld [vmem:[#allocation10 + $0x38] sm:$0xff] }
 0x5d3   :  { %3400 = vmatpush.msrb.mxu0 %v9502_v29  ;;  %3440 = vmatpush.msrb.mxu2 %v9505_v58  ;;  %11772 = vst [vmem:[#allocation21_spill] sm:$0xff] %v9526_v18 }
 0x5d4   :  { %3334 = vmatpush.msra.mxu1 %v8728_v24  ;;  %3374 = vmatpush.msra.mxu3 %v8731_v10  ;;  %11773 = vst [vmem:[#allocation47_spill] sm:$0xff] %v9529_v19  ;;  %v5216_v24 = vld [vmem:[#allocation10 + $0x3c0] sm:$0xff]  ;;  %v5217_v10 = vld [vmem:[#allocation10 + $0x3c8] sm:$0xff] }
 0x5d5   :  { %3401 = vmatpush.msrb.mxu0 %v9510_v35  ;;  %3441 = vmatpush.msrb.mxu2 %v9513_v13 }
 0x5d6   :  { %3335 = vmatpush.msra.mxu1 %v8736_v0  ;;  %3375 = vmatpush.msra.mxu3 %v8739_v41  ;;  %v5218_v0 = vld [vmem:[#allocation10 + $0x380] sm:$0xff]  ;;  %v5219_v41 = vld [vmem:[#allocation10 + $0x388] sm:$0xff] }
 0x5d7   :  { %3402 = vmatpush.msrb.mxu0 %v9518_v6  ;;  %3442 = vmatpush.msrb.mxu2 %v9521_v60 }
 0x5d8   :  { %3336 = vmatpush.msra.mxu1 %v8744_v32  ;;  %3376 = vmatpush.msra.mxu3 %v8747_v48  ;;  %v5220_v32 = vld [vmem:[#allocation10 + $0x340] sm:$0xff]  ;;  %v5221_v48 = vld [vmem:[#allocation10 + $0x348] sm:$0xff] }
 0x5d9   :  { %3403 = vmatpush.msrb.mxu0 %v9526_v18  ;;  %3443 = vmatpush.msrb.mxu2 %v9529_v19 }
 0x5da   :  { %3404 = vmatmul.f32.vlgmr.msrb.gmra.mxu0 %v9253_v27  ;;  %3444 = vmatmul.f32.vlgmr.msrb.gmra.mxu2 %v9253_v27  ;;  %v11784_v27 = vld [vmem:[#allocation71_spill] sm:$0xff] }
 0x5db   :  { %3337 = vmatpush.msra.mxu1 %v8754_v42  ;;  %3377 = vmatpush.msra.mxu3 %v8757_v9  ;;  %v5222_v42 = vld [vmem:[#allocation10 + $0x300] sm:$0xff]  ;;  %v5223_v9 = vld [vmem:[#allocation10 + $0x308] sm:$0xff] }
 0x5dc   :  { %3616 = vmatpush.msra.mxu0 %v5216_v24  ;;  %3656 = vmatpush.msra.mxu2 %v5217_v10  ;;  %v11788_v24 = vld [vmem:[#allocation72_spill] sm:$0xff]  ;;  %v11789_v10 = vld [vmem:[#allocation73_spill] sm:$0xff] }
 0x5dd   :  { %3338 = vmatpush.msra.mxu1 %v8762_v23  ;;  %3378 = vmatpush.msra.mxu3 %v8765_v57  ;;  %v5224_v23 = vld [vmem:[#allocation10 + $0x2c0] sm:$0xff]  ;;  %v5225_v57 = vld [vmem:[#allocation10 + $0x2c8] sm:$0xff] }
 0x5de   :  { %3617 = vmatpush.msra.mxu0 %v5218_v0  ;;  %3657 = vmatpush.msra.mxu2 %v5219_v41  ;;  %v11790_v0 = vld [vmem:[#allocation32_spill] sm:$0xff]  ;;  %v11791_v41 = vld [vmem:[#allocation37_spill] sm:$0xff] }
 0x5df   :  { %3339 = vmatpush.msra.mxu1 %v8770_v25  ;;  %3379 = vmatpush.msra.mxu3 %v8773_v53  ;;  %v5226_v25 = vld [vmem:[#allocation10 + $0x280] sm:$0xff]  ;;  %v11774_v53 = vld [vmem:[#allocation24_spill] sm:$0xff] }
 0x5e0   :  { %3618 = vmatpush.msra.mxu0 %v5220_v32  ;;  %3658 = vmatpush.msra.mxu2 %v5221_v48  ;;  %v11792_v32 = vld [vmem:[#allocation76_spill] sm:$0xff]  ;;  %v11793_v48 = vld [vmem:[#allocation77_spill] sm:$0xff] }
 0x5e1   :  { %3340 = vmatpush.msra.mxu1 %v8778_v55  ;;  %3380 = vmatpush.msra.mxu3 %v8781_v37  ;;  %v11775_v55 = vld [vmem:[#allocation29_spill] sm:$0xff]  ;;  %v11776_v37 = vld [vmem:[#allocation63_spill] sm:$0xff] }
 0x5e2   :  { %3619 = vmatpush.msra.mxu0 %v5222_v42  ;;  %3659 = vmatpush.msra.mxu2 %v5223_v9  ;;  %v11794_v42 = vld [vmem:[#allocation39_spill] sm:$0xff]  ;;  %v11795_v9 = vld [vmem:[#allocation34_spill] sm:$0xff] }
 0x5e3   :  { %3341 = vmatpush.msra.mxu1 %v8786_v50  ;;  %3381 = vmatpush.msra.mxu3 %v8789_v63  ;;  %v11777_v50 = vld [vmem:[#allocation58_spill] sm:$0xff]  ;;  %v11778_v63 = vld [vmem:[#allocation31_spill] sm:$0xff] }
 0x5e4   :  { %3620 = vmatpush.msra.mxu0 %v5224_v23  ;;  %3660 = vmatpush.msra.mxu2 %v5225_v57  ;;  %v11796_v23 = vld [vmem:[#allocation80_spill] sm:$0xff]  ;;  %v11797_v57 = vld [vmem:[#allocation81_spill] sm:$0xff] }
 0x5e5   :  { %3342 = vmatpush.msra.mxu1 %v8794_v8  ;;  %3382 = vmatpush.msra.mxu3 %v8797_v51  ;;  %v11779_v8 = vld [vmem:[#allocation26_spill] sm:$0xff]  ;;  %v11780_v51 = vld [vmem:[#allocation67_spill] sm:$0xff] }
 0x5e6   :  { %3621 = vmatpush.msra.mxu0 %v5226_v25  ;;  %3661 = vmatpush.msra.mxu2 %v8801_v52  ;;  %v11781_v52 = vld [vmem:[#allocation62_spill] sm:$0xff]  ;;  %v11798_v25 = vld [vmem:[#allocation40_spill] sm:$0xff] }
 0x5e7   :  { %3343 = vmatpush.msra.mxu1 %v8804_v62  ;;  %3383 = vmatpush.msra.mxu3 %v8807_v59  ;;  %v11782_v62 = vld [vmem:[#allocation28_spill] sm:$0xff]  ;;  %v11783_v59 = vld [vmem:[#allocation33_spill] sm:$0xff] }
 0x5e8   :  { %3344 = vmatmul.f32.vlgmr.msra.gmra.mxu1 %v9453_v5  ;;  %3384 = vmatmul.f32.vlgmr.msra.gmra.mxu3 %v9453_v5 }
 0x5e9   :  { %3408 = vmatpush.msrb.mxu1 %v11774_v53  ;;  %3448 = vmatpush.msrb.mxu3 %v11775_v55  ;;  %v11799_v53 = vld [vmem:[#allocation45_spill] sm:$0xff]  ;;  %v11800_v55 = vld [vmem:[#allocation84_spill] sm:$0xff] }
 0x5ea   :  { %3622 = vmatpush.msra.mxu0 %v11776_v37  ;;  %3662 = vmatpush.msra.mxu2 %v11777_v50  ;;  %v11801_v37 = vld [vmem:[#allocation85_spill] sm:$0xff]  ;;  %v11802_v50 = vld [vmem:[#allocation44_spill] sm:$0xff] }
 0x5eb   :  { %3409 = vmatpush.msrb.mxu1 %v11778_v63  ;;  %3449 = vmatpush.msrb.mxu3 %v11779_v8  ;;  %v11803_v63 = vld [vmem:[#allocation49_spill] sm:$0xff]  ;;  %v11804_v8 = vld [vmem:[#allocation88_spill] sm:$0xff] }
 0x5ec   :  { %3623 = vmatpush.msra.mxu0 %v11780_v51  ;;  %3663 = vmatpush.msra.mxu2 %v11781_v52  ;;  %v11805_v51 = vld [vmem:[#allocation89_spill] sm:$0xff]  ;;  %v11806_v52 = vld [vmem:[#allocation48_spill] sm:$0xff] }
 0x5ed   :  { %3410 = vmatpush.msrb.mxu1 %v11782_v62  ;;  %3450 = vmatpush.msrb.mxu3 %v11783_v59  ;;  %v11807_v62 = vld [vmem:[#allocation53_spill] sm:$0xff]  ;;  %v11808_v59 = vld [vmem:[#allocation92_spill] sm:$0xff] }
 0x5ee   :  { %3624 = vmatpush.msra.mxu0 %v11784_v27  ;;  %3664 = vmatpush.msra.mxu2 %v11785_v44  ;;  %v11809_v27 = vld [vmem:[#allocation93_spill] sm:$0xff]  ;;  %v11810_v44 = vld [vmem:[#allocation52_spill] sm:$0xff] }
 0x5ef   :  { %3411 = vmatpush.msrb.mxu1 %v11786_v38  ;;  %3451 = vmatpush.msrb.mxu3 %v11787_v49  ;;  %v11811_v38 = vld [vmem:[#allocation57_spill] sm:$0xff]  ;;  %v11812_v49 = vld [vmem:[#allocation96_spill] sm:$0xff] }
 0x5f0   :  { %3625 = vmatpush.msra.mxu0 %v11788_v24  ;;  %3665 = vmatpush.msra.mxu2 %v11789_v10  ;;  %v11813_v24 = vld [vmem:[#allocation97_spill] sm:$0xff]  ;;  %v11814_v10 = vld [vmem:[#allocation56_spill] sm:$0xff] }
 0x5f1   :  { %3412 = vmatpush.msrb.mxu1 %v11790_v0  ;;  %3452 = vmatpush.msrb.mxu3 %v11791_v41  ;;  %v11815_v0 = vld [vmem:[#allocation61_spill] sm:$0xff]  ;;  %v11816_v41 = vld [vmem:[#allocation100_spill] sm:$0xff] }
 0x5f2   :  { %3626 = vmatpush.msra.mxu0 %v11792_v32  ;;  %3666 = vmatpush.msra.mxu2 %v11793_v48  ;;  %v11817_v32 = vld [vmem:[#allocation101_spill] sm:$0xff]  ;;  %v11818_v48 = vld [vmem:[#allocation60_spill] sm:$0xff] }
 0x5f3   :  { %3413 = vmatpush.msrb.mxu1 %v11794_v42  ;;  %3453 = vmatpush.msrb.mxu3 %v11795_v9  ;;  %v11819_v42 = vld [vmem:[#allocation65_spill] sm:$0xff]  ;;  %v11820_v9 = vld [vmem:[#allocation64_spill] sm:$0xff] }
 0x5f4   :  { %3627 = vmatpush.msra.mxu0 %v11796_v23  ;;  %3667 = vmatpush.msra.mxu2 %v11797_v57  ;;  %v11821_v23 = vld [vmem:[#allocation69_spill] sm:$0xff]  ;;  %v11822_v57 = vld [vmem:[#allocation68_spill] sm:$0xff] }
 0x5f5   :  { %3414 = vmatpush.msrb.mxu1 %v11798_v25  ;;  %3454 = vmatpush.msrb.mxu3 %v11799_v53  ;;  %v11823_v25 = vld [vmem:[#allocation70_spill] sm:$0xff] }
 0x5f6   :  { %3628 = vmatpush.msra.mxu0 %v11800_v55  ;;  %3668 = vmatpush.msra.mxu2 %v11801_v37  ;;  %v11824_v53 = vld [vmem:[#allocation74_spill] sm:$0xff]  ;;  %v11825_v55 = vld [vmem:[#allocation75_spill] sm:$0xff] }
 0x5f7   :  { %3415 = vmatpush.msrb.mxu1 %v11802_v50  ;;  %3455 = vmatpush.msrb.mxu3 %v11803_v63  ;;  %v11826_v37 = vld [vmem:[#allocation78_spill] sm:$0xff]  ;;  %v11827_v50 = vld [vmem:[#allocation79_spill] sm:$0xff] }
 0x5f8   :  { %3629 = vmatpush.msra.mxu0 %v11804_v8  ;;  %3669 = vmatpush.msra.mxu2 %v11805_v51  ;;  %v11828_v63 = vld [vmem:[#allocation82_spill] sm:$0xff]  ;;  %v11829_v8 = vld [vmem:[#allocation83_spill] sm:$0xff]  ;;  %v11830_v51 = vld [vmem:[#allocation104_spill] sm:$0xff] }
 0x5f9   :  { %3416 = vmatpush.msrb.mxu1 %v11806_v52  ;;  %3456 = vmatpush.msrb.mxu3 %v11807_v62  ;;  %v11831_v52 = vld [vmem:[#allocation86_spill] sm:$0xff]  ;;  %v11832_v62 = vld [vmem:[#allocation87_spill] sm:$0xff] }
 0x5fa   :  { %3630 = vmatpush.msra.mxu0 %v11808_v59  ;;  %3670 = vmatpush.msra.mxu2 %v11809_v27  ;;  %v11833_v59 = vld [vmem:[#allocation105_spill] sm:$0xff]  ;;  %v11834_v27 = vld [vmem:[#allocation106_spill] sm:$0xff] }
 0x5fb   :  { %3417 = vmatpush.msrb.mxu1 %v11810_v44  ;;  %3457 = vmatpush.msrb.mxu3 %v11811_v38  ;;  %v11835_v44 = vld [vmem:[#allocation90_spill] sm:$0xff]  ;;  %v11836_v38 = vld [vmem:[#allocation91_spill] sm:$0xff] }
 0x5fc   :  { %3631 = vmatpush.msra.mxu0 %v11812_v49  ;;  %3671 = vmatpush.msra.mxu2 %v11813_v24  ;;  %v11837_v49 = vld [vmem:[#allocation107_spill] sm:$0xff]  ;;  %v5227_v24 = vld [vmem:[#allocation10 + $0x7c0] sm:$0xff] }
 0x5fd   :  { %3418 = vmatpush.msrb.mxu1 %v11814_v10  ;;  %3458 = vmatpush.msrb.mxu3 %v11815_v0  ;;  %v5228_v10 = vld [vmem:[#allocation10 + $0x7c8] sm:$0xff]  ;;  %v11838_v0 = vld [vmem:[#allocation108_spill] sm:$0xff] }
 0x5fe   :  { %3696 = vmatpush.msrb.mxu0 %v11816_v41  ;;  %3736 = vmatpush.msrb.mxu2 %v11817_v32  ;;  %v11839_v41 = vld [vmem:[#allocation94_spill] sm:$0xff] }
 0x5ff   :  { %3419 = vmatpush.msrb.mxu1 %v11818_v48  ;;  %3459 = vmatpush.msrb.mxu3 %v11819_v42  ;;  %v5229_v32 = vld [vmem:[#allocation10 + $0x780] sm:$0xff]  ;;  %v5230_v48 = vld [vmem:[#allocation10 + $0x788] sm:$0xff] }
 0x600   :  { %3697 = vmatpush.msrb.mxu0 %v11820_v9  ;;  %3737 = vmatpush.msrb.mxu2 %v11821_v23  ;;  %v11840_v42 = vld [vmem:[#allocation95_spill] sm:$0xff]  ;;  %v11841_v9 = vld [vmem:[#allocation109_spill] sm:$0xff] }
 0x601   :  { %3420 = vmatpush.msrb.mxu1 %v11822_v57  ;;  %3460 = vmatpush.msrb.mxu3 %v11823_v25  ;;  %v5232_v23 = vld [vmem:[#allocation10 + $0x748] sm:$0xff]  ;;  %v11842_v57 = vld [vmem:[#allocation110_spill] sm:$0xff] }
 0x602   :  { %3698 = vmatpush.msrb.mxu0 %v11824_v53  ;;  %3738 = vmatpush.msrb.mxu2 %v11825_v55  ;;  %v11843_v25 = vld [vmem:[#allocation98_spill] sm:$0xff]  ;;  %v5234_v55 = vld [vmem:[#allocation10 + $0x708] sm:$0xff] }
 0x603   :  { %3421 = vmatpush.msrb.mxu1 %v11826_v37  ;;  %3461 = vmatpush.msrb.mxu3 %v11827_v50  ;;  %v5233_v53 = vld [vmem:[#allocation10 + $0x700] sm:$0xff]  ;;  %v11844_v37 = vld [vmem:[#allocation99_spill] sm:$0xff] }
 0x604   :  { %3699 = vmatpush.msrb.mxu0 %v11828_v63  ;;  %3739 = vmatpush.msrb.mxu2 %v11829_v8  ;;  %v11845_v50 = vld [vmem:[#allocation111_spill] sm:$0xff]  ;;  %v5235_v63 = vld [vmem:[#allocation10 + $0x6c0] sm:$0xff] }
 0x605   :  { %3422 = vmatpush.msrb.mxu1 %v11830_v51  ;;  %3462 = vmatpush.msrb.mxu3 %v11831_v52  ;;  %v5236_v8 = vld [vmem:[#allocation10 + $0x6c8] sm:$0xff]  ;;  %v11846_v51 = vld [vmem:[#allocation112_spill] sm:$0xff]  ;;  %v11847_v52 = vld [vmem:[#allocation102_spill] sm:$0xff] }
 0x606   :  { %3700 = vmatpush.msrb.mxu0 %v11832_v62  ;;  %3740 = vmatpush.msrb.mxu2 %v11833_v59  ;;  %v5237_v62 = vld [vmem:[#allocation10 + $0x680] sm:$0xff]  ;;  %v11848_v59 = vld [vmem:[#allocation103_spill] sm:$0xff] }
 0x607   :  { %3423 = vmatpush.msrb.mxu1 %v11834_v27  ;;  %3463 = vmatpush.msrb.mxu3 %v11835_v44  ;;  %v11849_v27 = vld [vmem:[#allocation113_spill] sm:$0xff]  ;;  %v11850_v44 = vld [vmem:[#allocation114_spill] sm:$0xff] }
 0x608   :  { %3424 = vmatmul.f32.vlgmr.msrb.gmra.mxu1 %v9453_v5  ;;  %3464 = vmatmul.f32.vlgmr.msrb.gmra.mxu3 %v9453_v5  ;;  %v5231_v5 = vld [vmem:[#allocation10 + $0x740] sm:$0xff] }
 0x609   :  { %3701 = vmatpush.msrb.mxu0 %v11836_v38  ;;  %3741 = vmatpush.msrb.mxu2 %v11837_v49  ;;  %v11851_v38 = vld [vmem:[#allocation115_spill] sm:$0xff]  ;;  %v11852_v49 = vld [vmem:[#allocation116_spill] sm:$0xff] }
 0x60a   :  { %3636 = vmatpush.msra.mxu1 %v5227_v24  ;;  %3676 = vmatpush.msra.mxu3 %v5228_v10  ;;  %v11853_v24 = vld [vmem:[#allocation117_spill] sm:$0xff]  ;;  %v11854_v10 = vld [vmem:[#allocation118_spill] sm:$0xff] }
 0x60b   :  { %3702 = vmatpush.msrb.mxu0 %v11838_v0  ;;  %3742 = vmatpush.msrb.mxu2 %v11839_v41  ;;  %v11855_v0 = vld [vmem:[#allocation119_spill] sm:$0xff]  ;;  %v11856_v41 = vld [vmem:[#allocation120_spill] sm:$0xff] }
 0x60c   :  { %3637 = vmatpush.msra.mxu1 %v5229_v32  ;;  %3677 = vmatpush.msra.mxu3 %v5230_v48  ;;  %v11857_v32 = vld [vmem:[#allocation121_spill] sm:$0xff]  ;;  %v11858_v48 = vld [vmem:[#allocation122_spill] sm:$0xff] }
 0x60d   :  { %3703 = vmatpush.msrb.mxu0 %v11840_v42  ;;  %3743 = vmatpush.msrb.mxu2 %v11841_v9  ;;  %v11859_v42 = vld [vmem:[#allocation123_spill] sm:$0xff]  ;;  %v11860_v9 = vld [vmem:[#allocation124_spill] sm:$0xff] }
 0x60e   :  { %3638 = vmatpush.msra.mxu1 %v5231_v5  ;;  %3678 = vmatpush.msra.mxu3 %v5232_v23  ;;  %v11861_v5 = vld [vmem:[#allocation125_spill] sm:$0xff]  ;;  %v11862_v23 = vld [vmem:[#allocation126_spill] sm:$0xff] }
 0x60f   :  { %3704 = vmatpush.msrb.mxu0 %v11842_v57  ;;  %3744 = vmatpush.msrb.mxu2 %v11843_v25  ;;  %v11863_v57 = vld [vmem:[#allocation127_spill] sm:$0xff]  ;;  %v11864_v25 = vld [vmem:[#allocation128_spill] sm:$0xff] }
 0x610   :  { %3639 = vmatpush.msra.mxu1 %v5233_v53  ;;  %3679 = vmatpush.msra.mxu3 %v5234_v55  ;;  %v11865_v53 = vld [vmem:[#allocation129_spill] sm:$0xff]  ;;  %v11866_v55 = vld [vmem:[#allocation130_spill] sm:$0xff] }
 0x611   :  { %3705 = vmatpush.msrb.mxu0 %v11844_v37  ;;  %3745 = vmatpush.msrb.mxu2 %v11845_v50  ;;  %v11867_v37 = vld [vmem:[#allocation131_spill] sm:$0xff]  ;;  %v11868_v50 = vld [vmem:[#allocation134_spill] sm:$0xff] }
 0x612   :  { %3640 = vmatpush.msra.mxu1 %v5235_v63  ;;  %3680 = vmatpush.msra.mxu3 %v5236_v8  ;;  %v11869_v63 = vld [vmem:[#allocation135_spill] sm:$0xff]  ;;  %v11870_v8 = vld [vmem:[#allocation138_spill] sm:$0xff] }
 0x613   :  { %3706 = vmatpush.msrb.mxu0 %v11846_v51  ;;  %3746 = vmatpush.msrb.mxu2 %v11847_v52  ;;  %v11871_v51 = vld [vmem:[#allocation139_spill] sm:$0xff]  ;;  %v11872_v52 = vld [vmem:[#allocation142_spill] sm:$0xff] }
 0x614   :  { %3641 = vmatpush.msra.mxu1 %v5237_v62  ;;  %3681 = vmatpush.msra.mxu3 %v11848_v59  ;;  %v11873_v62 = vld [vmem:[#allocation143_spill] sm:$0xff]  ;;  %v11874_v59 = vld [vmem:[#allocation132_spill] sm:$0xff] }
 0x615   :  { %3707 = vmatpush.msrb.mxu0 %v11849_v27  ;;  %3747 = vmatpush.msrb.mxu2 %v11850_v44  ;;  %v11875_v27 = vld [vmem:[#allocation133_spill] sm:$0xff]  ;;  %v11876_v44 = vld [vmem:[#allocation136_spill] sm:$0xff] }
 0x616   :  { %3642 = vmatpush.msra.mxu1 %v11851_v38  ;;  %3682 = vmatpush.msra.mxu3 %v11852_v49  ;;  %v11877_v38 = vld [vmem:[#allocation137_spill] sm:$0xff]  ;;  %v11878_v49 = vld [vmem:[#allocation140_spill] sm:$0xff] }
 0x617   :  { %3708 = vmatpush.msrb.mxu0 %v11853_v24  ;;  %3748 = vmatpush.msrb.mxu2 %v11854_v10  ;;  %v11879_v24 = vld [vmem:[#allocation141_spill] sm:$0xff]  ;;  %v11880_v10 = vld [vmem:[#allocation144_spill] sm:$0xff] }
 0x618   :  { %3643 = vmatpush.msra.mxu1 %v11855_v0  ;;  %3683 = vmatpush.msra.mxu3 %v11856_v41  ;;  %v11881_v0 = vld [vmem:[#allocation145_spill] sm:$0xff]  ;;  %v11882_v41 = vld [vmem:[#allocation146_spill] sm:$0xff] }
 0x619   :  { %3709 = vmatpush.msrb.mxu0 %v11857_v32  ;;  %3749 = vmatpush.msrb.mxu2 %v11858_v48  ;;  %v11883_v32 = vld [vmem:[#allocation147_spill] sm:$0xff]  ;;  %v11884_v48 = vld [vmem:[#allocation148_spill] sm:$0xff] }
 0x61a   :  { %3644 = vmatpush.msra.mxu1 %v11859_v42  ;;  %3684 = vmatpush.msra.mxu3 %v11860_v9  ;;  %v11885_v42 = vld [vmem:[#allocation149_spill] sm:$0xff]  ;;  %v11886_v9 = vld [vmem:[#allocation150_spill] sm:$0xff] }
 0x61b   :  { %3710 = vmatpush.msrb.mxu0 %v11861_v5  ;;  %3750 = vmatpush.msrb.mxu2 %v11862_v23  ;;  %v11887_v5 = vld [vmem:[#allocation151_spill] sm:$0xff]  ;;  %v11888_v23 = vld [vmem:[#allocation152_spill] sm:$0xff] }
 0x61c   :  { %3645 = vmatpush.msra.mxu1 %v11863_v57  ;;  %3685 = vmatpush.msra.mxu3 %v11864_v25  ;;  %v11889_v57 = vld [vmem:[#allocation153_spill] sm:$0xff]  ;;  %v11890_v25 = vld [vmem:[#allocation154_spill] sm:$0xff] }
 0x61d   :  { %3711 = vmatpush.msrb.mxu0 %v11865_v53  ;;  %3751 = vmatpush.msrb.mxu2 %v11866_v55  ;;  %v11891_v53 = vld [vmem:[#allocation155_spill] sm:$0xff]  ;;  %v11892_v55 = vld [vmem:[#allocation156_spill] sm:$0xff] }
 0x61e   :  { %3646 = vmatpush.msra.mxu1 %v11867_v37  ;;  %3686 = vmatpush.msra.mxu3 %v11868_v50  ;;  %v11893_v37 = vld [vmem:[#allocation157_spill] sm:$0xff]  ;;  %v11894_v50 = vld [vmem:[#allocation158_spill] sm:$0xff] }
 0x620   :  { %3647 = vmatpush.msra.mxu1 %v11869_v63  ;;  %3687 = vmatpush.msra.mxu3 %v11870_v8  ;;  %v11895_v63 = vld [vmem:[#allocation159_spill] sm:$0xff]  ;;  %v11896_v8 = vld [vmem:[#allocation160_spill] sm:$0xff] }
 0x622   :  { %3648 = vmatpush.msra.mxu1 %v11871_v51  ;;  %3688 = vmatpush.msra.mxu3 %v11872_v52  ;;  %v11897_v51 = vld [vmem:[#allocation161_spill] sm:$0xff]  ;;  %v11898_v52 = vld [vmem:[#allocation162_spill] sm:$0xff] }
 0x624   :  { %3649 = vmatpush.msra.mxu1 %v11873_v62  ;;  %3689 = vmatpush.msra.mxu3 %v11874_v59  ;;  %v11899_v62 = vld [vmem:[#allocation163_spill] sm:$0xff]  ;;  %v11900_v59 = vld [vmem:[#allocation164_spill] sm:$0xff] }
 0x626   :  { %3650 = vmatpush.msra.mxu1 %v11875_v27  ;;  %3690 = vmatpush.msra.mxu3 %v11876_v44  ;;  %v11901_v27 = vld [vmem:[#allocation165_spill] sm:$0xff]  ;;  %v11902_v44 = vld [vmem:[#allocation166_spill] sm:$0xff] }
 0x628   :  { %3651 = vmatpush.msra.mxu1 %v11877_v38  ;;  %3691 = vmatpush.msra.mxu3 %v11878_v49  ;;  %v11903_v38 = vld [vmem:[#allocation167_spill] sm:$0xff]  ;;  %v11904_v49 = vld [vmem:[#allocation168_spill] sm:$0xff] }
 0x62a   :  { %3716 = vmatpush.msrb.mxu1 %v11879_v24  ;;  %3756 = vmatpush.msrb.mxu3 %v11880_v10  ;;  %v3165_v24 = vpop.f32.mrf.mxu0  ;;  %v11905_v10 = vld [vmem:[#allocation169_spill] sm:$0xff] }
 0x62c   :  { %3717 = vmatpush.msrb.mxu1 %v11881_v0  ;;  %3757 = vmatpush.msrb.mxu3 %v11882_v41  ;;  %v11906_v0 = vld [vmem:[#allocation170_spill] sm:$0xff] }
 0x62e   :  { %3718 = vmatpush.msrb.mxu1 %v11883_v32  ;;  %3758 = vmatpush.msrb.mxu3 %v11884_v48  ;;  %v3469_v32 = vld [vmem:[#allocation5 + $0xc0] sm:$0xff] }
 0x630   :  { %3719 = vmatpush.msrb.mxu1 %v11885_v42  ;;  %3759 = vmatpush.msrb.mxu3 %v11886_v9  ;;  %v11907_v42 = vld [vmem:[#allocation171_spill] sm:$0xff]  ;;  %v11908_v9 = vld [vmem:[#allocation172_spill] sm:$0xff] }
 0x632   :  { %3720 = vmatpush.msrb.mxu1 %v11887_v5  ;;  %3760 = vmatpush.msrb.mxu3 %v11888_v23  ;;  %v11909_v23 = vld [vmem:[#allocation173_spill] sm:$0xff] }
 0x634   :  { %3721 = vmatpush.msrb.mxu1 %v11889_v57  ;;  %3761 = vmatpush.msrb.mxu3 %v11890_v25  ;;  %v11910_v57 = vld [vmem:[#allocation174_spill] sm:$0xff] }
 0x636   :  { %3722 = vmatpush.msrb.mxu1 %v11891_v53  ;;  %3762 = vmatpush.msrb.mxu3 %v11892_v55  ;;  %v3205_v53 = vpop.f32.mrf.mxu2 }
 0x638   :  { %3723 = vmatpush.msrb.mxu1 %v11893_v37  ;;  %3763 = vmatpush.msrb.mxu3 %v11894_v50  ;;  %v3470_v37 = vld [vmem:[#allocation5 + $0xc8] sm:$0xff] }
 0x63a   :  { %3724 = vmatpush.msrb.mxu1 %v11895_v63  ;;  %3764 = vmatpush.msrb.mxu3 %v11896_v8  ;;  %v3245_v63 = vpop.f32.mrf.mxu0 }
 0x63c   :  { %3725 = vmatpush.msrb.mxu1 %v11897_v51  ;;  %3765 = vmatpush.msrb.mxu3 %v11898_v52  ;;  %v3471_v51 = vld [vmem:[#allocation5 + $0xd0] sm:$0xff] }
 0x63e   :  { %3726 = vmatpush.msrb.mxu1 %v11899_v62  ;;  %3766 = vmatpush.msrb.mxu3 %v11900_v59 }
 0x640   :  { %3727 = vmatpush.msrb.mxu1 %v11901_v27  ;;  %3767 = vmatpush.msrb.mxu3 %v11902_v44 }
 0x642   :  { %3728 = vmatpush.msrb.mxu1 %v11903_v38  ;;  %3768 = vmatpush.msrb.mxu3 %v11904_v49 }
 0x643   :  { %v3185_v41 = vpop.f32.mrf.mxu1 }
 0x644   :  { %3729 = vmatpush.msrb.mxu1 %v11905_v10  ;;  %3769 = vmatpush.msrb.mxu3 %v11906_v0  ;;  %v3186_v48 = vadd.f32 %v3185_v41, %v3165_v24 }
 0x646   :  { %3730 = vmatpush.msrb.mxu1 %v11907_v42  ;;  %3770 = vmatpush.msrb.mxu3 %v11908_v9  ;;  %v3473_v5 = vadd.f32 %v3469_v32, %v3186_v48  ;;  %v3285_v42 = vpop.f32.mrf.mxu2 }
 0x648   :  { %3731 = vmatpush.msrb.mxu1 %v11909_v23  ;;  %3771 = vmatpush.msrb.mxu3 %v11910_v57  ;;  %v4168_v25 = vmul.f32 -1.442695, %v3473_v5  ;;  %v3472_v57 = vld [vmem:[#allocation5 + $0xd8] sm:$0xff] }
 0x649   :  { %v3225_v55 = vpop.f32.mrf.mxu3 }
 0x64a   :  { %4384 = vpow2.f32 %v4168_v25  ;;  %v3226_v50 = vadd.f32 %v3225_v55, %v3205_v53 }
 0x64c   :  { %v3265_v8 = vpop.f32.mrf.mxu1  ;;  %v3474_v52 = vadd.f32 %v3470_v37, %v3226_v50 }
 0x64d   :  { %v3266_v62 = vadd.f32 %v3265_v8, %v3245_v63 }
 0x64e   :  { %v4169_v59 = vmul.f32 -1.442695, %v3474_v52 }
 0x64f   :  { %v3475_v27 = vadd.f32 %v3471_v51, %v3266_v62 }
 0x650   :  { %v4385_v44 = vpop.eup %4384  ;;  %4386 = vpow2.f32 %v4169_v59 }
 0x651   :  { %v4170_v38 = vmul.f32 -1.442695, %v3475_v27  ;;  %v3495_v49 = vadd.f32 1.0, %v4385_v44  ;;  %v3325_v44 = vpop.f32.mrf.mxu0 }
 0x652   :  { %v3305_v41 = vpop.f32.mrf.mxu3 }
 0x653   :  { %4388 = vpow2.f32 %v4170_v38  ;;  %v3306_v5 = vadd.f32 %v3305_v41, %v3285_v42  ;;  %v3509_v8 = vand.u32 2147483648, %v3495_v49  ;;  %vm3503_vm1 = vweird.f32 %v3495_v49  ;;  %v3478_v42 = vld [vmem:[#allocation8 + $0x20] sm:$0xff] }
 0x654   :  { %4390 = vrcp.f32 %v3495_v49  ;;  %v3507_v62 = vand.u32 2147483647, %v3495_v49 }
 0x655   :  { %v3476_v55 = vadd.f32 %v3472_v57, %v3306_v5  ;;  %v3510_v5 = vor.u32 1.1754944e-38, %v3509_v8  ;;  %v3479_v8 = vld [vmem:[#allocation8 + $0x28] sm:$0xff] }
 0x656   :  { %v4387_v24 = vpop.eup %4386  ;;  %vm3508_vm5 = vcmp.eq.f32.partialorder %v3507_v62, 8.507059e+37 }
 0x657   :  { %v3496_v10 = vadd.f32 1.0, %v4387_v24 }
 0x659   :  { %v4389_v0 = vpop.eup %4388  ;;  %4392 = vrcp.f32 %v3496_v10  ;;  %v3524_v59 = vand.u32 2147483648, %v3496_v10  ;;  %vm3518_vm4 = vweird.f32 %v3496_v10 }
 0x65a   :  { %v4391_v32 = vpop.eup %4390  ;;  %v9690_v48 = vadd.f32 1.0, %v4389_v0  ;;  %v3522_v0 = vand.u32 2147483647, %v3496_v10 }
 0x65b   :  { %v3499_v9 = vmul.f32 %v4391_v32, %v3495_v49  ;;  %vm3504_vm0 = vweird.f32 %v4391_v32  ;;  %v3525_v57 = vor.u32 1.1754944e-38, %v3524_v59 }
 0x65c   :  { %4394 = vrcp.f32 %v9690_v48  ;;  %vm9694_vm2 = vmor %vm3503_vm1, %vm3504_vm0  ;;  %vm3523_vm7 = vcmp.eq.f32.partialorder %v3522_v0, 8.507059e+37  ;;  %vm3533_vm9 = vweird.f32 %v9690_v48 }
 0x65d   :  { %v3500_v23 = vsub.f32 1.0, %v3499_v9  ;;  %4396 = vtanh.f32 %v3476_v55 }
 0x65f   :  { %v3501_v25 = vmul.f32 %v4391_v32, %v3500_v23  ;;  %v4393_v53 = vpop.eup %4392 }
 0x660   :  { %v3514_v37 = vmul.f32 %v4393_v53, %v3496_v10  ;;  %vm3519_vm3 = vweird.f32 %v4393_v53 }
 0x661   :  { %v3502_v50 = vadd.f32 %v4391_v32, %v3501_v25  ;;  %vm3520_vm6 = vmor %vm3518_vm4, %vm3519_vm3 }
 0x662   :  { %v4395_v63 = vpop.eup %4394  ;;  %v3515_v51 = vsub.f32 1.0, %v3514_v37 }
 0x663   :  { %v3529_v52 = vmul.f32 %v4395_v63, %v9690_v48  ;;  %v3506_v24 = vsel %vm9694_vm2, %v4391_v32, %v3502_v50  ;;  %v3365_v32 = vpop.f32.mrf.mxu2  ;;  %vm3534_vm8 = vweird.f32 %v4395_v63 }
 0x664   :  { %v3516_v38 = vmul.f32 %v4393_v53, %v3515_v51  ;;  %v3511_v25 = vsel %vm3508_vm5, %v3510_v5, %v3506_v24  ;;  %v4397_v51 = vpop.eup %4396  ;;  %vm3535_vm10 = vmor %vm3533_vm9, %vm3534_vm8  ;;  %v3480_v5 = vld [vmem:[#allocation8 + $0x30] sm:$0xff] }
 0x665   :  { %v3345_v41 = vpop.f32.mrf.mxu1  ;;  %v3530_v9 = vsub.f32 1.0, %v3529_v52  ;;  %v3545_v60 = vmul.f32 %v4397_v51, %v3511_v25  ;;  %v11919_v51 = vld [vmem:[#allocation181_spill] sm:$0xff] }
 0x666   :  { %v3346_v23 = vadd.f32 %v3345_v41, %v3325_v44  ;;  %v3517_v49 = vadd.f32 %v4393_v53, %v3516_v38  ;;  %v3537_v38 = vand.u32 2147483647, %v9690_v48 }
 0x667   :  { %v3531_v19 = vmul.f32 %v4395_v63, %v3530_v9 }
 0x668   :  { %v3482_v37 = vadd.f32 %v3478_v42, %v3346_v23  ;;  %v3521_v55 = vsel %vm3520_vm6, %v4393_v53, %v3517_v49  ;;  %v3539_v53 = vand.u32 2147483648, %v9690_v48  ;;  %vm3538_vm11 = vcmp.eq.f32.partialorder %v3537_v38, 8.507059e+37  ;;  %v11916_v23 = vld [vmem:[#allocation178_spill] sm:$0xff]  ;;  %v11917_v49 = vld [vmem:[#allocation179_spill] sm:$0xff] }
 0x669   :  { %v3526_v18 = vsel %vm3523_vm7, %v3525_v57, %v3521_v55  ;;  %v3532_v62 = vadd.f32 %v4395_v63, %v3531_v19 }
 0x66a   :  { %v4171_v27 = vmul.f32 -1.442695, %v3482_v37  ;;  %v3544_v50 = vmul.f32 %v3526_v18, %v9247_v56  ;;  %v3540_v0 = vor.u32 1.1754944e-38, %v3539_v53  ;;  %v11918_v37 = vld [vmem:[#allocation180_spill] sm:$0xff]  ;;  %v11922_v53 = vld [vmem:[#allocation183_spill] sm:$0xff] }
 0x66b   :  { %v3385_v52 = vpop.f32.mrf.mxu3  ;;  %v3536_v56 = vsel %vm3535_vm10, %v4395_v63, %v3532_v62 }
 0x66c   :  { %v3386_v44 = vadd.f32 %v3385_v52, %v3365_v32  ;;  %v9701_v10 = vadd.f32 %v3545_v60, %v3544_v50  ;;  %4398 = vpow2.f32 %v4171_v27  ;;  %v3541_v41 = vsel %vm3538_vm11, %v3540_v0, %v3536_v56  ;;  %v11920_v27 = vld [vmem:[#allocation182_spill] sm:$0xff]  ;;  %v3445_v50 = vpop.f32.mrf.mxu2 }
 0x66e   :  { %v3483_v59 = vadd.f32 %v3479_v8, %v3386_v44  ;;  %4400 = vtanh.f32 %v9701_v10  ;;  %v3481_v44 = vld [vmem:[#allocation8 + $0x38] sm:$0xff] }
 0x670   :  { %v4172_v24 = vmul.f32 -1.442695, %v3483_v59  ;;  %v11921_v59 = vld [vmem:[#allocation185_spill] sm:$0xff] }
 0x672   :  { %4402 = vpow2.f32 %v4172_v24  ;;  %v4399_v18 = vpop.eup %4398  ;;  %v11924_v24 = vld [vmem:[#allocation186_spill] sm:$0xff] }
 0x673   :  { %v9709_v42 = vadd.f32 1.0, %v4399_v18 }
 0x674   :  { %v4401_v60 = vpop.eup %4400 }
 0x675   :  { %v9707_v19 = vmul.f32 %v4401_v60, %v3541_v41  ;;  %4404 = vrcp.f32 %v9709_v42  ;;  %v11925_v60 = vld [vmem:[#allocation187_spill] sm:$0xff]  ;;  %v11926_v41 = vld [vmem:[#allocation188_spill] sm:$0xff]  ;;  %vm3566_vm14 = vweird.f32 %v9709_v42 }
 0x677   :  { %3613 = vst [vmem:[#allocation11 + $0x30] sm:$0xff] %v9707_v19  ;;  %3632 = vmatmul.f32.vlgmr.msra.gmra.mxu0 %v9707_v19  ;;  %3672 = vmatmul.f32.vlgmr.msra.gmra.mxu2 %v9707_v19 }
 0x678   :  { %v4403_v9 = vpop.eup %4402  ;;  %3776 = vmatpush.msra.mxu0 %v9262_v14  ;;  %3816 = vmatpush.msra.mxu2 %v9265_v46  ;;  %v11913_v46 = vld [vmem:[#allocation175_spill] sm:$0xff] }
 0x679   :  { %v9714_v48 = vadd.f32 1.0, %v4403_v9 }
 0x67a   :  { %3777 = vmatpush.msra.mxu0 %v9270_v15  ;;  %3817 = vmatpush.msra.mxu2 %v9273_v20 }
 0x67b   :  { %4406 = vrcp.f32 %v9714_v48  ;;  %v9726_v63 = vpop.eup %4404  ;;  %v3587_v9 = vand.u32 2147483648, %v9714_v48  ;;  %vm3581_vm15 = vweird.f32 %v9714_v48 }
 0x67c   :  { %3778 = vmatpush.msra.mxu0 %v9276_v43  ;;  %3818 = vmatpush.msra.mxu2 %v9279_v3  ;;  %v3562_v15 = vmul.f32 %v9726_v63, %v9709_v42  ;;  %v11914_v43 = vld [vmem:[#allocation176_spill] sm:$0xff]  ;;  %v11915_v3 = vld [vmem:[#allocation177_spill] sm:$0xff]  ;;  %vm3567_vm12 = vweird.f32 %v9726_v63 }
 0x67d   :  { %vm9762_vm0 = vmor %vm3566_vm14, %vm3567_vm12 }
 0x67e   :  { %3779 = vmatpush.msra.mxu0 %v9282_v11  ;;  %3819 = vmatpush.msra.mxu2 %v9285_v39  ;;  %v3405_v11 = vpop.f32.mrf.mxu0  ;;  %v3563_v57 = vsub.f32 1.0, %v3562_v15  ;;  %v5251_v15 = vld [vmem:[#allocation10 + $0x668] sm:$0xff] }
 0x67f   :  { %3712 = vmatmul.f32.vlgmr.msrb.gmra.mxu0 %v9707_v19  ;;  %3752 = vmatmul.f32.vlgmr.msrb.gmra.mxu2 %v9707_v19 }
 0x680   :  { %3780 = vmatpush.msra.mxu0 %v9294_v21  ;;  %3820 = vmatpush.msra.mxu2 %v11913_v46  ;;  %v3564_v62 = vmul.f32 %v9726_v63, %v3563_v57  ;;  %v3572_v46 = vand.u32 2147483648, %v9709_v42 }
 0x681   :  { %v9730_v14 = vpop.eup %4406 }
 0x682   :  { %v3577_v20 = vmul.f32 %v9730_v14, %v9714_v48  ;;  %3781 = vmatpush.msra.mxu0 %v11914_v43  ;;  %3821 = vmatpush.msra.mxu2 %v11915_v3  ;;  %vm3582_vm13 = vweird.f32 %v9730_v14  ;;  %v3565_v18 = vadd.f32 %v9726_v63, %v3564_v62  ;;  %v3585_v43 = vand.u32 2147483647, %v9714_v48  ;;  %v11929_v3 = vld [vmem:[#allocation189_spill] sm:$0xff]  ;;  %v11941_v62 = vld [vmem:[#allocation36_spill] sm:$0xff] }
 0x683   :  { %vm9772_vm1 = vmor %vm3581_vm15, %vm3582_vm13  ;;  %v3588_v48 = vor.u32 1.1754944e-38, %v3587_v9 }
 0x684   :  { %3782 = vmatpush.msra.mxu0 %v11916_v23  ;;  %3822 = vmatpush.msra.mxu2 %v11917_v49  ;;  %v3578_v25 = vsub.f32 1.0, %v3577_v20  ;;  %v3570_v20 = vand.u32 2147483647, %v9709_v42  ;;  %v3569_v49 = vsel %vm9762_vm0, %v9726_v63, %v3565_v18  ;;  %vm3586_vm3 = vcmp.eq.f32.partialorder %v3585_v43, 8.507059e+37  ;;  %v11944_v18 = vld [vmem:[#allocation38_spill] sm:$0xff] }
 0x685   :  { %v3425_v39 = vpop.f32.mrf.mxu1  ;;  %v5254_v43 = vld [vmem:[#allocation10 + $0x5e0] sm:$0xff] }
 0x686   :  { %v3426_v21 = vadd.f32 %v3425_v39, %v3405_v11  ;;  %3783 = vmatpush.msra.mxu0 %v11918_v37  ;;  %3823 = vmatpush.msra.mxu2 %v9319_v45  ;;  %v3579_v52 = vmul.f32 %v9730_v14, %v3578_v25  ;;  %v11923_v45 = vld [vmem:[#allocation184_spill] sm:$0xff]  ;;  %v11930_v11 = vld [vmem:[#allocation190_spill] sm:$0xff]  ;;  %vm3571_vm2 = vcmp.eq.f32.partialorder %v3570_v20, 8.507059e+37 }
 0x687   :  { %v5252_v20 = vld [vmem:[#allocation10 + $0x620] sm:$0xff] }
 0x688   :  { %v3484_v55 = vadd.f32 %v3480_v5, %v3426_v21  ;;  %3784 = vmatpush.msra.mxu0 %v11919_v51  ;;  %3824 = vmatpush.msra.mxu2 %v11920_v27  ;;  %v3580_v0 = vadd.f32 %v9730_v14, %v3579_v52  ;;  %v3573_v21 = vor.u32 1.1754944e-38, %v3572_v46  ;;  %v11936_v51 = vld [vmem:[#allocation193_spill] sm:$0xff]  ;;  %v11937_v27 = vld [vmem:[#allocation195_spill] sm:$0xff]  ;;  %v11940_v52 = vld [vmem:[#allocation198_spill] sm:$0xff] }
 0x689   :  { %v5244_v46 = vld [vmem:[#allocation10 + $0x720] sm:$0xff]  ;;  %v5261_v5 = vld [vmem:[#allocation10 + $0x528] sm:$0xff] }
 0x68a   :  { %v4173_v32 = vmul.f32 -1.442695, %v3484_v55  ;;  %3785 = vmatpush.msra.mxu0 %v11921_v59  ;;  %3825 = vmatpush.msra.mxu2 %v11922_v53  ;;  %v3584_v42 = vsel %vm9772_vm1, %v9730_v14, %v3580_v0  ;;  %v3574_v25 = vsel %vm3571_vm2, %v3573_v21, %v3569_v49  ;;  %v11933_v14 = vld [vmem:[#allocation191_spill] sm:$0xff]  ;;  %v11935_v55 = vld [vmem:[#allocation192_spill] sm:$0xff]  ;;  %v11942_v59 = vld [vmem:[#allocation41_spill] sm:$0xff] }
 0x68b   :  { %v3465_v8 = vpop.f32.mrf.mxu3  ;;  %v3589_v63 = vsel %vm3586_vm3, %v3588_v48, %v3584_v42  ;;  %v5263_v49 = vld [vmem:[#allocation10 + $0x4e8] sm:$0xff]  ;;  %v5264_v42 = vld [vmem:[#allocation10 + $0x4a0] sm:$0xff] }
 0x68c   :  { %4408 = vpow2.f32 %v4173_v32  ;;  %v3466_v38 = vadd.f32 %v3465_v8, %v3445_v50  ;;  %3786 = vmatpush.msra.mxu0 %v11923_v45  ;;  %3826 = vmatpush.msra.mxu2 %v11924_v24  ;;  %v11938_v32 = vld [vmem:[#allocation196_spill] sm:$0xff]  ;;  %v11939_v50 = vld [vmem:[#allocation197_spill] sm:$0xff]  ;;  %v11943_v45 = vld [vmem:[#allocation43_spill] sm:$0xff] }
 0x68d   :  { %v5265_v48 = vld [vmem:[#allocation10 + $0x4a8] sm:$0xff] }
 0x68e   :  { %v3485_v56 = vadd.f32 %v3481_v44, %v3466_v38  ;;  %3787 = vmatpush.msra.mxu0 %v11925_v60  ;;  %3827 = vmatpush.msra.mxu2 %v11926_v41  ;;  %v5267_v21 = vld [vmem:[#allocation10 + $0x468] sm:$0xff] }
 0x690   :  { %4410 = vtanh.f32 %v3485_v56  ;;  %3788 = vmatpush.msra.mxu0 %v11929_v3  ;;  %3828 = vmatpush.msra.mxu2 %v11930_v11  ;;  %v11947_v3 = vld [vmem:[#allocation47_spill] sm:$0xff]  ;;  %v5258_v11 = vld [vmem:[#allocation10 + $0x560] sm:$0xff] }
 0x692   :  { %v4409_v39 = vpop.eup %4408  ;;  %3789 = vmatpush.msra.mxu0 %v9382_v28  ;;  %3829 = vmatpush.msra.mxu2 %v9385_v7  ;;  %v11934_v7 = vld [vmem:[#allocation194_spill] sm:$0xff] }
 0x693   :  { %v3560_v23 = vadd.f32 1.0, %v4409_v39  ;;  %v3607_v28 = vmul.f32 %v3589_v63, %v11934_v7  ;;  %v5260_v39 = vld [vmem:[#allocation10 + $0x520] sm:$0xff]  ;;  %v5270_v63 = vld [vmem:[#allocation10 + $0x7f0] sm:$0xff]  ;;  %v5273_v7 = vld [vmem:[#allocation10 + $0x7b8] sm:$0xff] }
 0x694   :  { %3790 = vmatpush.msra.mxu0 %v9389_v47  ;;  %3830 = vmatpush.msra.mxu2 %v9392_v36 }
 0x695   :  { %4412 = vrcp.f32 %v3560_v23  ;;  %v3602_v44 = vand.u32 2147483648, %v3560_v23  ;;  %v3600_v38 = vand.u32 2147483647, %v3560_v23  ;;  %vm3596_vm5 = vweird.f32 %v3560_v23 }
 0x696   :  { %v4411_v57 = vpop.eup %4410  ;;  %3791 = vmatpush.msra.mxu0 %v9395_v40  ;;  %3831 = vmatpush.msra.mxu2 %v11933_v14  ;;  %v5272_v14 = vld [vmem:[#allocation10 + $0x7b0] sm:$0xff] }
 0x697   :  { %v3608_v37 = vmul.f32 %v4411_v57, %v3574_v25  ;;  %3792 = vmatmul.f32.vlgmr.msra.gmra.mxu0 %v9707_v19  ;;  %3832 = vmatmul.f32.vlgmr.msra.gmra.mxu2 %v9707_v19  ;;  %v3603_v56 = vor.u32 1.1754944e-38, %v3602_v44  ;;  %vm3601_vm7 = vcmp.eq.f32.partialorder %v3600_v38, 8.507059e+37  ;;  %v5268_v57 = vld [vmem:[#allocation10 + $0x420] sm:$0xff]  ;;  %v5269_v25 = vld [vmem:[#allocation10 + $0x428] sm:$0xff]  ;;  %v5284_v44 = vld [vmem:[#allocation10 + $0x630] sm:$0xff] }
 0x698   :  { %3856 = vmatpush.msrb.mxu0 %v11935_v55  ;;  %3896 = vmatpush.msrb.mxu2 %v11936_v51  ;;  %v5275_v55 = vld [vmem:[#allocation10 + $0x778] sm:$0xff]  ;;  %v5276_v51 = vld [vmem:[#allocation10 + $0x730] sm:$0xff] }
 0x699   :  { %v9793_v36 = vadd.f32 %v3608_v37, %v3607_v28  ;;  %v5271_v37 = vld [vmem:[#allocation10 + $0x7f8] sm:$0xff]  ;;  %v5274_v28 = vld [vmem:[#allocation10 + $0x770] sm:$0xff] }
 0x69a   :  { %3857 = vmatpush.msrb.mxu0 %v11937_v27  ;;  %3897 = vmatpush.msrb.mxu2 %v11938_v32  ;;  %v5278_v27 = vld [vmem:[#allocation10 + $0x6f0] sm:$0xff]  ;;  %v5279_v32 = vld [vmem:[#allocation10 + $0x6f8] sm:$0xff] }
 0x69b   :  { %v4413_v47 = vpop.eup %4412  ;;  %4414 = vtanh.f32 %v9793_v36  ;;  %v5288_v38 = vld [vmem:[#allocation10 + $0x5b0] sm:$0xff] }
 0x69c   :  { %v3592_v40 = vmul.f32 %v4413_v47, %v3560_v23  ;;  %3858 = vmatpush.msrb.mxu0 %v11939_v50  ;;  %3898 = vmatpush.msrb.mxu2 %v11940_v52  ;;  %vm3597_vm4 = vweird.f32 %v4413_v47  ;;  %v5262_v23 = vld [vmem:[#allocation10 + $0x4e0] sm:$0xff]  ;;  %v5281_v50 = vld [vmem:[#allocation10 + $0x6b8] sm:$0xff]  ;;  %v5282_v52 = vld [vmem:[#allocation10 + $0x670] sm:$0xff] }
 0x69d   :  { %vm3598_vm6 = vmor %vm3596_vm5, %vm3597_vm4 }
 0x69e   :  { %v3593_v8 = vsub.f32 1.0, %v3592_v40  ;;  %3859 = vmatpush.msrb.mxu0 %v11941_v62  ;;  %3899 = vmatpush.msrb.mxu2 %v11942_v59  ;;  %v5280_v40 = vld [vmem:[#allocation10 + $0x6b0] sm:$0xff]  ;;  %v5285_v62 = vld [vmem:[#allocation10 + $0x638] sm:$0xff] }
 0x69f   :  { %v5286_v59 = vld [vmem:[#allocation10 + $0x5f0] sm:$0xff] }
 0x6a0   :  { %v3594_v53 = vmul.f32 %v4413_v47, %v3593_v8  ;;  %3860 = vmatpush.msrb.mxu0 %v11943_v45  ;;  %3900 = vmatpush.msrb.mxu2 %v9437_v33  ;;  %v5238_v33 = vld [vmem:[#allocation10 + $0x7e0] sm:$0xff]  ;;  %v5283_v8 = vld [vmem:[#allocation10 + $0x678] sm:$0xff] }
 0x6a1   :  { %v4415_v60 = vpop.eup %4414  ;;  %v5289_v45 = vld [vmem:[#allocation10 + $0x5b8] sm:$0xff] }
 0x6a2   :  { %v3595_v24 = vadd.f32 %v4413_v47, %v3594_v53  ;;  %3861 = vmatpush.msrb.mxu0 %v11944_v18  ;;  %3901 = vmatpush.msrb.mxu2 %v9444_v17  ;;  %v5239_v17 = vld [vmem:[#allocation10 + $0x7e8] sm:$0xff]  ;;  %v5287_v53 = vld [vmem:[#allocation10 + $0x5f8] sm:$0xff]  ;;  %v5292_v18 = vld [vmem:[#allocation10 + $0x530] sm:$0xff] }
 0x6a4   :  { %v3599_v0 = vsel %vm3598_vm6, %v4413_v47, %v3595_v24  ;;  %3862 = vmatpush.msrb.mxu0 %v9447_v30  ;;  %3902 = vmatpush.msrb.mxu2 %v9450_v1  ;;  %v5240_v30 = vld [vmem:[#allocation10 + $0x7a0] sm:$0xff]  ;;  %v5241_v1 = vld [vmem:[#allocation10 + $0x7a8] sm:$0xff]  ;;  %v5277_v47 = vld [vmem:[#allocation10 + $0x738] sm:$0xff] }
 0x6a5   :  { %v3604_v41 = vsel %vm3601_vm7, %v3603_v56, %v3599_v0  ;;  %v5290_v24 = vld [vmem:[#allocation10 + $0x570] sm:$0xff]  ;;  %v5291_v56 = vld [vmem:[#allocation10 + $0x578] sm:$0xff] }
 0x6a6   :  { %v9808_v9 = vmul.f32 %v4415_v60, %v3604_v41  ;;  %3863 = vmatpush.msrb.mxu0 %v9455_v61  ;;  %3903 = vmatpush.msrb.mxu2 %v9458_v16  ;;  %v5242_v16 = vld [vmem:[#allocation10 + $0x760] sm:$0xff]  ;;  %v5243_v61 = vld [vmem:[#allocation10 + $0x768] sm:$0xff]  ;;  %v5293_v0 = vld [vmem:[#allocation10 + $0x538] sm:$0xff] }
 0x6a7   :  { %v5294_v60 = vld [vmem:[#allocation10 + $0x4f0] sm:$0xff]  ;;  %v5295_v41 = vld [vmem:[#allocation10 + $0x4f8] sm:$0xff] }
 0x6a8   :  { %3615 = vst [vmem:[#allocation12 + $0x8] sm:$0xff] %v9808_v9  ;;  %3652 = vmatmul.f32.vlgmr.msra.gmra.mxu1 %v9808_v9  ;;  %3692 = vmatmul.f32.vlgmr.msra.gmra.mxu3 %v9808_v9 }
 0x6a9   :  { %3796 = vmatpush.msra.mxu1 %v5238_v33  ;;  %3836 = vmatpush.msra.mxu3 %v5239_v17  ;;  %v5296_v33 = vld [vmem:[#allocation10 + $0x4b0] sm:$0xff]  ;;  %v5297_v17 = vld [vmem:[#allocation10 + $0x4b8] sm:$0xff] }
 0x6aa   :  { %3864 = vmatpush.msrb.mxu0 %v9466_v2  ;;  %3904 = vmatpush.msrb.mxu2 %v9469_v31  ;;  %v5245_v2 = vld [vmem:[#allocation10 + $0x728] sm:$0xff]  ;;  %v5246_v31 = vld [vmem:[#allocation10 + $0x6e0] sm:$0xff] }
 0x6ab   :  { %3797 = vmatpush.msra.mxu1 %v5240_v30  ;;  %3837 = vmatpush.msra.mxu3 %v5241_v1  ;;  %v5298_v30 = vld [vmem:[#allocation10 + $0x470] sm:$0xff]  ;;  %v5299_v1 = vld [vmem:[#allocation10 + $0x478] sm:$0xff] }
 0x6ac   :  { %3865 = vmatpush.msrb.mxu0 %v9474_v26  ;;  %3905 = vmatpush.msrb.mxu2 %v9477_v22  ;;  %v5247_v26 = vld [vmem:[#allocation10 + $0x6e8] sm:$0xff]  ;;  %v5248_v22 = vld [vmem:[#allocation10 + $0x6a0] sm:$0xff] }
 0x6ad   :  { %3798 = vmatpush.msra.mxu1 %v5242_v16  ;;  %3838 = vmatpush.msra.mxu3 %v5243_v61  ;;  %v5300_v16 = vld [vmem:[#allocation10 + $0x430] sm:$0xff]  ;;  %v5301_v61 = vld [vmem:[#allocation10 + $0x438] sm:$0xff] }
 0x6ae   :  { %3866 = vmatpush.msrb.mxu0 %v9482_v34  ;;  %3906 = vmatpush.msrb.mxu2 %v9485_v54  ;;  %v5249_v34 = vld [vmem:[#allocation10 + $0x6a8] sm:$0xff]  ;;  %v5250_v54 = vld [vmem:[#allocation10 + $0x660] sm:$0xff] }
 0x6af   :  { %3799 = vmatpush.msra.mxu1 %v5244_v46  ;;  %3839 = vmatpush.msra.mxu3 %v5245_v2 }
 0x6b0   :  { %3732 = vmatmul.f32.vlgmr.msrb.gmra.mxu1 %v9808_v9  ;;  %3772 = vmatmul.f32.vlgmr.msrb.gmra.mxu3 %v9808_v9 }
 0x6b1   :  { %3800 = vmatpush.msra.mxu1 %v5246_v31  ;;  %3840 = vmatpush.msra.mxu3 %v5247_v26  ;;  %v3937_v31 = vld [vmem:[#allocation5 + $0xe0] sm:$0xff] }
 0x6b2   :  { %3867 = vmatpush.msrb.mxu0 %v9494_v12  ;;  %3907 = vmatpush.msrb.mxu2 %v9497_v4  ;;  %v5253_v12 = vld [vmem:[#allocation10 + $0x628] sm:$0xff]  ;;  %v11945_v4 = vld [vmem:[#allocation18_spill] sm:$0xff] }
 0x6b3   :  { %3801 = vmatpush.msra.mxu1 %v5248_v22  ;;  %3841 = vmatpush.msra.mxu3 %v5249_v34 }
 0x6b4   :  { %3868 = vmatpush.msrb.mxu0 %v9502_v29  ;;  %3908 = vmatpush.msrb.mxu2 %v9505_v58  ;;  %v5255_v29 = vld [vmem:[#allocation10 + $0x5e8] sm:$0xff]  ;;  %v11946_v58 = vld [vmem:[#allocation21_spill] sm:$0xff] }
 0x6b5   :  { %3802 = vmatpush.msra.mxu1 %v5250_v54  ;;  %3842 = vmatpush.msra.mxu3 %v5251_v15 }
 0x6b6   :  { %3869 = vmatpush.msrb.mxu0 %v9510_v35  ;;  %3909 = vmatpush.msrb.mxu2 %v9513_v13  ;;  %v5256_v35 = vld [vmem:[#allocation10 + $0x5a0] sm:$0xff]  ;;  %v5257_v13 = vld [vmem:[#allocation10 + $0x5a8] sm:$0xff] }
 0x6b7   :  { %3803 = vmatpush.msra.mxu1 %v5252_v20  ;;  %3843 = vmatpush.msra.mxu3 %v5253_v12  ;;  %v3938_v20 = vld [vmem:[#allocation5 + $0xe8] sm:$0xff] }
 0x6b8   :  { %3870 = vmatpush.msrb.mxu0 %v9518_v6  ;;  %3910 = vmatpush.msrb.mxu2 %v11945_v4  ;;  %v5259_v6 = vld [vmem:[#allocation10 + $0x568] sm:$0xff] }
 0x6b9   :  { %3804 = vmatpush.msra.mxu1 %v5254_v43  ;;  %3844 = vmatpush.msra.mxu3 %v5255_v29  ;;  %v3939_v29 = vld [vmem:[#allocation5 + $0xf0] sm:$0xff] }
 0x6ba   :  { %3871 = vmatpush.msrb.mxu0 %v11946_v58  ;;  %3911 = vmatpush.msrb.mxu2 %v11947_v3 }
 0x6bb   :  { %3872 = vmatmul.f32.vlgmr.msrb.gmra.mxu0 %v9707_v19  ;;  %3912 = vmatmul.f32.vlgmr.msrb.gmra.mxu2 %v9707_v19  ;;  %v5266_v19 = vld [vmem:[#allocation10 + $0x460] sm:$0xff] }
 0x6bc   :  { %3805 = vmatpush.msra.mxu1 %v5256_v35  ;;  %3845 = vmatpush.msra.mxu3 %v5257_v13 }
 0x6be   :  { %3806 = vmatpush.msra.mxu1 %v5258_v11  ;;  %3846 = vmatpush.msra.mxu3 %v5259_v6 }
 0x6c0   :  { %3807 = vmatpush.msra.mxu1 %v5260_v39  ;;  %3847 = vmatpush.msra.mxu3 %v5261_v5 }
 0x6c2   :  { %3808 = vmatpush.msra.mxu1 %v5262_v23  ;;  %3848 = vmatpush.msra.mxu3 %v5263_v49 }
 0x6c4   :  { %3809 = vmatpush.msra.mxu1 %v5264_v42  ;;  %3849 = vmatpush.msra.mxu3 %v5265_v48 }
 0x6c6   :  { %3810 = vmatpush.msra.mxu1 %v5266_v19  ;;  %3850 = vmatpush.msra.mxu3 %v5267_v21 }
 0x6c8   :  { %3811 = vmatpush.msra.mxu1 %v5268_v57  ;;  %3851 = vmatpush.msra.mxu3 %v5269_v25 }
 0x6c9   :  { %3812 = vmatmul.f32.vlgmr.msra.gmra.mxu1 %v9808_v9  ;;  %3852 = vmatmul.f32.vlgmr.msra.gmra.mxu3 %v9808_v9 }
 0x6ca   :  { %3876 = vmatpush.msrb.mxu1 %v5270_v63  ;;  %3916 = vmatpush.msrb.mxu3 %v5271_v37  ;;  %v3940_v63 = vld [vmem:[#allocation5 + $0xf8] sm:$0xff] }
 0x6cc   :  { %3877 = vmatpush.msrb.mxu1 %v5272_v14  ;;  %3917 = vmatpush.msrb.mxu3 %v5273_v7 }
 0x6ce   :  { %3878 = vmatpush.msrb.mxu1 %v5274_v28  ;;  %3918 = vmatpush.msrb.mxu3 %v5275_v55 }
 0x6d0   :  { %3879 = vmatpush.msrb.mxu1 %v5276_v51  ;;  %3919 = vmatpush.msrb.mxu3 %v5277_v47 }
 0x6d2   :  { %3880 = vmatpush.msrb.mxu1 %v5278_v27  ;;  %3920 = vmatpush.msrb.mxu3 %v5279_v32 }
 0x6d4   :  { %3881 = vmatpush.msrb.mxu1 %v5280_v40  ;;  %3921 = vmatpush.msrb.mxu3 %v5281_v50 }
 0x6d6   :  { %3882 = vmatpush.msrb.mxu1 %v5282_v52  ;;  %3922 = vmatpush.msrb.mxu3 %v5283_v8 }
 0x6d8   :  { %3883 = vmatpush.msrb.mxu1 %v5284_v44  ;;  %3923 = vmatpush.msrb.mxu3 %v5285_v62 }
 0x6da   :  { %3884 = vmatpush.msrb.mxu1 %v5286_v59  ;;  %3924 = vmatpush.msrb.mxu3 %v5287_v53 }
 0x6dc   :  { %3885 = vmatpush.msrb.mxu1 %v5288_v38  ;;  %3925 = vmatpush.msrb.mxu3 %v5289_v45  ;;  %v3945_v38 = vld [vmem:[#allocation8] sm:$0xff] }
 0x6de   :  { %3886 = vmatpush.msrb.mxu1 %v5290_v24  ;;  %3926 = vmatpush.msrb.mxu3 %v5291_v56 }
 0x6e0   :  { %3887 = vmatpush.msrb.mxu1 %v5292_v18  ;;  %3927 = vmatpush.msrb.mxu3 %v5293_v0 }
 0x6e2   :  { %3888 = vmatpush.msrb.mxu1 %v5294_v60  ;;  %3928 = vmatpush.msrb.mxu3 %v5295_v41 }
 0x6e4   :  { %3889 = vmatpush.msrb.mxu1 %v5296_v33  ;;  %3929 = vmatpush.msrb.mxu3 %v5297_v17 }
 0x6e6   :  { %3890 = vmatpush.msrb.mxu1 %v5298_v30  ;;  %3930 = vmatpush.msrb.mxu3 %v5299_v1 }
 0x6e8   :  { %3891 = vmatpush.msrb.mxu1 %v5300_v16  ;;  %3931 = vmatpush.msrb.mxu3 %v5301_v61 }
 0x6e9   :  { %3892 = vmatmul.f32.vlgmr.msrb.gmra.mxu1 %v9808_v9  ;;  %3932 = vmatmul.f32.vlgmr.msrb.gmra.mxu3 %v9808_v9 }
 0x6f4   :  { %v3633_v46 = vpop.f32.mrf.mxu0 }
 0x6fa   :  { %v3673_v54 = vpop.f32.mrf.mxu2 }
 0x6fc   :  { %v3713_v4 = vpop.f32.mrf.mxu0 }
 0x702   :  { %v3753_v19 = vpop.f32.mrf.mxu2 }
 0x714   :  { %v3793_v8 = vpop.f32.mrf.mxu0 }
 0x71a   :  { %v3833_v61 = vpop.f32.mrf.mxu2 }
 0x725   :  { %v3653_v2 = vpop.f32.mrf.mxu1 }
 0x726   :  { %v3654_v26 = vadd.f32 %v3653_v2, %v3633_v46 }
 0x728   :  { %v3941_v22 = vadd.f32 %v3937_v31, %v3654_v26  ;;  %v3946_v26 = vld [vmem:[#allocation8 + $0x8] sm:$0xff] }
 0x72a   :  { %v4174_v34 = vmul.f32 -1.442695, %v3941_v22 }
 0x72b   :  { %v3693_v15 = vpop.f32.mrf.mxu3 }
 0x72c   :  { %4416 = vpow2.f32 %v4174_v34  ;;  %v3694_v12 = vadd.f32 %v3693_v15, %v3673_v54 }
 0x72d   :  { %v3733_v43 = vpop.f32.mrf.mxu1 }
 0x72e   :  { %v3942_v58 = vadd.f32 %v3938_v20, %v3694_v12  ;;  %v3734_v3 = vadd.f32 %v3733_v43, %v3713_v4 }
 0x730   :  { %v4175_v35 = vmul.f32 -1.442695, %v3942_v58  ;;  %v3943_v13 = vadd.f32 %v3939_v29, %v3734_v3 }
 0x732   :  { %v4417_v11 = vpop.eup %4416  ;;  %4418 = vpow2.f32 %v4175_v35  ;;  %v4176_v9 = vmul.f32 -1.442695, %v3943_v13 }
 0x733   :  { %v3962_v6 = vadd.f32 1.0, %v4417_v11  ;;  %v3773_v49 = vpop.f32.mrf.mxu3 }
 0x734   :  { %4420 = vpow2.f32 %v4176_v9  ;;  %v3774_v57 = vadd.f32 %v3773_v49, %v3753_v19 }
 0x735   :  { %4422 = vrcp.f32 %v3962_v6  ;;  %v3976_v47 = vand.u32 2147483648, %v3962_v6  ;;  %vm3970_vm9 = vweird.f32 %v3962_v6  ;;  %v3974_v40 = vand.u32 2147483647, %v3962_v6 }
 0x736   :  { %v3944_v7 = vadd.f32 %v3940_v63, %v3774_v57 }
 0x737   :  { %v3977_v24 = vor.u32 1.1754944e-38, %v3976_v47  ;;  %vm3975_vm13 = vcmp.eq.f32.partialorder %v3974_v40, 8.507059e+37 }
 0x738   :  { %v4419_v39 = vpop.eup %4418  ;;  %v3873_v49 = vpop.f32.mrf.mxu0 }
 0x739   :  { %v3963_v5 = vadd.f32 1.0, %v4419_v39 }
 0x73a   :  { %v4421_v23 = vpop.eup %4420 }
 0x73b   :  { %v4423_v42 = vpop.eup %4422  ;;  %4424 = vrcp.f32 %v3963_v5  ;;  %v9839_v48 = vadd.f32 1.0, %v4421_v23  ;;  %v3991_v50 = vand.u32 2147483648, %v3963_v5  ;;  %v3989_v59 = vand.u32 2147483647, %v3963_v5 }
 0x73c   :  { %v3966_v21 = vmul.f32 %v4423_v42, %v3962_v6  ;;  %vm3971_vm8 = vweird.f32 %v4423_v42  ;;  %vm3985_vm12 = vweird.f32 %v3963_v5 }
 0x73d   :  { %4426 = vrcp.f32 %v9839_v48  ;;  %vm9843_vm10 = vmor %vm3970_vm9, %vm3971_vm8  ;;  %v3992_v0 = vor.u32 1.1754944e-38, %v3991_v50  ;;  %vm3990_vm15 = vcmp.eq.f32.partialorder %v3989_v59, 8.507059e+37  ;;  %v4006_v20 = vand.u32 2147483648, %v9839_v48 }
 0x73e   :  { %v3967_v25 = vsub.f32 1.0, %v3966_v21  ;;  %4428 = vtanh.f32 %v3944_v7  ;;  %vm4000_vm1 = vweird.f32 %v9839_v48  ;;  %v4004_v12 = vand.u32 2147483647, %v9839_v48 }
 0x73f   :  { %v4007_v29 = vor.u32 1.1754944e-38, %v4006_v20 }
 0x740   :  { %v3968_v37 = vmul.f32 %v4423_v42, %v3967_v25  ;;  %vm4005_vm3 = vcmp.eq.f32.partialorder %v4004_v12, 8.507059e+37 }
 0x741   :  { %v4425_v14 = vpop.eup %4424 }
 0x742   :  { %v3981_v28 = vmul.f32 %v4425_v14, %v3963_v5  ;;  %v3969_v55 = vadd.f32 %v4423_v42, %v3968_v37  ;;  %vm3986_vm11 = vweird.f32 %v4425_v14  ;;  %v3913_v37 = vpop.f32.mrf.mxu2 }
 0x743   :  { %v4427_v51 = vpop.eup %4426  ;;  %vm3987_vm14 = vmor %vm3985_vm12, %vm3986_vm11 }
 0x744   :  { %v3982_v27 = vsub.f32 1.0, %v3981_v28  ;;  %v3996_v32 = vmul.f32 %v4427_v51, %v9839_v48  ;;  %v3973_v62 = vsel %vm9843_vm10, %v4423_v42, %v3969_v55  ;;  %v4429_v17 = vpop.eup %4428  ;;  %vm4001_vm0 = vweird.f32 %v4427_v51  ;;  %v3947_v48 = vld [vmem:[#allocation8 + $0x10] sm:$0xff]  ;;  %v3948_v28 = vld [vmem:[#allocation8 + $0x18] sm:$0xff] }
 0x745   :  { %v3978_v60 = vsel %vm3975_vm13, %v3977_v24, %v3973_v62  ;;  %vm4002_vm2 = vmor %vm4000_vm1, %vm4001_vm0 }
 0x746   :  { %v3983_v44 = vmul.f32 %v4425_v14, %v3982_v27  ;;  %v3813_v53 = vpop.f32.mrf.mxu1  ;;  %v3997_v45 = vsub.f32 1.0, %v3996_v32  ;;  %v4012_v2 = vmul.f32 %v4429_v17, %v3978_v60 }
 0x747   :  { %v3814_v56 = vadd.f32 %v3813_v53, %v3793_v8 }
 0x748   :  { %v3984_v18 = vadd.f32 %v4425_v14, %v3983_v44  ;;  %v3998_v30 = vmul.f32 %v4427_v51, %v3997_v45 }
 0x749   :  { %v3949_v41 = vadd.f32 %v3945_v38, %v3814_v56 }
 0x74a   :  { %v3988_v33 = vsel %vm3987_vm14, %v4425_v14, %v3984_v18  ;;  %v3999_v54 = vadd.f32 %v4427_v51, %v3998_v30 }
 0x74b   :  { %v3993_v1 = vsel %vm3990_vm15, %v3992_v0, %v3988_v33  ;;  %v4177_v16 = vmul.f32 -1.442695, %v3949_v41 }
 0x74c   :  { %v4011_v46 = vmul.f32 %v3993_v1, %v9701_v10  ;;  %v3853_v31 = vpop.f32.mrf.mxu3  ;;  %v4003_v43 = vsel %vm4002_vm2, %v4427_v51, %v3999_v54 }
 0x74d   :  { %v3854_v22 = vadd.f32 %v3853_v31, %v3833_v61  ;;  %4430 = vpow2.f32 %v4177_v16  ;;  %v4008_v3 = vsel %vm4005_vm3, %v4007_v29, %v4003_v43 }
 0x74e   :  { %v4013_v34 = vadd.f32 %v4012_v2, %v4011_v46 }
 0x74f   :  { %v3950_v15 = vadd.f32 %v3946_v26, %v3854_v22 }
 0x750   :  { %4432 = vtanh.f32 %v4013_v34 }
 0x751   :  { %v4178_v4 = vmul.f32 -1.442695, %v3950_v15 }
 0x753   :  { %4434 = vpow2.f32 %v4178_v4  ;;  %v4431_v10 = vpop.eup %4430 }
 0x754   :  { %v4025_v13 = vadd.f32 1.0, %v4431_v10 }
 0x756   :  { %v4433_v58 = vpop.eup %4432  ;;  %4436 = vrcp.f32 %v4025_v13  ;;  %vm4033_vm6 = vweird.f32 %v4025_v13  ;;  %v4039_v50 = vand.u32 2147483648, %v4025_v13  ;;  %v4037_v52 = vand.u32 2147483647, %v4025_v13 }
 0x757   :  { %v4015_v35 = vmul.f32 %v4433_v58, %v4008_v3 }
 0x758   :  { %v4040_v45 = vor.u32 1.1754944e-38, %v4039_v50  ;;  %vm4038_vm10 = vcmp.eq.f32.partialorder %v4037_v52, 8.507059e+37 }
 0x759   :  { %v4435_v11 = vpop.eup %4434  ;;  %4080 = vst [vmem:[#allocation11 + $0x38] sm:$0xff] %v4015_v35 }
 0x75a   :  { %v4026_v9 = vadd.f32 1.0, %v4435_v11  ;;  %4098 = dma.vmem_to_hbm [thread:$0]  %s4091_s2, 1024, %s4093_s9, [#allocation7], %s5439_s10, %s5439_s10, %s5440_s11  }
 0x75c   :  { %4438 = vrcp.f32 %v4026_v9  ;;  %v4437_v6 = vpop.eup %4436  ;;  %v4054_v40 = vand.u32 2147483648, %v4026_v9  ;;  %vm4048_vm7 = vweird.f32 %v4026_v9  ;;  %v4052_v8 = vand.u32 2147483647, %v4026_v9 }
 0x75d   :  { %v4029_v5 = vmul.f32 %v4437_v6, %v4025_v13  ;;  %vm4034_vm4 = vweird.f32 %v4437_v6 }
 0x75e   :  { %vm4035_vm8 = vmor %vm4033_vm6, %vm4034_vm4  ;;  %v4055_v38 = vor.u32 1.1754944e-38, %v4054_v40  ;;  %vm4053_vm11 = vcmp.eq.f32.partialorder %v4052_v8, 8.507059e+37 }
 0x75f   :  { %v4030_v21 = vsub.f32 1.0, %v4029_v5 }
 0x761   :  { %v4031_v55 = vmul.f32 %v4437_v6, %v4030_v21 }
 0x762   :  { %v4439_v39 = vpop.eup %4438 }
 0x763   :  { %v4044_v23 = vmul.f32 %v4439_v39, %v4026_v9  ;;  %vm4049_vm5 = vweird.f32 %v4439_v39  ;;  %v4032_v27 = vadd.f32 %v4437_v6, %v4031_v55 }
 0x764   :  { %vm4050_vm9 = vmor %vm4048_vm7, %vm4049_vm5 }
 0x765   :  { %v4045_v57 = vsub.f32 1.0, %v4044_v23  ;;  %v4036_v59 = vsel %vm4035_vm8, %v4437_v6, %v4032_v27 }
 0x766   :  { %v3893_v42 = vpop.f32.mrf.mxu1  ;;  %v4041_v56 = vsel %vm4038_vm10, %v4040_v45, %v4036_v59 }
 0x767   :  { %v3894_v19 = vadd.f32 %v3893_v42, %v3873_v49  ;;  %v4046_v14 = vmul.f32 %v4439_v39, %v4045_v57 }
 0x769   :  { %v3951_v25 = vadd.f32 %v3947_v48, %v3894_v19  ;;  %v4047_v32 = vadd.f32 %v4439_v39, %v4046_v14 }
 0x76b   :  { %v4179_v63 = vmul.f32 -1.442695, %v3951_v25  ;;  %v4051_v53 = vsel %vm4050_vm9, %v4439_v39, %v4047_v32 }
 0x76c   :  { %v3933_v7 = vpop.f32.mrf.mxu3  ;;  %v4056_v18 = vsel %vm4053_vm11, %v4055_v38, %v4051_v53 }
 0x76d   :  { %4440 = vpow2.f32 %v4179_v63  ;;  %v3934_v51 = vadd.f32 %v3933_v7, %v3913_v37  ;;  %v4074_v60 = vmul.f32 %v4056_v18, %v9793_v36 }
 0x76f   :  { %v3952_v47 = vadd.f32 %v3948_v28, %v3934_v51 }
 0x771   :  { %4442 = vtanh.f32 %v3952_v47 }
 0x773   :  { %v4441_v44 = vpop.eup %4440 }
 0x774   :  { %v4027_v62 = vadd.f32 1.0, %v4441_v44 }
 0x776   :  { %4444 = vrcp.f32 %v4027_v62  ;;  %v4069_v1 = vand.u32 2147483648, %v4027_v62  ;;  %v4067_v61 = vand.u32 2147483647, %v4027_v62  ;;  %vm4063_vm13 = vweird.f32 %v4027_v62 }
 0x777   :  { %v4443_v24 = vpop.eup %4442 }
 0x778   :  { %v4075_v0 = vmul.f32 %v4443_v24, %v4041_v56  ;;  %v4070_v2 = vor.u32 1.1754944e-38, %v4069_v1  ;;  %vm4068_vm15 = vcmp.eq.f32.partialorder %v4067_v61, 8.507059e+37 }
 0x77a   :  { %v4076_v33 = vadd.f32 %v4075_v0, %v4074_v60 }
 0x77c   :  { %v4445_v41 = vpop.eup %4444  ;;  %4446 = vtanh.f32 %v4076_v33 }
 0x77d   :  { %v4059_v17 = vmul.f32 %v4445_v41, %v4027_v62  ;;  %vm4064_vm12 = vweird.f32 %v4445_v41 }
 0x77e   :  { %vm4065_vm14 = vmor %vm4063_vm13, %vm4064_vm12 }
 0x77f   :  { %v4060_v30 = vsub.f32 1.0, %v4059_v17 }
 0x781   :  { %v4061_v16 = vmul.f32 %v4445_v41, %v4060_v30 }
 0x782   :  { %v4447_v31 = vpop.eup %4446 }
 0x783   :  { %v4062_v46 = vadd.f32 %v4445_v41, %v4061_v16 }
 0x785   :  { %v4066_v36 = vsel %vm4065_vm14, %v4445_v41, %v4062_v46 }
 0x786   :  { %v4071_v26 = vsel %vm4068_vm15, %v4070_v2, %v4066_v36 }
 0x787   :  { %v4078_v22 = vmul.f32 %v4447_v31, %v4071_v26 }
 0x789   :  { %4081 = vst [vmem:[#allocation12] sm:$0xff] %v4078_v22 }
 0x78a   :  { %4115 = dma.vmem_to_hbm [thread:$0]  %s4108_s12, 1024, %s4110_s15, [#allocation13], %s5439_s10, %s5439_s10, %s5440_s11  }
 0x78b   :  { %5426 = dma.done.wait [#allocation7], 1024  }
 0x78c   :  { %5427 = vsyncadd [#allocation7], 4294966272 }
 0x78d   :  { %5428 = dma.done.wait [#allocation13], 1024  }
 0x78e   :  { %5429 = vsyncadd [#allocation13], 4294966272 }
 0x78f   :  { %4124 = vsyncpa [#allocation6], 1 }
 0x790   :  { %4125 = vsyncpa [#allocation9], 1 }
 0x791   :  { %4126 = vsyncpa [#allocation7], 1 }
 0x792   :  { %4127 = vsyncpa [#allocation13], 1 }

</bundles_post_ra>
